<compile_context>
chip_gen: v7x
topology: tpu7x:2x2x1
jax: 0.10.0
libtpu: 0.0.40
codegen_flags: <defaults>
</compile_context>

<pallas_src>
import math
from functools import partial
from types import SimpleNamespace

import numpy as np
import jax
import jax.numpy as jnp
from jax import lax
from jax.experimental import pallas as pl
from jax.experimental.pallas import tpu as pltpu  # noqa: F401

LANE = 128
SUB = 8

MATMUL_FIELDS = ('wqkv', 'wo', 'w1', 'w2')                                # bf16 slab
VEC_FIELDS = ('ln1w', 'ln1b', 'bqkv', 'bo', 'ln2w', 'ln2b', 'b1', 'b2')   # f32 slab


# ----------------------------------------------------------------------------
# Parameter slab packing (few large lane-aligned DMAs instead of ~34 tiny ones)
# ----------------------------------------------------------------------------
def _pack_slab(entries, dtype):
    """Pack small 2-D params (cols <= 128) into a single [R, 128] slab.

    Every entry starts at an 8-aligned row so in-kernel slices stay
    sublane-aligned.  Returns (slab, {name: (row0, rows, cols)}).
    """
    offs, chunks, row = {}, [], 0
    for name, arr in entries:
        arr = jnp.asarray(arr, dtype)
        nr, nc = arr.shape
        assert nc <= LANE, name
        pad_r = (-nr) % SUB
        chunks.append(jnp.pad(arr, ((0, pad_r), (0, LANE - nc))))
        offs[name] = (row, nr, nc)
        row += nr + pad_r
    return jnp.concatenate(chunks, axis=0), offs


def build_slabs(params, cfg):
    w_entries = [('pe_w', params['pe_w'])]
    f_entries = [('pe_b', params['pe_b'])]
    for pfx, depth in (('enc', cfg.encoder_depth), ('dec', cfg.decoder_depth)):
        for l in range(depth):
            blk = params[pfx][l]
            for f in MATMUL_FIELDS:
                w_entries.append((f'{pfx}_{f}_{l}', blk[f]))
            for f in VEC_FIELDS:
                f_entries.append((f'{pfx}_{f}_{l}', blk[f]))
    w_entries += [('e2d_w', params['e2d_w']),
                  ('d2p_w', params['d2p_w_pad'])]
    f_entries += [('e2d_b', params['e2d_b']),
                  ('mask_tok', params['mask_tok']),
                  ('dec_pos', params['dec_pos']),
                  ('dnw', params['dnw']),
                  ('dnb', params['dnb']),
                  ('d2p_b', params['d2p_b_pad'])]
    wslab, w_off = _pack_slab(w_entries, jnp.bfloat16)
    fslab, f_off = _pack_slab(f_entries, jnp.float32)
    return wslab, fslab, w_off, f_off


# ----------------------------------------------------------------------------
# Fused whole-pipeline kernel (whole batch in one invocation, no grid)
# ----------------------------------------------------------------------------
def make_pipeline_kernel(cfg, batch, w_off, f_off):
    NH = cfg.n_heads
    ENC_DEPTH = cfg.encoder_depth
    DEC_DEPTH = cfg.decoder_depth
    OUT_IDX = tuple(cfg.out_indices)

    def kernel(patches_ref, pos_ref, perm_ref, w_ref, f_ref, out_ref):
        def W(name):                                  # bf16 matmul weight slice
            r0, nr, nc = w_off[name]
            return w_ref[r0:r0 + nr, 0:nc]

        def F(name):                                  # f32 LN/bias/pos slice
            r0, nr, nc = f_off[name]
            return f_ref[r0:r0 + nr, 0:nc]

        def ln(x, g, b, eps=1e-5):
            mu = jnp.mean(x, axis=-1, keepdims=True)
            var = jnp.mean((x - mu) ** 2, axis=-1, keepdims=True)
            return (x - mu) * lax.rsqrt(var + eps) * g + b

        def mm(x, wname):                             # MXU dot, f32 accumulate
            return jnp.dot(x.astype(jnp.bfloat16), W(wname),
                           preferred_element_type=jnp.float32)

        def block(x, pfx, l):
            """Pre-LN ViT block: x + MHA(LN(x)); x + MLP(LN(x))."""
            D = x.shape[-1]
            HD = D // NH
            scale = 1.0 / math.sqrt(HD)
            # --- MHA: one fused QKV dot, per-head score/PV, one out-proj dot --
            xn = ln(x, F(f'{pfx}_ln1w_{l}'), F(f'{pfx}_ln1b_{l}'))
            qkv = mm(xn, f'{pfx}_wqkv_{l}') + F(f'{pfx}_bqkv_{l}')    # [S, 3D]
            heads = []
            for h in range(NH):
                q = qkv[:, h * HD:(h + 1) * HD]
                k = qkv[:, D + h * HD:D + (h + 1) * HD]
                v = qkv[:, 2 * D + h * HD:2 * D + (h + 1) * HD]
                s = lax.dot_general(
                    q.astype(jnp.bfloat16), k.astype(jnp.bfloat16),
                    (((1,), (1,)), ((), ())),
                    preferred_element_type=jnp.float32) * scale        # [S, S]
                s = s - jnp.max(s, axis=-1, keepdims=True)
                e = jnp.exp(s)
                p = e * pl.reciprocal(jnp.sum(e, axis=-1, keepdims=True),
                                      approx=True)
                heads.append(jnp.dot(p.astype(jnp.bfloat16),
                                     v.astype(jnp.bfloat16),
                                     preferred_element_type=jnp.float32))
            ho = jnp.concatenate(heads, axis=-1)                       # [S, D]
            x = x + mm(ho, f'{pfx}_wo_{l}') + F(f'{pfx}_bo_{l}')
            # --- MLP ----------------------------------------------------------
            xn2 = ln(x, F(f'{pfx}_ln2w_{l}'), F(f'{pfx}_ln2b_{l}'))
            h1 = mm(xn2, f'{pfx}_w1_{l}') + F(f'{pfx}_b1_{l}')
            # TODO(synk): PyTorch nn.GELU defaults to exact erf; tanh approx used.
            h1 = jax.nn.gelu(h1, approximate=True)
            return x + mm(h1, f'{pfx}_w2_{l}') + F(f'{pfx}_b2_{l}')

        for b in range(batch):
            # --- MAE encoder: patch embed + pos embed on kept tokens ---------
            x = mm(patches_ref[b, :, :], 'pe_w') + F('pe_b')           # [keep, De]
            x = x + pos_ref[b, :, :]
            for l in range(ENC_DEPTH):
                x = block(x, 'enc', l)

            # --- encoder -> decoder projection --------------------------------
            x = mm(x, 'e2d_w') + F('e2d_b')                            # [keep, Dd]

            # --- append mask token, unshuffle via 0/1 matmul (exact selection),
            #     add decoder positional embedding ------------------------------
            xa = jnp.concatenate([x, F('mask_tok')], axis=0)           # [keep+1, Dd]
            x = jnp.dot(perm_ref[b, :, :], xa.astype(jnp.bfloat16),
                        preferred_element_type=jnp.float32)            # [L+1, Dd]
            x = x + F('dec_pos')

            # --- decoder blocks; fused LN + (padded) dec_to_patch per out idx --
            slot = 0
            for l in range(DEC_DEPTH):
                x = block(x, 'dec', l)
                if l in OUT_IDX:
                    xn = ln(x, F('dnw'), F('dnb'))
                    y = mm(xn, 'd2p_w') + F('d2p_b')                   # [L+1, 128]
                    out_ref[b, slot, :, :] = y[1:, :]                  # drop cls
                    slot += 1

    return kernel


def mae_pipeline(patches_keep, pos_keep, perm, wslab, fslab, cfg, w_off, f_off):
    B = patches_keep.shape[0]
    NF = len(cfg.out_indices)
    kern = make_pipeline_kernel(cfg, B, w_off, f_off)
    # No grid: single invocation, whole batch; all operands (~0.4 MiB) resident
    # in VMEM once, single-buffered.  Output is lane dense ([.., 16, 128]).
    return pl.pallas_call(
        kern,
        out_shape=jax.ShapeDtypeStruct((B, NF, cfg.seq_len, LANE), jnp.float32),
    )(patches_keep, pos_keep, perm, wslab, fslab)


# ----------------------------------------------------------------------------
# Glue (patchify / masking / reconstruct / conv head) in plain JAX
# ----------------------------------------------------------------------------
def img_to_patch(images, P):
    B, C, H, W = images.shape
    x = images.reshape(B, C, H // P, P, W // P, P)
    x = x.transpose(0, 2, 4, 1, 3, 5)
    return x.reshape(B, (H // P) * (W // P), C * P * P)


def reconstruct_image(x, cfg):
    B = x.shape[0]
    nps = cfg.img_size // cfg.patch_size
    x = x.reshape(B, nps, nps, cfg.c, cfg.patch_size, cfg.patch_size)
    x = x.transpose(0, 3, 1, 4, 2, 5)
    return x.reshape(B, cfg.c, cfg.img_size, cfg.img_size)


def get_2d_sincos_pos_embed(embed_dim, grid_size):
    def _1d(dim, pos):
        omega = np.arange(dim // 2, dtype=np.float64) / (dim / 2.0)
        omega = 1.0 / 10000 ** omega
        out = np.einsum('m,d->md', pos, omega)
        return np.concatenate([np.sin(out), np.cos(out)], axis=1)
    gh = np.arange(grid_size, dtype=np.float64)
    gw = np.arange(grid_size, dtype=np.float64)
    ww, hh = np.meshgrid(gw, gh)
    emb = np.concatenate([_1d(embed_dim // 2, hh.reshape(-1)),
                          _1d(embed_dim // 2, ww.reshape(-1))], axis=1)
    return emb.astype(np.float32)


def random_masking(key, B, L, keep):
    perms = jnp.stack([jax.random.permutation(jax.random.fold_in(key, i), L)
                       for i in range(B)])                       # [B, L]
    keep_idx = perms[:, :keep]
    mask_idxs = perms[:, keep:]
    ranks = jnp.argsort(perms, axis=1)
    # decoder token buffer = [kept tokens (keep), mask tokens]; any inverse
    # index >= keep selects the (shared) mask token; position 0 is the cls slot.
    # TODO(synk): Encoder is undefined in the source; standard MAE uses an
    # encoder cls token, here the decoder cls slot is filled by the mask token.
    inv_body = jnp.where(ranks < keep, ranks, ranks + 1)
    cls_col = jnp.full((B, 1), keep, dtype=inv_body.dtype)
    inverse_indices = jnp.concatenate([cls_col, inv_body], axis=1)   # [B, L+1]
    return keep_idx, mask_idxs, inverse_indices


def xavier(key, fan_in, fan_out):
    limit = math.sqrt(6.0 / (fan_in + fan_out))
    return jax.random.uniform(key, (fan_in, fan_out), jnp.float32, -limit, limit)


def init_block(key, D, hidden, n_heads):
    ks = jax.random.split(key, 4)
    return dict(
        ln1w=jnp.ones((1, D), jnp.float32), ln1b=jnp.zeros((1, D), jnp.float32),
        wqkv=xavier(ks[0], D, 3 * D),            # columns ordered [q | k | v]
        bqkv=jnp.zeros((1, 3 * D), jnp.float32),
        wo=xavier(ks[1], D, D),
        bo=jnp.zeros((1, D), jnp.float32),
        ln2w=jnp.ones((1, D), jnp.float32), ln2b=jnp.zeros((1, D), jnp.float32),
        w1=xavier(ks[2], D, hidden), b1=jnp.zeros((1, hidden), jnp.float32),
        w2=xavier(ks[3], hidden, D), b2=jnp.zeros((1, D), jnp.float32),
    )


def init_params(key, cfg):
    ks = jax.random.split(key, 8)
    P2C = cfg.flat_image_patch_size
    nps = cfg.img_size // cfg.patch_size
    De, Dd, NH = cfg.encoder_width, cfg.decoder_width, cfg.n_heads
    p = {}
    # TODO(synk): Encoder/Embedder/TransformerEncoderBlock not provided; using
    # patch embed + sin-cos pos embed + random masking + pre-LN ViT blocks.
    p['pe_w'] = xavier(ks[0], P2C, De)
    p['pe_b'] = jnp.zeros((1, De), jnp.float32)
    p['enc_pos'] = jnp.asarray(get_2d_sincos_pos_embed(De, nps))
    p['enc'] = [init_block(k, De, int(De * cfg.mlp_ratio), NH)
                for k in jax.random.split(ks[1], cfg.encoder_depth)]
    p['e2d_w'] = xavier(ks[2], De, Dd)
    p['e2d_b'] = jnp.zeros((1, Dd), jnp.float32)
    p['mask_tok'] = jax.random.normal(ks[3], (1, Dd), jnp.float32)
    dec_pos = jnp.asarray(get_2d_sincos_pos_embed(Dd, nps))
    p['dec_pos'] = jnp.concatenate([jnp.zeros((1, Dd), jnp.float32), dec_pos], 0)
    p['dec'] = [init_block(k, Dd, int(Dd * cfg.mlp_ratio), NH)
                for k in jax.random.split(ks[4], cfg.decoder_depth)]
    p['dnw'] = jnp.ones((1, Dd), jnp.float32)
    p['dnb'] = jnp.zeros((1, Dd), jnp.float32)
    d2p_w = xavier(ks[5], Dd, P2C)
    d2p_b = jnp.zeros((1, P2C), jnp.float32)
    # Zero-pad the dec_to_patch output dim 48 -> 128 so kernel stores are lane
    # dense; the padding columns are sliced away in XLA.
    p['d2p_w_pad'] = jnp.pad(d2p_w, ((0, 0), (0, LANE - P2C)))
    p['d2p_b_pad'] = jnp.pad(d2p_b, ((0, 0), (0, LANE - P2C)))
    # TODO(synk): SegmentHead definition not provided; single 3x3 conv assumed.
    cin = cfg.c * len(cfg.out_indices)
    lim = math.sqrt(6.0 / (cin * 9 + cfg.head_out_ch * 9))
    p['head_w'] = jax.random.uniform(ks[6], (cfg.head_out_ch, cin, 3, 3),
                                     jnp.float32, -lim, lim)
    p['head_b'] = jnp.zeros((cfg.head_out_ch,), jnp.float32)
    return p


# ----------------------------------------------------------------------------
# Model forward
# ----------------------------------------------------------------------------
def mae_segmentor_forward(images, enc_pos, wslab, fslab, head_w, head_b,
                          cfg, w_off, f_off, mask_key):
    B = images.shape[0]
    patches = img_to_patch(images, cfg.patch_size)                  # [B, L, P*P*C]
    keep_idx, mask_idxs, inverse = random_masking(
        mask_key, B, cfg.seq_len, cfg.keep_len)

    patches_keep = jnp.take_along_axis(patches, keep_idx[:, :, None], axis=1)
    pos_keep = jnp.take(enc_pos, keep_idx, axis=0)                  # [B, keep, De]
    # decoder token source = [kept tokens ; mask token]; index == keep selects
    # the mask token.  0/1 one-hot is exact in bf16.
    sel = jnp.minimum(inverse, cfg.keep_len)
    perm = jax.nn.one_hot(sel, cfg.keep_len + 1, dtype=jnp.bfloat16)  # [B,L+1,keep+1]

    feats = mae_pipeline(patches_keep, pos_keep, perm, wslab, fslab,
                         cfg, w_off, f_off)                          # [B,NF,L,128]
    feats = feats[..., :cfg.flat_image_patch_size]                   # [B,NF,L,48]

    imgs = [reconstruct_image(feats[:, j], cfg) for j in range(feats.shape[1])]
    x_img = jnp.concatenate(imgs, axis=1)                            # [B,3*NF,H,W]

    # 3x3 conv head kept in XLA (lax.conv) per perf review: ~27 KFLOP, so a
    # separate pallas_call dispatch / in-kernel 5-D reconstruct transpose would
    # cost more than the conv itself.
    seg = lax.conv_general_dilated(
        x_img, head_w, window_strides=(1, 1), padding='SAME',
        dimension_numbers=('NCHW', 'OIHW', 'NCHW'))
    seg = seg + head_b[None, :, None, None]
    return seg, mask_idxs


def make_config():
    cfg = SimpleNamespace(
        img_size=16, patch_size=4, c=3, mask_ratio=0.75,
        encoder_width=32, decoder_width=32,
        encoder_depth=1, decoder_depth=2,
        n_heads=4, mlp_ratio=2.0, dropout=0.0,
        no_cls_token_decoder=False, out_indices=(0, 1),
        head_out_ch=1,
    )
    cfg.seq_len = (cfg.img_size ** 2) // (cfg.patch_size ** 2)
    cfg.keep_len = int(cfg.seq_len * (1 - cfg.mask_ratio))
    cfg.n_mask_tokens = int(cfg.seq_len * cfg.mask_ratio)
    cfg.flat_image_patch_size = cfg.patch_size ** 2 * cfg.c
    return cfg


if __name__ == "__main__":
    cfg = make_config()
    root = jax.random.PRNGKey(0)
    k_img, k_param, k_mask = jax.random.split(root, 3)

    images = jax.random.normal(
        k_img, (2, cfg.c, cfg.img_size, cfg.img_size), dtype=jnp.float32)
    params = init_params(k_param, cfg)
    wslab, fslab, w_off, f_off = build_slabs(params, cfg)

    fwd = jax.jit(partial(mae_segmentor_forward, cfg=cfg, w_off=w_off,
                          f_off=f_off, mask_key=k_mask))
    seg, mask_idxs = fwd(images, params['enc_pos'], wslab, fslab,
                         params['head_w'], params['head_b'])
    jax.block_until_ready(seg)
    jax.block_until_ready(mask_idxs)

    assert seg.shape == (2, cfg.head_out_ch, cfg.img_size, cfg.img_size)
    assert mask_idxs.shape == (2, cfg.n_mask_tokens)
    print("KERNEL_OK")
</pallas_src>

<mosaic_0001>
module attributes {stable_mosaic.version = 11 : i64} {
  func.func @kernel(%arg0: memref<2x4x48xf32, #tpu.memory_space<vmem>>, %arg1: memref<2x4x32xf32, #tpu.memory_space<vmem>>, %arg2: memref<2x17x5xbf16, #tpu.memory_space<vmem>>, %arg3: memref<592x128xbf16, #tpu.memory_space<vmem>>, %arg4: memref<264x128xf32, #tpu.memory_space<vmem>>, %arg5: memref<2x2x16x128xf32, #tpu.memory_space<vmem>>) attributes {dimension_semantics = [], scalar_prefetch = 0 : i64, scratch_operands = 0 : i64, tpu.core_type = #tpu.core_type<tc>} {
    %c0 = arith.constant 0 : index
    %c0_0 = arith.constant 0 : index
    %c0_1 = arith.constant 0 : index
    %0 = vector.load %arg0[%c0, %c0_0, %c0_1] : memref<2x4x48xf32, #tpu.memory_space<vmem>>, vector<1x4x48xf32>
    %1 = vector.shape_cast %0 : vector<1x4x48xf32> to vector<4x48xf32>
    %2 = arith.truncf %1 : vector<4x48xf32> to vector<4x48xbf16>
    %c0_2 = arith.constant 0 : index
    %c0_3 = arith.constant 0 : index
    %3 = vector.load %arg3[%c0_2, %c0_3] : memref<592x128xbf16, #tpu.memory_space<vmem>>, vector<48x32xbf16>
    %cst = arith.constant dense<0.000000e+00> : vector<4x32xf32>
    %4 = tpu.matmul %2, %3, %cst {dimension_numbers = #tpu.dot_dimension_numbers<[1], [0], [0], [1], [0, 0, 1, 1], [], []>} : vector<4x48xbf16>, vector<48x32xbf16>, vector<4x32xf32> -> vector<4x32xf32>
    %c0_4 = arith.constant 0 : index
    %c0_5 = arith.constant 0 : index
    %5 = vector.load %arg4[%c0_4, %c0_5] : memref<264x128xf32, #tpu.memory_space<vmem>>, vector<1x32xf32>
    %6 = vector.broadcast %5 : vector<1x32xf32> to vector<4x32xf32>
    %7 = arith.addf %4, %6 : vector<4x32xf32>
    %c0_6 = arith.constant 0 : index
    %c0_7 = arith.constant 0 : index
    %c0_8 = arith.constant 0 : index
    %8 = vector.load %arg1[%c0_6, %c0_7, %c0_8] : memref<2x4x32xf32, #tpu.memory_space<vmem>>, vector<1x4x32xf32>
    %9 = vector.shape_cast %8 : vector<1x4x32xf32> to vector<4x32xf32>
    %10 = arith.addf %7, %9 : vector<4x32xf32>
    %c8 = arith.constant 8 : index
    %c0_9 = arith.constant 0 : index
    %11 = vector.load %arg4[%c8, %c0_9] : memref<264x128xf32, #tpu.memory_space<vmem>>, vector<1x32xf32>
    %c16 = arith.constant 16 : index
    %c0_10 = arith.constant 0 : index
    %12 = vector.load %arg4[%c16, %c0_10] : memref<264x128xf32, #tpu.memory_space<vmem>>, vector<1x32xf32>
    %cst_11 = arith.constant dense<0.000000e+00> : vector<4xf32>
    %13 = vector.multi_reduction <add>, %10, %cst_11 [1] : vector<4x32xf32> to vector<4xf32>
    %14 = vector.shape_cast %13 : vector<4xf32> to vector<4x1xf32>
    %cst_12 = arith.constant 3.200000e+01 : f32
    %15 = vector.broadcast %cst_12 : f32 to vector<4x1xf32>
    %16 = arith.divf %14, %15 : vector<4x1xf32>
    %17 = vector.broadcast %16 : vector<4x1xf32> to vector<4x32xf32>
    %18 = arith.subf %10, %17 : vector<4x32xf32>
    %19 = arith.mulf %18, %18 : vector<4x32xf32>
    %cst_13 = arith.constant dense<0.000000e+00> : vector<4xf32>
    %20 = vector.multi_reduction <add>, %19, %cst_13 [1] : vector<4x32xf32> to vector<4xf32>
    %21 = vector.shape_cast %20 : vector<4xf32> to vector<4x1xf32>
    %cst_14 = arith.constant 3.200000e+01 : f32
    %22 = vector.broadcast %cst_14 : f32 to vector<4x1xf32>
    %23 = arith.divf %21, %22 : vector<4x1xf32>
    %24 = vector.broadcast %16 : vector<4x1xf32> to vector<4x32xf32>
    %25 = arith.subf %10, %24 : vector<4x32xf32>
    %cst_15 = arith.constant 9.99999974E-6 : f32
    %26 = vector.broadcast %cst_15 : f32 to vector<4x1xf32>
    %27 = arith.addf %23, %26 : vector<4x1xf32>
    %28 = math.rsqrt %27 : vector<4x1xf32>
    %29 = vector.broadcast %28 : vector<4x1xf32> to vector<4x32xf32>
    %30 = arith.mulf %25, %29 : vector<4x32xf32>
    %31 = vector.broadcast %11 : vector<1x32xf32> to vector<4x32xf32>
    %32 = arith.mulf %30, %31 : vector<4x32xf32>
    %33 = vector.broadcast %12 : vector<1x32xf32> to vector<4x32xf32>
    %34 = arith.addf %32, %33 : vector<4x32xf32>
    %35 = arith.truncf %34 : vector<4x32xf32> to vector<4x32xbf16>
    %c48 = arith.constant 48 : index
    %c0_16 = arith.constant 0 : index
    %36 = vector.load %arg3[%c48, %c0_16] : memref<592x128xbf16, #tpu.memory_space<vmem>>, vector<32x96xbf16>
    %cst_17 = arith.constant dense<0.000000e+00> : vector<4x96xf32>
    %37 = tpu.matmul %35, %36, %cst_17 {dimension_numbers = #tpu.dot_dimension_numbers<[1], [0], [0], [1], [0, 0, 1, 1], [], []>} : vector<4x32xbf16>, vector<32x96xbf16>, vector<4x96xf32> -> vector<4x96xf32>
    %c24 = arith.constant 24 : index
    %c0_18 = arith.constant 0 : index
    %38 = vector.load %arg4[%c24, %c0_18] : memref<264x128xf32, #tpu.memory_space<vmem>>, vector<1x96xf32>
    %39 = vector.broadcast %38 : vector<1x96xf32> to vector<4x96xf32>
    %40 = arith.addf %37, %39 : vector<4x96xf32>
    %41 = vector.extract_strided_slice %40 {offsets = [0, 0], sizes = [4, 8], strides = [1, 1]} : vector<4x96xf32> to vector<4x8xf32>
    %42 = vector.extract_strided_slice %40 {offsets = [0, 32], sizes = [4, 8], strides = [1, 1]} : vector<4x96xf32> to vector<4x8xf32>
    %43 = vector.extract_strided_slice %40 {offsets = [0, 64], sizes = [4, 8], strides = [1, 1]} : vector<4x96xf32> to vector<4x8xf32>
    %44 = arith.truncf %41 : vector<4x8xf32> to vector<4x8xbf16>
    %45 = arith.truncf %42 : vector<4x8xf32> to vector<4x8xbf16>
    %cst_19 = arith.constant dense<0.000000e+00> : vector<4x4xf32>
    %46 = tpu.matmul %44, %45, %cst_19 {dimension_numbers = #tpu.dot_dimension_numbers<[1], [1], [0], [0], [0, 0, 1, 0], [], []>} : vector<4x8xbf16>, vector<4x8xbf16>, vector<4x4xf32> -> vector<4x4xf32>
    %cst_20 = arith.constant 0.353553385 : f32
    %47 = vector.broadcast %cst_20 : f32 to vector<4x4xf32>
    %48 = arith.mulf %46, %47 : vector<4x4xf32>
    %cst_21 = arith.constant dense<0xFF800000> : vector<4xf32>
    %49 = vector.multi_reduction <maximumf>, %48, %cst_21 [1] : vector<4x4xf32> to vector<4xf32>
    %50 = vector.shape_cast %49 : vector<4xf32> to vector<4x1xf32>
    %51 = vector.broadcast %50 : vector<4x1xf32> to vector<4x4xf32>
    %52 = arith.subf %48, %51 : vector<4x4xf32>
    %53 = math.exp %52 : vector<4x4xf32>
    %cst_22 = arith.constant dense<0.000000e+00> : vector<4xf32>
    %54 = vector.multi_reduction <add>, %53, %cst_22 [1] : vector<4x4xf32> to vector<4xf32>
    %55 = vector.shape_cast %54 : vector<4xf32> to vector<4x1xf32>
    %56 = tpu.reciprocal %55 {approx = true} : vector<4x1xf32> -> vector<4x1xf32>
    %57 = vector.broadcast %56 : vector<4x1xf32> to vector<4x4xf32>
    %58 = arith.mulf %53, %57 : vector<4x4xf32>
    %59 = arith.truncf %58 : vector<4x4xf32> to vector<4x4xbf16>
    %60 = arith.truncf %43 : vector<4x8xf32> to vector<4x8xbf16>
    %cst_23 = arith.constant dense<0.000000e+00> : vector<4x8xf32>
    %61 = tpu.matmul %59, %60, %cst_23 {dimension_numbers = #tpu.dot_dimension_numbers<[1], [0], [0], [1], [0, 0, 1, 1], [], []>} : vector<4x4xbf16>, vector<4x8xbf16>, vector<4x8xf32> -> vector<4x8xf32>
    %62 = vector.extract_strided_slice %40 {offsets = [0, 8], sizes = [4, 8], strides = [1, 1]} : vector<4x96xf32> to vector<4x8xf32>
    %63 = vector.extract_strided_slice %40 {offsets = [0, 40], sizes = [4, 8], strides = [1, 1]} : vector<4x96xf32> to vector<4x8xf32>
    %64 = vector.extract_strided_slice %40 {offsets = [0, 72], sizes = [4, 8], strides = [1, 1]} : vector<4x96xf32> to vector<4x8xf32>
    %65 = arith.truncf %62 : vector<4x8xf32> to vector<4x8xbf16>
    %66 = arith.truncf %63 : vector<4x8xf32> to vector<4x8xbf16>
    %cst_24 = arith.constant dense<0.000000e+00> : vector<4x4xf32>
    %67 = tpu.matmul %65, %66, %cst_24 {dimension_numbers = #tpu.dot_dimension_numbers<[1], [1], [0], [0], [0, 0, 1, 0], [], []>} : vector<4x8xbf16>, vector<4x8xbf16>, vector<4x4xf32> -> vector<4x4xf32>
    %cst_25 = arith.constant 0.353553385 : f32
    %68 = vector.broadcast %cst_25 : f32 to vector<4x4xf32>
    %69 = arith.mulf %67, %68 : vector<4x4xf32>
    %cst_26 = arith.constant dense<0xFF800000> : vector<4xf32>
    %70 = vector.multi_reduction <maximumf>, %69, %cst_26 [1] : vector<4x4xf32> to vector<4xf32>
    %71 = vector.shape_cast %70 : vector<4xf32> to vector<4x1xf32>
    %72 = vector.broadcast %71 : vector<4x1xf32> to vector<4x4xf32>
    %73 = arith.subf %69, %72 : vector<4x4xf32>
    %74 = math.exp %73 : vector<4x4xf32>
    %cst_27 = arith.constant dense<0.000000e+00> : vector<4xf32>
    %75 = vector.multi_reduction <add>, %74, %cst_27 [1] : vector<4x4xf32> to vector<4xf32>
    %76 = vector.shape_cast %75 : vector<4xf32> to vector<4x1xf32>
    %77 = tpu.reciprocal %76 {approx = true} : vector<4x1xf32> -> vector<4x1xf32>
    %78 = vector.broadcast %77 : vector<4x1xf32> to vector<4x4xf32>
    %79 = arith.mulf %74, %78 : vector<4x4xf32>
    %80 = arith.truncf %79 : vector<4x4xf32> to vector<4x4xbf16>
    %81 = arith.truncf %64 : vector<4x8xf32> to vector<4x8xbf16>
    %cst_28 = arith.constant dense<0.000000e+00> : vector<4x8xf32>
    %82 = tpu.matmul %80, %81, %cst_28 {dimension_numbers = #tpu.dot_dimension_numbers<[1], [0], [0], [1], [0, 0, 1, 1], [], []>} : vector<4x4xbf16>, vector<4x8xbf16>, vector<4x8xf32> -> vector<4x8xf32>
    %83 = vector.extract_strided_slice %40 {offsets = [0, 16], sizes = [4, 8], strides = [1, 1]} : vector<4x96xf32> to vector<4x8xf32>
    %84 = vector.extract_strided_slice %40 {offsets = [0, 48], sizes = [4, 8], strides = [1, 1]} : vector<4x96xf32> to vector<4x8xf32>
    %85 = vector.extract_strided_slice %40 {offsets = [0, 80], sizes = [4, 8], strides = [1, 1]} : vector<4x96xf32> to vector<4x8xf32>
    %86 = arith.truncf %83 : vector<4x8xf32> to vector<4x8xbf16>
    %87 = arith.truncf %84 : vector<4x8xf32> to vector<4x8xbf16>
    %cst_29 = arith.constant dense<0.000000e+00> : vector<4x4xf32>
    %88 = tpu.matmul %86, %87, %cst_29 {dimension_numbers = #tpu.dot_dimension_numbers<[1], [1], [0], [0], [0, 0, 1, 0], [], []>} : vector<4x8xbf16>, vector<4x8xbf16>, vector<4x4xf32> -> vector<4x4xf32>
    %cst_30 = arith.constant 0.353553385 : f32
    %89 = vector.broadcast %cst_30 : f32 to vector<4x4xf32>
    %90 = arith.mulf %88, %89 : vector<4x4xf32>
    %cst_31 = arith.constant dense<0xFF800000> : vector<4xf32>
    %91 = vector.multi_reduction <maximumf>, %90, %cst_31 [1] : vector<4x4xf32> to vector<4xf32>
    %92 = vector.shape_cast %91 : vector<4xf32> to vector<4x1xf32>
    %93 = vector.broadcast %92 : vector<4x1xf32> to vector<4x4xf32>
    %94 = arith.subf %90, %93 : vector<4x4xf32>
    %95 = math.exp %94 : vector<4x4xf32>
    %cst_32 = arith.constant dense<0.000000e+00> : vector<4xf32>
    %96 = vector.multi_reduction <add>, %95, %cst_32 [1] : vector<4x4xf32> to vector<4xf32>
    %97 = vector.shape_cast %96 : vector<4xf32> to vector<4x1xf32>
    %98 = tpu.reciprocal %97 {approx = true} : vector<4x1xf32> -> vector<4x1xf32>
    %99 = vector.broadcast %98 : vector<4x1xf32> to vector<4x4xf32>
    %100 = arith.mulf %95, %99 : vector<4x4xf32>
    %101 = arith.truncf %100 : vector<4x4xf32> to vector<4x4xbf16>
    %102 = arith.truncf %85 : vector<4x8xf32> to vector<4x8xbf16>
    %cst_33 = arith.constant dense<0.000000e+00> : vector<4x8xf32>
    %103 = tpu.matmul %101, %102, %cst_33 {dimension_numbers = #tpu.dot_dimension_numbers<[1], [0], [0], [1], [0, 0, 1, 1], [], []>} : vector<4x4xbf16>, vector<4x8xbf16>, vector<4x8xf32> -> vector<4x8xf32>
    %104 = vector.extract_strided_slice %40 {offsets = [0, 24], sizes = [4, 8], strides = [1, 1]} : vector<4x96xf32> to vector<4x8xf32>
    %105 = vector.extract_strided_slice %40 {offsets = [0, 56], sizes = [4, 8], strides = [1, 1]} : vector<4x96xf32> to vector<4x8xf32>
    %106 = vector.extract_strided_slice %40 {offsets = [0, 88], sizes = [4, 8], strides = [1, 1]} : vector<4x96xf32> to vector<4x8xf32>
    %107 = arith.truncf %104 : vector<4x8xf32> to vector<4x8xbf16>
    %108 = arith.truncf %105 : vector<4x8xf32> to vector<4x8xbf16>
    %cst_34 = arith.constant dense<0.000000e+00> : vector<4x4xf32>
    %109 = tpu.matmul %107, %108, %cst_34 {dimension_numbers = #tpu.dot_dimension_numbers<[1], [1], [0], [0], [0, 0, 1, 0], [], []>} : vector<4x8xbf16>, vector<4x8xbf16>, vector<4x4xf32> -> vector<4x4xf32>
    %cst_35 = arith.constant 0.353553385 : f32
    %110 = vector.broadcast %cst_35 : f32 to vector<4x4xf32>
    %111 = arith.mulf %109, %110 : vector<4x4xf32>
    %cst_36 = arith.constant dense<0xFF800000> : vector<4xf32>
    %112 = vector.multi_reduction <maximumf>, %111, %cst_36 [1] : vector<4x4xf32> to vector<4xf32>
    %113 = vector.shape_cast %112 : vector<4xf32> to vector<4x1xf32>
    %114 = vector.broadcast %113 : vector<4x1xf32> to vector<4x4xf32>
    %115 = arith.subf %111, %114 : vector<4x4xf32>
    %116 = math.exp %115 : vector<4x4xf32>
    %cst_37 = arith.constant dense<0.000000e+00> : vector<4xf32>
    %117 = vector.multi_reduction <add>, %116, %cst_37 [1] : vector<4x4xf32> to vector<4xf32>
    %118 = vector.shape_cast %117 : vector<4xf32> to vector<4x1xf32>
    %119 = tpu.reciprocal %118 {approx = true} : vector<4x1xf32> -> vector<4x1xf32>
    %120 = vector.broadcast %119 : vector<4x1xf32> to vector<4x4xf32>
    %121 = arith.mulf %116, %120 : vector<4x4xf32>
    %122 = arith.truncf %121 : vector<4x4xf32> to vector<4x4xbf16>
    %123 = arith.truncf %106 : vector<4x8xf32> to vector<4x8xbf16>
    %cst_38 = arith.constant dense<0.000000e+00> : vector<4x8xf32>
    %124 = tpu.matmul %122, %123, %cst_38 {dimension_numbers = #tpu.dot_dimension_numbers<[1], [0], [0], [1], [0, 0, 1, 1], [], []>} : vector<4x4xbf16>, vector<4x8xbf16>, vector<4x8xf32> -> vector<4x8xf32>
    %125 = tpu.concatenate %61, %82, %103, %124 in 1 : vector<4x8xf32>, vector<4x8xf32>, vector<4x8xf32>, vector<4x8xf32> -> vector<4x32xf32>
    %126 = arith.truncf %125 : vector<4x32xf32> to vector<4x32xbf16>
    %c80 = arith.constant 80 : index
    %c0_39 = arith.constant 0 : index
    %127 = vector.load %arg3[%c80, %c0_39] : memref<592x128xbf16, #tpu.memory_space<vmem>>, vector<32x32xbf16>
    %cst_40 = arith.constant dense<0.000000e+00> : vector<4x32xf32>
    %128 = tpu.matmul %126, %127, %cst_40 {dimension_numbers = #tpu.dot_dimension_numbers<[1], [0], [0], [1], [0, 0, 1, 1], [], []>} : vector<4x32xbf16>, vector<32x32xbf16>, vector<4x32xf32> -> vector<4x32xf32>
    %129 = arith.addf %10, %128 : vector<4x32xf32>
    %c32 = arith.constant 32 : index
    %c0_41 = arith.constant 0 : index
    %130 = vector.load %arg4[%c32, %c0_41] : memref<264x128xf32, #tpu.memory_space<vmem>>, vector<1x32xf32>
    %131 = vector.broadcast %130 : vector<1x32xf32> to vector<4x32xf32>
    %132 = arith.addf %129, %131 : vector<4x32xf32>
    %c40 = arith.constant 40 : index
    %c0_42 = arith.constant 0 : index
    %133 = vector.load %arg4[%c40, %c0_42] : memref<264x128xf32, #tpu.memory_space<vmem>>, vector<1x32xf32>
    %c48_43 = arith.constant 48 : index
    %c0_44 = arith.constant 0 : index
    %134 = vector.load %arg4[%c48_43, %c0_44] : memref<264x128xf32, #tpu.memory_space<vmem>>, vector<1x32xf32>
    %cst_45 = arith.constant dense<0.000000e+00> : vector<4xf32>
    %135 = vector.multi_reduction <add>, %132, %cst_45 [1] : vector<4x32xf32> to vector<4xf32>
    %136 = vector.shape_cast %135 : vector<4xf32> to vector<4x1xf32>
    %cst_46 = arith.constant 3.200000e+01 : f32
    %137 = vector.broadcast %cst_46 : f32 to vector<4x1xf32>
    %138 = arith.divf %136, %137 : vector<4x1xf32>
    %139 = vector.broadcast %138 : vector<4x1xf32> to vector<4x32xf32>
    %140 = arith.subf %132, %139 : vector<4x32xf32>
    %141 = arith.mulf %140, %140 : vector<4x32xf32>
    %cst_47 = arith.constant dense<0.000000e+00> : vector<4xf32>
    %142 = vector.multi_reduction <add>, %141, %cst_47 [1] : vector<4x32xf32> to vector<4xf32>
    %143 = vector.shape_cast %142 : vector<4xf32> to vector<4x1xf32>
    %cst_48 = arith.constant 3.200000e+01 : f32
    %144 = vector.broadcast %cst_48 : f32 to vector<4x1xf32>
    %145 = arith.divf %143, %144 : vector<4x1xf32>
    %146 = vector.broadcast %138 : vector<4x1xf32> to vector<4x32xf32>
    %147 = arith.subf %132, %146 : vector<4x32xf32>
    %cst_49 = arith.constant 9.99999974E-6 : f32
    %148 = vector.broadcast %cst_49 : f32 to vector<4x1xf32>
    %149 = arith.addf %145, %148 : vector<4x1xf32>
    %150 = math.rsqrt %149 : vector<4x1xf32>
    %151 = vector.broadcast %150 : vector<4x1xf32> to vector<4x32xf32>
    %152 = arith.mulf %147, %151 : vector<4x32xf32>
    %153 = vector.broadcast %133 : vector<1x32xf32> to vector<4x32xf32>
    %154 = arith.mulf %152, %153 : vector<4x32xf32>
    %155 = vector.broadcast %134 : vector<1x32xf32> to vector<4x32xf32>
    %156 = arith.addf %154, %155 : vector<4x32xf32>
    %157 = arith.truncf %156 : vector<4x32xf32> to vector<4x32xbf16>
    %c112 = arith.constant 112 : index
    %c0_50 = arith.constant 0 : index
    %158 = vector.load %arg3[%c112, %c0_50] : memref<592x128xbf16, #tpu.memory_space<vmem>>, vector<32x64xbf16>
    %cst_51 = arith.constant dense<0.000000e+00> : vector<4x64xf32>
    %159 = tpu.matmul %157, %158, %cst_51 {dimension_numbers = #tpu.dot_dimension_numbers<[1], [0], [0], [1], [0, 0, 1, 1], [], []>} : vector<4x32xbf16>, vector<32x64xbf16>, vector<4x64xf32> -> vector<4x64xf32>
    %c56 = arith.constant 56 : index
    %c0_52 = arith.constant 0 : index
    %160 = vector.load %arg4[%c56, %c0_52] : memref<264x128xf32, #tpu.memory_space<vmem>>, vector<1x64xf32>
    %161 = vector.broadcast %160 : vector<1x64xf32> to vector<4x64xf32>
    %162 = arith.addf %159, %161 : vector<4x64xf32>
    %163 = arith.mulf %162, %162 : vector<4x64xf32>
    %164 = arith.mulf %162, %163 : vector<4x64xf32>
    %cst_53 = arith.constant 4.471500e-02 : f32
    %165 = vector.broadcast %cst_53 : f32 to vector<4x64xf32>
    %166 = arith.mulf %165, %164 : vector<4x64xf32>
    %167 = arith.addf %162, %166 : vector<4x64xf32>
    %cst_54 = arith.constant 0.797884583 : f32
    %168 = vector.broadcast %cst_54 : f32 to vector<4x64xf32>
    %169 = arith.mulf %168, %167 : vector<4x64xf32>
    %170 = math.tanh %169 : vector<4x64xf32>
    %cst_55 = arith.constant 1.000000e+00 : f32
    %171 = vector.broadcast %cst_55 : f32 to vector<4x64xf32>
    %172 = arith.addf %171, %170 : vector<4x64xf32>
    %cst_56 = arith.constant 5.000000e-01 : f32
    %173 = vector.broadcast %cst_56 : f32 to vector<4x64xf32>
    %174 = arith.mulf %173, %172 : vector<4x64xf32>
    %175 = arith.mulf %162, %174 : vector<4x64xf32>
    %176 = arith.truncf %175 : vector<4x64xf32> to vector<4x64xbf16>
    %c144 = arith.constant 144 : index
    %c0_57 = arith.constant 0 : index
    %177 = vector.load %arg3[%c144, %c0_57] : memref<592x128xbf16, #tpu.memory_space<vmem>>, vector<64x32xbf16>
    %cst_58 = arith.constant dense<0.000000e+00> : vector<4x32xf32>
    %178 = tpu.matmul %176, %177, %cst_58 {dimension_numbers = #tpu.dot_dimension_numbers<[1], [0], [0], [1], [0, 0, 1, 1], [], []>} : vector<4x64xbf16>, vector<64x32xbf16>, vector<4x32xf32> -> vector<4x32xf32>
    %179 = arith.addf %132, %178 : vector<4x32xf32>
    %c64 = arith.constant 64 : index
    %c0_59 = arith.constant 0 : index
    %180 = vector.load %arg4[%c64, %c0_59] : memref<264x128xf32, #tpu.memory_space<vmem>>, vector<1x32xf32>
    %181 = vector.broadcast %180 : vector<1x32xf32> to vector<4x32xf32>
    %182 = arith.addf %179, %181 : vector<4x32xf32>
    %183 = arith.truncf %182 : vector<4x32xf32> to vector<4x32xbf16>
    %c528 = arith.constant 528 : index
    %c0_60 = arith.constant 0 : index
    %184 = vector.load %arg3[%c528, %c0_60] : memref<592x128xbf16, #tpu.memory_space<vmem>>, vector<32x32xbf16>
    %cst_61 = arith.constant dense<0.000000e+00> : vector<4x32xf32>
    %185 = tpu.matmul %183, %184, %cst_61 {dimension_numbers = #tpu.dot_dimension_numbers<[1], [0], [0], [1], [0, 0, 1, 1], [], []>} : vector<4x32xbf16>, vector<32x32xbf16>, vector<4x32xf32> -> vector<4x32xf32>
    %c200 = arith.constant 200 : index
    %c0_62 = arith.constant 0 : index
    %186 = vector.load %arg4[%c200, %c0_62] : memref<264x128xf32, #tpu.memory_space<vmem>>, vector<1x32xf32>
    %187 = vector.broadcast %186 : vector<1x32xf32> to vector<4x32xf32>
    %188 = arith.addf %185, %187 : vector<4x32xf32>
    %c208 = arith.constant 208 : index
    %c0_63 = arith.constant 0 : index
    %189 = vector.load %arg4[%c208, %c0_63] : memref<264x128xf32, #tpu.memory_space<vmem>>, vector<1x32xf32>
    %190 = tpu.concatenate %188, %189 in 0 : vector<4x32xf32>, vector<1x32xf32> -> vector<5x32xf32>
    %c0_64 = arith.constant 0 : index
    %c0_65 = arith.constant 0 : index
    %c0_66 = arith.constant 0 : index
    %191 = vector.load %arg2[%c0_64, %c0_65, %c0_66] : memref<2x17x5xbf16, #tpu.memory_space<vmem>>, vector<1x17x5xbf16>
    %192 = vector.shape_cast %191 : vector<1x17x5xbf16> to vector<17x5xbf16>
    %193 = arith.truncf %190 : vector<5x32xf32> to vector<5x32xbf16>
    %cst_67 = arith.constant dense<0.000000e+00> : vector<17x32xf32>
    %194 = tpu.matmul %192, %193, %cst_67 {dimension_numbers = #tpu.dot_dimension_numbers<[1], [0], [0], [1], [0, 0, 1, 1], [], []>} : vector<17x5xbf16>, vector<5x32xbf16>, vector<17x32xf32> -> vector<17x32xf32>
    %c216 = arith.constant 216 : index
    %c0_68 = arith.constant 0 : index
    %195 = vector.load %arg4[%c216, %c0_68] : memref<264x128xf32, #tpu.memory_space<vmem>>, vector<17x32xf32>
    %196 = arith.addf %194, %195 : vector<17x32xf32>
    %c72 = arith.constant 72 : index
    %c0_69 = arith.constant 0 : index
    %197 = vector.load %arg4[%c72, %c0_69] : memref<264x128xf32, #tpu.memory_space<vmem>>, vector<1x32xf32>
    %c80_70 = arith.constant 80 : index
    %c0_71 = arith.constant 0 : index
    %198 = vector.load %arg4[%c80_70, %c0_71] : memref<264x128xf32, #tpu.memory_space<vmem>>, vector<1x32xf32>
    %cst_72 = arith.constant dense<0.000000e+00> : vector<17xf32>
    %199 = vector.multi_reduction <add>, %196, %cst_72 [1] : vector<17x32xf32> to vector<17xf32>
    %200 = vector.shape_cast %199 : vector<17xf32> to vector<17x1xf32>
    %cst_73 = arith.constant 3.200000e+01 : f32
    %201 = vector.broadcast %cst_73 : f32 to vector<17x1xf32>
    %202 = arith.divf %200, %201 : vector<17x1xf32>
    %203 = vector.broadcast %202 : vector<17x1xf32> to vector<17x32xf32>
    %204 = arith.subf %196, %203 : vector<17x32xf32>
    %205 = arith.mulf %204, %204 : vector<17x32xf32>
    %cst_74 = arith.constant dense<0.000000e+00> : vector<17xf32>
    %206 = vector.multi_reduction <add>, %205, %cst_74 [1] : vector<17x32xf32> to vector<17xf32>
    %207 = vector.shape_cast %206 : vector<17xf32> to vector<17x1xf32>
    %cst_75 = arith.constant 3.200000e+01 : f32
    %208 = vector.broadcast %cst_75 : f32 to vector<17x1xf32>
    %209 = arith.divf %207, %208 : vector<17x1xf32>
    %210 = vector.broadcast %202 : vector<17x1xf32> to vector<17x32xf32>
    %211 = arith.subf %196, %210 : vector<17x32xf32>
    %cst_76 = arith.constant 9.99999974E-6 : f32
    %212 = vector.broadcast %cst_76 : f32 to vector<17x1xf32>
    %213 = arith.addf %209, %212 : vector<17x1xf32>
    %214 = math.rsqrt %213 : vector<17x1xf32>
    %215 = vector.broadcast %214 : vector<17x1xf32> to vector<17x32xf32>
    %216 = arith.mulf %211, %215 : vector<17x32xf32>
    %217 = vector.broadcast %197 : vector<1x32xf32> to vector<17x32xf32>
    %218 = arith.mulf %216, %217 : vector<17x32xf32>
    %219 = vector.broadcast %198 : vector<1x32xf32> to vector<17x32xf32>
    %220 = arith.addf %218, %219 : vector<17x32xf32>
    %221 = arith.truncf %220 : vector<17x32xf32> to vector<17x32xbf16>
    %c208_77 = arith.constant 208 : index
    %c0_78 = arith.constant 0 : index
    %222 = vector.load %arg3[%c208_77, %c0_78] : memref<592x128xbf16, #tpu.memory_space<vmem>>, vector<32x96xbf16>
    %cst_79 = arith.constant dense<0.000000e+00> : vector<17x96xf32>
    %223 = tpu.matmul %221, %222, %cst_79 {dimension_numbers = #tpu.dot_dimension_numbers<[1], [0], [0], [1], [0, 0, 1, 1], [], []>} : vector<17x32xbf16>, vector<32x96xbf16>, vector<17x96xf32> -> vector<17x96xf32>
    %c88 = arith.constant 88 : index
    %c0_80 = arith.constant 0 : index
    %224 = vector.load %arg4[%c88, %c0_80] : memref<264x128xf32, #tpu.memory_space<vmem>>, vector<1x96xf32>
    %225 = vector.broadcast %224 : vector<1x96xf32> to vector<17x96xf32>
    %226 = arith.addf %223, %225 : vector<17x96xf32>
    %227 = vector.extract_strided_slice %226 {offsets = [0, 0], sizes = [17, 8], strides = [1, 1]} : vector<17x96xf32> to vector<17x8xf32>
    %228 = vector.extract_strided_slice %226 {offsets = [0, 32], sizes = [17, 8], strides = [1, 1]} : vector<17x96xf32> to vector<17x8xf32>
    %229 = vector.extract_strided_slice %226 {offsets = [0, 64], sizes = [17, 8], strides = [1, 1]} : vector<17x96xf32> to vector<17x8xf32>
    %230 = arith.truncf %227 : vector<17x8xf32> to vector<17x8xbf16>
    %231 = arith.truncf %228 : vector<17x8xf32> to vector<17x8xbf16>
    %cst_81 = arith.constant dense<0.000000e+00> : vector<17x17xf32>
    %232 = tpu.matmul %230, %231, %cst_81 {dimension_numbers = #tpu.dot_dimension_numbers<[1], [1], [0], [0], [0, 0, 1, 0], [], []>} : vector<17x8xbf16>, vector<17x8xbf16>, vector<17x17xf32> -> vector<17x17xf32>
    %cst_82 = arith.constant 0.353553385 : f32
    %233 = vector.broadcast %cst_82 : f32 to vector<17x17xf32>
    %234 = arith.mulf %232, %233 : vector<17x17xf32>
    %cst_83 = arith.constant dense<0xFF800000> : vector<17xf32>
    %235 = vector.multi_reduction <maximumf>, %234, %cst_83 [1] : vector<17x17xf32> to vector<17xf32>
    %236 = vector.shape_cast %235 : vector<17xf32> to vector<17x1xf32>
    %237 = vector.broadcast %236 : vector<17x1xf32> to vector<17x17xf32>
    %238 = arith.subf %234, %237 : vector<17x17xf32>
    %239 = math.exp %238 : vector<17x17xf32>
    %cst_84 = arith.constant dense<0.000000e+00> : vector<17xf32>
    %240 = vector.multi_reduction <add>, %239, %cst_84 [1] : vector<17x17xf32> to vector<17xf32>
    %241 = vector.shape_cast %240 : vector<17xf32> to vector<17x1xf32>
    %242 = tpu.reciprocal %241 {approx = true} : vector<17x1xf32> -> vector<17x1xf32>
    %243 = vector.broadcast %242 : vector<17x1xf32> to vector<17x17xf32>
    %244 = arith.mulf %239, %243 : vector<17x17xf32>
    %245 = arith.truncf %244 : vector<17x17xf32> to vector<17x17xbf16>
    %246 = arith.truncf %229 : vector<17x8xf32> to vector<17x8xbf16>
    %cst_85 = arith.constant dense<0.000000e+00> : vector<17x8xf32>
    %247 = tpu.matmul %245, %246, %cst_85 {dimension_numbers = #tpu.dot_dimension_numbers<[1], [0], [0], [1], [0, 0, 1, 1], [], []>} : vector<17x17xbf16>, vector<17x8xbf16>, vector<17x8xf32> -> vector<17x8xf32>
    %248 = vector.extract_strided_slice %226 {offsets = [0, 8], sizes = [17, 8], strides = [1, 1]} : vector<17x96xf32> to vector<17x8xf32>
    %249 = vector.extract_strided_slice %226 {offsets = [0, 40], sizes = [17, 8], strides = [1, 1]} : vector<17x96xf32> to vector<17x8xf32>
    %250 = vector.extract_strided_slice %226 {offsets = [0, 72], sizes = [17, 8], strides = [1, 1]} : vector<17x96xf32> to vector<17x8xf32>
    %251 = arith.truncf %248 : vector<17x8xf32> to vector<17x8xbf16>
    %252 = arith.truncf %249 : vector<17x8xf32> to vector<17x8xbf16>
    %cst_86 = arith.constant dense<0.000000e+00> : vector<17x17xf32>
    %253 = tpu.matmul %251, %252, %cst_86 {dimension_numbers = #tpu.dot_dimension_numbers<[1], [1], [0], [0], [0, 0, 1, 0], [], []>} : vector<17x8xbf16>, vector<17x8xbf16>, vector<17x17xf32> -> vector<17x17xf32>
    %cst_87 = arith.constant 0.353553385 : f32
    %254 = vector.broadcast %cst_87 : f32 to vector<17x17xf32>
    %255 = arith.mulf %253, %254 : vector<17x17xf32>
    %cst_88 = arith.constant dense<0xFF800000> : vector<17xf32>
    %256 = vector.multi_reduction <maximumf>, %255, %cst_88 [1] : vector<17x17xf32> to vector<17xf32>
    %257 = vector.shape_cast %256 : vector<17xf32> to vector<17x1xf32>
    %258 = vector.broadcast %257 : vector<17x1xf32> to vector<17x17xf32>
    %259 = arith.subf %255, %258 : vector<17x17xf32>
    %260 = math.exp %259 : vector<17x17xf32>
    %cst_89 = arith.constant dense<0.000000e+00> : vector<17xf32>
    %261 = vector.multi_reduction <add>, %260, %cst_89 [1] : vector<17x17xf32> to vector<17xf32>
    %262 = vector.shape_cast %261 : vector<17xf32> to vector<17x1xf32>
    %263 = tpu.reciprocal %262 {approx = true} : vector<17x1xf32> -> vector<17x1xf32>
    %264 = vector.broadcast %263 : vector<17x1xf32> to vector<17x17xf32>
    %265 = arith.mulf %260, %264 : vector<17x17xf32>
    %266 = arith.truncf %265 : vector<17x17xf32> to vector<17x17xbf16>
    %267 = arith.truncf %250 : vector<17x8xf32> to vector<17x8xbf16>
    %cst_90 = arith.constant dense<0.000000e+00> : vector<17x8xf32>
    %268 = tpu.matmul %266, %267, %cst_90 {dimension_numbers = #tpu.dot_dimension_numbers<[1], [0], [0], [1], [0, 0, 1, 1], [], []>} : vector<17x17xbf16>, vector<17x8xbf16>, vector<17x8xf32> -> vector<17x8xf32>
    %269 = vector.extract_strided_slice %226 {offsets = [0, 16], sizes = [17, 8], strides = [1, 1]} : vector<17x96xf32> to vector<17x8xf32>
    %270 = vector.extract_strided_slice %226 {offsets = [0, 48], sizes = [17, 8], strides = [1, 1]} : vector<17x96xf32> to vector<17x8xf32>
    %271 = vector.extract_strided_slice %226 {offsets = [0, 80], sizes = [17, 8], strides = [1, 1]} : vector<17x96xf32> to vector<17x8xf32>
    %272 = arith.truncf %269 : vector<17x8xf32> to vector<17x8xbf16>
    %273 = arith.truncf %270 : vector<17x8xf32> to vector<17x8xbf16>
    %cst_91 = arith.constant dense<0.000000e+00> : vector<17x17xf32>
    %274 = tpu.matmul %272, %273, %cst_91 {dimension_numbers = #tpu.dot_dimension_numbers<[1], [1], [0], [0], [0, 0, 1, 0], [], []>} : vector<17x8xbf16>, vector<17x8xbf16>, vector<17x17xf32> -> vector<17x17xf32>
    %cst_92 = arith.constant 0.353553385 : f32
    %275 = vector.broadcast %cst_92 : f32 to vector<17x17xf32>
    %276 = arith.mulf %274, %275 : vector<17x17xf32>
    %cst_93 = arith.constant dense<0xFF800000> : vector<17xf32>
    %277 = vector.multi_reduction <maximumf>, %276, %cst_93 [1] : vector<17x17xf32> to vector<17xf32>
    %278 = vector.shape_cast %277 : vector<17xf32> to vector<17x1xf32>
    %279 = vector.broadcast %278 : vector<17x1xf32> to vector<17x17xf32>
    %280 = arith.subf %276, %279 : vector<17x17xf32>
    %281 = math.exp %280 : vector<17x17xf32>
    %cst_94 = arith.constant dense<0.000000e+00> : vector<17xf32>
    %282 = vector.multi_reduction <add>, %281, %cst_94 [1] : vector<17x17xf32> to vector<17xf32>
    %283 = vector.shape_cast %282 : vector<17xf32> to vector<17x1xf32>
    %284 = tpu.reciprocal %283 {approx = true} : vector<17x1xf32> -> vector<17x1xf32>
    %285 = vector.broadcast %284 : vector<17x1xf32> to vector<17x17xf32>
    %286 = arith.mulf %281, %285 : vector<17x17xf32>
    %287 = arith.truncf %286 : vector<17x17xf32> to vector<17x17xbf16>
    %288 = arith.truncf %271 : vector<17x8xf32> to vector<17x8xbf16>
    %cst_95 = arith.constant dense<0.000000e+00> : vector<17x8xf32>
    %289 = tpu.matmul %287, %288, %cst_95 {dimension_numbers = #tpu.dot_dimension_numbers<[1], [0], [0], [1], [0, 0, 1, 1], [], []>} : vector<17x17xbf16>, vector<17x8xbf16>, vector<17x8xf32> -> vector<17x8xf32>
    %290 = vector.extract_strided_slice %226 {offsets = [0, 24], sizes = [17, 8], strides = [1, 1]} : vector<17x96xf32> to vector<17x8xf32>
    %291 = vector.extract_strided_slice %226 {offsets = [0, 56], sizes = [17, 8], strides = [1, 1]} : vector<17x96xf32> to vector<17x8xf32>
    %292 = vector.extract_strided_slice %226 {offsets = [0, 88], sizes = [17, 8], strides = [1, 1]} : vector<17x96xf32> to vector<17x8xf32>
    %293 = arith.truncf %290 : vector<17x8xf32> to vector<17x8xbf16>
    %294 = arith.truncf %291 : vector<17x8xf32> to vector<17x8xbf16>
    %cst_96 = arith.constant dense<0.000000e+00> : vector<17x17xf32>
    %295 = tpu.matmul %293, %294, %cst_96 {dimension_numbers = #tpu.dot_dimension_numbers<[1], [1], [0], [0], [0, 0, 1, 0], [], []>} : vector<17x8xbf16>, vector<17x8xbf16>, vector<17x17xf32> -> vector<17x17xf32>
    %cst_97 = arith.constant 0.353553385 : f32
    %296 = vector.broadcast %cst_97 : f32 to vector<17x17xf32>
    %297 = arith.mulf %295, %296 : vector<17x17xf32>
    %cst_98 = arith.constant dense<0xFF800000> : vector<17xf32>
    %298 = vector.multi_reduction <maximumf>, %297, %cst_98 [1] : vector<17x17xf32> to vector<17xf32>
    %299 = vector.shape_cast %298 : vector<17xf32> to vector<17x1xf32>
    %300 = vector.broadcast %299 : vector<17x1xf32> to vector<17x17xf32>
    %301 = arith.subf %297, %300 : vector<17x17xf32>
    %302 = math.exp %301 : vector<17x17xf32>
    %cst_99 = arith.constant dense<0.000000e+00> : vector<17xf32>
    %303 = vector.multi_reduction <add>, %302, %cst_99 [1] : vector<17x17xf32> to vector<17xf32>
    %304 = vector.shape_cast %303 : vector<17xf32> to vector<17x1xf32>
    %305 = tpu.reciprocal %304 {approx = true} : vector<17x1xf32> -> vector<17x1xf32>
    %306 = vector.broadcast %305 : vector<17x1xf32> to vector<17x17xf32>
    %307 = arith.mulf %302, %306 : vector<17x17xf32>
    %308 = arith.truncf %307 : vector<17x17xf32> to vector<17x17xbf16>
    %309 = arith.truncf %292 : vector<17x8xf32> to vector<17x8xbf16>
    %cst_100 = arith.constant dense<0.000000e+00> : vector<17x8xf32>
    %310 = tpu.matmul %308, %309, %cst_100 {dimension_numbers = #tpu.dot_dimension_numbers<[1], [0], [0], [1], [0, 0, 1, 1], [], []>} : vector<17x17xbf16>, vector<17x8xbf16>, vector<17x8xf32> -> vector<17x8xf32>
    %311 = tpu.concatenate %247, %268, %289, %310 in 1 : vector<17x8xf32>, vector<17x8xf32>, vector<17x8xf32>, vector<17x8xf32> -> vector<17x32xf32>
    %312 = arith.truncf %311 : vector<17x32xf32> to vector<17x32xbf16>
    %c240 = arith.constant 240 : index
    %c0_101 = arith.constant 0 : index
    %313 = vector.load %arg3[%c240, %c0_101] : memref<592x128xbf16, #tpu.memory_space<vmem>>, vector<32x32xbf16>
    %cst_102 = arith.constant dense<0.000000e+00> : vector<17x32xf32>
    %314 = tpu.matmul %312, %313, %cst_102 {dimension_numbers = #tpu.dot_dimension_numbers<[1], [0], [0], [1], [0, 0, 1, 1], [], []>} : vector<17x32xbf16>, vector<32x32xbf16>, vector<17x32xf32> -> vector<17x32xf32>
    %315 = arith.addf %196, %314 : vector<17x32xf32>
    %c96 = arith.constant 96 : index
    %c0_103 = arith.constant 0 : index
    %316 = vector.load %arg4[%c96, %c0_103] : memref<264x128xf32, #tpu.memory_space<vmem>>, vector<1x32xf32>
    %317 = vector.broadcast %316 : vector<1x32xf32> to vector<17x32xf32>
    %318 = arith.addf %315, %317 : vector<17x32xf32>
    %c104 = arith.constant 104 : index
    %c0_104 = arith.constant 0 : index
    %319 = vector.load %arg4[%c104, %c0_104] : memref<264x128xf32, #tpu.memory_space<vmem>>, vector<1x32xf32>
    %c112_105 = arith.constant 112 : index
    %c0_106 = arith.constant 0 : index
    %320 = vector.load %arg4[%c112_105, %c0_106] : memref<264x128xf32, #tpu.memory_space<vmem>>, vector<1x32xf32>
    %cst_107 = arith.constant dense<0.000000e+00> : vector<17xf32>
    %321 = vector.multi_reduction <add>, %318, %cst_107 [1] : vector<17x32xf32> to vector<17xf32>
    %322 = vector.shape_cast %321 : vector<17xf32> to vector<17x1xf32>
    %cst_108 = arith.constant 3.200000e+01 : f32
    %323 = vector.broadcast %cst_108 : f32 to vector<17x1xf32>
    %324 = arith.divf %322, %323 : vector<17x1xf32>
    %325 = vector.broadcast %324 : vector<17x1xf32> to vector<17x32xf32>
    %326 = arith.subf %318, %325 : vector<17x32xf32>
    %327 = arith.mulf %326, %326 : vector<17x32xf32>
    %cst_109 = arith.constant dense<0.000000e+00> : vector<17xf32>
    %328 = vector.multi_reduction <add>, %327, %cst_109 [1] : vector<17x32xf32> to vector<17xf32>
    %329 = vector.shape_cast %328 : vector<17xf32> to vector<17x1xf32>
    %cst_110 = arith.constant 3.200000e+01 : f32
    %330 = vector.broadcast %cst_110 : f32 to vector<17x1xf32>
    %331 = arith.divf %329, %330 : vector<17x1xf32>
    %332 = vector.broadcast %324 : vector<17x1xf32> to vector<17x32xf32>
    %333 = arith.subf %318, %332 : vector<17x32xf32>
    %cst_111 = arith.constant 9.99999974E-6 : f32
    %334 = vector.broadcast %cst_111 : f32 to vector<17x1xf32>
    %335 = arith.addf %331, %334 : vector<17x1xf32>
    %336 = math.rsqrt %335 : vector<17x1xf32>
    %337 = vector.broadcast %336 : vector<17x1xf32> to vector<17x32xf32>
    %338 = arith.mulf %333, %337 : vector<17x32xf32>
    %339 = vector.broadcast %319 : vector<1x32xf32> to vector<17x32xf32>
    %340 = arith.mulf %338, %339 : vector<17x32xf32>
    %341 = vector.broadcast %320 : vector<1x32xf32> to vector<17x32xf32>
    %342 = arith.addf %340, %341 : vector<17x32xf32>
    %343 = arith.truncf %342 : vector<17x32xf32> to vector<17x32xbf16>
    %c272 = arith.constant 272 : index
    %c0_112 = arith.constant 0 : index
    %344 = vector.load %arg3[%c272, %c0_112] : memref<592x128xbf16, #tpu.memory_space<vmem>>, vector<32x64xbf16>
    %cst_113 = arith.constant dense<0.000000e+00> : vector<17x64xf32>
    %345 = tpu.matmul %343, %344, %cst_113 {dimension_numbers = #tpu.dot_dimension_numbers<[1], [0], [0], [1], [0, 0, 1, 1], [], []>} : vector<17x32xbf16>, vector<32x64xbf16>, vector<17x64xf32> -> vector<17x64xf32>
    %c120 = arith.constant 120 : index
    %c0_114 = arith.constant 0 : index
    %346 = vector.load %arg4[%c120, %c0_114] : memref<264x128xf32, #tpu.memory_space<vmem>>, vector<1x64xf32>
    %347 = vector.broadcast %346 : vector<1x64xf32> to vector<17x64xf32>
    %348 = arith.addf %345, %347 : vector<17x64xf32>
    %349 = arith.mulf %348, %348 : vector<17x64xf32>
    %350 = arith.mulf %348, %349 : vector<17x64xf32>
    %cst_115 = arith.constant 4.471500e-02 : f32
    %351 = vector.broadcast %cst_115 : f32 to vector<17x64xf32>
    %352 = arith.mulf %351, %350 : vector<17x64xf32>
    %353 = arith.addf %348, %352 : vector<17x64xf32>
    %cst_116 = arith.constant 0.797884583 : f32
    %354 = vector.broadcast %cst_116 : f32 to vector<17x64xf32>
    %355 = arith.mulf %354, %353 : vector<17x64xf32>
    %356 = math.tanh %355 : vector<17x64xf32>
    %cst_117 = arith.constant 1.000000e+00 : f32
    %357 = vector.broadcast %cst_117 : f32 to vector<17x64xf32>
    %358 = arith.addf %357, %356 : vector<17x64xf32>
    %cst_118 = arith.constant 5.000000e-01 : f32
    %359 = vector.broadcast %cst_118 : f32 to vector<17x64xf32>
    %360 = arith.mulf %359, %358 : vector<17x64xf32>
    %361 = arith.mulf %348, %360 : vector<17x64xf32>
    %362 = arith.truncf %361 : vector<17x64xf32> to vector<17x64xbf16>
    %c304 = arith.constant 304 : index
    %c0_119 = arith.constant 0 : index
    %363 = vector.load %arg3[%c304, %c0_119] : memref<592x128xbf16, #tpu.memory_space<vmem>>, vector<64x32xbf16>
    %cst_120 = arith.constant dense<0.000000e+00> : vector<17x32xf32>
    %364 = tpu.matmul %362, %363, %cst_120 {dimension_numbers = #tpu.dot_dimension_numbers<[1], [0], [0], [1], [0, 0, 1, 1], [], []>} : vector<17x64xbf16>, vector<64x32xbf16>, vector<17x32xf32> -> vector<17x32xf32>
    %365 = arith.addf %318, %364 : vector<17x32xf32>
    %c128 = arith.constant 128 : index
    %c0_121 = arith.constant 0 : index
    %366 = vector.load %arg4[%c128, %c0_121] : memref<264x128xf32, #tpu.memory_space<vmem>>, vector<1x32xf32>
    %367 = vector.broadcast %366 : vector<1x32xf32> to vector<17x32xf32>
    %368 = arith.addf %365, %367 : vector<17x32xf32>
    %c240_122 = arith.constant 240 : index
    %c0_123 = arith.constant 0 : index
    %369 = vector.load %arg4[%c240_122, %c0_123] : memref<264x128xf32, #tpu.memory_space<vmem>>, vector<1x32xf32>
    %c248 = arith.constant 248 : index
    %c0_124 = arith.constant 0 : index
    %370 = vector.load %arg4[%c248, %c0_124] : memref<264x128xf32, #tpu.memory_space<vmem>>, vector<1x32xf32>
    %cst_125 = arith.constant dense<0.000000e+00> : vector<17xf32>
    %371 = vector.multi_reduction <add>, %368, %cst_125 [1] : vector<17x32xf32> to vector<17xf32>
    %372 = vector.shape_cast %371 : vector<17xf32> to vector<17x1xf32>
    %cst_126 = arith.constant 3.200000e+01 : f32
    %373 = vector.broadcast %cst_126 : f32 to vector<17x1xf32>
    %374 = arith.divf %372, %373 : vector<17x1xf32>
    %375 = vector.broadcast %374 : vector<17x1xf32> to vector<17x32xf32>
    %376 = arith.subf %368, %375 : vector<17x32xf32>
    %377 = arith.mulf %376, %376 : vector<17x32xf32>
    %cst_127 = arith.constant dense<0.000000e+00> : vector<17xf32>
    %378 = vector.multi_reduction <add>, %377, %cst_127 [1] : vector<17x32xf32> to vector<17xf32>
    %379 = vector.shape_cast %378 : vector<17xf32> to vector<17x1xf32>
    %cst_128 = arith.constant 3.200000e+01 : f32
    %380 = vector.broadcast %cst_128 : f32 to vector<17x1xf32>
    %381 = arith.divf %379, %380 : vector<17x1xf32>
    %382 = vector.broadcast %374 : vector<17x1xf32> to vector<17x32xf32>
    %383 = arith.subf %368, %382 : vector<17x32xf32>
    %cst_129 = arith.constant 9.99999974E-6 : f32
    %384 = vector.broadcast %cst_129 : f32 to vector<17x1xf32>
    %385 = arith.addf %381, %384 : vector<17x1xf32>
    %386 = math.rsqrt %385 : vector<17x1xf32>
    %387 = vector.broadcast %386 : vector<17x1xf32> to vector<17x32xf32>
    %388 = arith.mulf %383, %387 : vector<17x32xf32>
    %389 = vector.broadcast %369 : vector<1x32xf32> to vector<17x32xf32>
    %390 = arith.mulf %388, %389 : vector<17x32xf32>
    %391 = vector.broadcast %370 : vector<1x32xf32> to vector<17x32xf32>
    %392 = arith.addf %390, %391 : vector<17x32xf32>
    %393 = arith.truncf %392 : vector<17x32xf32> to vector<17x32xbf16>
    %c560 = arith.constant 560 : index
    %c0_130 = arith.constant 0 : index
    %394 = vector.load %arg3[%c560, %c0_130] : memref<592x128xbf16, #tpu.memory_space<vmem>>, vector<32x128xbf16>
    %cst_131 = arith.constant dense<0.000000e+00> : vector<17x128xf32>
    %395 = tpu.matmul %393, %394, %cst_131 {dimension_numbers = #tpu.dot_dimension_numbers<[1], [0], [0], [1], [0, 0, 1, 1], [], []>} : vector<17x32xbf16>, vector<32x128xbf16>, vector<17x128xf32> -> vector<17x128xf32>
    %c256 = arith.constant 256 : index
    %c0_132 = arith.constant 0 : index
    %396 = vector.load %arg4[%c256, %c0_132] : memref<264x128xf32, #tpu.memory_space<vmem>>, vector<1x128xf32>
    %397 = vector.broadcast %396 : vector<1x128xf32> to vector<17x128xf32>
    %398 = arith.addf %395, %397 : vector<17x128xf32>
    %399 = vector.extract_strided_slice %398 {offsets = [1, 0], sizes = [16, 128], strides = [1, 1]} : vector<17x128xf32> to vector<16x128xf32>
    %c0_133 = arith.constant 0 : index
    %c0_134 = arith.constant 0 : index
    %c0_135 = arith.constant 0 : index
    %c0_136 = arith.constant 0 : index
    %400 = vector.load %arg5[%c0_133, %c0_134, %c0_135, %c0_136] : memref<2x2x16x128xf32, #tpu.memory_space<vmem>>, vector<1x1x16x128xf32>
    %401 = vector.shape_cast %400 : vector<1x1x16x128xf32> to vector<16x128xf32>
    %402 = vector.shape_cast %399 : vector<16x128xf32> to vector<1x1x16x128xf32>
    tpu.vector_store %arg5[%c0_133, %c0_134, %c0_135, %c0_136], %402 {strides = array<i32>} : memref<2x2x16x128xf32, #tpu.memory_space<vmem>>, vector<1x1x16x128xf32>,
    %c136 = arith.constant 136 : index
    %c0_137 = arith.constant 0 : index
    %403 = vector.load %arg4[%c136, %c0_137] : memref<264x128xf32, #tpu.memory_space<vmem>>, vector<1x32xf32>
    %c144_138 = arith.constant 144 : index
    %c0_139 = arith.constant 0 : index
    %404 = vector.load %arg4[%c144_138, %c0_139] : memref<264x128xf32, #tpu.memory_space<vmem>>, vector<1x32xf32>
    %cst_140 = arith.constant dense<0.000000e+00> : vector<17xf32>
    %405 = vector.multi_reduction <add>, %368, %cst_140 [1] : vector<17x32xf32> to vector<17xf32>
    %406 = vector.shape_cast %405 : vector<17xf32> to vector<17x1xf32>
    %cst_141 = arith.constant 3.200000e+01 : f32
    %407 = vector.broadcast %cst_141 : f32 to vector<17x1xf32>
    %408 = arith.divf %406, %407 : vector<17x1xf32>
    %409 = vector.broadcast %408 : vector<17x1xf32> to vector<17x32xf32>
    %410 = arith.subf %368, %409 : vector<17x32xf32>
    %411 = arith.mulf %410, %410 : vector<17x32xf32>
    %cst_142 = arith.constant dense<0.000000e+00> : vector<17xf32>
    %412 = vector.multi_reduction <add>, %411, %cst_142 [1] : vector<17x32xf32> to vector<17xf32>
    %413 = vector.shape_cast %412 : vector<17xf32> to vector<17x1xf32>
    %cst_143 = arith.constant 3.200000e+01 : f32
    %414 = vector.broadcast %cst_143 : f32 to vector<17x1xf32>
    %415 = arith.divf %413, %414 : vector<17x1xf32>
    %416 = vector.broadcast %408 : vector<17x1xf32> to vector<17x32xf32>
    %417 = arith.subf %368, %416 : vector<17x32xf32>
    %cst_144 = arith.constant 9.99999974E-6 : f32
    %418 = vector.broadcast %cst_144 : f32 to vector<17x1xf32>
    %419 = arith.addf %415, %418 : vector<17x1xf32>
    %420 = math.rsqrt %419 : vector<17x1xf32>
    %421 = vector.broadcast %420 : vector<17x1xf32> to vector<17x32xf32>
    %422 = arith.mulf %417, %421 : vector<17x32xf32>
    %423 = vector.broadcast %403 : vector<1x32xf32> to vector<17x32xf32>
    %424 = arith.mulf %422, %423 : vector<17x32xf32>
    %425 = vector.broadcast %404 : vector<1x32xf32> to vector<17x32xf32>
    %426 = arith.addf %424, %425 : vector<17x32xf32>
    %427 = arith.truncf %426 : vector<17x32xf32> to vector<17x32xbf16>
    %c368 = arith.constant 368 : index
    %c0_145 = arith.constant 0 : index
    %428 = vector.load %arg3[%c368, %c0_145] : memref<592x128xbf16, #tpu.memory_space<vmem>>, vector<32x96xbf16>
    %cst_146 = arith.constant dense<0.000000e+00> : vector<17x96xf32>
    %429 = tpu.matmul %427, %428, %cst_146 {dimension_numbers = #tpu.dot_dimension_numbers<[1], [0], [0], [1], [0, 0, 1, 1], [], []>} : vector<17x32xbf16>, vector<32x96xbf16>, vector<17x96xf32> -> vector<17x96xf32>
    %c152 = arith.constant 152 : index
    %c0_147 = arith.constant 0 : index
    %430 = vector.load %arg4[%c152, %c0_147] : memref<264x128xf32, #tpu.memory_space<vmem>>, vector<1x96xf32>
    %431 = vector.broadcast %430 : vector<1x96xf32> to vector<17x96xf32>
    %432 = arith.addf %429, %431 : vector<17x96xf32>
    %433 = vector.extract_strided_slice %432 {offsets = [0, 0], sizes = [17, 8], strides = [1, 1]} : vector<17x96xf32> to vector<17x8xf32>
    %434 = vector.extract_strided_slice %432 {offsets = [0, 32], sizes = [17, 8], strides = [1, 1]} : vector<17x96xf32> to vector<17x8xf32>
    %435 = vector.extract_strided_slice %432 {offsets = [0, 64], sizes = [17, 8], strides = [1, 1]} : vector<17x96xf32> to vector<17x8xf32>
    %436 = arith.truncf %433 : vector<17x8xf32> to vector<17x8xbf16>
    %437 = arith.truncf %434 : vector<17x8xf32> to vector<17x8xbf16>
    %cst_148 = arith.constant dense<0.000000e+00> : vector<17x17xf32>
    %438 = tpu.matmul %436, %437, %cst_148 {dimension_numbers = #tpu.dot_dimension_numbers<[1], [1], [0], [0], [0, 0, 1, 0], [], []>} : vector<17x8xbf16>, vector<17x8xbf16>, vector<17x17xf32> -> vector<17x17xf32>
    %cst_149 = arith.constant 0.353553385 : f32
    %439 = vector.broadcast %cst_149 : f32 to vector<17x17xf32>
    %440 = arith.mulf %438, %439 : vector<17x17xf32>
    %cst_150 = arith.constant dense<0xFF800000> : vector<17xf32>
    %441 = vector.multi_reduction <maximumf>, %440, %cst_150 [1] : vector<17x17xf32> to vector<17xf32>
    %442 = vector.shape_cast %441 : vector<17xf32> to vector<17x1xf32>
    %443 = vector.broadcast %442 : vector<17x1xf32> to vector<17x17xf32>
    %444 = arith.subf %440, %443 : vector<17x17xf32>
    %445 = math.exp %444 : vector<17x17xf32>
    %cst_151 = arith.constant dense<0.000000e+00> : vector<17xf32>
    %446 = vector.multi_reduction <add>, %445, %cst_151 [1] : vector<17x17xf32> to vector<17xf32>
    %447 = vector.shape_cast %446 : vector<17xf32> to vector<17x1xf32>
    %448 = tpu.reciprocal %447 {approx = true} : vector<17x1xf32> -> vector<17x1xf32>
    %449 = vector.broadcast %448 : vector<17x1xf32> to vector<17x17xf32>
    %450 = arith.mulf %445, %449 : vector<17x17xf32>
    %451 = arith.truncf %450 : vector<17x17xf32> to vector<17x17xbf16>
    %452 = arith.truncf %435 : vector<17x8xf32> to vector<17x8xbf16>
    %cst_152 = arith.constant dense<0.000000e+00> : vector<17x8xf32>
    %453 = tpu.matmul %451, %452, %cst_152 {dimension_numbers = #tpu.dot_dimension_numbers<[1], [0], [0], [1], [0, 0, 1, 1], [], []>} : vector<17x17xbf16>, vector<17x8xbf16>, vector<17x8xf32> -> vector<17x8xf32>
    %454 = vector.extract_strided_slice %432 {offsets = [0, 8], sizes = [17, 8], strides = [1, 1]} : vector<17x96xf32> to vector<17x8xf32>
    %455 = vector.extract_strided_slice %432 {offsets = [0, 40], sizes = [17, 8], strides = [1, 1]} : vector<17x96xf32> to vector<17x8xf32>
    %456 = vector.extract_strided_slice %432 {offsets = [0, 72], sizes = [17, 8], strides = [1, 1]} : vector<17x96xf32> to vector<17x8xf32>
    %457 = arith.truncf %454 : vector<17x8xf32> to vector<17x8xbf16>
    %458 = arith.truncf %455 : vector<17x8xf32> to vector<17x8xbf16>
    %cst_153 = arith.constant dense<0.000000e+00> : vector<17x17xf32>
    %459 = tpu.matmul %457, %458, %cst_153 {dimension_numbers = #tpu.dot_dimension_numbers<[1], [1], [0], [0], [0, 0, 1, 0], [], []>} : vector<17x8xbf16>, vector<17x8xbf16>, vector<17x17xf32> -> vector<17x17xf32>
    %cst_154 = arith.constant 0.353553385 : f32
    %460 = vector.broadcast %cst_154 : f32 to vector<17x17xf32>
    %461 = arith.mulf %459, %460 : vector<17x17xf32>
    %cst_155 = arith.constant dense<0xFF800000> : vector<17xf32>
    %462 = vector.multi_reduction <maximumf>, %461, %cst_155 [1] : vector<17x17xf32> to vector<17xf32>
    %463 = vector.shape_cast %462 : vector<17xf32> to vector<17x1xf32>
    %464 = vector.broadcast %463 : vector<17x1xf32> to vector<17x17xf32>
    %465 = arith.subf %461, %464 : vector<17x17xf32>
    %466 = math.exp %465 : vector<17x17xf32>
    %cst_156 = arith.constant dense<0.000000e+00> : vector<17xf32>
    %467 = vector.multi_reduction <add>, %466, %cst_156 [1] : vector<17x17xf32> to vector<17xf32>
    %468 = vector.shape_cast %467 : vector<17xf32> to vector<17x1xf32>
    %469 = tpu.reciprocal %468 {approx = true} : vector<17x1xf32> -> vector<17x1xf32>
    %470 = vector.broadcast %469 : vector<17x1xf32> to vector<17x17xf32>
    %471 = arith.mulf %466, %470 : vector<17x17xf32>
    %472 = arith.truncf %471 : vector<17x17xf32> to vector<17x17xbf16>
    %473 = arith.truncf %456 : vector<17x8xf32> to vector<17x8xbf16>
    %cst_157 = arith.constant dense<0.000000e+00> : vector<17x8xf32>
    %474 = tpu.matmul %472, %473, %cst_157 {dimension_numbers = #tpu.dot_dimension_numbers<[1], [0], [0], [1], [0, 0, 1, 1], [], []>} : vector<17x17xbf16>, vector<17x8xbf16>, vector<17x8xf32> -> vector<17x8xf32>
    %475 = vector.extract_strided_slice %432 {offsets = [0, 16], sizes = [17, 8], strides = [1, 1]} : vector<17x96xf32> to vector<17x8xf32>
    %476 = vector.extract_strided_slice %432 {offsets = [0, 48], sizes = [17, 8], strides = [1, 1]} : vector<17x96xf32> to vector<17x8xf32>
    %477 = vector.extract_strided_slice %432 {offsets = [0, 80], sizes = [17, 8], strides = [1, 1]} : vector<17x96xf32> to vector<17x8xf32>
    %478 = arith.truncf %475 : vector<17x8xf32> to vector<17x8xbf16>
    %479 = arith.truncf %476 : vector<17x8xf32> to vector<17x8xbf16>
    %cst_158 = arith.constant dense<0.000000e+00> : vector<17x17xf32>
    %480 = tpu.matmul %478, %479, %cst_158 {dimension_numbers = #tpu.dot_dimension_numbers<[1], [1], [0], [0], [0, 0, 1, 0], [], []>} : vector<17x8xbf16>, vector<17x8xbf16>, vector<17x17xf32> -> vector<17x17xf32>
    %cst_159 = arith.constant 0.353553385 : f32
    %481 = vector.broadcast %cst_159 : f32 to vector<17x17xf32>
    %482 = arith.mulf %480, %481 : vector<17x17xf32>
    %cst_160 = arith.constant dense<0xFF800000> : vector<17xf32>
    %483 = vector.multi_reduction <maximumf>, %482, %cst_160 [1] : vector<17x17xf32> to vector<17xf32>
    %484 = vector.shape_cast %483 : vector<17xf32> to vector<17x1xf32>
    %485 = vector.broadcast %484 : vector<17x1xf32> to vector<17x17xf32>
    %486 = arith.subf %482, %485 : vector<17x17xf32>
    %487 = math.exp %486 : vector<17x17xf32>
    %cst_161 = arith.constant dense<0.000000e+00> : vector<17xf32>
    %488 = vector.multi_reduction <add>, %487, %cst_161 [1] : vector<17x17xf32> to vector<17xf32>
    %489 = vector.shape_cast %488 : vector<17xf32> to vector<17x1xf32>
    %490 = tpu.reciprocal %489 {approx = true} : vector<17x1xf32> -> vector<17x1xf32>
    %491 = vector.broadcast %490 : vector<17x1xf32> to vector<17x17xf32>
    %492 = arith.mulf %487, %491 : vector<17x17xf32>
    %493 = arith.truncf %492 : vector<17x17xf32> to vector<17x17xbf16>
    %494 = arith.truncf %477 : vector<17x8xf32> to vector<17x8xbf16>
    %cst_162 = arith.constant dense<0.000000e+00> : vector<17x8xf32>
    %495 = tpu.matmul %493, %494, %cst_162 {dimension_numbers = #tpu.dot_dimension_numbers<[1], [0], [0], [1], [0, 0, 1, 1], [], []>} : vector<17x17xbf16>, vector<17x8xbf16>, vector<17x8xf32> -> vector<17x8xf32>
    %496 = vector.extract_strided_slice %432 {offsets = [0, 24], sizes = [17, 8], strides = [1, 1]} : vector<17x96xf32> to vector<17x8xf32>
    %497 = vector.extract_strided_slice %432 {offsets = [0, 56], sizes = [17, 8], strides = [1, 1]} : vector<17x96xf32> to vector<17x8xf32>
    %498 = vector.extract_strided_slice %432 {offsets = [0, 88], sizes = [17, 8], strides = [1, 1]} : vector<17x96xf32> to vector<17x8xf32>
    %499 = arith.truncf %496 : vector<17x8xf32> to vector<17x8xbf16>
    %500 = arith.truncf %497 : vector<17x8xf32> to vector<17x8xbf16>
    %cst_163 = arith.constant dense<0.000000e+00> : vector<17x17xf32>
    %501 = tpu.matmul %499, %500, %cst_163 {dimension_numbers = #tpu.dot_dimension_numbers<[1], [1], [0], [0], [0, 0, 1, 0], [], []>} : vector<17x8xbf16>, vector<17x8xbf16>, vector<17x17xf32> -> vector<17x17xf32>
    %cst_164 = arith.constant 0.353553385 : f32
    %502 = vector.broadcast %cst_164 : f32 to vector<17x17xf32>
    %503 = arith.mulf %501, %502 : vector<17x17xf32>
    %cst_165 = arith.constant dense<0xFF800000> : vector<17xf32>
    %504 = vector.multi_reduction <maximumf>, %503, %cst_165 [1] : vector<17x17xf32> to vector<17xf32>
    %505 = vector.shape_cast %504 : vector<17xf32> to vector<17x1xf32>
    %506 = vector.broadcast %505 : vector<17x1xf32> to vector<17x17xf32>
    %507 = arith.subf %503, %506 : vector<17x17xf32>
    %508 = math.exp %507 : vector<17x17xf32>
    %cst_166 = arith.constant dense<0.000000e+00> : vector<17xf32>
    %509 = vector.multi_reduction <add>, %508, %cst_166 [1] : vector<17x17xf32> to vector<17xf32>
    %510 = vector.shape_cast %509 : vector<17xf32> to vector<17x1xf32>
    %511 = tpu.reciprocal %510 {approx = true} : vector<17x1xf32> -> vector<17x1xf32>
    %512 = vector.broadcast %511 : vector<17x1xf32> to vector<17x17xf32>
    %513 = arith.mulf %508, %512 : vector<17x17xf32>
    %514 = arith.truncf %513 : vector<17x17xf32> to vector<17x17xbf16>
    %515 = arith.truncf %498 : vector<17x8xf32> to vector<17x8xbf16>
    %cst_167 = arith.constant dense<0.000000e+00> : vector<17x8xf32>
    %516 = tpu.matmul %514, %515, %cst_167 {dimension_numbers = #tpu.dot_dimension_numbers<[1], [0], [0], [1], [0, 0, 1, 1], [], []>} : vector<17x17xbf16>, vector<17x8xbf16>, vector<17x8xf32> -> vector<17x8xf32>
    %517 = tpu.concatenate %453, %474, %495, %516 in 1 : vector<17x8xf32>, vector<17x8xf32>, vector<17x8xf32>, vector<17x8xf32> -> vector<17x32xf32>
    %518 = arith.truncf %517 : vector<17x32xf32> to vector<17x32xbf16>
    %c400 = arith.constant 400 : index
    %c0_168 = arith.constant 0 : index
    %519 = vector.load %arg3[%c400, %c0_168] : memref<592x128xbf16, #tpu.memory_space<vmem>>, vector<32x32xbf16>
    %cst_169 = arith.constant dense<0.000000e+00> : vector<17x32xf32>
    %520 = tpu.matmul %518, %519, %cst_169 {dimension_numbers = #tpu.dot_dimension_numbers<[1], [0], [0], [1], [0, 0, 1, 1], [], []>} : vector<17x32xbf16>, vector<32x32xbf16>, vector<17x32xf32> -> vector<17x32xf32>
    %521 = arith.addf %368, %520 : vector<17x32xf32>
    %c160 = arith.constant 160 : index
    %c0_170 = arith.constant 0 : index
    %522 = vector.load %arg4[%c160, %c0_170] : memref<264x128xf32, #tpu.memory_space<vmem>>, vector<1x32xf32>
    %523 = vector.broadcast %522 : vector<1x32xf32> to vector<17x32xf32>
    %524 = arith.addf %521, %523 : vector<17x32xf32>
    %c168 = arith.constant 168 : index
    %c0_171 = arith.constant 0 : index
    %525 = vector.load %arg4[%c168, %c0_171] : memref<264x128xf32, #tpu.memory_space<vmem>>, vector<1x32xf32>
    %c176 = arith.constant 176 : index
    %c0_172 = arith.constant 0 : index
    %526 = vector.load %arg4[%c176, %c0_172] : memref<264x128xf32, #tpu.memory_space<vmem>>, vector<1x32xf32>
    %cst_173 = arith.constant dense<0.000000e+00> : vector<17xf32>
    %527 = vector.multi_reduction <add>, %524, %cst_173 [1] : vector<17x32xf32> to vector<17xf32>
    %528 = vector.shape_cast %527 : vector<17xf32> to vector<17x1xf32>
    %cst_174 = arith.constant 3.200000e+01 : f32
    %529 = vector.broadcast %cst_174 : f32 to vector<17x1xf32>
    %530 = arith.divf %528, %529 : vector<17x1xf32>
    %531 = vector.broadcast %530 : vector<17x1xf32> to vector<17x32xf32>
    %532 = arith.subf %524, %531 : vector<17x32xf32>
    %533 = arith.mulf %532, %532 : vector<17x32xf32>
    %cst_175 = arith.constant dense<0.000000e+00> : vector<17xf32>
    %534 = vector.multi_reduction <add>, %533, %cst_175 [1] : vector<17x32xf32> to vector<17xf32>
    %535 = vector.shape_cast %534 : vector<17xf32> to vector<17x1xf32>
    %cst_176 = arith.constant 3.200000e+01 : f32
    %536 = vector.broadcast %cst_176 : f32 to vector<17x1xf32>
    %537 = arith.divf %535, %536 : vector<17x1xf32>
    %538 = vector.broadcast %530 : vector<17x1xf32> to vector<17x32xf32>
    %539 = arith.subf %524, %538 : vector<17x32xf32>
    %cst_177 = arith.constant 9.99999974E-6 : f32
    %540 = vector.broadcast %cst_177 : f32 to vector<17x1xf32>
    %541 = arith.addf %537, %540 : vector<17x1xf32>
    %542 = math.rsqrt %541 : vector<17x1xf32>
    %543 = vector.broadcast %542 : vector<17x1xf32> to vector<17x32xf32>
    %544 = arith.mulf %539, %543 : vector<17x32xf32>
    %545 = vector.broadcast %525 : vector<1x32xf32> to vector<17x32xf32>
    %546 = arith.mulf %544, %545 : vector<17x32xf32>
    %547 = vector.broadcast %526 : vector<1x32xf32> to vector<17x32xf32>
    %548 = arith.addf %546, %547 : vector<17x32xf32>
    %549 = arith.truncf %548 : vector<17x32xf32> to vector<17x32xbf16>
    %c432 = arith.constant 432 : index
    %c0_178 = arith.constant 0 : index
    %550 = vector.load %arg3[%c432, %c0_178] : memref<592x128xbf16, #tpu.memory_space<vmem>>, vector<32x64xbf16>
    %cst_179 = arith.constant dense<0.000000e+00> : vector<17x64xf32>
    %551 = tpu.matmul %549, %550, %cst_179 {dimension_numbers = #tpu.dot_dimension_numbers<[1], [0], [0], [1], [0, 0, 1, 1], [], []>} : vector<17x32xbf16>, vector<32x64xbf16>, vector<17x64xf32> -> vector<17x64xf32>
    %c184 = arith.constant 184 : index
    %c0_180 = arith.constant 0 : index
    %552 = vector.load %arg4[%c184, %c0_180] : memref<264x128xf32, #tpu.memory_space<vmem>>, vector<1x64xf32>
    %553 = vector.broadcast %552 : vector<1x64xf32> to vector<17x64xf32>
    %554 = arith.addf %551, %553 : vector<17x64xf32>
    %555 = arith.mulf %554, %554 : vector<17x64xf32>
    %556 = arith.mulf %554, %555 : vector<17x64xf32>
    %cst_181 = arith.constant 4.471500e-02 : f32
    %557 = vector.broadcast %cst_181 : f32 to vector<17x64xf32>
    %558 = arith.mulf %557, %556 : vector<17x64xf32>
    %559 = arith.addf %554, %558 : vector<17x64xf32>
    %cst_182 = arith.constant 0.797884583 : f32
    %560 = vector.broadcast %cst_182 : f32 to vector<17x64xf32>
    %561 = arith.mulf %560, %559 : vector<17x64xf32>
    %562 = math.tanh %561 : vector<17x64xf32>
    %cst_183 = arith.constant 1.000000e+00 : f32
    %563 = vector.broadcast %cst_183 : f32 to vector<17x64xf32>
    %564 = arith.addf %563, %562 : vector<17x64xf32>
    %cst_184 = arith.constant 5.000000e-01 : f32
    %565 = vector.broadcast %cst_184 : f32 to vector<17x64xf32>
    %566 = arith.mulf %565, %564 : vector<17x64xf32>
    %567 = arith.mulf %554, %566 : vector<17x64xf32>
    %568 = arith.truncf %567 : vector<17x64xf32> to vector<17x64xbf16>
    %c464 = arith.constant 464 : index
    %c0_185 = arith.constant 0 : index
    %569 = vector.load %arg3[%c464, %c0_185] : memref<592x128xbf16, #tpu.memory_space<vmem>>, vector<64x32xbf16>
    %cst_186 = arith.constant dense<0.000000e+00> : vector<17x32xf32>
    %570 = tpu.matmul %568, %569, %cst_186 {dimension_numbers = #tpu.dot_dimension_numbers<[1], [0], [0], [1], [0, 0, 1, 1], [], []>} : vector<17x64xbf16>, vector<64x32xbf16>, vector<17x32xf32> -> vector<17x32xf32>
    %571 = arith.addf %524, %570 : vector<17x32xf32>
    %c192 = arith.constant 192 : index
    %c0_187 = arith.constant 0 : index
    %572 = vector.load %arg4[%c192, %c0_187] : memref<264x128xf32, #tpu.memory_space<vmem>>, vector<1x32xf32>
    %573 = vector.broadcast %572 : vector<1x32xf32> to vector<17x32xf32>
    %574 = arith.addf %571, %573 : vector<17x32xf32>
    %c240_188 = arith.constant 240 : index
    %c0_189 = arith.constant 0 : index
    %575 = vector.load %arg4[%c240_188, %c0_189] : memref<264x128xf32, #tpu.memory_space<vmem>>, vector<1x32xf32>
    %c248_190 = arith.constant 248 : index
    %c0_191 = arith.constant 0 : index
    %576 = vector.load %arg4[%c248_190, %c0_191] : memref<264x128xf32, #tpu.memory_space<vmem>>, vector<1x32xf32>
    %cst_192 = arith.constant dense<0.000000e+00> : vector<17xf32>
    %577 = vector.multi_reduction <add>, %574, %cst_192 [1] : vector<17x32xf32> to vector<17xf32>
    %578 = vector.shape_cast %577 : vector<17xf32> to vector<17x1xf32>
    %cst_193 = arith.constant 3.200000e+01 : f32
    %579 = vector.broadcast %cst_193 : f32 to vector<17x1xf32>
    %580 = arith.divf %578, %579 : vector<17x1xf32>
    %581 = vector.broadcast %580 : vector<17x1xf32> to vector<17x32xf32>
    %582 = arith.subf %574, %581 : vector<17x32xf32>
    %583 = arith.mulf %582, %582 : vector<17x32xf32>
    %cst_194 = arith.constant dense<0.000000e+00> : vector<17xf32>
    %584 = vector.multi_reduction <add>, %583, %cst_194 [1] : vector<17x32xf32> to vector<17xf32>
    %585 = vector.shape_cast %584 : vector<17xf32> to vector<17x1xf32>
    %cst_195 = arith.constant 3.200000e+01 : f32
    %586 = vector.broadcast %cst_195 : f32 to vector<17x1xf32>
    %587 = arith.divf %585, %586 : vector<17x1xf32>
    %588 = vector.broadcast %580 : vector<17x1xf32> to vector<17x32xf32>
    %589 = arith.subf %574, %588 : vector<17x32xf32>
    %cst_196 = arith.constant 9.99999974E-6 : f32
    %590 = vector.broadcast %cst_196 : f32 to vector<17x1xf32>
    %591 = arith.addf %587, %590 : vector<17x1xf32>
    %592 = math.rsqrt %591 : vector<17x1xf32>
    %593 = vector.broadcast %592 : vector<17x1xf32> to vector<17x32xf32>
    %594 = arith.mulf %589, %593 : vector<17x32xf32>
    %595 = vector.broadcast %575 : vector<1x32xf32> to vector<17x32xf32>
    %596 = arith.mulf %594, %595 : vector<17x32xf32>
    %597 = vector.broadcast %576 : vector<1x32xf32> to vector<17x32xf32>
    %598 = arith.addf %596, %597 : vector<17x32xf32>
    %599 = arith.truncf %598 : vector<17x32xf32> to vector<17x32xbf16>
    %c560_197 = arith.constant 560 : index
    %c0_198 = arith.constant 0 : index
    %600 = vector.load %arg3[%c560_197, %c0_198] : memref<592x128xbf16, #tpu.memory_space<vmem>>, vector<32x128xbf16>
    %cst_199 = arith.constant dense<0.000000e+00> : vector<17x128xf32>
    %601 = tpu.matmul %599, %600, %cst_199 {dimension_numbers = #tpu.dot_dimension_numbers<[1], [0], [0], [1], [0, 0, 1, 1], [], []>} : vector<17x32xbf16>, vector<32x128xbf16>, vector<17x128xf32> -> vector<17x128xf32>
    %c256_200 = arith.constant 256 : index
    %c0_201 = arith.constant 0 : index
    %602 = vector.load %arg4[%c256_200, %c0_201] : memref<264x128xf32, #tpu.memory_space<vmem>>, vector<1x128xf32>
    %603 = vector.broadcast %602 : vector<1x128xf32> to vector<17x128xf32>
    %604 = arith.addf %601, %603 : vector<17x128xf32>
    %605 = vector.extract_strided_slice %604 {offsets = [1, 0], sizes = [16, 128], strides = [1, 1]} : vector<17x128xf32> to vector<16x128xf32>
    %c0_202 = arith.constant 0 : index
    %c1 = arith.constant 1 : index
    %c0_203 = arith.constant 0 : index
    %c0_204 = arith.constant 0 : index
    %606 = vector.load %arg5[%c0_202, %c1, %c0_203, %c0_204] : memref<2x2x16x128xf32, #tpu.memory_space<vmem>>, vector<1x1x16x128xf32>
    %607 = vector.shape_cast %606 : vector<1x1x16x128xf32> to vector<16x128xf32>
    %608 = vector.shape_cast %605 : vector<16x128xf32> to vector<1x1x16x128xf32>
    tpu.vector_store %arg5[%c0_202, %c1, %c0_203, %c0_204], %608 {strides = array<i32>} : memref<2x2x16x128xf32, #tpu.memory_space<vmem>>, vector<1x1x16x128xf32>,
    %c1_205 = arith.constant 1 : index
    %c0_206 = arith.constant 0 : index
    %c0_207 = arith.constant 0 : index
    %609 = vector.load %arg0[%c1_205, %c0_206, %c0_207] : memref<2x4x48xf32, #tpu.memory_space<vmem>>, vector<1x4x48xf32>
    %610 = vector.shape_cast %609 : vector<1x4x48xf32> to vector<4x48xf32>
    %611 = arith.truncf %610 : vector<4x48xf32> to vector<4x48xbf16>
    %c0_208 = arith.constant 0 : index
    %c0_209 = arith.constant 0 : index
    %612 = vector.load %arg3[%c0_208, %c0_209] : memref<592x128xbf16, #tpu.memory_space<vmem>>, vector<48x32xbf16>
    %cst_210 = arith.constant dense<0.000000e+00> : vector<4x32xf32>
    %613 = tpu.matmul %611, %612, %cst_210 {dimension_numbers = #tpu.dot_dimension_numbers<[1], [0], [0], [1], [0, 0, 1, 1], [], []>} : vector<4x48xbf16>, vector<48x32xbf16>, vector<4x32xf32> -> vector<4x32xf32>
    %c0_211 = arith.constant 0 : index
    %c0_212 = arith.constant 0 : index
    %614 = vector.load %arg4[%c0_211, %c0_212] : memref<264x128xf32, #tpu.memory_space<vmem>>, vector<1x32xf32>
    %615 = vector.broadcast %614 : vector<1x32xf32> to vector<4x32xf32>
    %616 = arith.addf %613, %615 : vector<4x32xf32>
    %c1_213 = arith.constant 1 : index
    %c0_214 = arith.constant 0 : index
    %c0_215 = arith.constant 0 : index
    %617 = vector.load %arg1[%c1_213, %c0_214, %c0_215] : memref<2x4x32xf32, #tpu.memory_space<vmem>>, vector<1x4x32xf32>
    %618 = vector.shape_cast %617 : vector<1x4x32xf32> to vector<4x32xf32>
    %619 = arith.addf %616, %618 : vector<4x32xf32>
    %c8_216 = arith.constant 8 : index
    %c0_217 = arith.constant 0 : index
    %620 = vector.load %arg4[%c8_216, %c0_217] : memref<264x128xf32, #tpu.memory_space<vmem>>, vector<1x32xf32>
    %c16_218 = arith.constant 16 : index
    %c0_219 = arith.constant 0 : index
    %621 = vector.load %arg4[%c16_218, %c0_219] : memref<264x128xf32, #tpu.memory_space<vmem>>, vector<1x32xf32>
    %cst_220 = arith.constant dense<0.000000e+00> : vector<4xf32>
    %622 = vector.multi_reduction <add>, %619, %cst_220 [1] : vector<4x32xf32> to vector<4xf32>
    %623 = vector.shape_cast %622 : vector<4xf32> to vector<4x1xf32>
    %cst_221 = arith.constant 3.200000e+01 : f32
    %624 = vector.broadcast %cst_221 : f32 to vector<4x1xf32>
    %625 = arith.divf %623, %624 : vector<4x1xf32>
    %626 = vector.broadcast %625 : vector<4x1xf32> to vector<4x32xf32>
    %627 = arith.subf %619, %626 : vector<4x32xf32>
    %628 = arith.mulf %627, %627 : vector<4x32xf32>
    %cst_222 = arith.constant dense<0.000000e+00> : vector<4xf32>
    %629 = vector.multi_reduction <add>, %628, %cst_222 [1] : vector<4x32xf32> to vector<4xf32>
    %630 = vector.shape_cast %629 : vector<4xf32> to vector<4x1xf32>
    %cst_223 = arith.constant 3.200000e+01 : f32
    %631 = vector.broadcast %cst_223 : f32 to vector<4x1xf32>
    %632 = arith.divf %630, %631 : vector<4x1xf32>
    %633 = vector.broadcast %625 : vector<4x1xf32> to vector<4x32xf32>
    %634 = arith.subf %619, %633 : vector<4x32xf32>
    %cst_224 = arith.constant 9.99999974E-6 : f32
    %635 = vector.broadcast %cst_224 : f32 to vector<4x1xf32>
    %636 = arith.addf %632, %635 : vector<4x1xf32>
    %637 = math.rsqrt %636 : vector<4x1xf32>
    %638 = vector.broadcast %637 : vector<4x1xf32> to vector<4x32xf32>
    %639 = arith.mulf %634, %638 : vector<4x32xf32>
    %640 = vector.broadcast %620 : vector<1x32xf32> to vector<4x32xf32>
    %641 = arith.mulf %639, %640 : vector<4x32xf32>
    %642 = vector.broadcast %621 : vector<1x32xf32> to vector<4x32xf32>
    %643 = arith.addf %641, %642 : vector<4x32xf32>
    %644 = arith.truncf %643 : vector<4x32xf32> to vector<4x32xbf16>
    %c48_225 = arith.constant 48 : index
    %c0_226 = arith.constant 0 : index
    %645 = vector.load %arg3[%c48_225, %c0_226] : memref<592x128xbf16, #tpu.memory_space<vmem>>, vector<32x96xbf16>
    %cst_227 = arith.constant dense<0.000000e+00> : vector<4x96xf32>
    %646 = tpu.matmul %644, %645, %cst_227 {dimension_numbers = #tpu.dot_dimension_numbers<[1], [0], [0], [1], [0, 0, 1, 1], [], []>} : vector<4x32xbf16>, vector<32x96xbf16>, vector<4x96xf32> -> vector<4x96xf32>
    %c24_228 = arith.constant 24 : index
    %c0_229 = arith.constant 0 : index
    %647 = vector.load %arg4[%c24_228, %c0_229] : memref<264x128xf32, #tpu.memory_space<vmem>>, vector<1x96xf32>
    %648 = vector.broadcast %647 : vector<1x96xf32> to vector<4x96xf32>
    %649 = arith.addf %646, %648 : vector<4x96xf32>
    %650 = vector.extract_strided_slice %649 {offsets = [0, 0], sizes = [4, 8], strides = [1, 1]} : vector<4x96xf32> to vector<4x8xf32>
    %651 = vector.extract_strided_slice %649 {offsets = [0, 32], sizes = [4, 8], strides = [1, 1]} : vector<4x96xf32> to vector<4x8xf32>
    %652 = vector.extract_strided_slice %649 {offsets = [0, 64], sizes = [4, 8], strides = [1, 1]} : vector<4x96xf32> to vector<4x8xf32>
    %653 = arith.truncf %650 : vector<4x8xf32> to vector<4x8xbf16>
    %654 = arith.truncf %651 : vector<4x8xf32> to vector<4x8xbf16>
    %cst_230 = arith.constant dense<0.000000e+00> : vector<4x4xf32>
    %655 = tpu.matmul %653, %654, %cst_230 {dimension_numbers = #tpu.dot_dimension_numbers<[1], [1], [0], [0], [0, 0, 1, 0], [], []>} : vector<4x8xbf16>, vector<4x8xbf16>, vector<4x4xf32> -> vector<4x4xf32>
    %cst_231 = arith.constant 0.353553385 : f32
    %656 = vector.broadcast %cst_231 : f32 to vector<4x4xf32>
    %657 = arith.mulf %655, %656 : vector<4x4xf32>
    %cst_232 = arith.constant dense<0xFF800000> : vector<4xf32>
    %658 = vector.multi_reduction <maximumf>, %657, %cst_232 [1] : vector<4x4xf32> to vector<4xf32>
    %659 = vector.shape_cast %658 : vector<4xf32> to vector<4x1xf32>
    %660 = vector.broadcast %659 : vector<4x1xf32> to vector<4x4xf32>
    %661 = arith.subf %657, %660 : vector<4x4xf32>
    %662 = math.exp %661 : vector<4x4xf32>
    %cst_233 = arith.constant dense<0.000000e+00> : vector<4xf32>
    %663 = vector.multi_reduction <add>, %662, %cst_233 [1] : vector<4x4xf32> to vector<4xf32>
    %664 = vector.shape_cast %663 : vector<4xf32> to vector<4x1xf32>
    %665 = tpu.reciprocal %664 {approx = true} : vector<4x1xf32> -> vector<4x1xf32>
    %666 = vector.broadcast %665 : vector<4x1xf32> to vector<4x4xf32>
    %667 = arith.mulf %662, %666 : vector<4x4xf32>
    %668 = arith.truncf %667 : vector<4x4xf32> to vector<4x4xbf16>
    %669 = arith.truncf %652 : vector<4x8xf32> to vector<4x8xbf16>
    %cst_234 = arith.constant dense<0.000000e+00> : vector<4x8xf32>
    %670 = tpu.matmul %668, %669, %cst_234 {dimension_numbers = #tpu.dot_dimension_numbers<[1], [0], [0], [1], [0, 0, 1, 1], [], []>} : vector<4x4xbf16>, vector<4x8xbf16>, vector<4x8xf32> -> vector<4x8xf32>
    %671 = vector.extract_strided_slice %649 {offsets = [0, 8], sizes = [4, 8], strides = [1, 1]} : vector<4x96xf32> to vector<4x8xf32>
    %672 = vector.extract_strided_slice %649 {offsets = [0, 40], sizes = [4, 8], strides = [1, 1]} : vector<4x96xf32> to vector<4x8xf32>
    %673 = vector.extract_strided_slice %649 {offsets = [0, 72], sizes = [4, 8], strides = [1, 1]} : vector<4x96xf32> to vector<4x8xf32>
    %674 = arith.truncf %671 : vector<4x8xf32> to vector<4x8xbf16>
    %675 = arith.truncf %672 : vector<4x8xf32> to vector<4x8xbf16>
    %cst_235 = arith.constant dense<0.000000e+00> : vector<4x4xf32>
    %676 = tpu.matmul %674, %675, %cst_235 {dimension_numbers = #tpu.dot_dimension_numbers<[1], [1], [0], [0], [0, 0, 1, 0], [], []>} : vector<4x8xbf16>, vector<4x8xbf16>, vector<4x4xf32> -> vector<4x4xf32>
    %cst_236 = arith.constant 0.353553385 : f32
    %677 = vector.broadcast %cst_236 : f32 to vector<4x4xf32>
    %678 = arith.mulf %676, %677 : vector<4x4xf32>
    %cst_237 = arith.constant dense<0xFF800000> : vector<4xf32>
    %679 = vector.multi_reduction <maximumf>, %678, %cst_237 [1] : vector<4x4xf32> to vector<4xf32>
    %680 = vector.shape_cast %679 : vector<4xf32> to vector<4x1xf32>
    %681 = vector.broadcast %680 : vector<4x1xf32> to vector<4x4xf32>
    %682 = arith.subf %678, %681 : vector<4x4xf32>
    %683 = math.exp %682 : vector<4x4xf32>
    %cst_238 = arith.constant dense<0.000000e+00> : vector<4xf32>
    %684 = vector.multi_reduction <add>, %683, %cst_238 [1] : vector<4x4xf32> to vector<4xf32>
    %685 = vector.shape_cast %684 : vector<4xf32> to vector<4x1xf32>
    %686 = tpu.reciprocal %685 {approx = true} : vector<4x1xf32> -> vector<4x1xf32>
    %687 = vector.broadcast %686 : vector<4x1xf32> to vector<4x4xf32>
    %688 = arith.mulf %683, %687 : vector<4x4xf32>
    %689 = arith.truncf %688 : vector<4x4xf32> to vector<4x4xbf16>
    %690 = arith.truncf %673 : vector<4x8xf32> to vector<4x8xbf16>
    %cst_239 = arith.constant dense<0.000000e+00> : vector<4x8xf32>
    %691 = tpu.matmul %689, %690, %cst_239 {dimension_numbers = #tpu.dot_dimension_numbers<[1], [0], [0], [1], [0, 0, 1, 1], [], []>} : vector<4x4xbf16>, vector<4x8xbf16>, vector<4x8xf32> -> vector<4x8xf32>
    %692 = vector.extract_strided_slice %649 {offsets = [0, 16], sizes = [4, 8], strides = [1, 1]} : vector<4x96xf32> to vector<4x8xf32>
    %693 = vector.extract_strided_slice %649 {offsets = [0, 48], sizes = [4, 8], strides = [1, 1]} : vector<4x96xf32> to vector<4x8xf32>
    %694 = vector.extract_strided_slice %649 {offsets = [0, 80], sizes = [4, 8], strides = [1, 1]} : vector<4x96xf32> to vector<4x8xf32>
    %695 = arith.truncf %692 : vector<4x8xf32> to vector<4x8xbf16>
    %696 = arith.truncf %693 : vector<4x8xf32> to vector<4x8xbf16>
    %cst_240 = arith.constant dense<0.000000e+00> : vector<4x4xf32>
    %697 = tpu.matmul %695, %696, %cst_240 {dimension_numbers = #tpu.dot_dimension_numbers<[1], [1], [0], [0], [0, 0, 1, 0], [], []>} : vector<4x8xbf16>, vector<4x8xbf16>, vector<4x4xf32> -> vector<4x4xf32>
    %cst_241 = arith.constant 0.353553385 : f32
    %698 = vector.broadcast %cst_241 : f32 to vector<4x4xf32>
    %699 = arith.mulf %697, %698 : vector<4x4xf32>
    %cst_242 = arith.constant dense<0xFF800000> : vector<4xf32>
    %700 = vector.multi_reduction <maximumf>, %699, %cst_242 [1] : vector<4x4xf32> to vector<4xf32>
    %701 = vector.shape_cast %700 : vector<4xf32> to vector<4x1xf32>
    %702 = vector.broadcast %701 : vector<4x1xf32> to vector<4x4xf32>
    %703 = arith.subf %699, %702 : vector<4x4xf32>
    %704 = math.exp %703 : vector<4x4xf32>
    %cst_243 = arith.constant dense<0.000000e+00> : vector<4xf32>
    %705 = vector.multi_reduction <add>, %704, %cst_243 [1] : vector<4x4xf32> to vector<4xf32>
    %706 = vector.shape_cast %705 : vector<4xf32> to vector<4x1xf32>
    %707 = tpu.reciprocal %706 {approx = true} : vector<4x1xf32> -> vector<4x1xf32>
    %708 = vector.broadcast %707 : vector<4x1xf32> to vector<4x4xf32>
    %709 = arith.mulf %704, %708 : vector<4x4xf32>
    %710 = arith.truncf %709 : vector<4x4xf32> to vector<4x4xbf16>
    %711 = arith.truncf %694 : vector<4x8xf32> to vector<4x8xbf16>
    %cst_244 = arith.constant dense<0.000000e+00> : vector<4x8xf32>
    %712 = tpu.matmul %710, %711, %cst_244 {dimension_numbers = #tpu.dot_dimension_numbers<[1], [0], [0], [1], [0, 0, 1, 1], [], []>} : vector<4x4xbf16>, vector<4x8xbf16>, vector<4x8xf32> -> vector<4x8xf32>
    %713 = vector.extract_strided_slice %649 {offsets = [0, 24], sizes = [4, 8], strides = [1, 1]} : vector<4x96xf32> to vector<4x8xf32>
    %714 = vector.extract_strided_slice %649 {offsets = [0, 56], sizes = [4, 8], strides = [1, 1]} : vector<4x96xf32> to vector<4x8xf32>
    %715 = vector.extract_strided_slice %649 {offsets = [0, 88], sizes = [4, 8], strides = [1, 1]} : vector<4x96xf32> to vector<4x8xf32>
    %716 = arith.truncf %713 : vector<4x8xf32> to vector<4x8xbf16>
    %717 = arith.truncf %714 : vector<4x8xf32> to vector<4x8xbf16>
    %cst_245 = arith.constant dense<0.000000e+00> : vector<4x4xf32>
    %718 = tpu.matmul %716, %717, %cst_245 {dimension_numbers = #tpu.dot_dimension_numbers<[1], [1], [0], [0], [0, 0, 1, 0], [], []>} : vector<4x8xbf16>, vector<4x8xbf16>, vector<4x4xf32> -> vector<4x4xf32>
    %cst_246 = arith.constant 0.353553385 : f32
    %719 = vector.broadcast %cst_246 : f32 to vector<4x4xf32>
    %720 = arith.mulf %718, %719 : vector<4x4xf32>
    %cst_247 = arith.constant dense<0xFF800000> : vector<4xf32>
    %721 = vector.multi_reduction <maximumf>, %720, %cst_247 [1] : vector<4x4xf32> to vector<4xf32>
    %722 = vector.shape_cast %721 : vector<4xf32> to vector<4x1xf32>
    %723 = vector.broadcast %722 : vector<4x1xf32> to vector<4x4xf32>
    %724 = arith.subf %720, %723 : vector<4x4xf32>
    %725 = math.exp %724 : vector<4x4xf32>
    %cst_248 = arith.constant dense<0.000000e+00> : vector<4xf32>
    %726 = vector.multi_reduction <add>, %725, %cst_248 [1] : vector<4x4xf32> to vector<4xf32>
    %727 = vector.shape_cast %726 : vector<4xf32> to vector<4x1xf32>
    %728 = tpu.reciprocal %727 {approx = true} : vector<4x1xf32> -> vector<4x1xf32>
    %729 = vector.broadcast %728 : vector<4x1xf32> to vector<4x4xf32>
    %730 = arith.mulf %725, %729 : vector<4x4xf32>
    %731 = arith.truncf %730 : vector<4x4xf32> to vector<4x4xbf16>
    %732 = arith.truncf %715 : vector<4x8xf32> to vector<4x8xbf16>
    %cst_249 = arith.constant dense<0.000000e+00> : vector<4x8xf32>
    %733 = tpu.matmul %731, %732, %cst_249 {dimension_numbers = #tpu.dot_dimension_numbers<[1], [0], [0], [1], [0, 0, 1, 1], [], []>} : vector<4x4xbf16>, vector<4x8xbf16>, vector<4x8xf32> -> vector<4x8xf32>
    %734 = tpu.concatenate %670, %691, %712, %733 in 1 : vector<4x8xf32>, vector<4x8xf32>, vector<4x8xf32>, vector<4x8xf32> -> vector<4x32xf32>
    %735 = arith.truncf %734 : vector<4x32xf32> to vector<4x32xbf16>
    %c80_250 = arith.constant 80 : index
    %c0_251 = arith.constant 0 : index
    %736 = vector.load %arg3[%c80_250, %c0_251] : memref<592x128xbf16, #tpu.memory_space<vmem>>, vector<32x32xbf16>
    %cst_252 = arith.constant dense<0.000000e+00> : vector<4x32xf32>
    %737 = tpu.matmul %735, %736, %cst_252 {dimension_numbers = #tpu.dot_dimension_numbers<[1], [0], [0], [1], [0, 0, 1, 1], [], []>} : vector<4x32xbf16>, vector<32x32xbf16>, vector<4x32xf32> -> vector<4x32xf32>
    %738 = arith.addf %619, %737 : vector<4x32xf32>
    %c32_253 = arith.constant 32 : index
    %c0_254 = arith.constant 0 : index
    %739 = vector.load %arg4[%c32_253, %c0_254] : memref<264x128xf32, #tpu.memory_space<vmem>>, vector<1x32xf32>
    %740 = vector.broadcast %739 : vector<1x32xf32> to vector<4x32xf32>
    %741 = arith.addf %738, %740 : vector<4x32xf32>
    %c40_255 = arith.constant 40 : index
    %c0_256 = arith.constant 0 : index
    %742 = vector.load %arg4[%c40_255, %c0_256] : memref<264x128xf32, #tpu.memory_space<vmem>>, vector<1x32xf32>
    %c48_257 = arith.constant 48 : index
    %c0_258 = arith.constant 0 : index
    %743 = vector.load %arg4[%c48_257, %c0_258] : memref<264x128xf32, #tpu.memory_space<vmem>>, vector<1x32xf32>
    %cst_259 = arith.constant dense<0.000000e+00> : vector<4xf32>
    %744 = vector.multi_reduction <add>, %741, %cst_259 [1] : vector<4x32xf32> to vector<4xf32>
    %745 = vector.shape_cast %744 : vector<4xf32> to vector<4x1xf32>
    %cst_260 = arith.constant 3.200000e+01 : f32
    %746 = vector.broadcast %cst_260 : f32 to vector<4x1xf32>
    %747 = arith.divf %745, %746 : vector<4x1xf32>
    %748 = vector.broadcast %747 : vector<4x1xf32> to vector<4x32xf32>
    %749 = arith.subf %741, %748 : vector<4x32xf32>
    %750 = arith.mulf %749, %749 : vector<4x32xf32>
    %cst_261 = arith.constant dense<0.000000e+00> : vector<4xf32>
    %751 = vector.multi_reduction <add>, %750, %cst_261 [1] : vector<4x32xf32> to vector<4xf32>
    %752 = vector.shape_cast %751 : vector<4xf32> to vector<4x1xf32>
    %cst_262 = arith.constant 3.200000e+01 : f32
    %753 = vector.broadcast %cst_262 : f32 to vector<4x1xf32>
    %754 = arith.divf %752, %753 : vector<4x1xf32>
    %755 = vector.broadcast %747 : vector<4x1xf32> to vector<4x32xf32>
    %756 = arith.subf %741, %755 : vector<4x32xf32>
    %cst_263 = arith.constant 9.99999974E-6 : f32
    %757 = vector.broadcast %cst_263 : f32 to vector<4x1xf32>
    %758 = arith.addf %754, %757 : vector<4x1xf32>
    %759 = math.rsqrt %758 : vector<4x1xf32>
    %760 = vector.broadcast %759 : vector<4x1xf32> to vector<4x32xf32>
    %761 = arith.mulf %756, %760 : vector<4x32xf32>
    %762 = vector.broadcast %742 : vector<1x32xf32> to vector<4x32xf32>
    %763 = arith.mulf %761, %762 : vector<4x32xf32>
    %764 = vector.broadcast %743 : vector<1x32xf32> to vector<4x32xf32>
    %765 = arith.addf %763, %764 : vector<4x32xf32>
    %766 = arith.truncf %765 : vector<4x32xf32> to vector<4x32xbf16>
    %c112_264 = arith.constant 112 : index
    %c0_265 = arith.constant 0 : index
    %767 = vector.load %arg3[%c112_264, %c0_265] : memref<592x128xbf16, #tpu.memory_space<vmem>>, vector<32x64xbf16>
    %cst_266 = arith.constant dense<0.000000e+00> : vector<4x64xf32>
    %768 = tpu.matmul %766, %767, %cst_266 {dimension_numbers = #tpu.dot_dimension_numbers<[1], [0], [0], [1], [0, 0, 1, 1], [], []>} : vector<4x32xbf16>, vector<32x64xbf16>, vector<4x64xf32> -> vector<4x64xf32>
    %c56_267 = arith.constant 56 : index
    %c0_268 = arith.constant 0 : index
    %769 = vector.load %arg4[%c56_267, %c0_268] : memref<264x128xf32, #tpu.memory_space<vmem>>, vector<1x64xf32>
    %770 = vector.broadcast %769 : vector<1x64xf32> to vector<4x64xf32>
    %771 = arith.addf %768, %770 : vector<4x64xf32>
    %772 = arith.mulf %771, %771 : vector<4x64xf32>
    %773 = arith.mulf %771, %772 : vector<4x64xf32>
    %cst_269 = arith.constant 4.471500e-02 : f32
    %774 = vector.broadcast %cst_269 : f32 to vector<4x64xf32>
    %775 = arith.mulf %774, %773 : vector<4x64xf32>
    %776 = arith.addf %771, %775 : vector<4x64xf32>
    %cst_270 = arith.constant 0.797884583 : f32
    %777 = vector.broadcast %cst_270 : f32 to vector<4x64xf32>
    %778 = arith.mulf %777, %776 : vector<4x64xf32>
    %779 = math.tanh %778 : vector<4x64xf32>
    %cst_271 = arith.constant 1.000000e+00 : f32
    %780 = vector.broadcast %cst_271 : f32 to vector<4x64xf32>
    %781 = arith.addf %780, %779 : vector<4x64xf32>
    %cst_272 = arith.constant 5.000000e-01 : f32
    %782 = vector.broadcast %cst_272 : f32 to vector<4x64xf32>
    %783 = arith.mulf %782, %781 : vector<4x64xf32>
    %784 = arith.mulf %771, %783 : vector<4x64xf32>
    %785 = arith.truncf %784 : vector<4x64xf32> to vector<4x64xbf16>
    %c144_273 = arith.constant 144 : index
    %c0_274 = arith.constant 0 : index
    %786 = vector.load %arg3[%c144_273, %c0_274] : memref<592x128xbf16, #tpu.memory_space<vmem>>, vector<64x32xbf16>
    %cst_275 = arith.constant dense<0.000000e+00> : vector<4x32xf32>
    %787 = tpu.matmul %785, %786, %cst_275 {dimension_numbers = #tpu.dot_dimension_numbers<[1], [0], [0], [1], [0, 0, 1, 1], [], []>} : vector<4x64xbf16>, vector<64x32xbf16>, vector<4x32xf32> -> vector<4x32xf32>
    %788 = arith.addf %741, %787 : vector<4x32xf32>
    %c64_276 = arith.constant 64 : index
    %c0_277 = arith.constant 0 : index
    %789 = vector.load %arg4[%c64_276, %c0_277] : memref<264x128xf32, #tpu.memory_space<vmem>>, vector<1x32xf32>
    %790 = vector.broadcast %789 : vector<1x32xf32> to vector<4x32xf32>
    %791 = arith.addf %788, %790 : vector<4x32xf32>
    %792 = arith.truncf %791 : vector<4x32xf32> to vector<4x32xbf16>
    %c528_278 = arith.constant 528 : index
    %c0_279 = arith.constant 0 : index
    %793 = vector.load %arg3[%c528_278, %c0_279] : memref<592x128xbf16, #tpu.memory_space<vmem>>, vector<32x32xbf16>
    %cst_280 = arith.constant dense<0.000000e+00> : vector<4x32xf32>
    %794 = tpu.matmul %792, %793, %cst_280 {dimension_numbers = #tpu.dot_dimension_numbers<[1], [0], [0], [1], [0, 0, 1, 1], [], []>} : vector<4x32xbf16>, vector<32x32xbf16>, vector<4x32xf32> -> vector<4x32xf32>
    %c200_281 = arith.constant 200 : index
    %c0_282 = arith.constant 0 : index
    %795 = vector.load %arg4[%c200_281, %c0_282] : memref<264x128xf32, #tpu.memory_space<vmem>>, vector<1x32xf32>
    %796 = vector.broadcast %795 : vector<1x32xf32> to vector<4x32xf32>
    %797 = arith.addf %794, %796 : vector<4x32xf32>
    %c208_283 = arith.constant 208 : index
    %c0_284 = arith.constant 0 : index
    %798 = vector.load %arg4[%c208_283, %c0_284] : memref<264x128xf32, #tpu.memory_space<vmem>>, vector<1x32xf32>
    %799 = tpu.concatenate %797, %798 in 0 : vector<4x32xf32>, vector<1x32xf32> -> vector<5x32xf32>
    %c1_285 = arith.constant 1 : index
    %c0_286 = arith.constant 0 : index
    %c0_287 = arith.constant 0 : index
    %800 = vector.load %arg2[%c1_285, %c0_286, %c0_287] : memref<2x17x5xbf16, #tpu.memory_space<vmem>>, vector<1x17x5xbf16>
    %801 = vector.shape_cast %800 : vector<1x17x5xbf16> to vector<17x5xbf16>
    %802 = arith.truncf %799 : vector<5x32xf32> to vector<5x32xbf16>
    %cst_288 = arith.constant dense<0.000000e+00> : vector<17x32xf32>
    %803 = tpu.matmul %801, %802, %cst_288 {dimension_numbers = #tpu.dot_dimension_numbers<[1], [0], [0], [1], [0, 0, 1, 1], [], []>} : vector<17x5xbf16>, vector<5x32xbf16>, vector<17x32xf32> -> vector<17x32xf32>
    %c216_289 = arith.constant 216 : index
    %c0_290 = arith.constant 0 : index
    %804 = vector.load %arg4[%c216_289, %c0_290] : memref<264x128xf32, #tpu.memory_space<vmem>>, vector<17x32xf32>
    %805 = arith.addf %803, %804 : vector<17x32xf32>
    %c72_291 = arith.constant 72 : index
    %c0_292 = arith.constant 0 : index
    %806 = vector.load %arg4[%c72_291, %c0_292] : memref<264x128xf32, #tpu.memory_space<vmem>>, vector<1x32xf32>
    %c80_293 = arith.constant 80 : index
    %c0_294 = arith.constant 0 : index
    %807 = vector.load %arg4[%c80_293, %c0_294] : memref<264x128xf32, #tpu.memory_space<vmem>>, vector<1x32xf32>
    %cst_295 = arith.constant dense<0.000000e+00> : vector<17xf32>
    %808 = vector.multi_reduction <add>, %805, %cst_295 [1] : vector<17x32xf32> to vector<17xf32>
    %809 = vector.shape_cast %808 : vector<17xf32> to vector<17x1xf32>
    %cst_296 = arith.constant 3.200000e+01 : f32
    %810 = vector.broadcast %cst_296 : f32 to vector<17x1xf32>
    %811 = arith.divf %809, %810 : vector<17x1xf32>
    %812 = vector.broadcast %811 : vector<17x1xf32> to vector<17x32xf32>
    %813 = arith.subf %805, %812 : vector<17x32xf32>
    %814 = arith.mulf %813, %813 : vector<17x32xf32>
    %cst_297 = arith.constant dense<0.000000e+00> : vector<17xf32>
    %815 = vector.multi_reduction <add>, %814, %cst_297 [1] : vector<17x32xf32> to vector<17xf32>
    %816 = vector.shape_cast %815 : vector<17xf32> to vector<17x1xf32>
    %cst_298 = arith.constant 3.200000e+01 : f32
    %817 = vector.broadcast %cst_298 : f32 to vector<17x1xf32>
    %818 = arith.divf %816, %817 : vector<17x1xf32>
    %819 = vector.broadcast %811 : vector<17x1xf32> to vector<17x32xf32>
    %820 = arith.subf %805, %819 : vector<17x32xf32>
    %cst_299 = arith.constant 9.99999974E-6 : f32
    %821 = vector.broadcast %cst_299 : f32 to vector<17x1xf32>
    %822 = arith.addf %818, %821 : vector<17x1xf32>
    %823 = math.rsqrt %822 : vector<17x1xf32>
    %824 = vector.broadcast %823 : vector<17x1xf32> to vector<17x32xf32>
    %825 = arith.mulf %820, %824 : vector<17x32xf32>
    %826 = vector.broadcast %806 : vector<1x32xf32> to vector<17x32xf32>
    %827 = arith.mulf %825, %826 : vector<17x32xf32>
    %828 = vector.broadcast %807 : vector<1x32xf32> to vector<17x32xf32>
    %829 = arith.addf %827, %828 : vector<17x32xf32>
    %830 = arith.truncf %829 : vector<17x32xf32> to vector<17x32xbf16>
    %c208_300 = arith.constant 208 : index
    %c0_301 = arith.constant 0 : index
    %831 = vector.load %arg3[%c208_300, %c0_301] : memref<592x128xbf16, #tpu.memory_space<vmem>>, vector<32x96xbf16>
    %cst_302 = arith.constant dense<0.000000e+00> : vector<17x96xf32>
    %832 = tpu.matmul %830, %831, %cst_302 {dimension_numbers = #tpu.dot_dimension_numbers<[1], [0], [0], [1], [0, 0, 1, 1], [], []>} : vector<17x32xbf16>, vector<32x96xbf16>, vector<17x96xf32> -> vector<17x96xf32>
    %c88_303 = arith.constant 88 : index
    %c0_304 = arith.constant 0 : index
    %833 = vector.load %arg4[%c88_303, %c0_304] : memref<264x128xf32, #tpu.memory_space<vmem>>, vector<1x96xf32>
    %834 = vector.broadcast %833 : vector<1x96xf32> to vector<17x96xf32>
    %835 = arith.addf %832, %834 : vector<17x96xf32>
    %836 = vector.extract_strided_slice %835 {offsets = [0, 0], sizes = [17, 8], strides = [1, 1]} : vector<17x96xf32> to vector<17x8xf32>
    %837 = vector.extract_strided_slice %835 {offsets = [0, 32], sizes = [17, 8], strides = [1, 1]} : vector<17x96xf32> to vector<17x8xf32>
    %838 = vector.extract_strided_slice %835 {offsets = [0, 64], sizes = [17, 8], strides = [1, 1]} : vector<17x96xf32> to vector<17x8xf32>
    %839 = arith.truncf %836 : vector<17x8xf32> to vector<17x8xbf16>
    %840 = arith.truncf %837 : vector<17x8xf32> to vector<17x8xbf16>
    %cst_305 = arith.constant dense<0.000000e+00> : vector<17x17xf32>
    %841 = tpu.matmul %839, %840, %cst_305 {dimension_numbers = #tpu.dot_dimension_numbers<[1], [1], [0], [0], [0, 0, 1, 0], [], []>} : vector<17x8xbf16>, vector<17x8xbf16>, vector<17x17xf32> -> vector<17x17xf32>
    %cst_306 = arith.constant 0.353553385 : f32
    %842 = vector.broadcast %cst_306 : f32 to vector<17x17xf32>
    %843 = arith.mulf %841, %842 : vector<17x17xf32>
    %cst_307 = arith.constant dense<0xFF800000> : vector<17xf32>
    %844 = vector.multi_reduction <maximumf>, %843, %cst_307 [1] : vector<17x17xf32> to vector<17xf32>
    %845 = vector.shape_cast %844 : vector<17xf32> to vector<17x1xf32>
    %846 = vector.broadcast %845 : vector<17x1xf32> to vector<17x17xf32>
    %847 = arith.subf %843, %846 : vector<17x17xf32>
    %848 = math.exp %847 : vector<17x17xf32>
    %cst_308 = arith.constant dense<0.000000e+00> : vector<17xf32>
    %849 = vector.multi_reduction <add>, %848, %cst_308 [1] : vector<17x17xf32> to vector<17xf32>
    %850 = vector.shape_cast %849 : vector<17xf32> to vector<17x1xf32>
    %851 = tpu.reciprocal %850 {approx = true} : vector<17x1xf32> -> vector<17x1xf32>
    %852 = vector.broadcast %851 : vector<17x1xf32> to vector<17x17xf32>
    %853 = arith.mulf %848, %852 : vector<17x17xf32>
    %854 = arith.truncf %853 : vector<17x17xf32> to vector<17x17xbf16>
    %855 = arith.truncf %838 : vector<17x8xf32> to vector<17x8xbf16>
    %cst_309 = arith.constant dense<0.000000e+00> : vector<17x8xf32>
    %856 = tpu.matmul %854, %855, %cst_309 {dimension_numbers = #tpu.dot_dimension_numbers<[1], [0], [0], [1], [0, 0, 1, 1], [], []>} : vector<17x17xbf16>, vector<17x8xbf16>, vector<17x8xf32> -> vector<17x8xf32>
    %857 = vector.extract_strided_slice %835 {offsets = [0, 8], sizes = [17, 8], strides = [1, 1]} : vector<17x96xf32> to vector<17x8xf32>
    %858 = vector.extract_strided_slice %835 {offsets = [0, 40], sizes = [17, 8], strides = [1, 1]} : vector<17x96xf32> to vector<17x8xf32>
    %859 = vector.extract_strided_slice %835 {offsets = [0, 72], sizes = [17, 8], strides = [1, 1]} : vector<17x96xf32> to vector<17x8xf32>
    %860 = arith.truncf %857 : vector<17x8xf32> to vector<17x8xbf16>
    %861 = arith.truncf %858 : vector<17x8xf32> to vector<17x8xbf16>
    %cst_310 = arith.constant dense<0.000000e+00> : vector<17x17xf32>
    %862 = tpu.matmul %860, %861, %cst_310 {dimension_numbers = #tpu.dot_dimension_numbers<[1], [1], [0], [0], [0, 0, 1, 0], [], []>} : vector<17x8xbf16>, vector<17x8xbf16>, vector<17x17xf32> -> vector<17x17xf32>
    %cst_311 = arith.constant 0.353553385 : f32
    %863 = vector.broadcast %cst_311 : f32 to vector<17x17xf32>
    %864 = arith.mulf %862, %863 : vector<17x17xf32>
    %cst_312 = arith.constant dense<0xFF800000> : vector<17xf32>
    %865 = vector.multi_reduction <maximumf>, %864, %cst_312 [1] : vector<17x17xf32> to vector<17xf32>
    %866 = vector.shape_cast %865 : vector<17xf32> to vector<17x1xf32>
    %867 = vector.broadcast %866 : vector<17x1xf32> to vector<17x17xf32>
    %868 = arith.subf %864, %867 : vector<17x17xf32>
    %869 = math.exp %868 : vector<17x17xf32>
    %cst_313 = arith.constant dense<0.000000e+00> : vector<17xf32>
    %870 = vector.multi_reduction <add>, %869, %cst_313 [1] : vector<17x17xf32> to vector<17xf32>
    %871 = vector.shape_cast %870 : vector<17xf32> to vector<17x1xf32>
    %872 = tpu.reciprocal %871 {approx = true} : vector<17x1xf32> -> vector<17x1xf32>
    %873 = vector.broadcast %872 : vector<17x1xf32> to vector<17x17xf32>
    %874 = arith.mulf %869, %873 : vector<17x17xf32>
    %875 = arith.truncf %874 : vector<17x17xf32> to vector<17x17xbf16>
    %876 = arith.truncf %859 : vector<17x8xf32> to vector<17x8xbf16>
    %cst_314 = arith.constant dense<0.000000e+00> : vector<17x8xf32>
    %877 = tpu.matmul %875, %876, %cst_314 {dimension_numbers = #tpu.dot_dimension_numbers<[1], [0], [0], [1], [0, 0, 1, 1], [], []>} : vector<17x17xbf16>, vector<17x8xbf16>, vector<17x8xf32> -> vector<17x8xf32>
    %878 = vector.extract_strided_slice %835 {offsets = [0, 16], sizes = [17, 8], strides = [1, 1]} : vector<17x96xf32> to vector<17x8xf32>
    %879 = vector.extract_strided_slice %835 {offsets = [0, 48], sizes = [17, 8], strides = [1, 1]} : vector<17x96xf32> to vector<17x8xf32>
    %880 = vector.extract_strided_slice %835 {offsets = [0, 80], sizes = [17, 8], strides = [1, 1]} : vector<17x96xf32> to vector<17x8xf32>
    %881 = arith.truncf %878 : vector<17x8xf32> to vector<17x8xbf16>
    %882 = arith.truncf %879 : vector<17x8xf32> to vector<17x8xbf16>
    %cst_315 = arith.constant dense<0.000000e+00> : vector<17x17xf32>
    %883 = tpu.matmul %881, %882, %cst_315 {dimension_numbers = #tpu.dot_dimension_numbers<[1], [1], [0], [0], [0, 0, 1, 0], [], []>} : vector<17x8xbf16>, vector<17x8xbf16>, vector<17x17xf32> -> vector<17x17xf32>
    %cst_316 = arith.constant 0.353553385 : f32
    %884 = vector.broadcast %cst_316 : f32 to vector<17x17xf32>
    %885 = arith.mulf %883, %884 : vector<17x17xf32>
    %cst_317 = arith.constant dense<0xFF800000> : vector<17xf32>
    %886 = vector.multi_reduction <maximumf>, %885, %cst_317 [1] : vector<17x17xf32> to vector<17xf32>
    %887 = vector.shape_cast %886 : vector<17xf32> to vector<17x1xf32>
    %888 = vector.broadcast %887 : vector<17x1xf32> to vector<17x17xf32>
    %889 = arith.subf %885, %888 : vector<17x17xf32>
    %890 = math.exp %889 : vector<17x17xf32>
    %cst_318 = arith.constant dense<0.000000e+00> : vector<17xf32>
    %891 = vector.multi_reduction <add>, %890, %cst_318 [1] : vector<17x17xf32> to vector<17xf32>
    %892 = vector.shape_cast %891 : vector<17xf32> to vector<17x1xf32>
    %893 = tpu.reciprocal %892 {approx = true} : vector<17x1xf32> -> vector<17x1xf32>
    %894 = vector.broadcast %893 : vector<17x1xf32> to vector<17x17xf32>
    %895 = arith.mulf %890, %894 : vector<17x17xf32>
    %896 = arith.truncf %895 : vector<17x17xf32> to vector<17x17xbf16>
    %897 = arith.truncf %880 : vector<17x8xf32> to vector<17x8xbf16>
    %cst_319 = arith.constant dense<0.000000e+00> : vector<17x8xf32>
    %898 = tpu.matmul %896, %897, %cst_319 {dimension_numbers = #tpu.dot_dimension_numbers<[1], [0], [0], [1], [0, 0, 1, 1], [], []>} : vector<17x17xbf16>, vector<17x8xbf16>, vector<17x8xf32> -> vector<17x8xf32>
    %899 = vector.extract_strided_slice %835 {offsets = [0, 24], sizes = [17, 8], strides = [1, 1]} : vector<17x96xf32> to vector<17x8xf32>
    %900 = vector.extract_strided_slice %835 {offsets = [0, 56], sizes = [17, 8], strides = [1, 1]} : vector<17x96xf32> to vector<17x8xf32>
    %901 = vector.extract_strided_slice %835 {offsets = [0, 88], sizes = [17, 8], strides = [1, 1]} : vector<17x96xf32> to vector<17x8xf32>
    %902 = arith.truncf %899 : vector<17x8xf32> to vector<17x8xbf16>
    %903 = arith.truncf %900 : vector<17x8xf32> to vector<17x8xbf16>
    %cst_320 = arith.constant dense<0.000000e+00> : vector<17x17xf32>
    %904 = tpu.matmul %902, %903, %cst_320 {dimension_numbers = #tpu.dot_dimension_numbers<[1], [1], [0], [0], [0, 0, 1, 0], [], []>} : vector<17x8xbf16>, vector<17x8xbf16>, vector<17x17xf32> -> vector<17x17xf32>
    %cst_321 = arith.constant 0.353553385 : f32
    %905 = vector.broadcast %cst_321 : f32 to vector<17x17xf32>
    %906 = arith.mulf %904, %905 : vector<17x17xf32>
    %cst_322 = arith.constant dense<0xFF800000> : vector<17xf32>
    %907 = vector.multi_reduction <maximumf>, %906, %cst_322 [1] : vector<17x17xf32> to vector<17xf32>
    %908 = vector.shape_cast %907 : vector<17xf32> to vector<17x1xf32>
    %909 = vector.broadcast %908 : vector<17x1xf32> to vector<17x17xf32>
    %910 = arith.subf %906, %909 : vector<17x17xf32>
    %911 = math.exp %910 : vector<17x17xf32>
    %cst_323 = arith.constant dense<0.000000e+00> : vector<17xf32>
    %912 = vector.multi_reduction <add>, %911, %cst_323 [1] : vector<17x17xf32> to vector<17xf32>
    %913 = vector.shape_cast %912 : vector<17xf32> to vector<17x1xf32>
    %914 = tpu.reciprocal %913 {approx = true} : vector<17x1xf32> -> vector<17x1xf32>
    %915 = vector.broadcast %914 : vector<17x1xf32> to vector<17x17xf32>
    %916 = arith.mulf %911, %915 : vector<17x17xf32>
    %917 = arith.truncf %916 : vector<17x17xf32> to vector<17x17xbf16>
    %918 = arith.truncf %901 : vector<17x8xf32> to vector<17x8xbf16>
    %cst_324 = arith.constant dense<0.000000e+00> : vector<17x8xf32>
    %919 = tpu.matmul %917, %918, %cst_324 {dimension_numbers = #tpu.dot_dimension_numbers<[1], [0], [0], [1], [0, 0, 1, 1], [], []>} : vector<17x17xbf16>, vector<17x8xbf16>, vector<17x8xf32> -> vector<17x8xf32>
    %920 = tpu.concatenate %856, %877, %898, %919 in 1 : vector<17x8xf32>, vector<17x8xf32>, vector<17x8xf32>, vector<17x8xf32> -> vector<17x32xf32>
    %921 = arith.truncf %920 : vector<17x32xf32> to vector<17x32xbf16>
    %c240_325 = arith.constant 240 : index
    %c0_326 = arith.constant 0 : index
    %922 = vector.load %arg3[%c240_325, %c0_326] : memref<592x128xbf16, #tpu.memory_space<vmem>>, vector<32x32xbf16>
    %cst_327 = arith.constant dense<0.000000e+00> : vector<17x32xf32>
    %923 = tpu.matmul %921, %922, %cst_327 {dimension_numbers = #tpu.dot_dimension_numbers<[1], [0], [0], [1], [0, 0, 1, 1], [], []>} : vector<17x32xbf16>, vector<32x32xbf16>, vector<17x32xf32> -> vector<17x32xf32>
    %924 = arith.addf %805, %923 : vector<17x32xf32>
    %c96_328 = arith.constant 96 : index
    %c0_329 = arith.constant 0 : index
    %925 = vector.load %arg4[%c96_328, %c0_329] : memref<264x128xf32, #tpu.memory_space<vmem>>, vector<1x32xf32>
    %926 = vector.broadcast %925 : vector<1x32xf32> to vector<17x32xf32>
    %927 = arith.addf %924, %926 : vector<17x32xf32>
    %c104_330 = arith.constant 104 : index
    %c0_331 = arith.constant 0 : index
    %928 = vector.load %arg4[%c104_330, %c0_331] : memref<264x128xf32, #tpu.memory_space<vmem>>, vector<1x32xf32>
    %c112_332 = arith.constant 112 : index
    %c0_333 = arith.constant 0 : index
    %929 = vector.load %arg4[%c112_332, %c0_333] : memref<264x128xf32, #tpu.memory_space<vmem>>, vector<1x32xf32>
    %cst_334 = arith.constant dense<0.000000e+00> : vector<17xf32>
    %930 = vector.multi_reduction <add>, %927, %cst_334 [1] : vector<17x32xf32> to vector<17xf32>
    %931 = vector.shape_cast %930 : vector<17xf32> to vector<17x1xf32>
    %cst_335 = arith.constant 3.200000e+01 : f32
    %932 = vector.broadcast %cst_335 : f32 to vector<17x1xf32>
    %933 = arith.divf %931, %932 : vector<17x1xf32>
    %934 = vector.broadcast %933 : vector<17x1xf32> to vector<17x32xf32>
    %935 = arith.subf %927, %934 : vector<17x32xf32>
    %936 = arith.mulf %935, %935 : vector<17x32xf32>
    %cst_336 = arith.constant dense<0.000000e+00> : vector<17xf32>
    %937 = vector.multi_reduction <add>, %936, %cst_336 [1] : vector<17x32xf32> to vector<17xf32>
    %938 = vector.shape_cast %937 : vector<17xf32> to vector<17x1xf32>
    %cst_337 = arith.constant 3.200000e+01 : f32
    %939 = vector.broadcast %cst_337 : f32 to vector<17x1xf32>
    %940 = arith.divf %938, %939 : vector<17x1xf32>
    %941 = vector.broadcast %933 : vector<17x1xf32> to vector<17x32xf32>
    %942 = arith.subf %927, %941 : vector<17x32xf32>
    %cst_338 = arith.constant 9.99999974E-6 : f32
    %943 = vector.broadcast %cst_338 : f32 to vector<17x1xf32>
    %944 = arith.addf %940, %943 : vector<17x1xf32>
    %945 = math.rsqrt %944 : vector<17x1xf32>
    %946 = vector.broadcast %945 : vector<17x1xf32> to vector<17x32xf32>
    %947 = arith.mulf %942, %946 : vector<17x32xf32>
    %948 = vector.broadcast %928 : vector<1x32xf32> to vector<17x32xf32>
    %949 = arith.mulf %947, %948 : vector<17x32xf32>
    %950 = vector.broadcast %929 : vector<1x32xf32> to vector<17x32xf32>
    %951 = arith.addf %949, %950 : vector<17x32xf32>
    %952 = arith.truncf %951 : vector<17x32xf32> to vector<17x32xbf16>
    %c272_339 = arith.constant 272 : index
    %c0_340 = arith.constant 0 : index
    %953 = vector.load %arg3[%c272_339, %c0_340] : memref<592x128xbf16, #tpu.memory_space<vmem>>, vector<32x64xbf16>
    %cst_341 = arith.constant dense<0.000000e+00> : vector<17x64xf32>
    %954 = tpu.matmul %952, %953, %cst_341 {dimension_numbers = #tpu.dot_dimension_numbers<[1], [0], [0], [1], [0, 0, 1, 1], [], []>} : vector<17x32xbf16>, vector<32x64xbf16>, vector<17x64xf32> -> vector<17x64xf32>
    %c120_342 = arith.constant 120 : index
    %c0_343 = arith.constant 0 : index
    %955 = vector.load %arg4[%c120_342, %c0_343] : memref<264x128xf32, #tpu.memory_space<vmem>>, vector<1x64xf32>
    %956 = vector.broadcast %955 : vector<1x64xf32> to vector<17x64xf32>
    %957 = arith.addf %954, %956 : vector<17x64xf32>
    %958 = arith.mulf %957, %957 : vector<17x64xf32>
    %959 = arith.mulf %957, %958 : vector<17x64xf32>
    %cst_344 = arith.constant 4.471500e-02 : f32
    %960 = vector.broadcast %cst_344 : f32 to vector<17x64xf32>
    %961 = arith.mulf %960, %959 : vector<17x64xf32>
    %962 = arith.addf %957, %961 : vector<17x64xf32>
    %cst_345 = arith.constant 0.797884583 : f32
    %963 = vector.broadcast %cst_345 : f32 to vector<17x64xf32>
    %964 = arith.mulf %963, %962 : vector<17x64xf32>
    %965 = math.tanh %964 : vector<17x64xf32>
    %cst_346 = arith.constant 1.000000e+00 : f32
    %966 = vector.broadcast %cst_346 : f32 to vector<17x64xf32>
    %967 = arith.addf %966, %965 : vector<17x64xf32>
    %cst_347 = arith.constant 5.000000e-01 : f32
    %968 = vector.broadcast %cst_347 : f32 to vector<17x64xf32>
    %969 = arith.mulf %968, %967 : vector<17x64xf32>
    %970 = arith.mulf %957, %969 : vector<17x64xf32>
    %971 = arith.truncf %970 : vector<17x64xf32> to vector<17x64xbf16>
    %c304_348 = arith.constant 304 : index
    %c0_349 = arith.constant 0 : index
    %972 = vector.load %arg3[%c304_348, %c0_349] : memref<592x128xbf16, #tpu.memory_space<vmem>>, vector<64x32xbf16>
    %cst_350 = arith.constant dense<0.000000e+00> : vector<17x32xf32>
    %973 = tpu.matmul %971, %972, %cst_350 {dimension_numbers = #tpu.dot_dimension_numbers<[1], [0], [0], [1], [0, 0, 1, 1], [], []>} : vector<17x64xbf16>, vector<64x32xbf16>, vector<17x32xf32> -> vector<17x32xf32>
    %974 = arith.addf %927, %973 : vector<17x32xf32>
    %c128_351 = arith.constant 128 : index
    %c0_352 = arith.constant 0 : index
    %975 = vector.load %arg4[%c128_351, %c0_352] : memref<264x128xf32, #tpu.memory_space<vmem>>, vector<1x32xf32>
    %976 = vector.broadcast %975 : vector<1x32xf32> to vector<17x32xf32>
    %977 = arith.addf %974, %976 : vector<17x32xf32>
    %c240_353 = arith.constant 240 : index
    %c0_354 = arith.constant 0 : index
    %978 = vector.load %arg4[%c240_353, %c0_354] : memref<264x128xf32, #tpu.memory_space<vmem>>, vector<1x32xf32>
    %c248_355 = arith.constant 248 : index
    %c0_356 = arith.constant 0 : index
    %979 = vector.load %arg4[%c248_355, %c0_356] : memref<264x128xf32, #tpu.memory_space<vmem>>, vector<1x32xf32>
    %cst_357 = arith.constant dense<0.000000e+00> : vector<17xf32>
    %980 = vector.multi_reduction <add>, %977, %cst_357 [1] : vector<17x32xf32> to vector<17xf32>
    %981 = vector.shape_cast %980 : vector<17xf32> to vector<17x1xf32>
    %cst_358 = arith.constant 3.200000e+01 : f32
    %982 = vector.broadcast %cst_358 : f32 to vector<17x1xf32>
    %983 = arith.divf %981, %982 : vector<17x1xf32>
    %984 = vector.broadcast %983 : vector<17x1xf32> to vector<17x32xf32>
    %985 = arith.subf %977, %984 : vector<17x32xf32>
    %986 = arith.mulf %985, %985 : vector<17x32xf32>
    %cst_359 = arith.constant dense<0.000000e+00> : vector<17xf32>
    %987 = vector.multi_reduction <add>, %986, %cst_359 [1] : vector<17x32xf32> to vector<17xf32>
    %988 = vector.shape_cast %987 : vector<17xf32> to vector<17x1xf32>
    %cst_360 = arith.constant 3.200000e+01 : f32
    %989 = vector.broadcast %cst_360 : f32 to vector<17x1xf32>
    %990 = arith.divf %988, %989 : vector<17x1xf32>
    %991 = vector.broadcast %983 : vector<17x1xf32> to vector<17x32xf32>
    %992 = arith.subf %977, %991 : vector<17x32xf32>
    %cst_361 = arith.constant 9.99999974E-6 : f32
    %993 = vector.broadcast %cst_361 : f32 to vector<17x1xf32>
    %994 = arith.addf %990, %993 : vector<17x1xf32>
    %995 = math.rsqrt %994 : vector<17x1xf32>
    %996 = vector.broadcast %995 : vector<17x1xf32> to vector<17x32xf32>
    %997 = arith.mulf %992, %996 : vector<17x32xf32>
    %998 = vector.broadcast %978 : vector<1x32xf32> to vector<17x32xf32>
    %999 = arith.mulf %997, %998 : vector<17x32xf32>
    %1000 = vector.broadcast %979 : vector<1x32xf32> to vector<17x32xf32>
    %1001 = arith.addf %999, %1000 : vector<17x32xf32>
    %1002 = arith.truncf %1001 : vector<17x32xf32> to vector<17x32xbf16>
    %c560_362 = arith.constant 560 : index
    %c0_363 = arith.constant 0 : index
    %1003 = vector.load %arg3[%c560_362, %c0_363] : memref<592x128xbf16, #tpu.memory_space<vmem>>, vector<32x128xbf16>
    %cst_364 = arith.constant dense<0.000000e+00> : vector<17x128xf32>
    %1004 = tpu.matmul %1002, %1003, %cst_364 {dimension_numbers = #tpu.dot_dimension_numbers<[1], [0], [0], [1], [0, 0, 1, 1], [], []>} : vector<17x32xbf16>, vector<32x128xbf16>, vector<17x128xf32> -> vector<17x128xf32>
    %c256_365 = arith.constant 256 : index
    %c0_366 = arith.constant 0 : index
    %1005 = vector.load %arg4[%c256_365, %c0_366] : memref<264x128xf32, #tpu.memory_space<vmem>>, vector<1x128xf32>
    %1006 = vector.broadcast %1005 : vector<1x128xf32> to vector<17x128xf32>
    %1007 = arith.addf %1004, %1006 : vector<17x128xf32>
    %1008 = vector.extract_strided_slice %1007 {offsets = [1, 0], sizes = [16, 128], strides = [1, 1]} : vector<17x128xf32> to vector<16x128xf32>
    %c1_367 = arith.constant 1 : index
    %c0_368 = arith.constant 0 : index
    %c0_369 = arith.constant 0 : index
    %c0_370 = arith.constant 0 : index
    %1009 = vector.load %arg5[%c1_367, %c0_368, %c0_369, %c0_370] : memref<2x2x16x128xf32, #tpu.memory_space<vmem>>, vector<1x1x16x128xf32>
    %1010 = vector.shape_cast %1009 : vector<1x1x16x128xf32> to vector<16x128xf32>
    %1011 = vector.shape_cast %1008 : vector<16x128xf32> to vector<1x1x16x128xf32>
    tpu.vector_store %arg5[%c1_367, %c0_368, %c0_369, %c0_370], %1011 {strides = array<i32>} : memref<2x2x16x128xf32, #tpu.memory_space<vmem>>, vector<1x1x16x128xf32>,
    %c136_371 = arith.constant 136 : index
    %c0_372 = arith.constant 0 : index
    %1012 = vector.load %arg4[%c136_371, %c0_372] : memref<264x128xf32, #tpu.memory_space<vmem>>, vector<1x32xf32>
    %c144_373 = arith.constant 144 : index
    %c0_374 = arith.constant 0 : index
    %1013 = vector.load %arg4[%c144_373, %c0_374] : memref<264x128xf32, #tpu.memory_space<vmem>>, vector<1x32xf32>
    %cst_375 = arith.constant dense<0.000000e+00> : vector<17xf32>
    %1014 = vector.multi_reduction <add>, %977, %cst_375 [1] : vector<17x32xf32> to vector<17xf32>
    %1015 = vector.shape_cast %1014 : vector<17xf32> to vector<17x1xf32>
    %cst_376 = arith.constant 3.200000e+01 : f32
    %1016 = vector.broadcast %cst_376 : f32 to vector<17x1xf32>
    %1017 = arith.divf %1015, %1016 : vector<17x1xf32>
    %1018 = vector.broadcast %1017 : vector<17x1xf32> to vector<17x32xf32>
    %1019 = arith.subf %977, %1018 : vector<17x32xf32>
    %1020 = arith.mulf %1019, %1019 : vector<17x32xf32>
    %cst_377 = arith.constant dense<0.000000e+00> : vector<17xf32>
    %1021 = vector.multi_reduction <add>, %1020, %cst_377 [1] : vector<17x32xf32> to vector<17xf32>
    %1022 = vector.shape_cast %1021 : vector<17xf32> to vector<17x1xf32>
    %cst_378 = arith.constant 3.200000e+01 : f32
    %1023 = vector.broadcast %cst_378 : f32 to vector<17x1xf32>
    %1024 = arith.divf %1022, %1023 : vector<17x1xf32>
    %1025 = vector.broadcast %1017 : vector<17x1xf32> to vector<17x32xf32>
    %1026 = arith.subf %977, %1025 : vector<17x32xf32>
    %cst_379 = arith.constant 9.99999974E-6 : f32
    %1027 = vector.broadcast %cst_379 : f32 to vector<17x1xf32>
    %1028 = arith.addf %1024, %1027 : vector<17x1xf32>
    %1029 = math.rsqrt %1028 : vector<17x1xf32>
    %1030 = vector.broadcast %1029 : vector<17x1xf32> to vector<17x32xf32>
    %1031 = arith.mulf %1026, %1030 : vector<17x32xf32>
    %1032 = vector.broadcast %1012 : vector<1x32xf32> to vector<17x32xf32>
    %1033 = arith.mulf %1031, %1032 : vector<17x32xf32>
    %1034 = vector.broadcast %1013 : vector<1x32xf32> to vector<17x32xf32>
    %1035 = arith.addf %1033, %1034 : vector<17x32xf32>
    %1036 = arith.truncf %1035 : vector<17x32xf32> to vector<17x32xbf16>
    %c368_380 = arith.constant 368 : index
    %c0_381 = arith.constant 0 : index
    %1037 = vector.load %arg3[%c368_380, %c0_381] : memref<592x128xbf16, #tpu.memory_space<vmem>>, vector<32x96xbf16>
    %cst_382 = arith.constant dense<0.000000e+00> : vector<17x96xf32>
    %1038 = tpu.matmul %1036, %1037, %cst_382 {dimension_numbers = #tpu.dot_dimension_numbers<[1], [0], [0], [1], [0, 0, 1, 1], [], []>} : vector<17x32xbf16>, vector<32x96xbf16>, vector<17x96xf32> -> vector<17x96xf32>
    %c152_383 = arith.constant 152 : index
    %c0_384 = arith.constant 0 : index
    %1039 = vector.load %arg4[%c152_383, %c0_384] : memref<264x128xf32, #tpu.memory_space<vmem>>, vector<1x96xf32>
    %1040 = vector.broadcast %1039 : vector<1x96xf32> to vector<17x96xf32>
    %1041 = arith.addf %1038, %1040 : vector<17x96xf32>
    %1042 = vector.extract_strided_slice %1041 {offsets = [0, 0], sizes = [17, 8], strides = [1, 1]} : vector<17x96xf32> to vector<17x8xf32>
    %1043 = vector.extract_strided_slice %1041 {offsets = [0, 32], sizes = [17, 8], strides = [1, 1]} : vector<17x96xf32> to vector<17x8xf32>
    %1044 = vector.extract_strided_slice %1041 {offsets = [0, 64], sizes = [17, 8], strides = [1, 1]} : vector<17x96xf32> to vector<17x8xf32>
    %1045 = arith.truncf %1042 : vector<17x8xf32> to vector<17x8xbf16>
    %1046 = arith.truncf %1043 : vector<17x8xf32> to vector<17x8xbf16>
    %cst_385 = arith.constant dense<0.000000e+00> : vector<17x17xf32>
    %1047 = tpu.matmul %1045, %1046, %cst_385 {dimension_numbers = #tpu.dot_dimension_numbers<[1], [1], [0], [0], [0, 0, 1, 0], [], []>} : vector<17x8xbf16>, vector<17x8xbf16>, vector<17x17xf32> -> vector<17x17xf32>
    %cst_386 = arith.constant 0.353553385 : f32
    %1048 = vector.broadcast %cst_386 : f32 to vector<17x17xf32>
    %1049 = arith.mulf %1047, %1048 : vector<17x17xf32>
    %cst_387 = arith.constant dense<0xFF800000> : vector<17xf32>
    %1050 = vector.multi_reduction <maximumf>, %1049, %cst_387 [1] : vector<17x17xf32> to vector<17xf32>
    %1051 = vector.shape_cast %1050 : vector<17xf32> to vector<17x1xf32>
    %1052 = vector.broadcast %1051 : vector<17x1xf32> to vector<17x17xf32>
    %1053 = arith.subf %1049, %1052 : vector<17x17xf32>
    %1054 = math.exp %1053 : vector<17x17xf32>
    %cst_388 = arith.constant dense<0.000000e+00> : vector<17xf32>
    %1055 = vector.multi_reduction <add>, %1054, %cst_388 [1] : vector<17x17xf32> to vector<17xf32>
    %1056 = vector.shape_cast %1055 : vector<17xf32> to vector<17x1xf32>
    %1057 = tpu.reciprocal %1056 {approx = true} : vector<17x1xf32> -> vector<17x1xf32>
    %1058 = vector.broadcast %1057 : vector<17x1xf32> to vector<17x17xf32>
    %1059 = arith.mulf %1054, %1058 : vector<17x17xf32>
    %1060 = arith.truncf %1059 : vector<17x17xf32> to vector<17x17xbf16>
    %1061 = arith.truncf %1044 : vector<17x8xf32> to vector<17x8xbf16>
    %cst_389 = arith.constant dense<0.000000e+00> : vector<17x8xf32>
    %1062 = tpu.matmul %1060, %1061, %cst_389 {dimension_numbers = #tpu.dot_dimension_numbers<[1], [0], [0], [1], [0, 0, 1, 1], [], []>} : vector<17x17xbf16>, vector<17x8xbf16>, vector<17x8xf32> -> vector<17x8xf32>
    %1063 = vector.extract_strided_slice %1041 {offsets = [0, 8], sizes = [17, 8], strides = [1, 1]} : vector<17x96xf32> to vector<17x8xf32>
    %1064 = vector.extract_strided_slice %1041 {offsets = [0, 40], sizes = [17, 8], strides = [1, 1]} : vector<17x96xf32> to vector<17x8xf32>
    %1065 = vector.extract_strided_slice %1041 {offsets = [0, 72], sizes = [17, 8], strides = [1, 1]} : vector<17x96xf32> to vector<17x8xf32>
    %1066 = arith.truncf %1063 : vector<17x8xf32> to vector<17x8xbf16>
    %1067 = arith.truncf %1064 : vector<17x8xf32> to vector<17x8xbf16>
    %cst_390 = arith.constant dense<0.000000e+00> : vector<17x17xf32>
    %1068 = tpu.matmul %1066, %1067, %cst_390 {dimension_numbers = #tpu.dot_dimension_numbers<[1], [1], [0], [0], [0, 0, 1, 0], [], []>} : vector<17x8xbf16>, vector<17x8xbf16>, vector<17x17xf32> -> vector<17x17xf32>
    %cst_391 = arith.constant 0.353553385 : f32
    %1069 = vector.broadcast %cst_391 : f32 to vector<17x17xf32>
    %1070 = arith.mulf %1068, %1069 : vector<17x17xf32>
    %cst_392 = arith.constant dense<0xFF800000> : vector<17xf32>
    %1071 = vector.multi_reduction <maximumf>, %1070, %cst_392 [1] : vector<17x17xf32> to vector<17xf32>
    %1072 = vector.shape_cast %1071 : vector<17xf32> to vector<17x1xf32>
    %1073 = vector.broadcast %1072 : vector<17x1xf32> to vector<17x17xf32>
    %1074 = arith.subf %1070, %1073 : vector<17x17xf32>
    %1075 = math.exp %1074 : vector<17x17xf32>
    %cst_393 = arith.constant dense<0.000000e+00> : vector<17xf32>
    %1076 = vector.multi_reduction <add>, %1075, %cst_393 [1] : vector<17x17xf32> to vector<17xf32>
    %1077 = vector.shape_cast %1076 : vector<17xf32> to vector<17x1xf32>
    %1078 = tpu.reciprocal %1077 {approx = true} : vector<17x1xf32> -> vector<17x1xf32>
    %1079 = vector.broadcast %1078 : vector<17x1xf32> to vector<17x17xf32>
    %1080 = arith.mulf %1075, %1079 : vector<17x17xf32>
    %1081 = arith.truncf %1080 : vector<17x17xf32> to vector<17x17xbf16>
    %1082 = arith.truncf %1065 : vector<17x8xf32> to vector<17x8xbf16>
    %cst_394 = arith.constant dense<0.000000e+00> : vector<17x8xf32>
    %1083 = tpu.matmul %1081, %1082, %cst_394 {dimension_numbers = #tpu.dot_dimension_numbers<[1], [0], [0], [1], [0, 0, 1, 1], [], []>} : vector<17x17xbf16>, vector<17x8xbf16>, vector<17x8xf32> -> vector<17x8xf32>
    %1084 = vector.extract_strided_slice %1041 {offsets = [0, 16], sizes = [17, 8], strides = [1, 1]} : vector<17x96xf32> to vector<17x8xf32>
    %1085 = vector.extract_strided_slice %1041 {offsets = [0, 48], sizes = [17, 8], strides = [1, 1]} : vector<17x96xf32> to vector<17x8xf32>
    %1086 = vector.extract_strided_slice %1041 {offsets = [0, 80], sizes = [17, 8], strides = [1, 1]} : vector<17x96xf32> to vector<17x8xf32>
    %1087 = arith.truncf %1084 : vector<17x8xf32> to vector<17x8xbf16>
    %1088 = arith.truncf %1085 : vector<17x8xf32> to vector<17x8xbf16>
    %cst_395 = arith.constant dense<0.000000e+00> : vector<17x17xf32>
    %1089 = tpu.matmul %1087, %1088, %cst_395 {dimension_numbers = #tpu.dot_dimension_numbers<[1], [1], [0], [0], [0, 0, 1, 0], [], []>} : vector<17x8xbf16>, vector<17x8xbf16>, vector<17x17xf32> -> vector<17x17xf32>
    %cst_396 = arith.constant 0.353553385 : f32
    %1090 = vector.broadcast %cst_396 : f32 to vector<17x17xf32>
    %1091 = arith.mulf %1089, %1090 : vector<17x17xf32>
    %cst_397 = arith.constant dense<0xFF800000> : vector<17xf32>
    %1092 = vector.multi_reduction <maximumf>, %1091, %cst_397 [1] : vector<17x17xf32> to vector<17xf32>
    %1093 = vector.shape_cast %1092 : vector<17xf32> to vector<17x1xf32>
    %1094 = vector.broadcast %1093 : vector<17x1xf32> to vector<17x17xf32>
    %1095 = arith.subf %1091, %1094 : vector<17x17xf32>
    %1096 = math.exp %1095 : vector<17x17xf32>
    %cst_398 = arith.constant dense<0.000000e+00> : vector<17xf32>
    %1097 = vector.multi_reduction <add>, %1096, %cst_398 [1] : vector<17x17xf32> to vector<17xf32>
    %1098 = vector.shape_cast %1097 : vector<17xf32> to vector<17x1xf32>
    %1099 = tpu.reciprocal %1098 {approx = true} : vector<17x1xf32> -> vector<17x1xf32>
    %1100 = vector.broadcast %1099 : vector<17x1xf32> to vector<17x17xf32>
    %1101 = arith.mulf %1096, %1100 : vector<17x17xf32>
    %1102 = arith.truncf %1101 : vector<17x17xf32> to vector<17x17xbf16>
    %1103 = arith.truncf %1086 : vector<17x8xf32> to vector<17x8xbf16>
    %cst_399 = arith.constant dense<0.000000e+00> : vector<17x8xf32>
    %1104 = tpu.matmul %1102, %1103, %cst_399 {dimension_numbers = #tpu.dot_dimension_numbers<[1], [0], [0], [1], [0, 0, 1, 1], [], []>} : vector<17x17xbf16>, vector<17x8xbf16>, vector<17x8xf32> -> vector<17x8xf32>
    %1105 = vector.extract_strided_slice %1041 {offsets = [0, 24], sizes = [17, 8], strides = [1, 1]} : vector<17x96xf32> to vector<17x8xf32>
    %1106 = vector.extract_strided_slice %1041 {offsets = [0, 56], sizes = [17, 8], strides = [1, 1]} : vector<17x96xf32> to vector<17x8xf32>
    %1107 = vector.extract_strided_slice %1041 {offsets = [0, 88], sizes = [17, 8], strides = [1, 1]} : vector<17x96xf32> to vector<17x8xf32>
    %1108 = arith.truncf %1105 : vector<17x8xf32> to vector<17x8xbf16>
    %1109 = arith.truncf %1106 : vector<17x8xf32> to vector<17x8xbf16>
    %cst_400 = arith.constant dense<0.000000e+00> : vector<17x17xf32>
    %1110 = tpu.matmul %1108, %1109, %cst_400 {dimension_numbers = #tpu.dot_dimension_numbers<[1], [1], [0], [0], [0, 0, 1, 0], [], []>} : vector<17x8xbf16>, vector<17x8xbf16>, vector<17x17xf32> -> vector<17x17xf32>
    %cst_401 = arith.constant 0.353553385 : f32
    %1111 = vector.broadcast %cst_401 : f32 to vector<17x17xf32>
    %1112 = arith.mulf %1110, %1111 : vector<17x17xf32>
    %cst_402 = arith.constant dense<0xFF800000> : vector<17xf32>
    %1113 = vector.multi_reduction <maximumf>, %1112, %cst_402 [1] : vector<17x17xf32> to vector<17xf32>
    %1114 = vector.shape_cast %1113 : vector<17xf32> to vector<17x1xf32>
    %1115 = vector.broadcast %1114 : vector<17x1xf32> to vector<17x17xf32>
    %1116 = arith.subf %1112, %1115 : vector<17x17xf32>
    %1117 = math.exp %1116 : vector<17x17xf32>
    %cst_403 = arith.constant dense<0.000000e+00> : vector<17xf32>
    %1118 = vector.multi_reduction <add>, %1117, %cst_403 [1] : vector<17x17xf32> to vector<17xf32>
    %1119 = vector.shape_cast %1118 : vector<17xf32> to vector<17x1xf32>
    %1120 = tpu.reciprocal %1119 {approx = true} : vector<17x1xf32> -> vector<17x1xf32>
    %1121 = vector.broadcast %1120 : vector<17x1xf32> to vector<17x17xf32>
    %1122 = arith.mulf %1117, %1121 : vector<17x17xf32>
    %1123 = arith.truncf %1122 : vector<17x17xf32> to vector<17x17xbf16>
    %1124 = arith.truncf %1107 : vector<17x8xf32> to vector<17x8xbf16>
    %cst_404 = arith.constant dense<0.000000e+00> : vector<17x8xf32>
    %1125 = tpu.matmul %1123, %1124, %cst_404 {dimension_numbers = #tpu.dot_dimension_numbers<[1], [0], [0], [1], [0, 0, 1, 1], [], []>} : vector<17x17xbf16>, vector<17x8xbf16>, vector<17x8xf32> -> vector<17x8xf32>
    %1126 = tpu.concatenate %1062, %1083, %1104, %1125 in 1 : vector<17x8xf32>, vector<17x8xf32>, vector<17x8xf32>, vector<17x8xf32> -> vector<17x32xf32>
    %1127 = arith.truncf %1126 : vector<17x32xf32> to vector<17x32xbf16>
    %c400_405 = arith.constant 400 : index
    %c0_406 = arith.constant 0 : index
    %1128 = vector.load %arg3[%c400_405, %c0_406] : memref<592x128xbf16, #tpu.memory_space<vmem>>, vector<32x32xbf16>
    %cst_407 = arith.constant dense<0.000000e+00> : vector<17x32xf32>
    %1129 = tpu.matmul %1127, %1128, %cst_407 {dimension_numbers = #tpu.dot_dimension_numbers<[1], [0], [0], [1], [0, 0, 1, 1], [], []>} : vector<17x32xbf16>, vector<32x32xbf16>, vector<17x32xf32> -> vector<17x32xf32>
    %1130 = arith.addf %977, %1129 : vector<17x32xf32>
    %c160_408 = arith.constant 160 : index
    %c0_409 = arith.constant 0 : index
    %1131 = vector.load %arg4[%c160_408, %c0_409] : memref<264x128xf32, #tpu.memory_space<vmem>>, vector<1x32xf32>
    %1132 = vector.broadcast %1131 : vector<1x32xf32> to vector<17x32xf32>
    %1133 = arith.addf %1130, %1132 : vector<17x32xf32>
    %c168_410 = arith.constant 168 : index
    %c0_411 = arith.constant 0 : index
    %1134 = vector.load %arg4[%c168_410, %c0_411] : memref<264x128xf32, #tpu.memory_space<vmem>>, vector<1x32xf32>
    %c176_412 = arith.constant 176 : index
    %c0_413 = arith.constant 0 : index
    %1135 = vector.load %arg4[%c176_412, %c0_413] : memref<264x128xf32, #tpu.memory_space<vmem>>, vector<1x32xf32>
    %cst_414 = arith.constant dense<0.000000e+00> : vector<17xf32>
    %1136 = vector.multi_reduction <add>, %1133, %cst_414 [1] : vector<17x32xf32> to vector<17xf32>
    %1137 = vector.shape_cast %1136 : vector<17xf32> to vector<17x1xf32>
    %cst_415 = arith.constant 3.200000e+01 : f32
    %1138 = vector.broadcast %cst_415 : f32 to vector<17x1xf32>
    %1139 = arith.divf %1137, %1138 : vector<17x1xf32>
    %1140 = vector.broadcast %1139 : vector<17x1xf32> to vector<17x32xf32>
    %1141 = arith.subf %1133, %1140 : vector<17x32xf32>
    %1142 = arith.mulf %1141, %1141 : vector<17x32xf32>
    %cst_416 = arith.constant dense<0.000000e+00> : vector<17xf32>
    %1143 = vector.multi_reduction <add>, %1142, %cst_416 [1] : vector<17x32xf32> to vector<17xf32>
    %1144 = vector.shape_cast %1143 : vector<17xf32> to vector<17x1xf32>
    %cst_417 = arith.constant 3.200000e+01 : f32
    %1145 = vector.broadcast %cst_417 : f32 to vector<17x1xf32>
    %1146 = arith.divf %1144, %1145 : vector<17x1xf32>
    %1147 = vector.broadcast %1139 : vector<17x1xf32> to vector<17x32xf32>
    %1148 = arith.subf %1133, %1147 : vector<17x32xf32>
    %cst_418 = arith.constant 9.99999974E-6 : f32
    %1149 = vector.broadcast %cst_418 : f32 to vector<17x1xf32>
    %1150 = arith.addf %1146, %1149 : vector<17x1xf32>
    %1151 = math.rsqrt %1150 : vector<17x1xf32>
    %1152 = vector.broadcast %1151 : vector<17x1xf32> to vector<17x32xf32>
    %1153 = arith.mulf %1148, %1152 : vector<17x32xf32>
    %1154 = vector.broadcast %1134 : vector<1x32xf32> to vector<17x32xf32>
    %1155 = arith.mulf %1153, %1154 : vector<17x32xf32>
    %1156 = vector.broadcast %1135 : vector<1x32xf32> to vector<17x32xf32>
    %1157 = arith.addf %1155, %1156 : vector<17x32xf32>
    %1158 = arith.truncf %1157 : vector<17x32xf32> to vector<17x32xbf16>
    %c432_419 = arith.constant 432 : index
    %c0_420 = arith.constant 0 : index
    %1159 = vector.load %arg3[%c432_419, %c0_420] : memref<592x128xbf16, #tpu.memory_space<vmem>>, vector<32x64xbf16>
    %cst_421 = arith.constant dense<0.000000e+00> : vector<17x64xf32>
    %1160 = tpu.matmul %1158, %1159, %cst_421 {dimension_numbers = #tpu.dot_dimension_numbers<[1], [0], [0], [1], [0, 0, 1, 1], [], []>} : vector<17x32xbf16>, vector<32x64xbf16>, vector<17x64xf32> -> vector<17x64xf32>
    %c184_422 = arith.constant 184 : index
    %c0_423 = arith.constant 0 : index
    %1161 = vector.load %arg4[%c184_422, %c0_423] : memref<264x128xf32, #tpu.memory_space<vmem>>, vector<1x64xf32>
    %1162 = vector.broadcast %1161 : vector<1x64xf32> to vector<17x64xf32>
    %1163 = arith.addf %1160, %1162 : vector<17x64xf32>
    %1164 = arith.mulf %1163, %1163 : vector<17x64xf32>
    %1165 = arith.mulf %1163, %1164 : vector<17x64xf32>
    %cst_424 = arith.constant 4.471500e-02 : f32
    %1166 = vector.broadcast %cst_424 : f32 to vector<17x64xf32>
    %1167 = arith.mulf %1166, %1165 : vector<17x64xf32>
    %1168 = arith.addf %1163, %1167 : vector<17x64xf32>
    %cst_425 = arith.constant 0.797884583 : f32
    %1169 = vector.broadcast %cst_425 : f32 to vector<17x64xf32>
    %1170 = arith.mulf %1169, %1168 : vector<17x64xf32>
    %1171 = math.tanh %1170 : vector<17x64xf32>
    %cst_426 = arith.constant 1.000000e+00 : f32
    %1172 = vector.broadcast %cst_426 : f32 to vector<17x64xf32>
    %1173 = arith.addf %1172, %1171 : vector<17x64xf32>
    %cst_427 = arith.constant 5.000000e-01 : f32
    %1174 = vector.broadcast %cst_427 : f32 to vector<17x64xf32>
    %1175 = arith.mulf %1174, %1173 : vector<17x64xf32>
    %1176 = arith.mulf %1163, %1175 : vector<17x64xf32>
    %1177 = arith.truncf %1176 : vector<17x64xf32> to vector<17x64xbf16>
    %c464_428 = arith.constant 464 : index
    %c0_429 = arith.constant 0 : index
    %1178 = vector.load %arg3[%c464_428, %c0_429] : memref<592x128xbf16, #tpu.memory_space<vmem>>, vector<64x32xbf16>
    %cst_430 = arith.constant dense<0.000000e+00> : vector<17x32xf32>
    %1179 = tpu.matmul %1177, %1178, %cst_430 {dimension_numbers = #tpu.dot_dimension_numbers<[1], [0], [0], [1], [0, 0, 1, 1], [], []>} : vector<17x64xbf16>, vector<64x32xbf16>, vector<17x32xf32> -> vector<17x32xf32>
    %1180 = arith.addf %1133, %1179 : vector<17x32xf32>
    %c192_431 = arith.constant 192 : index
    %c0_432 = arith.constant 0 : index
    %1181 = vector.load %arg4[%c192_431, %c0_432] : memref<264x128xf32, #tpu.memory_space<vmem>>, vector<1x32xf32>
    %1182 = vector.broadcast %1181 : vector<1x32xf32> to vector<17x32xf32>
    %1183 = arith.addf %1180, %1182 : vector<17x32xf32>
    %c240_433 = arith.constant 240 : index
    %c0_434 = arith.constant 0 : index
    %1184 = vector.load %arg4[%c240_433, %c0_434] : memref<264x128xf32, #tpu.memory_space<vmem>>, vector<1x32xf32>
    %c248_435 = arith.constant 248 : index
    %c0_436 = arith.constant 0 : index
    %1185 = vector.load %arg4[%c248_435, %c0_436] : memref<264x128xf32, #tpu.memory_space<vmem>>, vector<1x32xf32>
    %cst_437 = arith.constant dense<0.000000e+00> : vector<17xf32>
    %1186 = vector.multi_reduction <add>, %1183, %cst_437 [1] : vector<17x32xf32> to vector<17xf32>
    %1187 = vector.shape_cast %1186 : vector<17xf32> to vector<17x1xf32>
    %cst_438 = arith.constant 3.200000e+01 : f32
    %1188 = vector.broadcast %cst_438 : f32 to vector<17x1xf32>
    %1189 = arith.divf %1187, %1188 : vector<17x1xf32>
    %1190 = vector.broadcast %1189 : vector<17x1xf32> to vector<17x32xf32>
    %1191 = arith.subf %1183, %1190 : vector<17x32xf32>
    %1192 = arith.mulf %1191, %1191 : vector<17x32xf32>
    %cst_439 = arith.constant dense<0.000000e+00> : vector<17xf32>
    %1193 = vector.multi_reduction <add>, %1192, %cst_439 [1] : vector<17x32xf32> to vector<17xf32>
    %1194 = vector.shape_cast %1193 : vector<17xf32> to vector<17x1xf32>
    %cst_440 = arith.constant 3.200000e+01 : f32
    %1195 = vector.broadcast %cst_440 : f32 to vector<17x1xf32>
    %1196 = arith.divf %1194, %1195 : vector<17x1xf32>
    %1197 = vector.broadcast %1189 : vector<17x1xf32> to vector<17x32xf32>
    %1198 = arith.subf %1183, %1197 : vector<17x32xf32>
    %cst_441 = arith.constant 9.99999974E-6 : f32
    %1199 = vector.broadcast %cst_441 : f32 to vector<17x1xf32>
    %1200 = arith.addf %1196, %1199 : vector<17x1xf32>
    %1201 = math.rsqrt %1200 : vector<17x1xf32>
    %1202 = vector.broadcast %1201 : vector<17x1xf32> to vector<17x32xf32>
    %1203 = arith.mulf %1198, %1202 : vector<17x32xf32>
    %1204 = vector.broadcast %1184 : vector<1x32xf32> to vector<17x32xf32>
    %1205 = arith.mulf %1203, %1204 : vector<17x32xf32>
    %1206 = vector.broadcast %1185 : vector<1x32xf32> to vector<17x32xf32>
    %1207 = arith.addf %1205, %1206 : vector<17x32xf32>
    %1208 = arith.truncf %1207 : vector<17x32xf32> to vector<17x32xbf16>
    %c560_442 = arith.constant 560 : index
    %c0_443 = arith.constant 0 : index
    %1209 = vector.load %arg3[%c560_442, %c0_443] : memref<592x128xbf16, #tpu.memory_space<vmem>>, vector<32x128xbf16>
    %cst_444 = arith.constant dense<0.000000e+00> : vector<17x128xf32>
    %1210 = tpu.matmul %1208, %1209, %cst_444 {dimension_numbers = #tpu.dot_dimension_numbers<[1], [0], [0], [1], [0, 0, 1, 1], [], []>} : vector<17x32xbf16>, vector<32x128xbf16>, vector<17x128xf32> -> vector<17x128xf32>
    %c256_445 = arith.constant 256 : index
    %c0_446 = arith.constant 0 : index
    %1211 = vector.load %arg4[%c256_445, %c0_446] : memref<264x128xf32, #tpu.memory_space<vmem>>, vector<1x128xf32>
    %1212 = vector.broadcast %1211 : vector<1x128xf32> to vector<17x128xf32>
    %1213 = arith.addf %1210, %1212 : vector<17x128xf32>
    %1214 = vector.extract_strided_slice %1213 {offsets = [1, 0], sizes = [16, 128], strides = [1, 1]} : vector<17x128xf32> to vector<16x128xf32>
    %c1_447 = arith.constant 1 : index
    %c1_448 = arith.constant 1 : index
    %c0_449 = arith.constant 0 : index
    %c0_450 = arith.constant 0 : index
    %1215 = vector.load %arg5[%c1_447, %c1_448, %c0_449, %c0_450] : memref<2x2x16x128xf32, #tpu.memory_space<vmem>>, vector<1x1x16x128xf32>
    %1216 = vector.shape_cast %1215 : vector<1x1x16x128xf32> to vector<16x128xf32>
    %1217 = vector.shape_cast %1214 : vector<16x128xf32> to vector<1x1x16x128xf32>
    tpu.vector_store %arg5[%c1_447, %c1_448, %c0_449, %c0_450], %1217 {strides = array<i32>} : memref<2x2x16x128xf32, #tpu.memory_space<vmem>>, vector<1x1x16x128xf32>,
    return
  }
}

</mosaic_0001>

<bundles_post_ra>
// kernel: squeeze.17
= control target key start
LH: loop header
LB: loop body
LE: loop exit
PB: predicated region body
PF: predicated region fallthrough
CT: control target
= control target key end

     0   :  { %vm66_vm0 = vcmask 31744   ;;  %s1649_s10 = smov 124   ;;  %s1650_s11 = smov 116   ;;  %v1659_v60 = vmov 0.0   ;;  %s2244_s0 = inlined_call_operand.vmem [shape: bf16[2,1,16,48], index: 0, kind: input, shape index: {}]   ;;  %s2245_s1 = inlined_call_operand.vmem [shape: bf16[2,4,4,3,4,4], index: 1, kind: output, shape index: {}]  }
   0x1   :  { %v1522_v0 = vld [vmem:[%s2244_s0] sm:$0xff]   ;;  %v1525_v1 = vld [vmem:[%s2244_s0 + $0x8] sm:$0xff]   ;;  %s1648_s0 = smov 120   ;;  %s1651_s12 = smov 112  }
   0x2   :  { %v1523_v2 = vunpack.c.l.bf16 %v1522_v0  ;;  %v1524_v3 = vunpack.c.h.bf16 %v1522_v0  ;;  %v1519_v4 = vunpack.c.l.bf16 %v1525_v1  ;;  %v1520_v5 = vunpack.c.h.bf16 %v1525_v1  ;;  %s1652_s13 = smov 108   ;;  %s1653_s14 = smov 104  }
   0x3   :  { %s1654_s15 = smov 100   ;;  %s1655_s16 = smov 96  }
   0x4   :  { %51 = vst [vmem:[#allocation1 + $0x8] sm:$0xff] %v1524_v3  ;;  %64 = vst [vmem:[#allocation1] sm:$0xff] %v1523_v2  ;;  %s1656_s17 = smov 92   ;;  %s1657_s18 = smov 88  }
   0x5   :  { %20 = vst [vmem:[#allocation1 + $0x18] sm:$0xff] %v1520_v5  ;;  %36 = vst [vmem:[#allocation1 + $0x10] sm:$0xff] %v1519_v4  ;;  %s1658_s19 = smov 84  }
   0x6   :  { %67 = vst.msk [vmem:[#allocation0] ss:$24 sm:$0xf] %vm66_vm0, %v1523_v2   ;;  %68 = vst.msk [vmem:[#allocation0] ss:$24 sm:$0xf0] %vm66_vm0, %v1523_v2  }
   0x7   :  { %73 = vst.msk [vmem:[#allocation0 + $0xc0] ss:$24 sm:$0xf] %vm66_vm0, %v1524_v3   ;;  %75 = vst.msk [vmem:[#allocation0 + $0xc0] ss:$24 sm:$0xf0] %vm66_vm0, %v1524_v3  }
   0x8   :  { %87 = vst.msk [vmem:[#allocation0 + $0x240] ss:$24 sm:$0xf] %vm66_vm0, %v1520_v5   ;;  %89 = vst.msk [vmem:[#allocation0 + $0x240] ss:$24 sm:$0xf0] %vm66_vm0, %v1520_v5  }
   0x9   :  { %80 = vst.msk [vmem:[#allocation0 + $0x180] ss:$24 sm:$0xf] %vm66_vm0, %v1519_v4   ;;  %82 = vst.msk [vmem:[#allocation0 + $0x180] ss:$24 sm:$0xf0] %vm66_vm0, %v1519_v4  }
   0xb   :  { %v141_v6 = vld.sshfl [vmem:[#allocation1] sm:$0xff pattern:$0x56741230]   ;;  %v154_v7 = vld.sshfl [vmem:[#allocation1 + $0x8] sm:$0xff pattern:$0x56741230]  }
   0xc   :  { %v1548_v8 = vpack.i.bf16 %v154_v7, %v141_v6  ;;  %v167_v9 = vld.sshfl [vmem:[#allocation1 + $0x10] sm:$0xff pattern:$0x56741230]   ;;  %v180_v10 = vld.sshfl [vmem:[#allocation1 + $0x18] sm:$0xff pattern:$0x56741230]  }
   0xd   :  { %v1553_v11 = vpack.i.bf16 %v180_v10, %v167_v9  ;;  %v269_v12 = vld.sshfl [vmem:[#allocation1 + $0x10] sm:$0xff pattern:$0x67452301]   ;;  %v282_v13 = vld.sshfl [vmem:[#allocation1 + $0x18] sm:$0xff pattern:$0x67452301]  }
   0xe   :  { %1549 = vrot.lane.b32.xlu1 %v1548_v8, %s1648_s0  ;;  %1539 = vrot.lane.b32.xlu0 %v1548_v8, %s1649_s10  ;;  %v243_v14 = vld.sshfl [vmem:[#allocation1] sm:$0xff pattern:$0x67452301]   ;;  %v256_v15 = vld.sshfl [vmem:[#allocation1 + $0x8] sm:$0xff pattern:$0x67452301]   ;;  %v1573_v16 = vpack.i.bf16 %v282_v13, %v269_v12 }
   0xf   :  { %v1568_v17 = vpack.i.bf16 %v256_v15, %v243_v14  ;;  %v473_v18 = vld.sshfl [vmem:[#allocation1 + $0x10] sm:$0xff pattern:$0x74563012]   ;;  %v486_v19 = vld.sshfl [vmem:[#allocation1 + $0x18] sm:$0xff pattern:$0x74563012]  }
  0x10   :  { %v447_v20 = vld.sshfl [vmem:[#allocation1] sm:$0xff pattern:$0x74563012]   ;;  %v460_v21 = vld.sshfl [vmem:[#allocation1 + $0x8] sm:$0xff pattern:$0x74563012]   ;;  %v1613_v22 = vpack.i.bf16 %v486_v19, %v473_v18 }
  0x11   :  { %v1608_v23 = vpack.i.bf16 %v460_v21, %v447_v20 }
  0x12   :  { %1554 = vrot.lane.b32.xlu1 %v1553_v11, %s1648_s0  ;;  %1544 = vrot.lane.b32.xlu0 %v1553_v11, %s1649_s10 }
  0x16   :  { %1564 = vrot.lane.b32.xlu1 %v1553_v11, %s1650_s11  ;;  %1559 = vrot.lane.b32.xlu0 %v1548_v8, %s1650_s11 }
  0x1a   :  { %1574 = vrot.lane.b32.xlu1 %v1573_v16, %s1651_s12  ;;  %1569 = vrot.lane.b32.xlu0 %v1568_v17, %s1651_s12 }
  0x1e   :  { %1584 = vrot.lane.b32.xlu1 %v1573_v16, %s1652_s13  ;;  %1579 = vrot.lane.b32.xlu0 %v1568_v17, %s1652_s13 }
  0x22   :  { %1594 = vrot.lane.b32.xlu1 %v1573_v16, %s1653_s14  ;;  %1589 = vrot.lane.b32.xlu0 %v1568_v17, %s1653_s14 }
  0x26   :  { %1604 = vrot.lane.b32.xlu1 %v1573_v16, %s1654_s15  ;;  %1599 = vrot.lane.b32.xlu0 %v1568_v17, %s1654_s15 }
  0x2a   :  { %1614 = vrot.lane.b32.xlu1 %v1613_v22, %s1655_s16  ;;  %1609 = vrot.lane.b32.xlu0 %v1608_v23, %s1655_s16 }
  0x2e   :  { %1624 = vrot.lane.b32.xlu1 %v1613_v22, %s1656_s17  ;;  %1619 = vrot.lane.b32.xlu0 %v1608_v23, %s1656_s17 }
  0x32   :  { %1634 = vrot.lane.b32.xlu1 %v1613_v22, %s1657_s18  ;;  %1629 = vrot.lane.b32.xlu0 %v1608_v23, %s1657_s18 }
  0x36   :  { %1644 = vrot.lane.b32.xlu1 %v1613_v22, %s1658_s19  ;;  %1639 = vrot.lane.b32.xlu0 %v1608_v23, %s1658_s19 }
  0x80   :  { %v1550_v24 = vpop.permute.xlu1 %1549  ;;  %v1540_v25 = vpop.permute.xlu0 %1539 }
  0x81   :  { %v1552_v26 = vunpack.i.h.bf16 %v1550_v24  ;;  %v1551_v27 = vunpack.i.l.bf16 %v1550_v24  ;;  %v1542_v28 = vunpack.i.h.bf16 %v1540_v25  ;;  %v1541_v29 = vunpack.i.l.bf16 %v1540_v25 }
  0x83   :  { %159 = vst.msk [vmem:[#allocation0 + $0xc2] ss:$72 sm:$0x3] %vm66_vm0, %v1552_v26   ;;  %161 = vst.msk [vmem:[#allocation0 + $0x122] ss:$-24 sm:$0xc] %vm66_vm0, %v1552_v26  }
  0x84   :  { %163 = vst.msk [vmem:[#allocation0 + $0x2] ss:$72 sm:$0x30] %vm66_vm0, %v1552_v26   ;;  %165 = vst.msk [vmem:[#allocation0 + $0x1e2] ss:$-24 sm:$0xc0] %vm66_vm0, %v1552_v26   ;;  %v1555_v30 = vpop.permute.xlu1 %1554  ;;  %v1545_v31 = vpop.permute.xlu0 %1544 }
  0x85   :  { %146 = vst.msk [vmem:[#allocation0 + $0x2] ss:$72 sm:$0x3] %vm66_vm0, %v1551_v27   ;;  %148 = vst.msk [vmem:[#allocation0 + $0x62] ss:$-24 sm:$0xc] %vm66_vm0, %v1551_v27   ;;  %v1557_v32 = vunpack.i.h.bf16 %v1555_v30  ;;  %v1556_v33 = vunpack.i.l.bf16 %v1555_v30  ;;  %v1547_v34 = vunpack.i.h.bf16 %v1545_v31  ;;  %v1546_v35 = vunpack.i.l.bf16 %v1545_v31 }
  0x86   :  { %150 = vst.msk [vmem:[#allocation0 - $0xbe] ss:$72 sm:$0x30] %vm66_vm0, %v1551_v27   ;;  %152 = vst.msk [vmem:[#allocation0 + $0x122] ss:$-24 sm:$0xc0] %vm66_vm0, %v1551_v27  }
  0x87   :  { %108 = vst.msk [vmem:[#allocation0 + $0xc1] ss:$72 sm:$0x3] %vm66_vm0, %v1542_v28   ;;  %110 = vst.msk [vmem:[#allocation0 + $0x121] ss:$-24 sm:$0xc] %vm66_vm0, %v1542_v28  }
  0x88   :  { %112 = vst.msk [vmem:[#allocation0 + $0x1] ss:$72 sm:$0x30] %vm66_vm0, %v1542_v28   ;;  %114 = vst.msk [vmem:[#allocation0 + $0x1e1] ss:$-24 sm:$0xc0] %vm66_vm0, %v1542_v28   ;;  %v1565_v36 = vpop.permute.xlu1 %1564  ;;  %v1560_v37 = vpop.permute.xlu0 %1559 }
  0x89   :  { %95 = vst.msk [vmem:[#allocation0 + $0x1] ss:$72 sm:$0x3] %vm66_vm0, %v1541_v29   ;;  %97 = vst.msk [vmem:[#allocation0 + $0x61] ss:$-24 sm:$0xc] %vm66_vm0, %v1541_v29   ;;  %v1567_v38 = vunpack.i.h.bf16 %v1565_v36  ;;  %v1566_v39 = vunpack.i.l.bf16 %v1565_v36  ;;  %v1562_v40 = vunpack.i.h.bf16 %v1560_v37  ;;  %v1561_v41 = vunpack.i.l.bf16 %v1560_v37 }
  0x8a   :  { %99 = vst.msk [vmem:[#allocation0 - $0xbf] ss:$72 sm:$0x30] %vm66_vm0, %v1541_v29   ;;  %101 = vst.msk [vmem:[#allocation0 + $0x121] ss:$-24 sm:$0xc0] %vm66_vm0, %v1541_v29  }
  0x8b   :  { %185 = vst.msk [vmem:[#allocation0 + $0x242] ss:$72 sm:$0x3] %vm66_vm0, %v1557_v32   ;;  %187 = vst.msk [vmem:[#allocation0 + $0x2a2] ss:$-24 sm:$0xc] %vm66_vm0, %v1557_v32  }
  0x8c   :  { %189 = vst.msk [vmem:[#allocation0 + $0x182] ss:$72 sm:$0x30] %vm66_vm0, %v1557_v32   ;;  %191 = vst.msk [vmem:[#allocation0 + $0x362] ss:$-24 sm:$0xc0] %vm66_vm0, %v1557_v32   ;;  %v1575_v42 = vpop.permute.xlu1 %1574  ;;  %v1570_v43 = vpop.permute.xlu0 %1569 }
  0x8d   :  { %172 = vst.msk [vmem:[#allocation0 + $0x182] ss:$72 sm:$0x3] %vm66_vm0, %v1556_v33   ;;  %174 = vst.msk [vmem:[#allocation0 + $0x1e2] ss:$-24 sm:$0xc] %vm66_vm0, %v1556_v33   ;;  %v1577_v44 = vunpack.i.h.bf16 %v1575_v42  ;;  %v1576_v45 = vunpack.i.l.bf16 %v1575_v42  ;;  %v1572_v46 = vunpack.i.h.bf16 %v1570_v43  ;;  %v1571_v47 = vunpack.i.l.bf16 %v1570_v43 }
  0x8e   :  { %176 = vst.msk [vmem:[#allocation0 + $0xc2] ss:$72 sm:$0x30] %vm66_vm0, %v1556_v33   ;;  %178 = vst.msk [vmem:[#allocation0 + $0x2a2] ss:$-24 sm:$0xc0] %vm66_vm0, %v1556_v33  }
  0x8f   :  { %134 = vst.msk [vmem:[#allocation0 + $0x241] ss:$72 sm:$0x3] %vm66_vm0, %v1547_v34   ;;  %136 = vst.msk [vmem:[#allocation0 + $0x2a1] ss:$-24 sm:$0xc] %vm66_vm0, %v1547_v34  }
  0x90   :  { %138 = vst.msk [vmem:[#allocation0 + $0x181] ss:$72 sm:$0x30] %vm66_vm0, %v1547_v34   ;;  %140 = vst.msk [vmem:[#allocation0 + $0x361] ss:$-24 sm:$0xc0] %vm66_vm0, %v1547_v34   ;;  %v1585_v48 = vpop.permute.xlu1 %1584  ;;  %v1580_v49 = vpop.permute.xlu0 %1579 }
  0x91   :  { %121 = vst.msk [vmem:[#allocation0 + $0x181] ss:$72 sm:$0x3] %vm66_vm0, %v1546_v35   ;;  %123 = vst.msk [vmem:[#allocation0 + $0x1e1] ss:$-24 sm:$0xc] %vm66_vm0, %v1546_v35   ;;  %v1587_v50 = vunpack.i.h.bf16 %v1585_v48  ;;  %v1586_v51 = vunpack.i.l.bf16 %v1585_v48  ;;  %v1582_v52 = vunpack.i.h.bf16 %v1580_v49  ;;  %v1581_v53 = vunpack.i.l.bf16 %v1580_v49 }
  0x92   :  { %125 = vst.msk [vmem:[#allocation0 + $0xc1] ss:$72 sm:$0x30] %vm66_vm0, %v1546_v35   ;;  %127 = vst.msk [vmem:[#allocation0 + $0x2a1] ss:$-24 sm:$0xc0] %vm66_vm0, %v1546_v35  }
  0x93   :  { %236 = vst.msk [vmem:[#allocation0 + $0x243] ss:$72 sm:$0x3] %vm66_vm0, %v1567_v38   ;;  %238 = vst.msk [vmem:[#allocation0 + $0x2a3] ss:$-24 sm:$0xc] %vm66_vm0, %v1567_v38  }
  0x94   :  { %240 = vst.msk [vmem:[#allocation0 + $0x183] ss:$72 sm:$0x30] %vm66_vm0, %v1567_v38   ;;  %242 = vst.msk [vmem:[#allocation0 + $0x363] ss:$-24 sm:$0xc0] %vm66_vm0, %v1567_v38   ;;  %v1595_v3 = vpop.permute.xlu1 %1594  ;;  %v1590_v4 = vpop.permute.xlu0 %1589 }
  0x95   :  { %223 = vst.msk [vmem:[#allocation0 + $0x183] ss:$72 sm:$0x3] %vm66_vm0, %v1566_v39   ;;  %225 = vst.msk [vmem:[#allocation0 + $0x1e3] ss:$-24 sm:$0xc] %vm66_vm0, %v1566_v39   ;;  %v1597_v11 = vunpack.i.h.bf16 %v1595_v3  ;;  %v1596_v12 = vunpack.i.l.bf16 %v1595_v3  ;;  %v1592_v13 = vunpack.i.h.bf16 %v1590_v4  ;;  %v1591_v14 = vunpack.i.l.bf16 %v1590_v4 }
  0x96   :  { %227 = vst.msk [vmem:[#allocation0 + $0xc3] ss:$72 sm:$0x30] %vm66_vm0, %v1566_v39   ;;  %229 = vst.msk [vmem:[#allocation0 + $0x2a3] ss:$-24 sm:$0xc0] %vm66_vm0, %v1566_v39  }
  0x97   :  { %210 = vst.msk [vmem:[#allocation0 + $0xc3] ss:$72 sm:$0x3] %vm66_vm0, %v1562_v40   ;;  %212 = vst.msk [vmem:[#allocation0 + $0x123] ss:$-24 sm:$0xc] %vm66_vm0, %v1562_v40  }
  0x98   :  { %214 = vst.msk [vmem:[#allocation0 + $0x3] ss:$72 sm:$0x30] %vm66_vm0, %v1562_v40   ;;  %216 = vst.msk [vmem:[#allocation0 + $0x1e3] ss:$-24 sm:$0xc0] %vm66_vm0, %v1562_v40   ;;  %v1605_v32 = vpop.permute.xlu1 %1604  ;;  %v1600_v37 = vpop.permute.xlu0 %1599 }
  0x99   :  { %197 = vst.msk [vmem:[#allocation0 + $0x3] ss:$72 sm:$0x3] %vm66_vm0, %v1561_v41   ;;  %199 = vst.msk [vmem:[#allocation0 + $0x63] ss:$-24 sm:$0xc] %vm66_vm0, %v1561_v41   ;;  %v1606_v42 = vunpack.i.l.bf16 %v1605_v32 }
  0x9a   :  { %201 = vst.msk [vmem:[#allocation0 - $0xbd] ss:$72 sm:$0x30] %vm66_vm0, %v1561_v41   ;;  %203 = vst.msk [vmem:[#allocation0 + $0x123] ss:$-24 sm:$0xc0] %vm66_vm0, %v1561_v41   ;;  %v1607_v41 = vunpack.i.h.bf16 %v1605_v32 }
  0x9b   :  { %287 = vst.msk [vmem:[#allocation0 + $0x260] ss:$-24 sm:$0x3] %vm66_vm0, %v1577_v44   ;;  %289 = vst.msk [vmem:[#allocation0 + $0x2c0] ss:$-24 sm:$0xc] %vm66_vm0, %v1577_v44  }
  0x9c   :  { %291 = vst.msk [vmem:[#allocation0 + $0x320] ss:$-24 sm:$0x30] %vm66_vm0, %v1577_v44   ;;  %293 = vst.msk [vmem:[#allocation0 + $0x380] ss:$-24 sm:$0xc0] %vm66_vm0, %v1577_v44   ;;  %v1610_v3 = vpop.permute.xlu0 %1609 }
  0x9d   :  { %274 = vst.msk [vmem:[#allocation0 + $0x1a0] ss:$-24 sm:$0x3] %vm66_vm0, %v1576_v45   ;;  %276 = vst.msk [vmem:[#allocation0 + $0x200] ss:$-24 sm:$0xc] %vm66_vm0, %v1576_v45  }
  0x9e   :  { %278 = vst.msk [vmem:[#allocation0 + $0x260] ss:$-24 sm:$0x30] %vm66_vm0, %v1576_v45   ;;  %280 = vst.msk [vmem:[#allocation0 + $0x2c0] ss:$-24 sm:$0xc0] %vm66_vm0, %v1576_v45  }
  0x9f   :  { %261 = vst.msk [vmem:[#allocation0 + $0xe0] ss:$-24 sm:$0x3] %vm66_vm0, %v1572_v46   ;;  %263 = vst.msk [vmem:[#allocation0 + $0x140] ss:$-24 sm:$0xc] %vm66_vm0, %v1572_v46  }
  0xa0   :  { %265 = vst.msk [vmem:[#allocation0 + $0x1a0] ss:$-24 sm:$0x30] %vm66_vm0, %v1572_v46   ;;  %267 = vst.msk [vmem:[#allocation0 + $0x200] ss:$-24 sm:$0xc0] %vm66_vm0, %v1572_v46  }
  0xa1   :  { %248 = vst.msk [vmem:[#allocation0 + $0x20] ss:$-24 sm:$0x3] %vm66_vm0, %v1571_v47   ;;  %250 = vst.msk [vmem:[#allocation0 + $0x80] ss:$-24 sm:$0xc] %vm66_vm0, %v1571_v47  }
  0xa2   :  { %252 = vst.msk [vmem:[#allocation0 + $0xe0] ss:$-24 sm:$0x30] %vm66_vm0, %v1571_v47   ;;  %254 = vst.msk [vmem:[#allocation0 + $0x140] ss:$-24 sm:$0xc0] %vm66_vm0, %v1571_v47  }
  0xa3   :  { %v988_v54 = vld [vmem:[#allocation0 + $0x180] sm:$0xf]  ;;  %v1009_v55 = vld [vmem:[#allocation0 + $0x198] sm:$0xf]  ;;  %v1030_v56 = vld [vmem:[#allocation0 + $0x1b0] sm:$0xf] }
  0xa4   :  { %v1051_v57 = vld [vmem:[#allocation0 + $0x1c8] sm:$0xf]  ;;  %v1072_v58 = vld [vmem:[#allocation0 + $0x1e0] sm:$0xf]  ;;  %v1093_v59 = vld [vmem:[#allocation0 + $0x1f8] sm:$0xf]  ;;  %v989_v61 = vpack.c.bf16 %v1659_v60, %v988_v54  ;;  %v1010_v62 = vpack.c.bf16 %v1659_v60, %v1009_v55  ;;  %v1031_v63 = vpack.c.bf16 %v1659_v60, %v1030_v56 }
  0xa5   :  { %338 = vst.msk [vmem:[#allocation0 + $0x261] ss:$-24 sm:$0x3] %vm66_vm0, %v1587_v50   ;;  %340 = vst.msk [vmem:[#allocation0 + $0x2c1] ss:$-24 sm:$0xc] %vm66_vm0, %v1587_v50   ;;  %v1052_v5 = vpack.c.bf16 %v1659_v60, %v1051_v57  ;;  %v1073_v6 = vpack.c.bf16 %v1659_v60, %v1072_v58  ;;  %v1094_v7 = vpack.c.bf16 %v1659_v60, %v1093_v59  ;;  %v1602_v58 = vunpack.i.h.bf16 %v1600_v37 }
  0xa6   :  { %342 = vst.msk [vmem:[#allocation0 + $0x321] ss:$-24 sm:$0x30] %vm66_vm0, %v1587_v50   ;;  %344 = vst.msk [vmem:[#allocation0 + $0x381] ss:$-24 sm:$0xc0] %vm66_vm0, %v1587_v50  }
  0xa7   :  { %325 = vst.msk [vmem:[#allocation0 + $0x1a1] ss:$-24 sm:$0x3] %vm66_vm0, %v1586_v51   ;;  %327 = vst.msk [vmem:[#allocation0 + $0x201] ss:$-24 sm:$0xc] %vm66_vm0, %v1586_v51  }
  0xa8   :  { %329 = vst.msk [vmem:[#allocation0 + $0x261] ss:$-24 sm:$0x30] %vm66_vm0, %v1586_v51   ;;  %331 = vst.msk [vmem:[#allocation0 + $0x2c1] ss:$-24 sm:$0xc0] %vm66_vm0, %v1586_v51  }
  0xa9   :  { %312 = vst.msk [vmem:[#allocation0 + $0xe1] ss:$-24 sm:$0x3] %vm66_vm0, %v1582_v52   ;;  %314 = vst.msk [vmem:[#allocation0 + $0x141] ss:$-24 sm:$0xc] %vm66_vm0, %v1582_v52  }
  0xaa   :  { %316 = vst.msk [vmem:[#allocation0 + $0x1a1] ss:$-24 sm:$0x30] %vm66_vm0, %v1582_v52   ;;  %318 = vst.msk [vmem:[#allocation0 + $0x201] ss:$-24 sm:$0xc0] %vm66_vm0, %v1582_v52  }
  0xab   :  { %299 = vst.msk [vmem:[#allocation0 + $0x21] ss:$-24 sm:$0x3] %vm66_vm0, %v1581_v53   ;;  %301 = vst.msk [vmem:[#allocation0 + $0x81] ss:$-24 sm:$0xc] %vm66_vm0, %v1581_v53  }
  0xac   :  { %303 = vst.msk [vmem:[#allocation0 + $0xe1] ss:$-24 sm:$0x30] %vm66_vm0, %v1581_v53   ;;  %305 = vst.msk [vmem:[#allocation0 + $0x141] ss:$-24 sm:$0xc0] %vm66_vm0, %v1581_v53  }
  0xad   :  { %v1114_v0 = vld [vmem:[#allocation0 + $0x210] sm:$0xf]  ;;  %v1135_v1 = vld [vmem:[#allocation0 + $0x228] sm:$0xf]  ;;  %v1156_v2 = vld [vmem:[#allocation0 + $0x240] sm:$0xf] }
  0xae   :  { %v1177_v8 = vld [vmem:[#allocation0 + $0x258] sm:$0xf]  ;;  %v1198_v9 = vld [vmem:[#allocation0 + $0x270] sm:$0xf]  ;;  %v1219_v10 = vld [vmem:[#allocation0 + $0x288] sm:$0xf]  ;;  %v1115_v18 = vpack.c.bf16 %v1659_v60, %v1114_v0  ;;  %v1136_v19 = vpack.c.bf16 %v1659_v60, %v1135_v1  ;;  %v1157_v20 = vpack.c.bf16 %v1659_v60, %v1156_v2  ;;  %v1601_v1 = vunpack.i.l.bf16 %v1600_v37  ;;  %v1615_v2 = vpop.permute.xlu1 %1614 }
  0xaf   :  { %1469 = vst [vmem:[%s2245_s1 + $0x60] sm:$0x3] %v989_v61  ;;  %1472 = vst [vmem:[%s2245_s1 + $0x66] sm:$0x3] %v1010_v62  ;;  %v1240_v15 = vld [vmem:[#allocation0 + $0x2a0] sm:$0xf]  ;;  %v1178_v21 = vpack.c.bf16 %v1659_v60, %v1177_v8  ;;  %v1199_v25 = vpack.c.bf16 %v1659_v60, %v1198_v9  ;;  %v1220_v26 = vpack.c.bf16 %v1659_v60, %v1219_v10  ;;  %v1612_v8 = vunpack.i.h.bf16 %v1610_v3 }
  0xb0   :  { %1475 = vst [vmem:[%s2245_s1 + $0x6c] sm:$0x3] %v1031_v63  ;;  %v1261_v16 = vld [vmem:[#allocation0 + $0x2b8] sm:$0xf]  ;;  %v1282_v17 = vld [vmem:[#allocation0 + $0x2d0] sm:$0xf]  ;;  %v1241_v27 = vpack.c.bf16 %v1659_v60, %v1240_v15  ;;  %v1611_v9 = vunpack.i.l.bf16 %v1610_v3 }
  0xb1   :  { %1478 = vst [vmem:[%s2245_s1 + $0x72] sm:$0x3] %v1052_v5  ;;  %1481 = vst [vmem:[%s2245_s1 + $0x78] sm:$0x3] %v1073_v6  ;;  %v1303_v22 = vld [vmem:[#allocation0 + $0x2e8] sm:$0xf]  ;;  %v1262_v28 = vpack.c.bf16 %v1659_v60, %v1261_v16  ;;  %v1283_v35 = vpack.c.bf16 %v1659_v60, %v1282_v17  ;;  %v1617_v6 = vunpack.i.h.bf16 %v1615_v2 }
  0xb2   :  { %1484 = vst [vmem:[%s2245_s1 + $0x7e] sm:$0x3] %v1094_v7  ;;  %v655_v23 = vld [vmem:[#allocation0] sm:$0xf]  ;;  %v673_v24 = vld [vmem:[#allocation0 + $0x18] sm:$0xf]  ;;  %v1304_v36 = vpack.c.bf16 %v1659_v60, %v1303_v22  ;;  %v1616_v7 = vunpack.i.l.bf16 %v1615_v2  ;;  %v1625_v10 = vpop.permute.xlu1 %1624 }
  0xb3   :  { %389 = vst.msk [vmem:[#allocation0 + $0x262] ss:$-24 sm:$0x3] %vm66_vm0, %v1597_v11   ;;  %391 = vst.msk [vmem:[#allocation0 + $0x2c2] ss:$-24 sm:$0xc] %vm66_vm0, %v1597_v11   ;;  %v656_v33 = vpack.c.bf16 %v1659_v60, %v655_v23  ;;  %v674_v34 = vpack.c.bf16 %v1659_v60, %v673_v24 }
  0xb4   :  { %393 = vst.msk [vmem:[#allocation0 + $0x322] ss:$-24 sm:$0x30] %vm66_vm0, %v1597_v11   ;;  %395 = vst.msk [vmem:[#allocation0 + $0x382] ss:$-24 sm:$0xc0] %vm66_vm0, %v1597_v11   ;;  %v1620_v11 = vpop.permute.xlu0 %1619 }
  0xb5   :  { %376 = vst.msk [vmem:[#allocation0 + $0x1a2] ss:$-24 sm:$0x3] %vm66_vm0, %v1596_v12   ;;  %378 = vst.msk [vmem:[#allocation0 + $0x202] ss:$-24 sm:$0xc] %vm66_vm0, %v1596_v12   ;;  %v1621_v15 = vunpack.i.l.bf16 %v1620_v11 }
  0xb6   :  { %380 = vst.msk [vmem:[#allocation0 + $0x262] ss:$-24 sm:$0x30] %vm66_vm0, %v1596_v12   ;;  %382 = vst.msk [vmem:[#allocation0 + $0x2c2] ss:$-24 sm:$0xc0] %vm66_vm0, %v1596_v12   ;;  %v1627_v12 = vunpack.i.h.bf16 %v1625_v10 }
  0xb7   :  { %363 = vst.msk [vmem:[#allocation0 + $0xe2] ss:$-24 sm:$0x3] %vm66_vm0, %v1592_v13   ;;  %365 = vst.msk [vmem:[#allocation0 + $0x142] ss:$-24 sm:$0xc] %vm66_vm0, %v1592_v13  }
  0xb8   :  { %367 = vst.msk [vmem:[#allocation0 + $0x1a2] ss:$-24 sm:$0x30] %vm66_vm0, %v1592_v13   ;;  %369 = vst.msk [vmem:[#allocation0 + $0x202] ss:$-24 sm:$0xc0] %vm66_vm0, %v1592_v13   ;;  %v1626_v13 = vunpack.i.l.bf16 %v1625_v10  ;;  %v1630_v32 = vpop.permute.xlu0 %1629 }
  0xb9   :  { %350 = vst.msk [vmem:[#allocation0 + $0x22] ss:$-24 sm:$0x3] %vm66_vm0, %v1591_v14   ;;  %352 = vst.msk [vmem:[#allocation0 + $0x82] ss:$-24 sm:$0xc] %vm66_vm0, %v1591_v14  }
  0xba   :  { %354 = vst.msk [vmem:[#allocation0 + $0xe2] ss:$-24 sm:$0x30] %vm66_vm0, %v1591_v14   ;;  %356 = vst.msk [vmem:[#allocation0 + $0x142] ss:$-24 sm:$0xc0] %vm66_vm0, %v1591_v14   ;;  %v1622_v14 = vunpack.i.h.bf16 %v1620_v11 }
  0xbb   :  { %v694_v29 = vld [vmem:[#allocation0 + $0x30] sm:$0xf]  ;;  %v715_v30 = vld [vmem:[#allocation0 + $0x48] sm:$0xf]  ;;  %v736_v31 = vld [vmem:[#allocation0 + $0x60] sm:$0xf] }
  0xbc   :  { %1487 = vst [vmem:[%s2245_s1 + $0x84] sm:$0x3] %v1115_v18  ;;  %1490 = vst [vmem:[%s2245_s1 + $0x8a] sm:$0x3] %v1136_v19  ;;  %v757_v38 = vld [vmem:[#allocation0 + $0x78] sm:$0xf]  ;;  %v695_v43 = vpack.c.bf16 %v1659_v60, %v694_v29  ;;  %v716_v44 = vpack.c.bf16 %v1659_v60, %v715_v30  ;;  %v737_v48 = vpack.c.bf16 %v1659_v60, %v736_v31  ;;  %v1635_v31 = vpop.permute.xlu1 %1634 }
  0xbd   :  { %1493 = vst [vmem:[%s2245_s1 + $0x90] sm:$0x3] %v1157_v20  ;;  %1496 = vst [vmem:[%s2245_s1 + $0x96] sm:$0x3] %v1178_v21  ;;  %v778_v39 = vld [vmem:[#allocation0 + $0x90] sm:$0xf]  ;;  %v758_v49 = vpack.c.bf16 %v1659_v60, %v757_v38 }
  0xbe   :  { %v799_v40 = vld [vmem:[#allocation0 + $0xa8] sm:$0xf]  ;;  %1499 = vst [vmem:[%s2245_s1 + $0x9c] sm:$0x3] %v1199_v25  ;;  %1502 = vst [vmem:[%s2245_s1 + $0xa2] sm:$0x3] %v1220_v26  ;;  %v779_v50 = vpack.c.bf16 %v1659_v60, %v778_v39  ;;  %v1637_v39 = vunpack.i.h.bf16 %v1635_v31 }
  0xbf   :  { %1505 = vst [vmem:[%s2245_s1 + $0xa8] sm:$0x3] %v1241_v27  ;;  %1508 = vst [vmem:[%s2245_s1 + $0xae] sm:$0x3] %v1262_v28  ;;  %v820_v45 = vld [vmem:[#allocation0 + $0xc0] sm:$0xf]  ;;  %v800_v51 = vpack.c.bf16 %v1659_v60, %v799_v40 }
  0xc0   :  { %v841_v46 = vld [vmem:[#allocation0 + $0xd8] sm:$0xf]  ;;  %v862_v47 = vld [vmem:[#allocation0 + $0xf0] sm:$0xf]  ;;  %658 = vst [vmem:[%s2245_s1] sm:$0x3] %v656_v33  ;;  %v821_v55 = vpack.c.bf16 %v1659_v60, %v820_v45 }
  0xc1   :  { %1424 = vst [vmem:[%s2245_s1 + $0x6] sm:$0x3] %v674_v34  ;;  %1511 = vst [vmem:[%s2245_s1 + $0xb4] sm:$0x3] %v1283_v35  ;;  %v883_v52 = vld [vmem:[#allocation0 + $0x108] sm:$0xf]  ;;  %v842_v56 = vpack.c.bf16 %v1659_v60, %v841_v46  ;;  %v863_v57 = vpack.c.bf16 %v1659_v60, %v862_v47  ;;  %v1636_v46 = vunpack.i.l.bf16 %v1635_v31 }
  0xc2   :  { %1514 = vst [vmem:[%s2245_s1 + $0xba] sm:$0x3] %v1304_v36  ;;  %v904_v53 = vld [vmem:[#allocation0 + $0x120] sm:$0xf]  ;;  %v925_v54 = vld [vmem:[#allocation0 + $0x138] sm:$0xf]  ;;  %v884_v62 = vpack.c.bf16 %v1659_v60, %v883_v52 }
  0xc3   :  { %440 = vst.msk [vmem:[#allocation0 + $0x263] ss:$-24 sm:$0x3] %vm66_vm0, %v1607_v41   ;;  %442 = vst.msk [vmem:[#allocation0 + $0x2c3] ss:$-24 sm:$0xc] %vm66_vm0, %v1607_v41   ;;  %v905_v63 = vpack.c.bf16 %v1659_v60, %v904_v53  ;;  %v926_v0 = vpack.c.bf16 %v1659_v60, %v925_v54  ;;  %v1632_v53 = vunpack.i.h.bf16 %v1630_v32 }
  0xc4   :  { %444 = vst.msk [vmem:[#allocation0 + $0x323] ss:$-24 sm:$0x30] %vm66_vm0, %v1607_v41   ;;  %446 = vst.msk [vmem:[#allocation0 + $0x383] ss:$-24 sm:$0xc0] %vm66_vm0, %v1607_v41  }
  0xc5   :  { %427 = vst.msk [vmem:[#allocation0 + $0x1a3] ss:$-24 sm:$0x3] %vm66_vm0, %v1606_v42   ;;  %429 = vst.msk [vmem:[#allocation0 + $0x203] ss:$-24 sm:$0xc] %vm66_vm0, %v1606_v42  }
  0xc6   :  { %431 = vst.msk [vmem:[#allocation0 + $0x263] ss:$-24 sm:$0x30] %vm66_vm0, %v1606_v42   ;;  %433 = vst.msk [vmem:[#allocation0 + $0x2c3] ss:$-24 sm:$0xc0] %vm66_vm0, %v1606_v42  }
  0xc7   :  { %1427 = vst [vmem:[%s2245_s1 + $0xc] sm:$0x3] %v695_v43  ;;  %1430 = vst [vmem:[%s2245_s1 + $0x12] sm:$0x3] %v716_v44  ;;  %v946_v59 = vld [vmem:[#allocation0 + $0x150] sm:$0xf] }
  0xc8   :  { %v967_v61 = vld [vmem:[#allocation0 + $0x168] sm:$0xf]  ;;  %1433 = vst [vmem:[%s2245_s1 + $0x18] sm:$0x3] %v737_v48  ;;  %1436 = vst [vmem:[%s2245_s1 + $0x1e] sm:$0x3] %v758_v49  ;;  %v947_v4 = vpack.c.bf16 %v1659_v60, %v946_v59 }
  0xc9   :  { %1439 = vst [vmem:[%s2245_s1 + $0x24] sm:$0x3] %v779_v50  ;;  %1442 = vst [vmem:[%s2245_s1 + $0x2a] sm:$0x3] %v800_v51  ;;  %v968_v5 = vpack.c.bf16 %v1659_v60, %v967_v61  ;;  %v1631_v61 = vunpack.i.l.bf16 %v1630_v32 }
  0xca   :  { %414 = vst.msk [vmem:[#allocation0 + $0xe3] ss:$-24 sm:$0x3] %vm66_vm0, %v1602_v58   ;;  %416 = vst.msk [vmem:[#allocation0 + $0x143] ss:$-24 sm:$0xc] %vm66_vm0, %v1602_v58  }
  0xcb   :  { %418 = vst.msk [vmem:[#allocation0 + $0x1a3] ss:$-24 sm:$0x30] %vm66_vm0, %v1602_v58   ;;  %420 = vst.msk [vmem:[#allocation0 + $0x203] ss:$-24 sm:$0xc0] %vm66_vm0, %v1602_v58  }
  0xcc   :  { %1445 = vst [vmem:[%s2245_s1 + $0x30] sm:$0x3] %v821_v55  ;;  %1448 = vst [vmem:[%s2245_s1 + $0x36] sm:$0x3] %v842_v56  ;;  %v1247_v16 = vld [vmem:[#allocation0 + $0x2a8] sm:$0xf] }
  0xcd   :  { %1451 = vst [vmem:[%s2245_s1 + $0x3c] sm:$0x3] %v863_v57  ;;  %401 = vst.msk [vmem:[#allocation0 + $0x23] ss:$-24 sm:$0x3] %vm66_vm0, %v1601_v1   ;;  %v1248_v19 = vpack.c.bf16 %v1659_v60, %v1247_v16 }
  0xce   :  { %403 = vst.msk [vmem:[#allocation0 + $0x83] ss:$-24 sm:$0xc] %vm66_vm0, %v1601_v1   ;;  %405 = vst.msk [vmem:[#allocation0 + $0xe3] ss:$-24 sm:$0x30] %vm66_vm0, %v1601_v1  }
  0xcf   :  { %407 = vst.msk [vmem:[#allocation0 + $0x143] ss:$-24 sm:$0xc0] %vm66_vm0, %v1601_v1   ;;  %1454 = vst [vmem:[%s2245_s1 + $0x42] sm:$0x3] %v884_v62  ;;  %v1645_v62 = vpop.permute.xlu1 %1644 }
  0xd0   :  { %1457 = vst [vmem:[%s2245_s1 + $0x48] sm:$0x3] %v905_v63  ;;  %1460 = vst [vmem:[%s2245_s1 + $0x4e] sm:$0x3] %v926_v0  ;;  %v1268_v17 = vld [vmem:[#allocation0 + $0x2c0] sm:$0xf]  ;;  %v1640_v63 = vpop.permute.xlu0 %1639 }
  0xd1   :  { %1463 = vst [vmem:[%s2245_s1 + $0x54] sm:$0x3] %v947_v4  ;;  %1466 = vst [vmem:[%s2245_s1 + $0x5a] sm:$0x3] %v968_v5  ;;  %v995_v18 = vld [vmem:[#allocation0 + $0x188] sm:$0xf]  ;;  %v1269_v20 = vpack.c.bf16 %v1659_v60, %v1268_v17 }
  0xd2   :  { %491 = vst.msk [vmem:[#allocation0 + $0x280] ss:$-24 sm:$0x7] %vm66_vm0, %v1617_v6   ;;  %493 = vst.msk [vmem:[#allocation0 + $0x1c0] ss:$72 sm:$0x18] %vm66_vm0, %v1617_v6   ;;  %v996_v24 = vpack.c.bf16 %v1659_v60, %v995_v18 }
  0xd3   :  { %495 = vst.msk [vmem:[#allocation0 + $0x340] ss:$-24 sm:$0x60] %vm66_vm0, %v1617_v6   ;;  %497 = vst.msk [vmem:[#allocation0 + $0x2f1] sm:$0x80] %vm66_vm0, %v1617_v6   ;;  %v1647_v6 = vunpack.i.h.bf16 %v1645_v62 }
  0xd4   :  { %478 = vst.msk [vmem:[#allocation0 + $0x1c0] ss:$-24 sm:$0x7] %vm66_vm0, %v1616_v7   ;;  %480 = vst.msk [vmem:[#allocation0 + $0x100] ss:$72 sm:$0x18] %vm66_vm0, %v1616_v7  }
  0xd5   :  { %482 = vst.msk [vmem:[#allocation0 + $0x280] ss:$-24 sm:$0x60] %vm66_vm0, %v1616_v7   ;;  %484 = vst.msk [vmem:[#allocation0 + $0x231] sm:$0x80] %vm66_vm0, %v1616_v7  }
  0xd6   :  { %465 = vst.msk [vmem:[#allocation0 + $0x100] ss:$-24 sm:$0x7] %vm66_vm0, %v1612_v8   ;;  %467 = vst.msk [vmem:[#allocation0 + $0x40] ss:$72 sm:$0x18] %vm66_vm0, %v1612_v8  }
  0xd7   :  { %469 = vst.msk [vmem:[#allocation0 + $0x1c0] ss:$-24 sm:$0x60] %vm66_vm0, %v1612_v8   ;;  %471 = vst.msk [vmem:[#allocation0 + $0x171] sm:$0x80] %vm66_vm0, %v1612_v8  }
  0xd8   :  { %452 = vst.msk [vmem:[#allocation0 + $0x40] ss:$-24 sm:$0x7] %vm66_vm0, %v1611_v9   ;;  %454 = vst.msk [vmem:[#allocation0 - $0x80] ss:$72 sm:$0x18] %vm66_vm0, %v1611_v9  }
  0xd9   :  { %456 = vst.msk [vmem:[#allocation0 + $0x100] ss:$-24 sm:$0x60] %vm66_vm0, %v1611_v9   ;;  %458 = vst.msk [vmem:[#allocation0 + $0xb1] sm:$0x80] %vm66_vm0, %v1611_v9  }
  0xda   :  { %v1016_v21 = vld [vmem:[#allocation0 + $0x1a0] sm:$0xf]  ;;  %v1037_v22 = vld [vmem:[#allocation0 + $0x1b8] sm:$0xf]  ;;  %v1058_v23 = vld [vmem:[#allocation0 + $0x1d0] sm:$0xf] }
  0xdb   :  { %542 = vst.msk [vmem:[#allocation0 + $0x281] ss:$-24 sm:$0x7] %vm66_vm0, %v1627_v12   ;;  %544 = vst.msk [vmem:[#allocation0 + $0x1c1] ss:$72 sm:$0x18] %vm66_vm0, %v1627_v12   ;;  %v1017_v28 = vpack.c.bf16 %v1659_v60, %v1016_v21  ;;  %v1038_v29 = vpack.c.bf16 %v1659_v60, %v1037_v22  ;;  %v1059_v30 = vpack.c.bf16 %v1659_v60, %v1058_v23 }
  0xdc   :  { %546 = vst.msk [vmem:[#allocation0 + $0x341] ss:$-24 sm:$0x60] %vm66_vm0, %v1627_v12   ;;  %548 = vst.msk [vmem:[#allocation0 + $0x2f2] sm:$0x80] %vm66_vm0, %v1627_v12  }
  0xdd   :  { %529 = vst.msk [vmem:[#allocation0 + $0x1c1] ss:$-24 sm:$0x7] %vm66_vm0, %v1626_v13   ;;  %531 = vst.msk [vmem:[#allocation0 + $0x101] ss:$72 sm:$0x18] %vm66_vm0, %v1626_v13  }
  0xde   :  { %533 = vst.msk [vmem:[#allocation0 + $0x281] ss:$-24 sm:$0x60] %vm66_vm0, %v1626_v13   ;;  %535 = vst.msk [vmem:[#allocation0 + $0x232] sm:$0x80] %vm66_vm0, %v1626_v13   ;;  %v1646_v13 = vunpack.i.l.bf16 %v1645_v62 }
  0xdf   :  { %516 = vst.msk [vmem:[#allocation0 + $0x101] ss:$-24 sm:$0x7] %vm66_vm0, %v1622_v14   ;;  %518 = vst.msk [vmem:[#allocation0 + $0x41] ss:$72 sm:$0x18] %vm66_vm0, %v1622_v14  }
  0xe0   :  { %520 = vst.msk [vmem:[#allocation0 + $0x1c1] ss:$-24 sm:$0x60] %vm66_vm0, %v1622_v14   ;;  %522 = vst.msk [vmem:[#allocation0 + $0x172] sm:$0x80] %vm66_vm0, %v1622_v14  }
  0xe1   :  { %503 = vst.msk [vmem:[#allocation0 + $0x41] ss:$-24 sm:$0x7] %vm66_vm0, %v1621_v15   ;;  %505 = vst.msk [vmem:[#allocation0 - $0x7f] ss:$72 sm:$0x18] %vm66_vm0, %v1621_v15  }
  0xe2   :  { %507 = vst.msk [vmem:[#allocation0 + $0x101] ss:$-24 sm:$0x60] %vm66_vm0, %v1621_v15   ;;  %509 = vst.msk [vmem:[#allocation0 + $0xb2] sm:$0x80] %vm66_vm0, %v1621_v15  }
  0xe3   :  { %v1079_v25 = vld [vmem:[#allocation0 + $0x1e8] sm:$0xf]  ;;  %v1100_v26 = vld [vmem:[#allocation0 + $0x200] sm:$0xf]  ;;  %v1121_v27 = vld [vmem:[#allocation0 + $0x218] sm:$0xf] }
  0xe4   :  { %1506 = vst [vmem:[%s2245_s1 + $0xaa] sm:$0x3] %v1248_v19  ;;  %1509 = vst [vmem:[%s2245_s1 + $0xb0] sm:$0x3] %v1269_v20  ;;  %v1142_v33 = vld [vmem:[#allocation0 + $0x230] sm:$0xf]  ;;  %v1080_v36 = vpack.c.bf16 %v1659_v60, %v1079_v25  ;;  %v1101_v37 = vpack.c.bf16 %v1659_v60, %v1100_v26  ;;  %v1122_v38 = vpack.c.bf16 %v1659_v60, %v1121_v27  ;;  %v1642_v20 = vunpack.i.h.bf16 %v1640_v63 }
  0xe5   :  { %v1163_v34 = vld [vmem:[#allocation0 + $0x248] sm:$0xf]  ;;  %v1184_v35 = vld [vmem:[#allocation0 + $0x260] sm:$0xf]  ;;  %1470 = vst [vmem:[%s2245_s1 + $0x62] sm:$0x3] %v996_v24  ;;  %v1143_v43 = vpack.c.bf16 %v1659_v60, %v1142_v33  ;;  %v1641_v26 = vunpack.i.l.bf16 %v1640_v63 }
  0xe6   :  { %v1205_v40 = vld [vmem:[#allocation0 + $0x278] sm:$0xf]  ;;  %v1226_v41 = vld [vmem:[#allocation0 + $0x290] sm:$0xf]  ;;  %v1164_v44 = vpack.c.bf16 %v1659_v60, %v1163_v34  ;;  %v1185_v45 = vpack.c.bf16 %v1659_v60, %v1184_v35  ;;  %1473 = vst [vmem:[%s2245_s1 + $0x68] sm:$0x3] %v1017_v28 }
  0xe7   :  { %v1289_v42 = vld [vmem:[#allocation0 + $0x2d8] sm:$0xf]  ;;  %1476 = vst [vmem:[%s2245_s1 + $0x6e] sm:$0x3] %v1038_v29  ;;  %1479 = vst [vmem:[%s2245_s1 + $0x74] sm:$0x3] %v1059_v30  ;;  %v1206_v50 = vpack.c.bf16 %v1659_v60, %v1205_v40  ;;  %v1227_v51 = vpack.c.bf16 %v1659_v60, %v1226_v41 }
  0xe8   :  { %v1310_v47 = vld [vmem:[#allocation0 + $0x2f0] sm:$0xf]  ;;  %v827_v48 = vld [vmem:[#allocation0 + $0xc8] sm:$0xf]  ;;  %v848_v49 = vld [vmem:[#allocation0 + $0xe0] sm:$0xf]  ;;  %v1290_v52 = vpack.c.bf16 %v1659_v60, %v1289_v42 }
  0xe9   :  { %1482 = vst [vmem:[%s2245_s1 + $0x7a] sm:$0x3] %v1080_v36  ;;  %1485 = vst [vmem:[%s2245_s1 + $0x80] sm:$0x3] %v1101_v37  ;;  %v828_v54 = vpack.c.bf16 %v1659_v60, %v827_v48  ;;  %v849_v55 = vpack.c.bf16 %v1659_v60, %v848_v49  ;;  %v869_v56 = vld [vmem:[#allocation0 + $0xf8] sm:$0xf]  ;;  %v1311_v59 = vpack.c.bf16 %v1659_v60, %v1310_v47 }
  0xea   :  { %1488 = vst [vmem:[%s2245_s1 + $0x86] sm:$0x3] %v1122_v38  ;;  %593 = vst.msk [vmem:[#allocation0 + $0x282] ss:$-24 sm:$0x7] %vm66_vm0, %v1637_v39   ;;  %v870_v0 = vpack.c.bf16 %v1659_v60, %v869_v56 }
  0xeb   :  { %595 = vst.msk [vmem:[#allocation0 + $0x1c2] ss:$72 sm:$0x18] %vm66_vm0, %v1637_v39   ;;  %597 = vst.msk [vmem:[#allocation0 + $0x342] ss:$-24 sm:$0x60] %vm66_vm0, %v1637_v39  }
  0xec   :  { %599 = vst.msk [vmem:[#allocation0 + $0x2f3] sm:$0x80] %vm66_vm0, %v1637_v39   ;;  %v890_v57 = vld [vmem:[#allocation0 + $0x110] sm:$0xf]  ;;  %v911_v58 = vld [vmem:[#allocation0 + $0x128] sm:$0xf] }
  0xed   :  { %1491 = vst [vmem:[%s2245_s1 + $0x8c] sm:$0x3] %v1143_v43  ;;  %1494 = vst [vmem:[%s2245_s1 + $0x92] sm:$0x3] %v1164_v44  ;;  %v891_v1 = vpack.c.bf16 %v1659_v60, %v890_v57  ;;  %v912_v2 = vpack.c.bf16 %v1659_v60, %v911_v58  ;;  %v932_v3 = vld [vmem:[#allocation0 + $0x140] sm:$0xf] }
  0xee   :  { %1497 = vst [vmem:[%s2245_s1 + $0x98] sm:$0x3] %v1185_v45  ;;  %580 = vst.msk [vmem:[#allocation0 + $0x1c2] ss:$-24 sm:$0x7] %vm66_vm0, %v1636_v46   ;;  %v933_v7 = vpack.c.bf16 %v1659_v60, %v932_v3 }
  0xef   :  { %582 = vst.msk [vmem:[#allocation0 + $0x102] ss:$72 sm:$0x18] %vm66_vm0, %v1636_v46   ;;  %584 = vst.msk [vmem:[#allocation0 + $0x282] ss:$-24 sm:$0x60] %vm66_vm0, %v1636_v46  }
  0xf0   :  { %586 = vst.msk [vmem:[#allocation0 + $0x233] sm:$0x80] %vm66_vm0, %v1636_v46   ;;  %v660_v4 = vld [vmem:[#allocation0 + $0x8] sm:$0xf]  ;;  %v680_v5 = vld [vmem:[#allocation0 + $0x20] sm:$0xf] }
  0xf1   :  { %1500 = vst [vmem:[%s2245_s1 + $0x9e] sm:$0x3] %v1206_v50  ;;  %1503 = vst [vmem:[%s2245_s1 + $0xa4] sm:$0x3] %v1227_v51  ;;  %v701_v8 = vld [vmem:[#allocation0 + $0x38] sm:$0xf]  ;;  %v661_v11 = vpack.c.bf16 %v1659_v60, %v660_v4  ;;  %v681_v12 = vpack.c.bf16 %v1659_v60, %v680_v5 }
  0xf2   :  { %1512 = vst [vmem:[%s2245_s1 + $0xb6] sm:$0x3] %v1290_v52  ;;  %567 = vst.msk [vmem:[#allocation0 + $0x102] ss:$-24 sm:$0x7] %vm66_vm0, %v1632_v53   ;;  %v702_v17 = vpack.c.bf16 %v1659_v60, %v701_v8 }
  0xf3   :  { %569 = vst.msk [vmem:[#allocation0 + $0x42] ss:$72 sm:$0x18] %vm66_vm0, %v1632_v53   ;;  %571 = vst.msk [vmem:[#allocation0 + $0x1c2] ss:$-24 sm:$0x60] %vm66_vm0, %v1632_v53  }
  0xf4   :  { %573 = vst.msk [vmem:[#allocation0 + $0x173] sm:$0x80] %vm66_vm0, %v1632_v53   ;;  %1446 = vst [vmem:[%s2245_s1 + $0x32] sm:$0x3] %v828_v54  ;;  %v722_v9 = vld [vmem:[#allocation0 + $0x50] sm:$0xf] }
  0xf5   :  { %1449 = vst [vmem:[%s2245_s1 + $0x38] sm:$0x3] %v849_v55  ;;  %v743_v10 = vld [vmem:[#allocation0 + $0x68] sm:$0xf]  ;;  %1515 = vst [vmem:[%s2245_s1 + $0xbc] sm:$0x3] %v1311_v59  ;;  %v723_v18 = vpack.c.bf16 %v1659_v60, %v722_v9 }
  0xf6   :  { %554 = vst.msk [vmem:[#allocation0 + $0x42] ss:$-24 sm:$0x7] %vm66_vm0, %v1631_v61   ;;  %556 = vst.msk [vmem:[#allocation0 - $0x7e] ss:$72 sm:$0x18] %vm66_vm0, %v1631_v61   ;;  %v744_v19 = vpack.c.bf16 %v1659_v60, %v743_v10 }
  0xf7   :  { %558 = vst.msk [vmem:[#allocation0 + $0x102] ss:$-24 sm:$0x60] %vm66_vm0, %v1631_v61   ;;  %560 = vst.msk [vmem:[#allocation0 + $0xb3] sm:$0x80] %vm66_vm0, %v1631_v61  }
  0xf8   :  { %1452 = vst [vmem:[%s2245_s1 + $0x3e] sm:$0x3] %v870_v0  ;;  %1455 = vst [vmem:[%s2245_s1 + $0x44] sm:$0x3] %v891_v1  ;;  %v764_v14 = vld [vmem:[#allocation0 + $0x80] sm:$0xf] }
  0xf9   :  { %1458 = vst [vmem:[%s2245_s1 + $0x4a] sm:$0x3] %v912_v2  ;;  %v785_v15 = vld [vmem:[#allocation0 + $0x98] sm:$0xf]  ;;  %v806_v16 = vld [vmem:[#allocation0 + $0xb0] sm:$0xf]  ;;  %v765_v23 = vpack.c.bf16 %v1659_v60, %v764_v14 }
  0xfa   :  { %644 = vst.msk [vmem:[#allocation0 + $0x283] ss:$-24 sm:$0x7] %vm66_vm0, %v1647_v6   ;;  %646 = vst.msk [vmem:[#allocation0 + $0x1c3] ss:$72 sm:$0x18] %vm66_vm0, %v1647_v6   ;;  %v786_v24 = vpack.c.bf16 %v1659_v60, %v785_v15  ;;  %v807_v25 = vpack.c.bf16 %v1659_v60, %v806_v16 }
  0xfb   :  { %648 = vst.msk [vmem:[#allocation0 + $0x343] ss:$-24 sm:$0x60] %vm66_vm0, %v1647_v6   ;;  %650 = vst.msk [vmem:[#allocation0 + $0x2f4] sm:$0x80] %vm66_vm0, %v1647_v6  }
  0xfc   :  { %1461 = vst [vmem:[%s2245_s1 + $0x50] sm:$0x3] %v933_v7  ;;  %v953_v21 = vld [vmem:[#allocation0 + $0x158] sm:$0xf]  ;;  %v974_v22 = vld [vmem:[#allocation0 + $0x170] sm:$0xf] }
  0xfd   :  { %1422 = vst [vmem:[%s2245_s1 + $0x2] sm:$0x3] %v661_v11  ;;  %1425 = vst [vmem:[%s2245_s1 + $0x8] sm:$0x3] %v681_v12  ;;  %v954_v27 = vpack.c.bf16 %v1659_v60, %v953_v21  ;;  %v975_v28 = vpack.c.bf16 %v1659_v60, %v974_v22 }
  0xfe   :  { %631 = vst.msk [vmem:[#allocation0 + $0x1c3] ss:$-24 sm:$0x7] %vm66_vm0, %v1646_v13   ;;  %633 = vst.msk [vmem:[#allocation0 + $0x103] ss:$72 sm:$0x18] %vm66_vm0, %v1646_v13  }
  0xff   :  { %635 = vst.msk [vmem:[#allocation0 + $0x283] ss:$-24 sm:$0x60] %vm66_vm0, %v1646_v13   ;;  %637 = vst.msk [vmem:[#allocation0 + $0x234] sm:$0x80] %vm66_vm0, %v1646_v13  }
 0x100   :  { %1428 = vst [vmem:[%s2245_s1 + $0xe] sm:$0x3] %v702_v17  ;;  %1431 = vst [vmem:[%s2245_s1 + $0x14] sm:$0x3] %v723_v18 }
 0x101   :  { %1434 = vst [vmem:[%s2245_s1 + $0x1a] sm:$0x3] %v744_v19  ;;  %618 = vst.msk [vmem:[#allocation0 + $0x103] ss:$-24 sm:$0x7] %vm66_vm0, %v1642_v20  }
 0x102   :  { %620 = vst.msk [vmem:[#allocation0 + $0x43] ss:$72 sm:$0x18] %vm66_vm0, %v1642_v20   ;;  %622 = vst.msk [vmem:[#allocation0 + $0x1c3] ss:$-24 sm:$0x60] %vm66_vm0, %v1642_v20  }
 0x103   :  { %624 = vst.msk [vmem:[#allocation0 + $0x174] sm:$0x80] %vm66_vm0, %v1642_v20   ;;  %1437 = vst [vmem:[%s2245_s1 + $0x20] sm:$0x3] %v765_v23  ;;  %v1170_v29 = vld [vmem:[#allocation0 + $0x250] sm:$0xf] }
 0x104   :  { %1440 = vst [vmem:[%s2245_s1 + $0x26] sm:$0x3] %v786_v24  ;;  %1443 = vst [vmem:[%s2245_s1 + $0x2c] sm:$0x3] %v807_v25  ;;  %v1191_v30 = vld [vmem:[#allocation0 + $0x268] sm:$0xf]  ;;  %v1171_v35 = vpack.c.bf16 %v1659_v60, %v1170_v29 }
 0x105   :  { %605 = vst.msk [vmem:[#allocation0 + $0x43] ss:$-24 sm:$0x7] %vm66_vm0, %v1641_v26   ;;  %607 = vst.msk [vmem:[#allocation0 - $0x7d] ss:$72 sm:$0x18] %vm66_vm0, %v1641_v26   ;;  %v1192_v36 = vpack.c.bf16 %v1659_v60, %v1191_v30 }
 0x106   :  { %609 = vst.msk [vmem:[#allocation0 + $0x103] ss:$-24 sm:$0x60] %vm66_vm0, %v1641_v26   ;;  %611 = vst.msk [vmem:[#allocation0 + $0xb4] sm:$0x80] %vm66_vm0, %v1641_v26  }
 0x107   :  { %1464 = vst [vmem:[%s2245_s1 + $0x56] sm:$0x3] %v954_v27  ;;  %1467 = vst [vmem:[%s2245_s1 + $0x5c] sm:$0x3] %v975_v28  ;;  %v1212_v31 = vld [vmem:[#allocation0 + $0x280] sm:$0xf] }
 0x108   :  { %v1002_v32 = vld [vmem:[#allocation0 + $0x190] sm:$0xf]  ;;  %v1023_v33 = vld [vmem:[#allocation0 + $0x1a8] sm:$0xf]  ;;  %v1044_v34 = vld [vmem:[#allocation0 + $0x1c0] sm:$0xf]  ;;  %v1213_v37 = vpack.c.bf16 %v1659_v60, %v1212_v31 }
 0x109   :  { %v1003_v38 = vpack.c.bf16 %v1659_v60, %v1002_v32  ;;  %v1024_v39 = vpack.c.bf16 %v1659_v60, %v1023_v33  ;;  %v1045_v40 = vpack.c.bf16 %v1659_v60, %v1044_v34  ;;  %v1065_v41 = vld [vmem:[#allocation0 + $0x1d8] sm:$0xf]  ;;  %v1086_v42 = vld [vmem:[#allocation0 + $0x1f0] sm:$0xf]  ;;  %v1107_v43 = vld [vmem:[#allocation0 + $0x208] sm:$0xf] }
 0x10a   :  { %v1066_v44 = vpack.c.bf16 %v1659_v60, %v1065_v41  ;;  %v1087_v45 = vpack.c.bf16 %v1659_v60, %v1086_v42  ;;  %v1108_v46 = vpack.c.bf16 %v1659_v60, %v1107_v43  ;;  %v1128_v47 = vld [vmem:[#allocation0 + $0x220] sm:$0xf]  ;;  %v1149_v48 = vld [vmem:[#allocation0 + $0x238] sm:$0xf]  ;;  %1495 = vst [vmem:[%s2245_s1 + $0x94] sm:$0x3] %v1171_v35 }
 0x10b   :  { %1498 = vst [vmem:[%s2245_s1 + $0x9a] sm:$0x3] %v1192_v36  ;;  %1501 = vst [vmem:[%s2245_s1 + $0xa0] sm:$0x3] %v1213_v37  ;;  %v1233_v49 = vld [vmem:[#allocation0 + $0x298] sm:$0xf]  ;;  %v1129_v50 = vpack.c.bf16 %v1659_v60, %v1128_v47  ;;  %v1150_v51 = vpack.c.bf16 %v1659_v60, %v1149_v48 }
 0x10c   :  { %1471 = vst [vmem:[%s2245_s1 + $0x64] sm:$0x3] %v1003_v38  ;;  %1474 = vst [vmem:[%s2245_s1 + $0x6a] sm:$0x3] %v1024_v39  ;;  %v1234_v52 = vpack.c.bf16 %v1659_v60, %v1233_v49  ;;  %v1254_v53 = vld [vmem:[#allocation0 + $0x2b0] sm:$0xf] }
 0x10d   :  { %1477 = vst [vmem:[%s2245_s1 + $0x70] sm:$0x3] %v1045_v40  ;;  %v1275_v54 = vld [vmem:[#allocation0 + $0x2c8] sm:$0xf]  ;;  %v1296_v55 = vld [vmem:[#allocation0 + $0x2e0] sm:$0xf]  ;;  %v1255_v56 = vpack.c.bf16 %v1659_v60, %v1254_v53 }
 0x10e   :  { %1480 = vst [vmem:[%s2245_s1 + $0x76] sm:$0x3] %v1066_v44  ;;  %1483 = vst [vmem:[%s2245_s1 + $0x7c] sm:$0x3] %v1087_v45  ;;  %v1276_v57 = vpack.c.bf16 %v1659_v60, %v1275_v54  ;;  %v1297_v58 = vpack.c.bf16 %v1659_v60, %v1296_v55  ;;  %v1317_v59 = vld [vmem:[#allocation0 + $0x2f8] sm:$0xf] }
 0x10f   :  { %1486 = vst [vmem:[%s2245_s1 + $0x82] sm:$0x3] %v1108_v46  ;;  %v666_v61 = vld [vmem:[#allocation0 + $0x10] sm:$0xf]  ;;  %v687_v62 = vld [vmem:[#allocation0 + $0x28] sm:$0xf]  ;;  %v1318_v63 = vpack.c.bf16 %v1659_v60, %v1317_v59 }
 0x110   :  { %1489 = vst [vmem:[%s2245_s1 + $0x88] sm:$0x3] %v1129_v50  ;;  %1492 = vst [vmem:[%s2245_s1 + $0x8e] sm:$0x3] %v1150_v51  ;;  %v667_v0 = vpack.c.bf16 %v1659_v60, %v666_v61  ;;  %v688_v1 = vpack.c.bf16 %v1659_v60, %v687_v62  ;;  %v708_v2 = vld [vmem:[#allocation0 + $0x40] sm:$0xf] }
 0x111   :  { %1504 = vst [vmem:[%s2245_s1 + $0xa6] sm:$0x3] %v1234_v52  ;;  %v729_v3 = vld [vmem:[#allocation0 + $0x58] sm:$0xf]  ;;  %v750_v4 = vld [vmem:[#allocation0 + $0x70] sm:$0xf]  ;;  %v709_v5 = vpack.c.bf16 %v1659_v60, %v708_v2 }
 0x112   :  { %1507 = vst [vmem:[%s2245_s1 + $0xac] sm:$0x3] %v1255_v56  ;;  %1510 = vst [vmem:[%s2245_s1 + $0xb2] sm:$0x3] %v1276_v57  ;;  %v730_v6 = vpack.c.bf16 %v1659_v60, %v729_v3  ;;  %v751_v7 = vpack.c.bf16 %v1659_v60, %v750_v4  ;;  %v771_v8 = vld [vmem:[#allocation0 + $0x88] sm:$0xf] }
 0x113   :  { %1513 = vst [vmem:[%s2245_s1 + $0xb8] sm:$0x3] %v1297_v58  ;;  %v792_v9 = vld [vmem:[#allocation0 + $0xa0] sm:$0xf]  ;;  %v813_v10 = vld [vmem:[#allocation0 + $0xb8] sm:$0xf]  ;;  %v772_v11 = vpack.c.bf16 %v1659_v60, %v771_v8 }
 0x114   :  { %1516 = vst [vmem:[%s2245_s1 + $0xbe] sm:$0x3] %v1318_v63  ;;  %1423 = vst [vmem:[%s2245_s1 + $0x4] sm:$0x3] %v667_v0  ;;  %v793_v12 = vpack.c.bf16 %v1659_v60, %v792_v9  ;;  %v814_v13 = vpack.c.bf16 %v1659_v60, %v813_v10  ;;  %v834_v14 = vld [vmem:[#allocation0 + $0xd0] sm:$0xf] }
 0x115   :  { %1426 = vst [vmem:[%s2245_s1 + $0xa] sm:$0x3] %v688_v1  ;;  %v855_v15 = vld [vmem:[#allocation0 + $0xe8] sm:$0xf]  ;;  %v876_v16 = vld [vmem:[#allocation0 + $0x100] sm:$0xf]  ;;  %v835_v17 = vpack.c.bf16 %v1659_v60, %v834_v14 }
 0x116   :  { %1429 = vst [vmem:[%s2245_s1 + $0x10] sm:$0x3] %v709_v5  ;;  %1432 = vst [vmem:[%s2245_s1 + $0x16] sm:$0x3] %v730_v6  ;;  %v856_v18 = vpack.c.bf16 %v1659_v60, %v855_v15  ;;  %v877_v19 = vpack.c.bf16 %v1659_v60, %v876_v16  ;;  %v897_v20 = vld [vmem:[#allocation0 + $0x118] sm:$0xf] }
 0x117   :  { %1435 = vst [vmem:[%s2245_s1 + $0x1c] sm:$0x3] %v751_v7  ;;  %v918_v21 = vld [vmem:[#allocation0 + $0x130] sm:$0xf]  ;;  %v939_v22 = vld [vmem:[#allocation0 + $0x148] sm:$0xf]  ;;  %v898_v23 = vpack.c.bf16 %v1659_v60, %v897_v20 }
 0x118   :  { %1438 = vst [vmem:[%s2245_s1 + $0x22] sm:$0x3] %v772_v11  ;;  %1441 = vst [vmem:[%s2245_s1 + $0x28] sm:$0x3] %v793_v12  ;;  %v919_v24 = vpack.c.bf16 %v1659_v60, %v918_v21  ;;  %v940_v25 = vpack.c.bf16 %v1659_v60, %v939_v22  ;;  %v960_v26 = vld [vmem:[#allocation0 + $0x160] sm:$0xf] }
 0x119   :  { %1444 = vst [vmem:[%s2245_s1 + $0x2e] sm:$0x3] %v814_v13  ;;  %v981_v27 = vld [vmem:[#allocation0 + $0x178] sm:$0xf]  ;;  %1447 = vst [vmem:[%s2245_s1 + $0x34] sm:$0x3] %v835_v17  ;;  %v961_v28 = vpack.c.bf16 %v1659_v60, %v960_v26 }
 0x11a   :  { %1450 = vst [vmem:[%s2245_s1 + $0x3a] sm:$0x3] %v856_v18  ;;  %1453 = vst [vmem:[%s2245_s1 + $0x40] sm:$0x3] %v877_v19  ;;  %v982_v60 = vpack.c.bf16 %v1659_v60, %v981_v27 }
 0x11b   :  { %1456 = vst [vmem:[%s2245_s1 + $0x46] sm:$0x3] %v898_v23  ;;  %1459 = vst [vmem:[%s2245_s1 + $0x4c] sm:$0x3] %v919_v24 }
 0x11c   :  { %1462 = vst [vmem:[%s2245_s1 + $0x52] sm:$0x3] %v940_v25  ;;  %1465 = vst [vmem:[%s2245_s1 + $0x58] sm:$0x3] %v961_v28 }
 0x11d   :  { %1468 = vst [vmem:[%s2245_s1 + $0x5e] sm:$0x3] %v982_v60 }

// kernel: mae_segmentor_forward.1
= control target key start
LH: loop header
LB: loop body
LE: loop exit
PB: predicated region body
PF: predicated region fallthrough
CT: control target
= control target key end

     0   :  { %v9059_v0 = vmov 0.0   ;;  %vm9060_vm0 = vmmov 0   ;;  %vm52_vm1 = vcmask 392192   ;;  %vm100_vm2 = vcmask 257024   ;;  %s9061_s15 = smov 120   ;;  %s9062_s16 = smov 96   ;;  %s10686_s3 = inlined_call_operand.vmem [shape: bf16[592,128], index: 3, kind: input, shape index: {}]   ;;  %s10687_s0 = inlined_call_operand.vmem [shape: f32[2,4,48], index: 0, kind: input, shape index: {}]   ;;  %s10688_s4 = inlined_call_operand.vmem [shape: f32[264,128], index: 4, kind: input, shape index: {}]   ;;  %s10689_s1 = inlined_call_operand.vmem [shape: f32[2,4,32], index: 1, kind: input, shape index: {}]   ;;  %s10690_s2 = inlined_call_operand.vmem [shape: bf16[2,17,5], index: 2, kind: input, shape index: {}]   ;;  %s10691_s5 = inlined_call_operand.vmem [shape: f32[2,2,16,128], index: 5, kind: output, shape index: {}]  }
   0x1   :  { %7899 = vmatprep.subr.bf16.mxu0 %v9059_v0  ;;  %v8657_v1 = vld [vmem:[%s10686_s3] sm:$0xff]   ;;  %7905 = vmatprep.mubr.msk.bf16.mxu0 %vm9060_vm0, %v9059_v0  ;;  %v8658_v2 = vld [vmem:[%s10686_s3 + $0x8] sm:$0xff]   ;;  %v8659_v3 = vld [vmem:[%s10686_s3 + $0x10] sm:$0xff]   ;;  %vm147_vm3 = vcmask 261120   ;;  %s9063_s17 = smov 88   ;;  %s9064_s18 = smov 80  }
   0x2   :  { %7909 = vmatprep.subr.bf16.mxu1 %v9059_v0  ;;  %7913 = vmatprep.mubr.msk.bf16.mxu1 %vm9060_vm0, %v9059_v0  ;;  %v21_v4 = vld [vmem:[%s10687_s0] sm:$0xf]  ;;  %v8660_v20 = vld [vmem:[%s10686_s3 + $0x18] sm:$0xff]   ;;  %v7312_v26 = vld [vmem:[%s10688_s4 + $0x8] ss:$0 sm:$0xff]  ;;  %s9065_s19 = smov 112  }
   0x3   :  { %7900 = vmatpush3.bf16.msra.mxu0 %v8657_v1  ;;  %v22_v5 = vpack.c.bf16 %v21_v4, %v21_v4  ;;  %v7307_v6 = vld [vmem:[%s10688_s4] ss:$0 sm:$0xff]  ;;  %7910 = vmatpush3.bf16.msra.mxu1 %v8660_v20  ;;  %v7313_v28 = vld [vmem:[%s10688_s4 + $0x10] ss:$0 sm:$0xff]  ;;  %v7314_v32 = vld [vmem:[%s10688_s4 + $0x18] ss:$0 sm:$0xff] }
   0x4   :  { %7901 = vmatprep.subr.bf16.mxu0 %v9059_v0  ;;  %v96_v8 = vld [vmem:[%s10689_s1] sm:$0xf]  ;;  %7911 = vmatprep.subr.bf16.mxu1 %v9059_v0  ;;  %s9066_s20 = smov 72   ;;  %s9067_s21 = smov 104   ;;  %vm195_vm4 = vcmask 64512   ;;  %vm243_vm5 = vcmask 27648  }
   0x5   :  { %v8661_v21 = vld [vmem:[%s10686_s3 + $0x20] sm:$0xff]   ;;  %s9068_s22 = smov 64   ;;  %s9069_s23 = smov 56   ;;  %vm262_vm6 = vcmask 1041408   ;;  %vm258_vm7 = vcmask 31744   ;;  %vm652_vm8 = vcmask 130048  }
   0x6   :  { %s9070_s24 = smov 48   ;;  %s9071_s25 = smov 40   ;;  %vm654_vm9 = vcmask 195584   ;;  %vm855_vm10 = vcmask 523264   ;;  %vm992_vm11 = vcmask 39936   ;;  %vm10692_vm12 = vcmask 1043456  }
   0x7   :  { %7902 = vmatpush3.bf16.msra.mxu0 %v8658_v2  ;;  %7912 = vmatpush3.bf16.msra.mxu1 %v8661_v21  ;;  %s9072_s26 = smov 8   ;;  %s9073_s6 = smov 16   ;;  %vm999_vm13 = vcmask 1042432   ;;  %vm1061_vm14 = vcmask 253952   ;;  %vm1257_vm15 = vcmask 138240  }
   0x8   :  { %7903 = vmatprep.subr.bf16.mxu0 %v9059_v0  ;;  %7917 = vmatprep.subr.bf16.mxu1 %v9059_v0  ;;  %s9074_s7 = smov 24  }
   0xb   :  { %7904 = vmatpush3.bf16.msra.mxu0 %v8659_v3 }
   0xc   :  { %7923 = vmatprep.subr.bf16.mxu0 %v9059_v0 }
   0xe   :  { %7906 = vmatmul.mubr.msk.bf16.vlgmr.msra.gmra.mrb[0].mxu0 %vm52_vm1, %v22_v5 }
   0xf   :  { %7925 = vmatprep.mubr.msk.bf16.mxu0 %vm9060_vm0, %v9059_v0 }
  0xe1   :  { %v90_v7 = vpop.f32.mrb[0].mxu0 }
  0xe2   :  { %v91_v9 = vadd.f32 %v7307_v6, %v90_v7  ;;  %v7907_v10 = vpop.f32.mrb[1].mxu0 }
  0xe3   :  { %v93_v11 = vpop.f32.mrb[2].mxu0 }
  0xe4   :  { %v9137_v12 = vadd.f32 %v96_v8, %v91_v9  ;;  %v7908_v13 = vpop.f32.mrb[3].mxu0 }
  0xe6   :  { %v101_v14 = vsel %vm100_vm2, %v9137_v12, 0.0 }
  0xe7   :  { %102 = vadd.xlane.f32.xlu0 %v101_v14 }
 0x174   :  { %v103_v15 = vpop.xlane.xlu0 %102 }
 0x175   :  { %v105_v16 = vmul.f32 0.03125, %v103_v15 }
 0x177   :  { %v106_v17 = vsub.f32 %v9137_v12, %v105_v16 }
 0x179   :  { %v107_v18 = vmul.f32 %v106_v17, %v106_v17 }
 0x17b   :  { %v108_v19 = vsel %vm100_vm2, %v107_v18, 0.0 }
 0x17c   :  { %109 = vadd.xlane.f32.xlu0 %v108_v19 }
 0x209   :  { %v110_v22 = vpop.xlane.xlu0 %109 }
 0x20a   :  { %v111_v23 = vmul.f32 0.03125, %v110_v22 }
 0x20c   :  { %v112_v24 = vadd.f32 1e-05, %v111_v23 }
 0x20e   :  { %8739 = vrsqrt.f32 %v112_v24 }
 0x218   :  { %v8740_v25 = vpop.eup %8739 }
 0x219   :  { %v114_v27 = vmul.f32 %v8740_v25, %v106_v17 }
 0x21b   :  { %v119_v29 = vmul.f32 %v7312_v26, %v114_v27 }
 0x21d   :  { %v124_v30 = vadd.f32 %v7313_v28, %v119_v29 }
 0x21f   :  { %v125_v31 = vpack.c.bf16 %v124_v30, %v124_v30 }
 0x221   :  { %7914 = vmatmul.mubr.msk.bf16.vlgmr.msra.gmra.mrb[0].mxu1 %vm147_vm3, %v125_v31 }
 0x222   :  { %7919 = vmatprep.mubr.msk.bf16.mxu1 %vm9060_vm0, %v9059_v0 }
 0x2f4   :  { %v185_v33 = vpop.f32.mrb[0].mxu1 }
 0x2f5   :  { %v186_v34 = vadd.f32 %v7314_v32, %v185_v33  ;;  %v7915_v35 = vpop.f32.mrb[1].mxu1 }
 0x2f6   :  { %v188_v36 = vpop.f32.mrb[2].mxu1 }
 0x2f7   :  { %v9163_v37 = vpack.c.bf16 %v186_v34, %v186_v34  ;;  %v7916_v38 = vpop.f32.mrb[3].mxu1 }
 0x2f9   :  { %306 = vrot.lane.b32.xlu0 %v9163_v37, %s9061_s15  ;;  %193 = vrot.lane.b32.xlu1 %v9163_v37, %s9062_s16 }
 0x2fd   :  { %308 = vrot.lane.b32.xlu1 %v9163_v37, %s9063_s17 }
 0x301   :  { %419 = vrot.lane.b32.xlu1 %v9163_v37, %s9064_s18 }
 0x305   :  { %417 = vrot.lane.b32.xlu1 %v9163_v37, %s9065_s19 }
 0x309   :  { %530 = vrot.lane.b32.xlu1 %v9163_v37, %s9066_s20 }
 0x30d   :  { %528 = vrot.lane.b32.xlu1 %v9163_v37, %s9067_s21 }
 0x36b   :  { %v194_v39 = vpop.permute.xlu1 %193  ;;  %v307_v44 = vpop.permute.xlu0 %306 }
 0x36c   :  { %v200_v40 = vsel %vm195_vm4, %v194_v39, 0 }
 0x36d   :  { %7918 = vmatpush3.bf16.xpose.msra.mxu1 %v200_v40 }
 0x36e   :  { %7929 = vmatprep.subr.bf16.mxu1 %v9059_v0 }
 0x36f   :  { %v309_v41 = vpop.permute.xlu1 %308 }
 0x370   :  { %v314_v42 = vsel %vm195_vm4, %v309_v41, 0 }
 0x373   :  { %v420_v43 = vpop.permute.xlu1 %419 }
 0x374   :  { %7920 = vmatmul.mubr.msk.bf16.vlgmr.msra.gmra.mrb[4].mxu1 %vm195_vm4, %v9163_v37  ;;  %v425_v46 = vsel %vm195_vm4, %v420_v43, 0 }
 0x375   :  { %7930 = vmatpush3.bf16.xpose.msra.mxu1 %v314_v42  ;;  %7931 = vmatprep.mubr.msk.bf16.mxu1 %vm9060_vm0, %v9059_v0 }
 0x376   :  { %7941 = vmatprep.subr.bf16.mxu1 %v9059_v0 }
 0x377   :  { %v418_v45 = vpop.permute.xlu1 %417 }
 0x37b   :  { %v531_v47 = vpop.permute.xlu1 %530 }
 0x37c   :  { %7932 = vmatmul.mubr.msk.bf16.vlgmr.msra.gmra.mrb[8].mxu1 %vm195_vm4, %v307_v44  ;;  %v536_v48 = vsel %vm195_vm4, %v531_v47, 0 }
 0x37d   :  { %7942 = vmatpush3.bf16.xpose.msra.mxu1 %v425_v46  ;;  %7943 = vmatprep.mubr.msk.bf16.mxu1 %vm9060_vm0, %v9059_v0 }
 0x37e   :  { %7953 = vmatprep.subr.bf16.mxu1 %v9059_v0 }
 0x37f   :  { %v529_v49 = vpop.permute.xlu1 %528 }
 0x384   :  { %7944 = vmatmul.mubr.msk.bf16.vlgmr.msra.gmra.mrb[12].mxu1 %vm195_vm4, %v418_v45 }
 0x385   :  { %7954 = vmatpush3.bf16.xpose.msra.mxu1 %v536_v48  ;;  %7955 = vmatprep.mubr.msk.bf16.mxu1 %vm9060_vm0, %v9059_v0 }
 0x386   :  { %7965 = vmatprep.subr.bf16.mxu1 %v9059_v0 }
 0x38c   :  { %7956 = vmatmul.mubr.msk.bf16.vlgmr.msra.gmra.mrb[16].mxu1 %vm195_vm4, %v529_v49 }
 0x38d   :  { %7969 = vmatprep.mubr.msk.bf16.mxu1 %vm9060_vm0, %v9059_v0 }
 0x447   :  { %v236_v50 = vpop.f32.mrb[4].mxu1 }
 0x448   :  { %v242_v51 = vmul.f32 0.35355338, %v236_v50  ;;  %v7921_v52 = vpop.f32.mrb[5].mxu1 }
 0x449   :  { %v239_v53 = vpop.f32.mrb[6].mxu1 }
 0x44a   :  { %v7922_v54 = vpop.f32.mrb[7].mxu1  ;;  %v244_v55 = vsel %vm243_vm5, %v242_v51, -inf }
 0x44b   :  { %245 = vmax.xlane.f32.xlu1 %v244_v55 }
 0x44f   :  { %v350_v56 = vpop.f32.mrb[8].mxu1 }
 0x450   :  { %v356_v57 = vmul.f32 0.35355338, %v350_v56  ;;  %v7933_v58 = vpop.f32.mrb[9].mxu1 }
 0x451   :  { %v353_v59 = vpop.f32.mrb[10].mxu1 }
 0x452   :  { %v7934_v60 = vpop.f32.mrb[11].mxu1  ;;  %v357_v61 = vsel %vm243_vm5, %v356_v57, -inf }
 0x453   :  { %358 = vmax.xlane.f32.xlu0 %v357_v61 }
 0x457   :  { %v461_v62 = vpop.f32.mrb[12].mxu1 }
 0x458   :  { %v467_v63 = vmul.f32 0.35355338, %v461_v62  ;;  %v7945_v1 = vpop.f32.mrb[13].mxu1 }
 0x459   :  { %v464_v2 = vpop.f32.mrb[14].mxu1  ;;  %v8662_v1 = vld [vmem:[%s10686_s3 + $0x28] sm:$0xff]  }
 0x45a   :  { %v7946_v3 = vpop.f32.mrb[15].mxu1  ;;  %v468_v4 = vsel %vm243_vm5, %v467_v63, -inf  ;;  %7966 = vmatpush3.bf16.msra.mxu1 %v8662_v1  ;;  %v8663_v2 = vld [vmem:[%s10686_s3 + $0x30] sm:$0xff]  }
 0x45b   :  { %469 = vmax.xlane.f32.xlu1 %v468_v4  ;;  %7967 = vmatprep.subr.bf16.mxu1 %v9059_v0  ;;  %v8671_v1 = vld [vmem:[%s10686_s3 + $0x110] sm:$0xff]  }
 0x45e   :  { %7968 = vmatpush3.bf16.msra.mxu1 %v8663_v2 }
 0x45f   :  { %v572_v5 = vpop.f32.mrb[16].mxu1  ;;  %7981 = vmatprep.subr.bf16.mxu1 %v9059_v0 }
 0x460   :  { %v578_v6 = vmul.f32 0.35355338, %v572_v5  ;;  %v7957_v7 = vpop.f32.mrb[17].mxu1 }
 0x461   :  { %v575_v8 = vpop.f32.mrb[18].mxu1 }
 0x462   :  { %v7958_v9 = vpop.f32.mrb[19].mxu1  ;;  %v579_v10 = vsel %vm243_vm5, %v578_v6, -inf }
 0x463   :  { %580 = vmax.xlane.f32.xlu0 %v579_v10 }
 0x4d8   :  { %v246_v11 = vpop.xlane.xlu1 %245 }
 0x4d9   :  { %v247_v13 = vsub.f32 %v242_v51, %v246_v11 }
 0x4db   :  { %v248_v14 = vmul.f32 1.442695, %v247_v13 }
 0x4dd   :  { %8741 = vpow2.f32 %v248_v14 }
 0x4e0   :  { %v359_v15 = vpop.xlane.xlu0 %358 }
 0x4e1   :  { %v360_v16 = vsub.f32 %v356_v57, %v359_v15 }
 0x4e3   :  { %v361_v17 = vmul.f32 1.442695, %v360_v16 }
 0x4e5   :  { %8743 = vpow2.f32 %v361_v17 }
 0x4e7   :  { %v8742_v18 = vpop.eup %8741 }
 0x4e8   :  { %v250_v19 = vsel %vm243_vm5, %v8742_v18, 0.0  ;;  %v470_v27 = vpop.xlane.xlu1 %469 }
 0x4e9   :  { %251 = vadd.xlane.f32.xlu1 %v250_v19  ;;  %v471_v28 = vsub.f32 %v467_v63, %v470_v27 }
 0x4eb   :  { %v472_v29 = vmul.f32 1.442695, %v471_v28 }
 0x4ef   :  { %v8744_v20 = vpop.eup %8743 }
 0x4f0   :  { %v581_v21 = vpop.xlane.xlu0 %580  ;;  %v363_v22 = vsel %vm243_vm5, %v8744_v20, 0.0 }
 0x4f1   :  { %v582_v23 = vsub.f32 %v578_v6, %v581_v21  ;;  %364 = vadd.xlane.f32.xlu0 %v363_v22 }
 0x4f3   :  { %v583_v24 = vmul.f32 1.442695, %v582_v23 }
 0x4f5   :  { %8745 = vpow2.f32 %v583_v24 }
 0x4f6   :  { %8747 = vpow2.f32 %v472_v29 }
 0x4fa   :  { %256 = vrot.lane.b32.xlu1 %v9163_v37, %s9068_s22 }
 0x4ff   :  { %v8746_v25 = vpop.eup %8745 }
 0x500   :  { %v585_v26 = vsel %vm243_vm5, %v8746_v25, 0.0  ;;  %v8748_v30 = vpop.eup %8747 }
 0x501   :  { %586 = vadd.xlane.f32.xlu0 %v585_v26  ;;  %v474_v31 = vsel %vm243_vm5, %v8748_v30, 0.0 }
 0x517   :  { %369 = vrot.lane.b32.xlu0 %v9163_v37, %s9069_s23 }
 0x51e   :  { %475 = vadd.xlane.f32.xlu1 %v474_v31 }
 0x52f   :  { %480 = vrot.lane.b32.xlu1 %v9163_v37, %s9070_s24 }
 0x533   :  { %591 = vrot.lane.b32.xlu1 %v9163_v37, %s9071_s25 }
 0x576   :  { %v252_v32 = vpop.xlane.xlu1 %251 }
 0x577   :  { %8749 = vrcp.f32 %v252_v32  ;;  %v8665_v32 = vld [vmem:[%s10686_s3 + $0x40] sm:$0xff]  }
 0x57a   :  { %v257_v33 = vpop.permute.xlu1 %256 }
 0x57b   :  { %v264_v34 = vsel %vm262_vm6, %v257_v33, 0 }
 0x57c   :  { %7924 = vmatpush3.bf16.msra.mxu0 %v264_v34 }
 0x57d   :  { %7935 = vmatprep.subr.bf16.mxu0 %v9059_v0 }
 0x57e   :  { %v365_v36 = vpop.xlane.xlu0 %364 }
 0x57f   :  { %8751 = vrcp.f32 %v365_v36 }
 0x581   :  { %v8750_v35 = vpop.eup %8749 }
 0x582   :  { %v254_v38 = vmul.f32 %v8750_v35, %v8742_v18 }
 0x584   :  { %v255_v39 = vpack.c.bf16 %v254_v38, %v254_v38  ;;  %v7330_v38 = vld [vmem:[%s10688_s4 + $0x28] ss:$0 sm:$0xff] }
 0x586   :  { %7926 = vmatmul.mubr.msk.bf16.vlgmr.msra.gmra.mrb[4].mxu0 %vm258_vm7, %v255_v39 }
 0x587   :  { %7937 = vmatprep.mubr.msk.bf16.mxu0 %vm9060_vm0, %v9059_v0 }
 0x589   :  { %v8752_v37 = vpop.eup %8751 }
 0x58a   :  { %v367_v41 = vmul.f32 %v8752_v37, %v8744_v20  ;;  %v7329_v20 = vld [vmem:[%s10688_s4 + $0x20] ss:$0 sm:$0xff]  ;;  %v7331_v37 = vld [vmem:[%s10688_s4 + $0x30] ss:$0 sm:$0xff] }
 0x58c   :  { %v368_v44 = vpack.c.bf16 %v367_v41, %v367_v41 }
 0x58e   :  { %v587_v40 = vpop.xlane.xlu0 %586 }
 0x592   :  { %v370_v42 = vpop.permute.xlu0 %369 }
 0x593   :  { %v375_v43 = vsel %vm262_vm6, %v370_v42, 0 }
 0x594   :  { %7936 = vmatpush3.bf16.msra.mxu0 %v375_v43  ;;  %v8666_v43 = vld [vmem:[%s10686_s3 + $0x48] sm:$0xff]  }
 0x595   :  { %7947 = vmatprep.subr.bf16.mxu0 %v9059_v0 }
 0x597   :  { %7938 = vmatmul.mubr.msk.bf16.vlgmr.msra.gmra.mrb[8].mxu0 %vm258_vm7, %v368_v44  ;;  %v8667_v44 = vld [vmem:[%s10686_s3 + $0x50] sm:$0xff]  }
 0x598   :  { %7949 = vmatprep.mubr.msk.bf16.mxu0 %vm9060_vm0, %v9059_v0 }
 0x5ab   :  { %v476_v45 = vpop.xlane.xlu1 %475 }
 0x5ac   :  { %8753 = vrcp.f32 %v476_v45  ;;  %v8668_v45 = vld [vmem:[%s10686_s3 + $0x58] sm:$0xff]  }
 0x5ad   :  { %8755 = vrcp.f32 %v587_v40 }
 0x5af   :  { %v481_v46 = vpop.permute.xlu1 %480 }
 0x5b0   :  { %v486_v47 = vsel %vm262_vm6, %v481_v46, 0  ;;  %v8669_v46 = vld [vmem:[%s10686_s3 + $0x60] sm:$0xff]  }
 0x5b1   :  { %7948 = vmatpush3.bf16.msra.mxu0 %v486_v47  ;;  %v7332_v47 = vld [vmem:[%s10688_s4 + $0x38] ss:$0 sm:$0xff] }
 0x5b2   :  { %7959 = vmatprep.subr.bf16.mxu0 %v9059_v0 }
 0x5b3   :  { %v592_v50 = vpop.permute.xlu1 %591 }
 0x5b4   :  { %v597_v53 = vsel %vm262_vm6, %v592_v50, 0 }
 0x5b6   :  { %v8754_v48 = vpop.eup %8753 }
 0x5b7   :  { %v478_v49 = vmul.f32 %v8754_v48, %v8748_v30  ;;  %v8756_v52 = vpop.eup %8755 }
 0x5b8   :  { %v589_v54 = vmul.f32 %v8756_v52, %v8746_v25 }
 0x5b9   :  { %v479_v51 = vpack.c.bf16 %v478_v49, %v478_v49 }
 0x5ba   :  { %v590_v55 = vpack.c.bf16 %v589_v54, %v589_v54 }
 0x5bb   :  { %7950 = vmatmul.mubr.msk.bf16.vlgmr.msra.gmra.mrb[12].mxu0 %vm258_vm7, %v479_v51 }
 0x5bc   :  { %7960 = vmatpush3.bf16.msra.mxu0 %v597_v53  ;;  %7961 = vmatprep.mubr.msk.bf16.mxu0 %vm9060_vm0, %v9059_v0 }
 0x5bd   :  { %7973 = vmatprep.subr.bf16.mxu0 %v9059_v0 }
 0x5c3   :  { %7962 = vmatmul.mubr.msk.bf16.vlgmr.msra.gmra.mrb[16].mxu0 %vm258_vm7, %v590_v55 }
 0x5c4   :  { %7977 = vmatprep.mubr.msk.bf16.mxu0 %vm9060_vm0, %v9059_v0 }
 0x659   :  { %v300_v56 = vpop.f32.mrb[4].mxu0 }
 0x65a   :  { %v7927_v57 = vpop.f32.mrb[5].mxu0 }
 0x65b   :  { %v303_v58 = vpop.f32.mrb[6].mxu0 }
 0x65c   :  { %v7928_v59 = vpop.f32.mrb[7].mxu0 }
 0x66a   :  { %v411_v60 = vpop.f32.mrb[8].mxu0 }
 0x66b   :  { %640 = vrot.lane.b32.xlu0 %v411_v60, %s9072_s26  ;;  %v7939_v61 = vpop.f32.mrb[9].mxu0 }
 0x66c   :  { %v414_v62 = vpop.f32.mrb[10].mxu0 }
 0x66d   :  { %v7940_v63 = vpop.f32.mrb[11].mxu0 }
 0x66e   :  { %v8670_v63 = vld [vmem:[%s10686_s3 + $0x108] sm:$0xff]  }
 0x68e   :  { %v522_v3 = vpop.f32.mrb[12].mxu0 }
 0x68f   :  { %644 = vrot.lane.b32.xlu1 %v522_v3, %s9073_s6  ;;  %v7951_v4 = vpop.f32.mrb[13].mxu0  ;;  %v7341_v3 = vld [vmem:[%s10688_s4 + $0x40] ss:$0 sm:$0xff] }
 0x690   :  { %v525_v5 = vpop.f32.mrb[14].mxu0 }
 0x691   :  { %v7952_v6 = vpop.f32.mrb[15].mxu0 }
 0x696   :  { %v633_v7 = vpop.f32.mrb[16].mxu0 }
 0x697   :  { %648 = vrot.lane.b32.xlu0 %v633_v7, %s9074_s7  ;;  %v7963_v8 = vpop.f32.mrb[17].mxu0 }
 0x698   :  { %v636_v9 = vpop.f32.mrb[18].mxu0 }
 0x699   :  { %v7964_v10 = vpop.f32.mrb[19].mxu0 }
 0x69a   :  { %v8672_v10 = vld [vmem:[%s10690_s2] sm:$0xff]  }
 0x6dd   :  { %v641_v11 = vpop.permute.xlu0 %640 }
 0x6de   :  { %v651_v14 = vsel %vm195_vm4, %v300_v56, %v641_v11  ;;  %v971_v11 = vld [vmem:[%s10688_s4 + $0xd0] sm:$0x1] }
 0x701   :  { %v645_v13 = vpop.permute.xlu1 %644 }
 0x702   :  { %v653_v15 = vsel %vm652_vm8, %v651_v14, %v645_v13  ;;  %v7342_v13 = vld [vmem:[%s10688_s4 + $0xc8] ss:$0 sm:$0xff]  ;;  %v973_v14 = vrot.slane %v971_v11, 4 }
 0x709   :  { %v649_v16 = vpop.permute.xlu0 %648 }
 0x70a   :  { %v655_v17 = vsel %vm654_vm9, %v653_v15, %v649_v16  ;;  %v9075_v16 = vmov 65535  }
 0x70b   :  { %v656_v18 = vpack.c.bf16 %v655_v17, %v655_v17  ;;  %v1000_v17 = vsel %vm262_vm6, 4294967295, %v9075_v16 }
 0x70d   :  { %7970 = vmatmul.mubr.msk.bf16.vlgmr.msra.gmra.mrb[20].mxu1 %vm147_vm3, %v656_v18 }
 0x70e   :  { %7989 = vmatprep.mubr.msk.bf16.mxu1 %vm9060_vm0, %v9059_v0  ;;  %7982 = vmatpush3.bf16.msra.mxu1 %v8666_v43 }
 0x70f   :  { %7983 = vmatprep.subr.bf16.mxu1 %v9059_v0 }
 0x712   :  { %7984 = vmatpush3.bf16.msra.mxu1 %v8667_v44 }
 0x713   :  { %7985 = vmatprep.subr.bf16.mxu1 %v9059_v0 }
 0x716   :  { %7986 = vmatpush3.bf16.msra.mxu1 %v8668_v45 }
 0x717   :  { %7987 = vmatprep.subr.bf16.mxu1 %v9059_v0 }
 0x71a   :  { %7988 = vmatpush3.bf16.msra.mxu1 %v8669_v46 }
 0x7e0   :  { %v710_v19 = vpop.f32.mrb[20].mxu1 }
 0x7e1   :  { %v716_v21 = vadd.f32 %v710_v19, %v9137_v12  ;;  %v7971_v22 = vpop.f32.mrb[21].mxu1  ;;  %v8664_v12 = vld [vmem:[%s10686_s3 + $0x38] sm:$0xff]  }
 0x7e2   :  { %v713_v23 = vpop.f32.mrb[22].mxu1  ;;  %7974 = vmatpush3.bf16.msra.mxu0 %v8664_v12 }
 0x7e3   :  { %v9257_v24 = vadd.f32 %v7329_v20, %v716_v21  ;;  %v7972_v25 = vpop.f32.mrb[23].mxu1  ;;  %7975 = vmatprep.subr.bf16.mxu0 %v9059_v0  ;;  %v9323_v23 = vsel %vm999_vm13, %v1000_v17, 0  ;;  %vm1264_vm13 = vcmask 131072  }
 0x7e5   :  { %v725_v26 = vsel %vm100_vm2, %v9257_v24, 0.0 }
 0x7e6   :  { %726 = vadd.xlane.f32.xlu1 %v725_v26  ;;  %7976 = vmatpush3.bf16.msra.mxu0 %v8665_v32  ;;  %v8673_v26 = vld [vmem:[%s10690_s2 + $0x8] ss:$0 sps:$4 sm:$0x11]  }
 0x7e7   :  { %7993 = vmatprep.subr.bf16.mxu0 %v9059_v0 }
 0x873   :  { %v727_v27 = vpop.xlane.xlu1 %726 }
 0x874   :  { %v728_v28 = vmul.f32 0.03125, %v727_v27  ;;  %v981_v27 = vld [vmem:[%s10688_s4 + $0xd8] sm:$0xff] }
 0x876   :  { %v729_v29 = vsub.f32 %v9257_v24, %v728_v28 }
 0x878   :  { %v730_v30 = vmul.f32 %v729_v29, %v729_v29 }
 0x87a   :  { %v731_v31 = vsel %vm100_vm2, %v730_v30, 0.0 }
 0x87b   :  { %732 = vadd.xlane.f32.xlu0 %v731_v31  ;;  %v982_v31 = vld [vmem:[%s10688_s4 + $0xe0] sm:$0xff] }
 0x908   :  { %v733_v33 = vpop.xlane.xlu0 %732 }
 0x909   :  { %v734_v34 = vmul.f32 0.03125, %v733_v33 }
 0x90b   :  { %v735_v35 = vadd.f32 1e-05, %v734_v34 }
 0x90d   :  { %8757 = vrsqrt.f32 %v735_v35 }
 0x917   :  { %v8758_v36 = vpop.eup %8757 }
 0x918   :  { %v737_v39 = vmul.f32 %v8758_v36, %v729_v29  ;;  %v983_v29 = vld [vmem:[%s10688_s4 + $0xe8] sm:$0x1] }
 0x91a   :  { %v742_v40 = vmul.f32 %v7330_v38, %v737_v39 }
 0x91c   :  { %v747_v41 = vadd.f32 %v7331_v37, %v742_v40 }
 0x91e   :  { %v748_v42 = vpack.c.bf16 %v747_v41, %v747_v41 }
 0x920   :  { %7978 = vmatmul.mubr.msk.bf16.vlgmr.msra.gmra.mrb[20].mxu0 %vm147_vm3, %v748_v42 }
 0x921   :  { %7997 = vmatprep.mubr.msk.bf16.mxu0 %vm9060_vm0, %v9059_v0  ;;  %7994 = vmatpush3.bf16.msra.mxu0 %v8670_v63 }
 0x922   :  { %7995 = vmatprep.subr.bf16.mxu0 %v9059_v0 }
 0x925   :  { %7996 = vmatpush3.bf16.msra.mxu0 %v8671_v1 }
 0x9f3   :  { %v807_v48 = vpop.f32.mrb[20].mxu0 }
 0x9f4   :  { %v808_v49 = vadd.f32 %v7332_v47, %v807_v48  ;;  %v7979_v50 = vpop.f32.mrb[21].mxu0 }
 0x9f5   :  { %v810_v51 = vpop.f32.mrb[22].mxu0 }
 0x9f6   :  { %v813_v52 = vmul.f32 %v808_v49, %v808_v49  ;;  %v7980_v53 = vpop.f32.mrb[23].mxu0 }
 0x9f8   :  { %v814_v54 = vmul.f32 %v813_v52, %v808_v49 }
 0x9fa   :  { %v815_v55 = vmul.f32 0.044715, %v814_v54  ;;  %v8674_v54 = vld [vmem:[%s10686_s3 + $0x68] sm:$0xff]  }
 0x9fb   :  { %8007 = vmatprep.subr.bf16.mxu1 %v8674_v54 }
 0x9fc   :  { %v816_v56 = vadd.f32 %v815_v55, %v808_v49  ;;  %v8675_v55 = vld [vmem:[%s10686_s3 + $0x70] sm:$0xff]  }
 0x9fe   :  { %v817_v57 = vmul.f32 0.7978846, %v816_v56 }
 0xa00   :  { %8759 = vtanh.f32 %v817_v57 }
 0xa0a   :  { %v8760_v58 = vpop.eup %8759 }
 0xa0b   :  { %v819_v59 = vadd.f32 1.0, %v8760_v58 }
 0xa0d   :  { %v820_v60 = vmul.f32 0.5, %v819_v59 }
 0xa0f   :  { %v821_v61 = vmul.f32 %v820_v60, %v808_v49 }
 0xa11   :  { %v822_v62 = vpack.c.bf16 %v821_v61, %v821_v61 }
 0xa13   :  { %7990 = vmatmul.mubr.msk.bf16.vlgmr.msra.gmra.mrb[24].mxu1 %vm855_vm10, %v822_v62 }
 0xa14   :  { %8008 = vmatpush3.bf16.msra.mxu1 %v8674_v54 }
 0xa15   :  { %8009 = vmatprep.subr.bf16.mxu1 %v8675_v55 }
 0xa18   :  { %8010 = vmatpush3.bf16.msra.mxu1 %v8675_v55 }
 0xae6   :  { %v893_v2 = vpop.f32.mrb[24].mxu1 }
 0xae7   :  { %v899_v4 = vadd.f32 %v893_v2, %v9257_v24  ;;  %v7991_v5 = vpop.f32.mrb[25].mxu1 }
 0xae8   :  { %v896_v6 = vpop.f32.mrb[26].mxu1 }
 0xae9   :  { %v905_v7 = vadd.f32 %v7341_v3, %v899_v4  ;;  %v7992_v8 = vpop.f32.mrb[27].mxu1  ;;  %v7350_v3 = vld [vmem:[%s10688_s4 + $0x48] ss:$0 sm:$0xff] }
 0xaeb   :  { %v906_v9 = vpack.c.bf16 %v905_v7, %v905_v7 }
 0xaed   :  { %7998 = vmatmul.mubr.msk.bf16.vlgmr.msra.gmra.mrb[24].mxu0 %vm147_vm3, %v906_v9  ;;  %v7351_v9 = vld [vmem:[%s10688_s4 + $0x50] ss:$0 sm:$0xff] }
 0xaee   :  { %8003 = vmatprep.mubr.msk.bf16.mxu0 %vm992_vm11, %v8672_v10 }
 0xbc0   :  { %v965_v15 = vpop.f32.mrb[24].mxu0 }
 0xbc1   :  { %v966_v18 = vadd.f32 %v7342_v13, %v965_v15  ;;  %v7999_v19 = vpop.f32.mrb[25].mxu0 }
 0xbc2   :  { %v968_v20 = vpop.f32.mrb[26].mxu0  ;;  %v7352_v19 = vld [vmem:[%s10688_s4 + $0x58] ss:$0 sm:$0xff] }
 0xbc3   :  { %v976_v21 = vsel %vm10692_vm12, %v966_v18, %v973_v14  ;;  %v8000_v22 = vpop.f32.mrb[27].mxu0  ;;  %vm1305_vm12 = vcmask 1040384  }
 0xbc4   :  { %v980_v24 = vpack.c.bf16 %v976_v21, %v976_v21 }
 0xbc6   :  { %v1003_v25 = vand.u32 %v9323_v23, %v980_v24 }
 0xbc8   :  { %8001 = vmatprep.subr.bf16.mxu0 %v1003_v25 }
 0xbc9   :  { %8002 = vmatpush3.bf16.msra.mxu0 %v1003_v25 }
 0xbcc   :  { %8004 = vmatmul.mubr.msk.bf16.vlgmr.msra.gmra.mrb[28].mxu0 %vm992_vm11, %v8673_v26 }
 0xc9f   :  { %v8005_v28 = vpop.f32.mrb[28].mxu0 }
 0xca0   :  { %v1039_v30 = vpop.f32.mrb[29].mxu0  ;;  %v9341_v34 = vadd.f32 %v8005_v28, %v983_v29 }
 0xca1   :  { %v9339_v12 = vadd.f32 %v1039_v30, %v981_v27  ;;  %v8006_v32 = vpop.f32.mrb[30].mxu0 }
 0xca2   :  { %v1042_v33 = vpop.f32.mrb[31].mxu0  ;;  %v1062_v39 = vsel %vm1061_vm14, %v9341_v34, 0.0 }
 0xca3   :  { %v9343_v35 = vadd.f32 %v1042_v33, %v982_v31  ;;  %v1055_v36 = vsel %vm147_vm3, %v9339_v12, 0.0 }
 0xca4   :  { %1056 = vadd.xlane.f32.xlu0 %v1055_v36 }
 0xca5   :  { %v1058_v38 = vsel %vm147_vm3, %v9343_v35, 0.0 }
 0xca6   :  { %1059 = vadd.xlane.f32.xlu1 %v1058_v38 }
 0xca8   :  { %1063 = vadd.xlane.f32.xlu0 %v1062_v39 }
 0xd31   :  { %v1057_v37 = vpop.xlane.xlu0 %1056 }
 0xd32   :  { %v1065_v40 = vmul.f32 0.03125, %v1057_v37 }
 0xd33   :  { %v1060_v41 = vpop.xlane.xlu1 %1059 }
 0xd34   :  { %v1068_v42 = vsub.f32 %v9339_v12, %v1065_v40  ;;  %v1066_v43 = vmul.f32 0.03125, %v1060_v41 }
 0xd35   :  { %v1064_v44 = vpop.xlane.xlu0 %1063 }
 0xd36   :  { %v1069_v45 = vsub.f32 %v9343_v35, %v1066_v43  ;;  %v1067_v46 = vmul.f32 0.03125, %v1064_v44  ;;  %v1071_v47 = vmul.f32 %v1068_v42, %v1068_v42 }
 0xd38   :  { %v1070_v48 = vsub.f32 %v9341_v34, %v1067_v46  ;;  %v1074_v49 = vsel %vm147_vm3, %v1071_v47, 0.0  ;;  %v1072_v50 = vmul.f32 %v1069_v45, %v1069_v45 }
 0xd39   :  { %1075 = vadd.xlane.f32.xlu1 %v1074_v49 }
 0xd3a   :  { %v1077_v51 = vsel %vm147_vm3, %v1072_v50, 0.0  ;;  %v1073_v52 = vmul.f32 %v1070_v48, %v1070_v48 }
 0xd3b   :  { %1078 = vadd.xlane.f32.xlu0 %v1077_v51 }
 0xd3c   :  { %v1080_v53 = vsel %vm1061_vm14, %v1073_v52, 0.0 }
 0xd3d   :  { %1081 = vadd.xlane.f32.xlu1 %v1080_v53 }
 0xdc6   :  { %v1076_v56 = vpop.xlane.xlu1 %1075 }
 0xdc7   :  { %v1083_v57 = vmul.f32 0.03125, %v1076_v56 }
 0xdc8   :  { %v1079_v58 = vpop.xlane.xlu0 %1078 }
 0xdc9   :  { %v1086_v59 = vadd.f32 1e-05, %v1083_v57  ;;  %v1084_v60 = vmul.f32 0.03125, %v1079_v58 }
 0xdca   :  { %v1082_v61 = vpop.xlane.xlu1 %1081 }
 0xdcb   :  { %8761 = vrsqrt.f32 %v1086_v59  ;;  %v1087_v62 = vadd.f32 1e-05, %v1084_v60  ;;  %v1085_v63 = vmul.f32 0.03125, %v1082_v61 }
 0xdcd   :  { %8763 = vrsqrt.f32 %v1087_v62  ;;  %v1088_v1 = vadd.f32 1e-05, %v1085_v63 }
 0xdcf   :  { %8765 = vrsqrt.f32 %v1088_v1 }
 0xdd5   :  { %v8762_v2 = vpop.eup %8761 }
 0xdd6   :  { %v1092_v4 = vmul.f32 %v8762_v2, %v1068_v42  ;;  %v9076_v2 = vmov 0  }
 0xdd7   :  { %v8764_v5 = vpop.eup %8763 }
 0xdd8   :  { %v1093_v6 = vmul.f32 %v8764_v5, %v1069_v45  ;;  %v1099_v7 = vmul.f32 %v7350_v3, %v1092_v4 }
 0xdd9   :  { %v8766_v8 = vpop.eup %8765 }
 0xdda   :  { %v1094_v10 = vmul.f32 %v8766_v8, %v1070_v48  ;;  %v1100_v11 = vmul.f32 %v7350_v3, %v1093_v6  ;;  %v1106_v13 = vadd.f32 %v7351_v9, %v1099_v7 }
 0xddc   :  { %v1107_v14 = vadd.f32 %v7351_v9, %v1100_v11  ;;  %v1101_v15 = vmul.f32 %v7350_v3, %v1094_v10  ;;  %v9408_v3 = vsel %vm1305_vm12, 65535, %v9076_v2 }
 0xdde   :  { %v1109_v16 = vpack.c.bf16 %v1107_v14, %v1106_v13  ;;  %v1108_v17 = vadd.f32 %v7351_v9, %v1101_v15 }
 0xde0   :  { %8011 = vmatprep.mubr.msk.bf16.mxu1 %vm147_vm3, %v1109_v16  ;;  %v1110_v18 = vpack.c.bf16 %v1108_v17, %v1108_v17 }
 0xde2   :  { %8012 = vmatmul.mubr.msk.bf16.vlgmr.msra.gmra.mrb[28].mxu1 %vm147_vm3, %v1110_v18 }
 0xeb5   :  { %v8013_v20 = vpop.f32.mrb[28].mxu1 }
 0xeb6   :  { %v1181_v21 = vadd.f32 %v8013_v20, %v7352_v19  ;;  %v1172_v22 = vpop.f32.mrb[29].mxu1 }
 0xeb7   :  { %v8014_v24 = vpop.f32.mrb[30].mxu1  ;;  %v1173_v27 = vadd.f32 %v7352_v19, %v1172_v22 }
 0xeb8   :  { %v9374_v25 = vpack.c.bf16 %v1181_v21, %v1181_v21  ;;  %v1175_v26 = vpop.f32.mrb[31].mxu1 }
 0xeb9   :  { %v1176_v28 = vadd.f32 %v7352_v19, %v1175_v26 }
 0xeba   :  { %1192 = vrot.lane.b32.xlu1 %v9374_v25, %s9062_s16 }
 0xebb   :  { %v9378_v29 = vpack.c.bf16 %v1176_v28, %v1173_v27 }
 0xebd   :  { %1190 = vrot.lane.b32.xlu0 %v9378_v29, %s9062_s16  ;;  %8019 = vmatprep.mubr.msk.bf16.mxu0 %vm195_vm4, %v9378_v29 }
 0xf2c   :  { %v1193_v32 = vpop.permute.xlu1 %1192 }
 0xf2d   :  { %v1204_v33 = vsel %vm195_vm4, %v1193_v32, 0 }
 0xf2f   :  { %v1191_v30 = vpop.permute.xlu0 %1190 }
 0xf30   :  { %8547 = vmatprep.subr.msk.bf16.mxu0 %vm195_vm4, %v1191_v30  ;;  %v1201_v31 = vsel %vm195_vm4, %v1191_v30, 0 }
 0xf31   :  { %8016 = vmatpush3.bf16.xpose.msra.mxu0 %v1201_v31 }
 0xf32   :  { %8548 = vmatprep.subr.msk.bf16.mxu0 %vm195_vm4, %v1193_v32 }
 0xf39   :  { %8018 = vmatpush3.bf16.xpose.msra.mxu0 %v1204_v33 }
 0xf40   :  { %8020 = vmatmul.mubr.msk.bf16.vlgmr.msra.gmra.mrb[32].mxu0 %vm195_vm4, %v9374_v25 }
0x1013   :  { %v8021_v36 = vpop.f32.mrb[32].mxu0 }
0x1014   :  { %v1240_v38 = vpop.f32.mrb[33].mxu0  ;;  %v1256_v43 = vmul.f32 0.35355338, %v8021_v36 }
0x1015   :  { %v1254_v39 = vmul.f32 0.35355338, %v1240_v38  ;;  %v8022_v37 = vpop.f32.mrb[34].mxu0 }
0x1016   :  { %v1243_v40 = vpop.f32.mrb[35].mxu0  ;;  %v1265_v45 = vsel %vm1264_vm13, %v1256_v43, -inf }
0x1017   :  { %v1255_v41 = vmul.f32 0.35355338, %v1243_v40  ;;  %v1258_v42 = vsel %vm1257_vm15, %v1254_v39, -inf }
0x1018   :  { %1259 = vmax.xlane.f32.xlu1 %v1258_v42 }
0x1019   :  { %v1261_v44 = vsel %vm1257_vm15, %v1255_v41, -inf }
0x101a   :  { %1262 = vmax.xlane.f32.xlu0 %v1261_v44 }
0x101e   :  { %1266 = vmax.xlane.f32.xlu0 %v1265_v45 }
0x10a5   :  { %v1260_v46 = vpop.xlane.xlu1 %1259 }
0x10a6   :  { %v1268_v49 = vsub.f32 %v1254_v39, %v1260_v46 }
0x10a7   :  { %v1263_v47 = vpop.xlane.xlu0 %1262 }
0x10a8   :  { %v1269_v48 = vsub.f32 %v1255_v41, %v1263_v47  ;;  %v1271_v53 = vmul.f32 1.442695, %v1268_v49 }
0x10aa   :  { %v1273_v50 = vmul.f32 1.442695, %v1269_v48 }
0x10ab   :  { %v1267_v51 = vpop.xlane.xlu0 %1266 }
0x10ac   :  { %8767 = vpow2.f32 %v1273_v50  ;;  %v1270_v52 = vsub.f32 %v1256_v43, %v1267_v51 }
0x10ae   :  { %v1275_v54 = vmul.f32 1.442695, %v1270_v52 }
0x10b0   :  { %8769 = vpow2.f32 %v1275_v54 }
0x10b1   :  { %8771 = vpow2.f32 %v1271_v53 }
0x10b6   :  { %v8768_v55 = vpop.eup %8767 }
0x10b7   :  { %v1280_v56 = vsel %vm1257_vm15, %v8768_v55, 0.0 }
0x10b8   :  { %1281 = vadd.xlane.f32.xlu0 %v1280_v56 }
0x10ba   :  { %v8770_v57 = vpop.eup %8769 }
0x10bb   :  { %v1283_v58 = vsel %vm1264_vm13, %v8770_v57, 0.0  ;;  %v8772_v59 = vpop.eup %8771 }
0x10bc   :  { %1284 = vadd.xlane.f32.xlu1 %v1283_v58  ;;  %v1277_v60 = vsel %vm1257_vm15, %v8772_v59, 0.0 }
0x10c0   :  { %1278 = vadd.xlane.f32.xlu1 %v1277_v60 }
0x10ce   :  { %1294 = vrot.lane.b32.xlu0 %v9378_v29, %s9068_s22 }
0x10d1   :  { %1296 = vrot.lane.b32.xlu1 %v9374_v25, %s9068_s22 }
0x10d2   :  { %1365 = vrot.lane.b32.xlu0 %v9374_v25, %s9063_s17 }
0x10d5   :  { %1363 = vrot.lane.b32.xlu1 %v9378_v29, %s9063_s17 }
0x10d6   :  { %1361 = vrot.lane.b32.xlu0 %v9374_v25, %s9061_s15 }
0x10d9   :  { %1359 = vrot.lane.b32.xlu1 %v9378_v29, %s9061_s15 }
0x1145   :  { %v1282_v61 = vpop.xlane.xlu0 %1281 }
0x1149   :  { %v1285_v62 = vpop.xlane.xlu1 %1284  ;;  %v1295_v63 = vpop.permute.xlu0 %1294 }
0x114a   :  { %8023 = vmatprep.subr.bf16.mxu1 %v1295_v63  ;;  %8773 = vrcp.f32 %v1285_v62 }
0x114b   :  { %8024 = vmatpush3.bf16.msra.mxu1 %v1295_v63  ;;  %8775 = vrcp.f32 %v1282_v61 }
0x114d   :  { %v1279_v1 = vpop.xlane.xlu1 %1278  ;;  %v1366_v18 = vpop.permute.xlu0 %1365 }
0x114e   :  { %8777 = vrcp.f32 %v1279_v1  ;;  %v1377_v19 = vsel %vm195_vm4, %v1366_v18, 0 }
0x1151   :  { %v1297_v4 = vpop.permute.xlu1 %1296  ;;  %v1362_v20 = vpop.permute.xlu0 %1361 }
0x1152   :  { %v1309_v5 = vand.u32 %v9408_v3, %v1297_v4 }
0x1154   :  { %8025 = vmatprep.subr.bf16.mxu1 %v1309_v5  ;;  %v8774_v6 = vpop.eup %8773 }
0x1155   :  { %v1364_v7 = vpop.permute.xlu1 %1363  ;;  %8026 = vmatpush3.bf16.msra.mxu1 %v1309_v5  ;;  %v8776_v8 = vpop.eup %8775  ;;  %v1291_v10 = vmul.f32 %v8774_v6, %v8770_v57 }
0x1156   :  { %8549 = vmatprep.subr.msk.bf16.mxu1 %vm195_vm4, %v1364_v7  ;;  %v1290_v13 = vmul.f32 %v8776_v8, %v8768_v55  ;;  %v1374_v17 = vsel %vm195_vm4, %v1364_v7, 0 }
0x1157   :  { %v1293_v15 = vpack.c.bf16 %v1291_v10, %v1291_v10 }
0x1158   :  { %v8778_v9 = vpop.eup %8777 }
0x1159   :  { %v1289_v11 = vmul.f32 %v8778_v9, %v8772_v59  ;;  %v1360_v16 = vpop.permute.xlu1 %1359 }
0x115b   :  { %v1292_v14 = vpack.c.bf16 %v1290_v13, %v1289_v11 }
0x115d   :  { %8027 = vmatprep.mubr.msk.bf16.mxu1 %vm1257_vm15, %v1292_v14 }
0x115e   :  { %8028 = vmatmul.mubr.msk.bf16.vlgmr.msra.gmra.mrb[32].mxu1 %vm1257_vm15, %v1293_v15 }
0x115f   :  { %8032 = vmatpush3.bf16.xpose.msra.mxu1 %v1374_v17  ;;  %8035 = vmatprep.mubr.msk.bf16.mxu1 %vm195_vm4, %v1360_v16 }
0x1160   :  { %8550 = vmatprep.subr.msk.bf16.mxu1 %vm195_vm4, %v1366_v18 }
0x1167   :  { %8034 = vmatpush3.bf16.xpose.msra.mxu1 %v1377_v19 }
0x116e   :  { %8036 = vmatmul.mubr.msk.bf16.vlgmr.msra.gmra.mrb[36].mxu1 %vm195_vm4, %v1362_v20 }
0x1231   :  { %v9419_v21 = vpop.f32.mrb[32].mxu1 }
0x1232   :  { %v9421_v22 = vpop.f32.mrb[33].mxu1 }
0x1233   :  { %v8030_v24 = vpop.f32.mrb[34].mxu1 }
0x1234   :  { %v9423_v26 = vpop.f32.mrb[35].mxu1 }
0x1241   :  { %v8037_v27 = vpop.f32.mrb[36].mxu1 }
0x1242   :  { %v1413_v28 = vpop.f32.mrb[37].mxu1  ;;  %v1429_v38 = vmul.f32 0.35355338, %v8037_v27 }
0x1243   :  { %v1427_v30 = vmul.f32 0.35355338, %v1413_v28  ;;  %v8038_v31 = vpop.f32.mrb[38].mxu1 }
0x1244   :  { %v1416_v32 = vpop.f32.mrb[39].mxu1  ;;  %v1436_v37 = vsel %vm1264_vm13, %v1429_v38, -inf }
0x1245   :  { %v1428_v33 = vmul.f32 0.35355338, %v1416_v32  ;;  %v1430_v36 = vsel %vm1257_vm15, %v1427_v30, -inf }
0x1246   :  { %1431 = vmax.xlane.f32.xlu1 %v1430_v36 }
0x1247   :  { %v1433_v39 = vsel %vm1257_vm15, %v1428_v33, -inf }
0x1248   :  { %1434 = vmax.xlane.f32.xlu0 %v1433_v39 }
0x124c   :  { %1437 = vmax.xlane.f32.xlu0 %v1436_v37 }
0x12d3   :  { %v1432_v40 = vpop.xlane.xlu1 %1431 }
0x12d4   :  { %v1439_v43 = vsub.f32 %v1427_v30, %v1432_v40 }
0x12d5   :  { %v1435_v41 = vpop.xlane.xlu0 %1434 }
0x12d6   :  { %v1440_v42 = vsub.f32 %v1428_v33, %v1435_v41  ;;  %v1442_v47 = vmul.f32 1.442695, %v1439_v43 }
0x12d8   :  { %v1444_v44 = vmul.f32 1.442695, %v1440_v42 }
0x12d9   :  { %v1438_v45 = vpop.xlane.xlu0 %1437 }
0x12da   :  { %8779 = vpow2.f32 %v1444_v44  ;;  %v1441_v46 = vsub.f32 %v1429_v38, %v1438_v45 }
0x12dc   :  { %v1446_v48 = vmul.f32 1.442695, %v1441_v46 }
0x12de   :  { %8781 = vpow2.f32 %v1446_v48 }
0x12df   :  { %8783 = vpow2.f32 %v1442_v47 }
0x12e4   :  { %v8780_v49 = vpop.eup %8779 }
0x12e5   :  { %v1451_v50 = vsel %vm1257_vm15, %v8780_v49, 0.0 }
0x12e6   :  { %1452 = vadd.xlane.f32.xlu0 %v1451_v50 }
0x12e8   :  { %v8782_v51 = vpop.eup %8781 }
0x12e9   :  { %v1454_v52 = vsel %vm1264_vm13, %v8782_v51, 0.0  ;;  %v8784_v53 = vpop.eup %8783 }
0x12ea   :  { %1455 = vadd.xlane.f32.xlu1 %v1454_v52  ;;  %v1448_v54 = vsel %vm1257_vm15, %v8784_v53, 0.0 }
0x12ee   :  { %1449 = vadd.xlane.f32.xlu1 %v1448_v54 }
0x12fc   :  { %1465 = vrot.lane.b32.xlu0 %v9378_v29, %s9069_s23 }
0x12ff   :  { %1467 = vrot.lane.b32.xlu1 %v9374_v25, %s9069_s23 }
0x1300   :  { %1533 = vrot.lane.b32.xlu0 %v9374_v25, %s9064_s18 }
0x1303   :  { %1531 = vrot.lane.b32.xlu1 %v9378_v29, %s9064_s18 }
0x1304   :  { %1529 = vrot.lane.b32.xlu0 %v9374_v25, %s9065_s19 }
0x1307   :  { %1527 = vrot.lane.b32.xlu1 %v9378_v29, %s9065_s19 }
0x1373   :  { %v1453_v55 = vpop.xlane.xlu0 %1452 }
0x1377   :  { %v1456_v56 = vpop.xlane.xlu1 %1455  ;;  %v1466_v57 = vpop.permute.xlu0 %1465 }
0x1378   :  { %8039 = vmatprep.subr.bf16.mxu0 %v1466_v57  ;;  %8785 = vrcp.f32 %v1456_v56 }
0x1379   :  { %8040 = vmatpush3.bf16.msra.mxu0 %v1466_v57  ;;  %8787 = vrcp.f32 %v1453_v55 }
0x137b   :  { %v1450_v58 = vpop.xlane.xlu1 %1449  ;;  %v1534_v10 = vpop.permute.xlu0 %1533 }
0x137c   :  { %8789 = vrcp.f32 %v1450_v58  ;;  %v1545_v11 = vsel %vm195_vm4, %v1534_v10, 0 }
0x137f   :  { %v1468_v59 = vpop.permute.xlu1 %1467  ;;  %v1530_v13 = vpop.permute.xlu0 %1529 }
0x1380   :  { %v1477_v60 = vand.u32 %v1468_v59, %v9408_v3 }
0x1382   :  { %8041 = vmatprep.subr.bf16.mxu0 %v1477_v60  ;;  %v8786_v61 = vpop.eup %8785 }
0x1383   :  { %v1532_v62 = vpop.permute.xlu1 %1531  ;;  %8042 = vmatpush3.bf16.msra.mxu0 %v1477_v60  ;;  %v8788_v63 = vpop.eup %8787  ;;  %v1462_v2 = vmul.f32 %v8786_v61, %v8782_v51 }
0x1384   :  { %8551 = vmatprep.subr.msk.bf16.mxu0 %vm195_vm4, %v1532_v62  ;;  %v1461_v5 = vmul.f32 %v8788_v63, %v8780_v49  ;;  %v1542_v9 = vsel %vm195_vm4, %v1532_v62, 0 }
0x1385   :  { %v1464_v7 = vpack.c.bf16 %v1462_v2, %v1462_v2 }
0x1386   :  { %v8790_v1 = vpop.eup %8789 }
0x1387   :  { %v1460_v4 = vmul.f32 %v8790_v1, %v8784_v53  ;;  %v1528_v8 = vpop.permute.xlu1 %1527 }
0x1389   :  { %v1463_v6 = vpack.c.bf16 %v1461_v5, %v1460_v4 }
0x138b   :  { %8043 = vmatprep.mubr.msk.bf16.mxu0 %vm1257_vm15, %v1463_v6 }
0x138c   :  { %8044 = vmatmul.mubr.msk.bf16.vlgmr.msra.gmra.mrb[36].mxu0 %vm1257_vm15, %v1464_v7 }
0x138d   :  { %8048 = vmatpush3.bf16.xpose.msra.mxu0 %v1542_v9  ;;  %8051 = vmatprep.mubr.msk.bf16.mxu0 %vm195_vm4, %v1528_v8 }
0x138e   :  { %8552 = vmatprep.subr.msk.bf16.mxu0 %vm195_vm4, %v1534_v10 }
0x1395   :  { %8050 = vmatpush3.bf16.xpose.msra.mxu0 %v1545_v11 }
0x139c   :  { %8052 = vmatmul.mubr.msk.bf16.vlgmr.msra.gmra.mrb[40].mxu0 %vm195_vm4, %v1530_v13 }
0x145f   :  { %v9452_v14 = vpop.f32.mrb[36].mxu0 }
0x1460   :  { %v9454_v15 = vpop.f32.mrb[37].mxu0 }
0x1461   :  { %v8046_v16 = vpop.f32.mrb[38].mxu0 }
0x1462   :  { %v9456_v17 = vpop.f32.mrb[39].mxu0 }
0x1463   :  { %v8597_v18 = vpack.i.bf16 %v9456_v17, %v9454_v15 }
0x146f   :  { %v8053_v19 = vpop.f32.mrb[40].mxu0 }
0x1470   :  { %v1581_v20 = vpop.f32.mrb[41].mxu0  ;;  %v1597_v32 = vmul.f32 0.35355338, %v8053_v19 }
0x1471   :  { %v1595_v24 = vmul.f32 0.35355338, %v1581_v20  ;;  %v8054_v27 = vpop.f32.mrb[42].mxu0 }
0x1472   :  { %v1584_v28 = vpop.f32.mrb[43].mxu0  ;;  %v1604_v36 = vsel %vm1264_vm13, %v1597_v32, -inf }
0x1473   :  { %v1596_v30 = vmul.f32 0.35355338, %v1584_v28  ;;  %v1598_v31 = vsel %vm1257_vm15, %v1595_v24, -inf }
0x1474   :  { %1599 = vmax.xlane.f32.xlu1 %v1598_v31 }
0x1475   :  { %v1601_v33 = vsel %vm1257_vm15, %v1596_v30, -inf }
0x1476   :  { %1602 = vmax.xlane.f32.xlu0 %v1601_v33 }
0x147a   :  { %1605 = vmax.xlane.f32.xlu0 %v1604_v36 }
0x1501   :  { %v1600_v38 = vpop.xlane.xlu1 %1599 }
0x1502   :  { %v1607_v40 = vsub.f32 %v1595_v24, %v1600_v38 }
0x1503   :  { %v1603_v39 = vpop.xlane.xlu0 %1602 }
0x1504   :  { %v1608_v37 = vsub.f32 %v1596_v30, %v1603_v39  ;;  %v1610_v44 = vmul.f32 1.442695, %v1607_v40 }
0x1506   :  { %v1612_v41 = vmul.f32 1.442695, %v1608_v37 }
0x1507   :  { %v1606_v42 = vpop.xlane.xlu0 %1605 }
0x1508   :  { %8791 = vpow2.f32 %v1612_v41  ;;  %v1609_v43 = vsub.f32 %v1597_v32, %v1606_v42 }
0x150a   :  { %v1614_v45 = vmul.f32 1.442695, %v1609_v43 }
0x150c   :  { %8793 = vpow2.f32 %v1614_v45 }
0x150d   :  { %8795 = vpow2.f32 %v1610_v44 }
0x1512   :  { %v8792_v46 = vpop.eup %8791 }
0x1513   :  { %v1619_v47 = vsel %vm1257_vm15, %v8792_v46, 0.0 }
0x1514   :  { %1620 = vadd.xlane.f32.xlu0 %v1619_v47 }
0x1516   :  { %v8794_v48 = vpop.eup %8793 }
0x1517   :  { %v1622_v49 = vsel %vm1264_vm13, %v8794_v48, 0.0  ;;  %v8796_v50 = vpop.eup %8795 }
0x1518   :  { %1623 = vadd.xlane.f32.xlu1 %v1622_v49  ;;  %v1616_v51 = vsel %vm1257_vm15, %v8796_v50, 0.0 }
0x151c   :  { %1617 = vadd.xlane.f32.xlu1 %v1616_v51 }
0x152a   :  { %1633 = vrot.lane.b32.xlu0 %v9378_v29, %s9070_s24 }
0x152d   :  { %1635 = vrot.lane.b32.xlu1 %v9374_v25, %s9070_s24 }
0x152e   :  { %1701 = vrot.lane.b32.xlu0 %v9374_v25, %s9066_s20 }
0x1531   :  { %1699 = vrot.lane.b32.xlu1 %v9378_v29, %s9066_s20 }
0x1532   :  { %1697 = vrot.lane.b32.xlu0 %v9374_v25, %s9067_s21 }
0x1535   :  { %1695 = vrot.lane.b32.xlu1 %v9378_v29, %s9067_s21 }
0x15a1   :  { %v1621_v52 = vpop.xlane.xlu0 %1620 }
0x15a5   :  { %v1624_v53 = vpop.xlane.xlu1 %1623  ;;  %v1634_v54 = vpop.permute.xlu0 %1633 }
0x15a6   :  { %8055 = vmatprep.subr.bf16.mxu1 %v1634_v54  ;;  %8797 = vrcp.f32 %v1624_v53 }
0x15a7   :  { %8056 = vmatpush3.bf16.msra.mxu1 %v1634_v54  ;;  %8799 = vrcp.f32 %v1621_v52 }
0x15a9   :  { %v1618_v55 = vpop.xlane.xlu1 %1617  ;;  %v1702_v7 = vpop.permute.xlu0 %1701 }
0x15aa   :  { %8801 = vrcp.f32 %v1618_v55  ;;  %v1713_v8 = vsel %vm195_vm4, %v1702_v7, 0 }
0x15ad   :  { %v1636_v56 = vpop.permute.xlu1 %1635  ;;  %v1698_v9 = vpop.permute.xlu0 %1697 }
0x15ae   :  { %v1645_v57 = vand.u32 %v1636_v56, %v9408_v3 }
0x15b0   :  { %8057 = vmatprep.subr.bf16.mxu1 %v1645_v57  ;;  %v8798_v58 = vpop.eup %8797 }
0x15b1   :  { %v1700_v59 = vpop.permute.xlu1 %1699  ;;  %8058 = vmatpush3.bf16.msra.mxu1 %v1645_v57  ;;  %v8800_v60 = vpop.eup %8799  ;;  %v1630_v62 = vmul.f32 %v8798_v58, %v8794_v48 }
0x15b2   :  { %8553 = vmatprep.subr.msk.bf16.mxu1 %vm195_vm4, %v1700_v59  ;;  %v1629_v1 = vmul.f32 %v8800_v60, %v8792_v46  ;;  %v1710_v6 = vsel %vm195_vm4, %v1700_v59, 0 }
0x15b3   :  { %v1632_v4 = vpack.c.bf16 %v1630_v62, %v1630_v62  ;;  %v8677_v62 = vld [vmem:[%s10686_s3 + $0x80] sm:$0xff]  }
0x15b4   :  { %v8802_v61 = vpop.eup %8801 }
0x15b5   :  { %v1628_v63 = vmul.f32 %v8802_v61, %v8796_v50  ;;  %v1696_v5 = vpop.permute.xlu1 %1695  ;;  %v8676_v61 = vld [vmem:[%s10686_s3 + $0x78] sm:$0xff]  }
0x15b7   :  { %v1631_v2 = vpack.c.bf16 %v1629_v1, %v1628_v63 }
0x15b9   :  { %8059 = vmatprep.mubr.msk.bf16.mxu1 %vm1257_vm15, %v1631_v2 }
0x15ba   :  { %8060 = vmatmul.mubr.msk.bf16.vlgmr.msra.gmra.mrb[40].mxu1 %vm1257_vm15, %v1632_v4 }
0x15bb   :  { %8064 = vmatpush3.bf16.xpose.msra.mxu1 %v1710_v6  ;;  %8067 = vmatprep.mubr.msk.bf16.mxu1 %vm195_vm4, %v1696_v5 }
0x15bc   :  { %8554 = vmatprep.subr.msk.bf16.mxu1 %vm195_vm4, %v1702_v7 }
0x15c3   :  { %8066 = vmatpush3.bf16.xpose.msra.mxu1 %v1713_v8 }
0x15ca   :  { %8068 = vmatmul.mubr.msk.bf16.vlgmr.msra.gmra.mrb[44].mxu1 %vm195_vm4, %v1698_v9 }
0x168d   :  { %v8061_v10 = vpop.f32.mrb[40].mxu1 }
0x168e   :  { %v1681_v11 = vpop.f32.mrb[41].mxu1 }
0x168f   :  { %v8062_v13 = vpop.f32.mrb[42].mxu1 }
0x1690   :  { %v1684_v16 = vpop.f32.mrb[43].mxu1 }
0x1691   :  { %v8602_v19 = vpack.i.bf16 %v1684_v16, %v1681_v11 }
0x169d   :  { %v8069_v20 = vpop.f32.mrb[44].mxu1 }
0x169e   :  { %v1749_v24 = vpop.f32.mrb[45].mxu1  ;;  %v1765_v33 = vmul.f32 0.35355338, %v8069_v20 }
0x169f   :  { %v1763_v27 = vmul.f32 0.35355338, %v1749_v24  ;;  %v8070_v28 = vpop.f32.mrb[46].mxu1 }
0x16a0   :  { %v1752_v30 = vpop.f32.mrb[47].mxu1  ;;  %v1772_v38 = vsel %vm1264_vm13, %v1765_v33, -inf }
0x16a1   :  { %v1764_v31 = vmul.f32 0.35355338, %v1752_v30  ;;  %v1766_v32 = vsel %vm1257_vm15, %v1763_v27, -inf }
0x16a2   :  { %1767 = vmax.xlane.f32.xlu1 %v1766_v32 }
0x16a3   :  { %v1769_v36 = vsel %vm1257_vm15, %v1764_v31, -inf }
0x16a4   :  { %1770 = vmax.xlane.f32.xlu0 %v1769_v36 }
0x16a8   :  { %1773 = vmax.xlane.f32.xlu0 %v1772_v38 }
0x172f   :  { %v1768_v39 = vpop.xlane.xlu1 %1767 }
0x1730   :  { %v1775_v41 = vsub.f32 %v1763_v27, %v1768_v39 }
0x1731   :  { %v1771_v37 = vpop.xlane.xlu0 %1770 }
0x1732   :  { %v1776_v40 = vsub.f32 %v1764_v31, %v1771_v37  ;;  %v1778_v45 = vmul.f32 1.442695, %v1775_v41 }
0x1734   :  { %v1780_v42 = vmul.f32 1.442695, %v1776_v40 }
0x1735   :  { %v1774_v43 = vpop.xlane.xlu0 %1773 }
0x1736   :  { %8803 = vpow2.f32 %v1780_v42  ;;  %v1777_v44 = vsub.f32 %v1765_v33, %v1774_v43 }
0x1738   :  { %v1782_v46 = vmul.f32 1.442695, %v1777_v44 }
0x173a   :  { %8805 = vpow2.f32 %v1782_v46 }
0x173b   :  { %8807 = vpow2.f32 %v1778_v45 }
0x1740   :  { %v8804_v47 = vpop.eup %8803 }
0x1741   :  { %v1787_v48 = vsel %vm1257_vm15, %v8804_v47, 0.0 }
0x1742   :  { %1788 = vadd.xlane.f32.xlu0 %v1787_v48 }
0x1744   :  { %v8806_v49 = vpop.eup %8805 }
0x1745   :  { %v1790_v50 = vsel %vm1264_vm13, %v8806_v49, 0.0  ;;  %v8808_v51 = vpop.eup %8807 }
0x1746   :  { %1791 = vadd.xlane.f32.xlu1 %v1790_v50  ;;  %v1784_v52 = vsel %vm1257_vm15, %v8808_v51, 0.0 }
0x174a   :  { %1785 = vadd.xlane.f32.xlu1 %v1784_v52 }
0x1758   :  { %1801 = vrot.lane.b32.xlu0 %v9378_v29, %s9071_s25 }
0x175b   :  { %1803 = vrot.lane.b32.xlu1 %v9374_v25, %s9071_s25 }
0x175c   :  { %1870 = vrot.lane.b32.xlu0 %v9452_v14, %s9072_s26 }
0x175f   :  { %8598 = vrot.lane.b32.xlu1 %v8597_v18, %s9072_s26 }
0x1760   :  { %1882 = vrot.lane.b32.xlu0 %v8061_v10, %s9073_s6 }
0x1763   :  { %8603 = vrot.lane.b32.xlu1 %v8602_v19, %s9073_s6 }
0x17cf   :  { %v1789_v53 = vpop.xlane.xlu0 %1788 }
0x17d3   :  { %v1792_v54 = vpop.xlane.xlu1 %1791  ;;  %v1802_v55 = vpop.permute.xlu0 %1801 }
0x17d4   :  { %8071 = vmatprep.subr.bf16.mxu0 %v1802_v55  ;;  %8809 = vrcp.f32 %v1792_v54 }
0x17d5   :  { %8072 = vmatpush3.bf16.msra.mxu0 %v1802_v55  ;;  %8811 = vrcp.f32 %v1789_v53 }
0x17d7   :  { %v1786_v25 = vpop.xlane.xlu1 %1785  ;;  %v1871_v6 = vpop.permute.xlu0 %1870 }
0x17d8   :  { %8813 = vrcp.f32 %v1786_v25  ;;  %v1901_v19 = vsel %vm195_vm4, %v9419_v21, %v1871_v6 }
0x17db   :  { %v1804_v29 = vpop.permute.xlu1 %1803  ;;  %v1883_v8 = vpop.permute.xlu0 %1882 }
0x17dc   :  { %v1813_v14 = vand.u32 %v1804_v29, %v9408_v3  ;;  %v1904_v24 = vsel %vm652_vm8, %v1901_v19, %v1883_v8  ;;  %v7379_v19 = vld [vmem:[%s10688_s4 + $0x70] ss:$0 sm:$0xff] }
0x17de   :  { %8073 = vmatprep.subr.bf16.mxu0 %v1813_v14  ;;  %v8810_v56 = vpop.eup %8809 }
0x17df   :  { %8074 = vmatpush3.bf16.msra.mxu0 %v1813_v14  ;;  %v8812_v15 = vpop.eup %8811  ;;  %v1798_v18 = vmul.f32 %v8810_v56, %v8806_v49  ;;  %v8599_v7 = vpop.permute.xlu1 %8598 }
0x17e0   :  { %v1797_v58 = vmul.f32 %v8812_v15, %v8804_v47  ;;  %8079 = vmatprep.subr.bf16.mxu0 %v8676_v61  ;;  %v8601_v10 = vunpack.i.h.bf16 %v8599_v7  ;;  %v8600_v11 = vunpack.i.l.bf16 %v8599_v7 }
0x17e1   :  { %v1800_v60 = vpack.c.bf16 %v1798_v18, %v1798_v18 }
0x17e2   :  { %v8814_v17 = vpop.eup %8813  ;;  %v1900_v28 = vsel %vm195_vm4, %v9423_v26, %v8601_v10  ;;  %v1899_v30 = vsel %vm195_vm4, %v9421_v22, %v8600_v11  ;;  %v7377_v22 = vld [vmem:[%s10688_s4 + $0x60] ss:$0 sm:$0xff] }
0x17e3   :  { %v1796_v57 = vmul.f32 %v8814_v17, %v8808_v51  ;;  %v8604_v9 = vpop.permute.xlu1 %8603 }
0x17e4   :  { %v8606_v13 = vunpack.i.h.bf16 %v8604_v9  ;;  %v8605_v16 = vunpack.i.l.bf16 %v8604_v9  ;;  %v7378_v9 = vld [vmem:[%s10688_s4 + $0x68] ss:$0 sm:$0xff] }
0x17e5   :  { %v1799_v59 = vpack.c.bf16 %v1797_v58, %v1796_v57 }
0x17e6   :  { %v1902_v33 = vsel %vm652_vm8, %v1899_v30, %v8605_v16  ;;  %v1903_v36 = vsel %vm652_vm8, %v1900_v28, %v8606_v13 }
0x17e7   :  { %8075 = vmatprep.mubr.msk.bf16.mxu0 %vm1257_vm15, %v1799_v59  ;;  %v8678_v59 = vld [vmem:[%s10686_s3 + $0x88] sm:$0xff]  }
0x17e8   :  { %8076 = vmatmul.mubr.msk.bf16.vlgmr.msra.gmra.mrb[44].mxu0 %vm1257_vm15, %v1800_v60  ;;  %8087 = vmatprep.subr.bf16.mxu1 %v8678_v59  ;;  %v8679_v60 = vld [vmem:[%s10686_s3 + $0x90] sm:$0xff]  }
0x17e9   :  { %8080 = vmatpush3.bf16.msra.mxu0 %v8676_v61  ;;  %8088 = vmatpush3.bf16.msra.mxu1 %v8678_v59 }
0x17ea   :  { %8081 = vmatprep.subr.bf16.mxu0 %v8677_v62  ;;  %8089 = vmatprep.subr.bf16.mxu1 %v8679_v60 }
0x17ed   :  { %8082 = vmatpush3.bf16.msra.mxu0 %v8677_v62  ;;  %8090 = vmatpush3.bf16.msra.mxu1 %v8679_v60 }
0x18bb   :  { %v8077_v63 = vpop.f32.mrb[44].mxu0 }
0x18bc   :  { %1894 = vrot.lane.b32.xlu0 %v8077_v63, %s9074_s7  ;;  %v1849_v1 = vpop.f32.mrb[45].mxu0 }
0x18bd   :  { %v8078_v2 = vpop.f32.mrb[46].mxu0 }
0x18be   :  { %v1852_v4 = vpop.f32.mrb[47].mxu0 }
0x18bf   :  { %v8607_v5 = vpack.i.bf16 %v1852_v4, %v1849_v1 }
0x18c1   :  { %8608 = vrot.lane.b32.xlu1 %v8607_v5, %s9074_s7 }
0x192e   :  { %v1895_v20 = vpop.permute.xlu0 %1894 }
0x192f   :  { %v1907_v38 = vsel %vm654_vm9, %v1904_v24, %v1895_v20 }
0x1930   :  { %v1909_v40 = vpack.c.bf16 %v1907_v38, %v1907_v38  ;;  %v8680_v38 = vld [vmem:[%s10686_s3 + $0x98] sm:$0xff]  }
0x1931   :  { %8095 = vmatprep.subr.bf16.mxu0 %v8680_v38 }
0x1933   :  { %v8609_v27 = vpop.permute.xlu1 %8608 }
0x1934   :  { %v8611_v31 = vunpack.i.h.bf16 %v8609_v27  ;;  %v8610_v32 = vunpack.i.l.bf16 %v8609_v27 }
0x1936   :  { %v1906_v21 = vsel %vm654_vm9, %v1903_v36, %v8611_v31  ;;  %v1905_v39 = vsel %vm654_vm9, %v1902_v33, %v8610_v32 }
0x1937   :  { %v1908_v37 = vpack.c.bf16 %v1906_v21, %v1905_v39  ;;  %v8681_v21 = vld [vmem:[%s10686_s3 + $0xa0] sm:$0xff]   ;;  %v8682_v39 = vld [vmem:[%s10686_s3 + $0xa8] sm:$0xff]  }
0x1939   :  { %8083 = vmatprep.mubr.msk.bf16.mxu0 %vm147_vm3, %v1908_v37  ;;  %v8683_v37 = vld [vmem:[%s10686_s3 + $0xb0] sm:$0xff]  }
0x193a   :  { %8084 = vmatmul.mubr.msk.bf16.vlgmr.msra.gmra.mrb[48].mxu0 %vm147_vm3, %v1909_v40  ;;  %v7380_v40 = vld [vmem:[%s10688_s4 + $0x78] ss:$0 sm:$0xff] }
0x193b   :  { %8096 = vmatpush3.bf16.msra.mxu0 %v8680_v38 }
0x193c   :  { %8097 = vmatprep.subr.bf16.mxu0 %v8681_v21 }
0x193f   :  { %8098 = vmatpush3.bf16.msra.mxu0 %v8681_v21 }
0x1940   :  { %8099 = vmatprep.subr.bf16.mxu0 %v8682_v39 }
0x1943   :  { %8100 = vmatpush3.bf16.msra.mxu0 %v8682_v39 }
0x1944   :  { %8101 = vmatprep.subr.bf16.mxu0 %v8683_v37 }
0x1947   :  { %8102 = vmatpush3.bf16.msra.mxu0 %v8683_v37 }
0x1a0d   :  { %v8085_v26 = vpop.f32.mrb[48].mxu0 }
0x1a0e   :  { %v1966_v41 = vpop.f32.mrb[49].mxu0  ;;  %v1982_v45 = vadd.f32 %v8085_v26, %v9341_v34 }
0x1a0f   :  { %v1980_v42 = vadd.f32 %v1966_v41, %v9339_v12  ;;  %v8086_v43 = vpop.f32.mrb[50].mxu0 }
0x1a10   :  { %v1969_v44 = vpop.f32.mrb[51].mxu0  ;;  %v9542_v50 = vadd.f32 %v7377_v22, %v1982_v45 }
0x1a11   :  { %v9535_v46 = vadd.f32 %v7377_v22, %v1980_v42  ;;  %v1981_v47 = vadd.f32 %v1969_v44, %v9343_v35 }
0x1a12   :  { %v1999_v12 = vsel %vm1061_vm14, %v9542_v50, 0.0 }
0x1a13   :  { %v9538_v48 = vadd.f32 %v7377_v22, %v1981_v47  ;;  %v1993_v49 = vsel %vm147_vm3, %v9535_v46, 0.0 }
0x1a14   :  { %1994 = vadd.xlane.f32.xlu1 %v1993_v49 }
0x1a15   :  { %v1996_v51 = vsel %vm147_vm3, %v9538_v48, 0.0 }
0x1a16   :  { %1997 = vadd.xlane.f32.xlu0 %v1996_v51 }
0x1a1a   :  { %2000 = vadd.xlane.f32.xlu0 %v1999_v12 }
0x1aa1   :  { %v1995_v34 = vpop.xlane.xlu1 %1994 }
0x1aa2   :  { %v2002_v52 = vmul.f32 0.03125, %v1995_v34 }
0x1aa3   :  { %v1998_v53 = vpop.xlane.xlu0 %1997 }
0x1aa4   :  { %v2005_v35 = vsub.f32 %v9535_v46, %v2002_v52  ;;  %v2003_v54 = vmul.f32 0.03125, %v1998_v53 }
0x1aa6   :  { %v2006_v55 = vsub.f32 %v9538_v48, %v2003_v54  ;;  %v2008_v25 = vmul.f32 %v2005_v35, %v2005_v35 }
0x1aa7   :  { %v2001_v29 = vpop.xlane.xlu0 %2000 }
0x1aa8   :  { %v2004_v14 = vmul.f32 0.03125, %v2001_v29  ;;  %v2011_v56 = vsel %vm147_vm3, %v2008_v25, 0.0  ;;  %v2009_v15 = vmul.f32 %v2006_v55, %v2006_v55 }
0x1aa9   :  { %2012 = vadd.xlane.f32.xlu1 %v2011_v56 }
0x1aaa   :  { %v2007_v17 = vsub.f32 %v9542_v50, %v2004_v14  ;;  %v2014_v18 = vsel %vm147_vm3, %v2009_v15, 0.0 }
0x1aab   :  { %2015 = vadd.xlane.f32.xlu0 %v2014_v18 }
0x1aac   :  { %v2010_v57 = vmul.f32 %v2007_v17, %v2007_v17 }
0x1aae   :  { %v2017_v58 = vsel %vm1061_vm14, %v2010_v57, 0.0 }
0x1aaf   :  { %2018 = vadd.xlane.f32.xlu1 %v2017_v58 }
0x1b36   :  { %v2013_v61 = vpop.xlane.xlu1 %2012 }
0x1b37   :  { %v2020_v62 = vmul.f32 0.03125, %v2013_v61 }
0x1b38   :  { %v2016_v63 = vpop.xlane.xlu0 %2015 }
0x1b39   :  { %v2023_v1 = vadd.f32 1e-05, %v2020_v62  ;;  %v2021_v2 = vmul.f32 0.03125, %v2016_v63 }
0x1b3b   :  { %8815 = vrsqrt.f32 %v2023_v1  ;;  %v2024_v4 = vadd.f32 1e-05, %v2021_v2 }
0x1b3c   :  { %v2019_v5 = vpop.xlane.xlu1 %2018 }
0x1b3d   :  { %8817 = vrsqrt.f32 %v2024_v4  ;;  %v2022_v6 = vmul.f32 0.03125, %v2019_v5 }
0x1b3f   :  { %v2025_v7 = vadd.f32 1e-05, %v2022_v6 }
0x1b41   :  { %8819 = vrsqrt.f32 %v2025_v7 }
0x1b45   :  { %v8816_v8 = vpop.eup %8815 }
0x1b46   :  { %v2029_v10 = vmul.f32 %v8816_v8, %v2005_v35  ;;  %v7391_v8 = vld [vmem:[%s10688_s4 + $0x80] ss:$0 sm:$0xff] }
0x1b47   :  { %v8818_v11 = vpop.eup %8817 }
0x1b48   :  { %v2030_v13 = vmul.f32 %v8818_v11, %v2006_v55  ;;  %v2036_v16 = vmul.f32 %v7378_v9, %v2029_v10 }
0x1b4a   :  { %v2037_v20 = vmul.f32 %v7378_v9, %v2030_v13  ;;  %v2043_v28 = vadd.f32 %v7379_v19, %v2036_v16 }
0x1b4b   :  { %v8820_v24 = vpop.eup %8819 }
0x1b4c   :  { %v2031_v27 = vmul.f32 %v8820_v24, %v2007_v17  ;;  %v2044_v30 = vadd.f32 %v7379_v19, %v2037_v20 }
0x1b4e   :  { %v2046_v31 = vpack.c.bf16 %v2044_v30, %v2043_v28  ;;  %v2038_v32 = vmul.f32 %v7378_v9, %v2031_v27 }
0x1b50   :  { %8091 = vmatprep.mubr.msk.bf16.mxu1 %vm147_vm3, %v2046_v31  ;;  %v2045_v33 = vadd.f32 %v7379_v19, %v2038_v32 }
0x1b52   :  { %v2047_v36 = vpack.c.bf16 %v2045_v33, %v2045_v33 }
0x1b54   :  { %8092 = vmatmul.mubr.msk.bf16.vlgmr.msra.gmra.mrb[48].mxu1 %vm147_vm3, %v2047_v36 }
0x1c27   :  { %v8093_v26 = vpop.f32.mrb[48].mxu1 }
0x1c28   :  { %v2118_v22 = vadd.f32 %v8093_v26, %v7380_v40  ;;  %v2109_v41 = vpop.f32.mrb[49].mxu1 }
0x1c29   :  { %v2110_v42 = vadd.f32 %v7380_v40, %v2109_v41  ;;  %v8094_v43 = vpop.f32.mrb[50].mxu1 }
0x1c2a   :  { %v2125_v44 = vmul.f32 %v2118_v22, %v2118_v22  ;;  %v2112_v45 = vpop.f32.mrb[51].mxu1  ;;  %v8684_v43 = vld [vmem:[%s10686_s3 + $0x118] sm:$0xff]  }
0x1c2b   :  { %v2123_v47 = vmul.f32 %v2110_v42, %v2110_v42  ;;  %v2113_v49 = vadd.f32 %v7380_v40, %v2112_v45  ;;  %8107 = vmatprep.subr.bf16.mxu1 %v8684_v43  ;;  %v8686_v45 = vld [vmem:[%s10686_s3 + $0xb8] sm:$0xff]  }
0x1c2c   :  { %v2128_v51 = vmul.f32 %v2125_v44, %v2118_v22  ;;  %v8685_v44 = vld [vmem:[%s10686_s3 + $0x120] sm:$0xff]   ;;  %8108 = vmatpush3.bf16.msra.mxu1 %v8684_v43 }
0x1c2d   :  { %v2126_v12 = vmul.f32 %v2123_v47, %v2110_v42  ;;  %v2124_v34 = vmul.f32 %v2113_v49, %v2113_v49  ;;  %8109 = vmatprep.subr.bf16.mxu1 %v8685_v44 }
0x1c2e   :  { %v2131_v52 = vmul.f32 0.044715, %v2128_v51 }
0x1c2f   :  { %v2129_v53 = vmul.f32 0.044715, %v2126_v12  ;;  %v2127_v35 = vmul.f32 %v2124_v34, %v2113_v49 }
0x1c30   :  { %v2134_v54 = vadd.f32 %v2131_v52, %v2118_v22  ;;  %8110 = vmatpush3.bf16.msra.mxu1 %v8685_v44 }
0x1c31   :  { %v2132_v55 = vadd.f32 %v2129_v53, %v2110_v42  ;;  %v2130_v25 = vmul.f32 0.044715, %v2127_v35  ;;  %8115 = vmatprep.subr.bf16.mxu1 %v8686_v45 }
0x1c32   :  { %v2137_v29 = vmul.f32 0.7978846, %v2134_v54 }
0x1c33   :  { %v2135_v14 = vmul.f32 0.7978846, %v2132_v55  ;;  %v2133_v56 = vadd.f32 %v2130_v25, %v2113_v49  ;;  %v7392_v25 = vld [vmem:[%s10688_s4 + $0xf0] ss:$0 sm:$0xff] }
0x1c34   :  { %8821 = vtanh.f32 %v2137_v29 }
0x1c35   :  { %8823 = vtanh.f32 %v2135_v14  ;;  %v2136_v15 = vmul.f32 0.7978846, %v2133_v56 }
0x1c37   :  { %8825 = vtanh.f32 %v2136_v15 }
0x1c3e   :  { %v8822_v17 = vpop.eup %8821 }
0x1c3f   :  { %v8824_v18 = vpop.eup %8823  ;;  %v2143_v57 = vadd.f32 1.0, %v8822_v17  ;;  %v7399_v17 = vld [vmem:[%s10688_s4 + $0x88] ss:$0 sm:$0xff] }
0x1c40   :  { %v2141_v58 = vadd.f32 1.0, %v8824_v18 }
0x1c41   :  { %v8826_v59 = vpop.eup %8825  ;;  %v2146_v60 = vmul.f32 0.5, %v2143_v57  ;;  %v7393_v57 = vld [vmem:[%s10688_s4 + $0xf8] ss:$0 sm:$0xff] }
0x1c42   :  { %v2144_v61 = vmul.f32 0.5, %v2141_v58  ;;  %v2142_v62 = vadd.f32 1.0, %v8826_v59 }
0x1c43   :  { %v2149_v1 = vmul.f32 %v2146_v60, %v2118_v22 }
0x1c44   :  { %v2145_v63 = vmul.f32 0.5, %v2142_v62  ;;  %v2147_v2 = vmul.f32 %v2144_v61, %v2110_v42 }
0x1c45   :  { %v2151_v6 = vpack.c.bf16 %v2149_v1, %v2149_v1 }
0x1c46   :  { %v2148_v4 = vmul.f32 %v2145_v63, %v2113_v49 }
0x1c48   :  { %v2150_v5 = vpack.c.bf16 %v2148_v4, %v2147_v2  ;;  %v7400_v2 = vld [vmem:[%s10688_s4 + $0x90] ss:$0 sm:$0xff] }
0x1c4a   :  { %8103 = vmatprep.mubr.msk.bf16.mxu0 %vm855_vm10, %v2150_v5 }
0x1c4b   :  { %8104 = vmatmul.mubr.msk.bf16.vlgmr.msra.gmra.mrb[52].mxu0 %vm855_vm10, %v2151_v6 }
0x1d1e   :  { %v8105_v7 = vpop.f32.mrb[52].mxu0 }
0x1d1f   :  { %v2224_v9 = vpop.f32.mrb[53].mxu0  ;;  %v2240_v10 = vadd.f32 %v8105_v7, %v9542_v50 }
0x1d20   :  { %v2238_v11 = vadd.f32 %v2224_v9, %v9535_v46  ;;  %v8106_v13 = vpop.f32.mrb[54].mxu0  ;;  %v8687_v9 = vld [vmem:[%s10686_s3 + $0xc0] sm:$0xff]  }
0x1d21   :  { %v2227_v16 = vpop.f32.mrb[55].mxu0  ;;  %v9593_v24 = vadd.f32 %v7391_v8, %v2240_v10 }
0x1d22   :  { %v9590_v19 = vadd.f32 %v7391_v8, %v2238_v11  ;;  %v2239_v20 = vadd.f32 %v2227_v16, %v9538_v48 }
0x1d23   :  { %v2257_v46 = vsel %vm1061_vm14, %v9593_v24, 0.0 }
0x1d24   :  { %v9595_v27 = vadd.f32 %v7391_v8, %v2239_v20  ;;  %v2251_v28 = vsel %vm147_vm3, %v9590_v19, 0.0  ;;  %v7394_v20 = vld [vmem:[%s10688_s4 + $0x100] ss:$0 sm:$0xff] }
0x1d25   :  { %2252 = vadd.xlane.f32.xlu0 %v2251_v28 }
0x1d26   :  { %v2254_v30 = vsel %vm147_vm3, %v9595_v27, 0.0 }
0x1d27   :  { %2255 = vadd.xlane.f32.xlu1 %v2254_v30 }
0x1d29   :  { %2258 = vadd.xlane.f32.xlu0 %v2257_v46 }
0x1db2   :  { %v2253_v50 = vpop.xlane.xlu0 %2252 }
0x1db3   :  { %v2260_v31 = vmul.f32 0.03125, %v2253_v50 }
0x1db4   :  { %v2256_v32 = vpop.xlane.xlu1 %2255 }
0x1db5   :  { %v2263_v48 = vsub.f32 %v9590_v19, %v2260_v31  ;;  %v2261_v33 = vmul.f32 0.03125, %v2256_v32 }
0x1db6   :  { %v2259_v36 = vpop.xlane.xlu0 %2258 }
0x1db7   :  { %v2264_v38 = vsub.f32 %v9595_v27, %v2261_v33  ;;  %v2262_v21 = vmul.f32 0.03125, %v2259_v36  ;;  %v2266_v39 = vmul.f32 %v2263_v48, %v2263_v48  ;;  %v7401_v33 = vld [vmem:[%s10688_s4 + $0x98] ss:$0 sm:$0xff] }
0x1db9   :  { %v2265_v37 = vsub.f32 %v9593_v24, %v2262_v21  ;;  %v2269_v40 = vsel %vm147_vm3, %v2266_v39, 0.0  ;;  %v2267_v26 = vmul.f32 %v2264_v38, %v2264_v38 }
0x1dba   :  { %2270 = vadd.xlane.f32.xlu1 %v2269_v40 }
0x1dbb   :  { %v2272_v22 = vsel %vm147_vm3, %v2267_v26, 0.0  ;;  %v2268_v41 = vmul.f32 %v2265_v37, %v2265_v37 }
0x1dbc   :  { %2273 = vadd.xlane.f32.xlu0 %v2272_v22 }
0x1dbd   :  { %v2275_v42 = vsel %vm1061_vm14, %v2268_v41, 0.0 }
0x1dbe   :  { %2276 = vadd.xlane.f32.xlu1 %v2275_v42 }
0x1e47   :  { %v2271_v47 = vpop.xlane.xlu1 %2270 }
0x1e48   :  { %v2278_v49 = vmul.f32 0.03125, %v2271_v47 }
0x1e49   :  { %v2274_v51 = vpop.xlane.xlu0 %2273 }
0x1e4a   :  { %v2281_v12 = vadd.f32 1e-05, %v2278_v49  ;;  %v2279_v34 = vmul.f32 0.03125, %v2274_v51 }
0x1e4b   :  { %v2277_v52 = vpop.xlane.xlu1 %2276 }
0x1e4c   :  { %8827 = vrsqrt.f32 %v2281_v12  ;;  %v2282_v53 = vadd.f32 1e-05, %v2279_v34  ;;  %v2280_v35 = vmul.f32 0.03125, %v2277_v52 }
0x1e4e   :  { %8829 = vrsqrt.f32 %v2282_v53  ;;  %v2283_v54 = vadd.f32 1e-05, %v2280_v35 }
0x1e50   :  { %8831 = vrsqrt.f32 %v2283_v54 }
0x1e56   :  { %v8828_v55 = vpop.eup %8827 }
0x1e57   :  { %v2287_v29 = vmul.f32 %v8828_v55, %v2263_v48 }
0x1e58   :  { %v8830_v14 = vpop.eup %8829 }
0x1e59   :  { %v2288_v56 = vmul.f32 %v8830_v14, %v2264_v38  ;;  %v2294_v15 = vmul.f32 %v7392_v25, %v2287_v29  ;;  %v2390_v61 = vmul.f32 %v7399_v17, %v2287_v29 }
0x1e5a   :  { %v8832_v18 = vpop.eup %8831 }
0x1e5b   :  { %v2289_v58 = vmul.f32 %v8832_v18, %v2265_v37  ;;  %v2295_v59 = vmul.f32 %v7392_v25, %v2288_v56  ;;  %v2391_v60 = vmul.f32 %v7399_v17, %v2288_v56  ;;  %v2301_v62 = vadd.f32 %v7393_v57, %v2294_v15 }
0x1e5c   :  { %v2397_v7 = vadd.f32 %v7400_v2, %v2390_v61 }
0x1e5d   :  { %v2302_v63 = vadd.f32 %v7393_v57, %v2295_v59  ;;  %v2296_v1 = vmul.f32 %v7392_v25, %v2289_v58  ;;  %v2398_v4 = vadd.f32 %v7400_v2, %v2391_v60  ;;  %v2392_v10 = vmul.f32 %v7399_v17, %v2289_v58 }
0x1e5f   :  { %v2304_v5 = vpack.c.bf16 %v2302_v63, %v2301_v62  ;;  %v2303_v6 = vadd.f32 %v7393_v57, %v2296_v1  ;;  %v2400_v11 = vpack.c.bf16 %v2398_v4, %v2397_v7  ;;  %v2399_v13 = vadd.f32 %v7400_v2, %v2392_v10 }
0x1e61   :  { %8111 = vmatprep.mubr.msk.bf16.mxu1 %vm147_vm3, %v2304_v5  ;;  %v2305_v8 = vpack.c.bf16 %v2303_v6, %v2303_v6  ;;  %v2401_v16 = vpack.c.bf16 %v2399_v13, %v2399_v13 }
0x1e63   :  { %8112 = vmatmul.mubr.msk.bf16.vlgmr.msra.gmra.mrb[52].mxu1 %vm147_vm3, %v2305_v8 }
0x1e64   :  { %8116 = vmatpush3.bf16.msra.mxu1 %v8686_v45  ;;  %8119 = vmatprep.mubr.msk.bf16.mxu1 %vm147_vm3, %v2400_v11 }
0x1e65   :  { %8117 = vmatprep.subr.bf16.mxu1 %v8687_v9 }
0x1e68   :  { %8118 = vmatpush3.bf16.msra.mxu1 %v8687_v9 }
0x1e6b   :  { %8120 = vmatmul.mubr.msk.bf16.vlgmr.msra.gmra.mrb[56].mxu1 %vm147_vm3, %v2401_v16 }
0x1f36   :  { %v8113_v28 = vpop.f32.mrb[52].mxu1 }
0x1f37   :  { %v2376_v30 = vadd.f32 %v8113_v28, %v7394_v20  ;;  %v2367_v46 = vpop.f32.mrb[53].mxu1 }
0x1f38   :  { %v2368_v50 = vadd.f32 %v7394_v20, %v2367_v46  ;;  %v8114_v31 = vpop.f32.mrb[54].mxu1 }
0x1f39   :  { %2383 = vst [vmem:[%s10691_s5 + $0xf] sm:$0x1] %v2376_v30  ;;  %v2370_v32 = vpop.f32.mrb[55].mxu1 }
0x1f3a   :  { %2381 = vst [vmem:[%s10691_s5 - $0x1] sm:$0xfe] %v2368_v50  ;;  %v2371_v48 = vadd.f32 %v7394_v20, %v2370_v32 }
0x1f3c   :  { %2382 = vst [vmem:[%s10691_s5 + $0x7] sm:$0xff] %v2371_v48 }
0x1f3e   :  { %v8121_v36 = vpop.f32.mrb[56].mxu1 }
0x1f3f   :  { %v2472_v38 = vadd.f32 %v8121_v36, %v7401_v33  ;;  %v2463_v21 = vpop.f32.mrb[57].mxu1 }
0x1f40   :  { %v8122_v39 = vpop.f32.mrb[58].mxu1  ;;  %v2464_v26 = vadd.f32 %v7401_v33, %v2463_v21 }
0x1f41   :  { %v9652_v37 = vpack.c.bf16 %v2472_v38, %v2472_v38  ;;  %v2466_v40 = vpop.f32.mrb[59].mxu1 }
0x1f42   :  { %v2467_v22 = vadd.f32 %v7401_v33, %v2466_v40 }
0x1f43   :  { %2483 = vrot.lane.b32.xlu1 %v9652_v37, %s9062_s16 }
0x1f44   :  { %v9656_v41 = vpack.c.bf16 %v2467_v22, %v2464_v26 }
0x1f46   :  { %2481 = vrot.lane.b32.xlu0 %v9656_v41, %s9062_s16  ;;  %8127 = vmatprep.mubr.msk.bf16.mxu0 %vm195_vm4, %v9656_v41 }
0x1fb5   :  { %v2484_v44 = vpop.permute.xlu1 %2483 }
0x1fb6   :  { %v2495_v45 = vsel %vm195_vm4, %v2484_v44, 0 }
0x1fb8   :  { %v2482_v42 = vpop.permute.xlu0 %2481 }
0x1fb9   :  { %8555 = vmatprep.subr.msk.bf16.mxu0 %vm195_vm4, %v2482_v42  ;;  %v2492_v43 = vsel %vm195_vm4, %v2482_v42, 0 }
0x1fba   :  { %8124 = vmatpush3.bf16.xpose.msra.mxu0 %v2492_v43 }
0x1fbb   :  { %8556 = vmatprep.subr.msk.bf16.mxu0 %vm195_vm4, %v2484_v44 }
0x1fc2   :  { %8126 = vmatpush3.bf16.xpose.msra.mxu0 %v2495_v45 }
0x1fc9   :  { %8128 = vmatmul.mubr.msk.bf16.vlgmr.msra.gmra.mrb[56].mxu0 %vm195_vm4, %v9652_v37 }
0x209c   :  { %v8129_v47 = vpop.f32.mrb[56].mxu0 }
0x209d   :  { %v2531_v49 = vpop.f32.mrb[57].mxu0  ;;  %v2547_v35 = vmul.f32 0.35355338, %v8129_v47 }
0x209e   :  { %v2545_v51 = vmul.f32 0.35355338, %v2531_v49  ;;  %v8130_v12 = vpop.f32.mrb[58].mxu0 }
0x209f   :  { %v2534_v34 = vpop.f32.mrb[59].mxu0  ;;  %v2554_v55 = vsel %vm1264_vm13, %v2547_v35, -inf }
0x20a0   :  { %v2546_v52 = vmul.f32 0.35355338, %v2534_v34  ;;  %v2548_v53 = vsel %vm1257_vm15, %v2545_v51, -inf }
0x20a1   :  { %2549 = vmax.xlane.f32.xlu1 %v2548_v53 }
0x20a2   :  { %v2551_v54 = vsel %vm1257_vm15, %v2546_v52, -inf }
0x20a3   :  { %2552 = vmax.xlane.f32.xlu0 %v2551_v54 }
0x20a7   :  { %2555 = vmax.xlane.f32.xlu0 %v2554_v55 }
0x212e   :  { %v2550_v25 = vpop.xlane.xlu1 %2549 }
0x212f   :  { %v2557_v56 = vsub.f32 %v2545_v51, %v2550_v25 }
0x2130   :  { %v2553_v29 = vpop.xlane.xlu0 %2552 }
0x2131   :  { %v2558_v14 = vsub.f32 %v2546_v52, %v2553_v29  ;;  %v2560_v57 = vmul.f32 1.442695, %v2557_v56 }
0x2133   :  { %v2562_v15 = vmul.f32 1.442695, %v2558_v14 }
0x2134   :  { %v2556_v17 = vpop.xlane.xlu0 %2555 }
0x2135   :  { %8833 = vpow2.f32 %v2562_v15  ;;  %v2559_v18 = vsub.f32 %v2547_v35, %v2556_v17 }
0x2137   :  { %v2564_v58 = vmul.f32 1.442695, %v2559_v18 }
0x2139   :  { %8835 = vpow2.f32 %v2564_v58 }
0x213a   :  { %8837 = vpow2.f32 %v2560_v57 }
0x213f   :  { %v8834_v59 = vpop.eup %8833 }
0x2140   :  { %v2569_v60 = vsel %vm1257_vm15, %v8834_v59, 0.0 }
0x2141   :  { %2570 = vadd.xlane.f32.xlu0 %v2569_v60 }
0x2143   :  { %v8836_v61 = vpop.eup %8835 }
0x2144   :  { %v2572_v62 = vsel %vm1264_vm13, %v8836_v61, 0.0  ;;  %v8838_v63 = vpop.eup %8837 }
0x2145   :  { %2573 = vadd.xlane.f32.xlu1 %v2572_v62  ;;  %v2566_v1 = vsel %vm1257_vm15, %v8838_v63, 0.0 }
0x2149   :  { %2567 = vadd.xlane.f32.xlu1 %v2566_v1 }
0x2157   :  { %2583 = vrot.lane.b32.xlu0 %v9656_v41, %s9068_s22 }
0x215a   :  { %2585 = vrot.lane.b32.xlu1 %v9652_v37, %s9068_s22 }
0x215b   :  { %2651 = vrot.lane.b32.xlu0 %v9652_v37, %s9063_s17 }
0x215e   :  { %2649 = vrot.lane.b32.xlu1 %v9656_v41, %s9063_s17 }
0x215f   :  { %2647 = vrot.lane.b32.xlu0 %v9652_v37, %s9061_s15 }
0x2162   :  { %2645 = vrot.lane.b32.xlu1 %v9656_v41, %s9061_s15 }
0x21ce   :  { %v2571_v2 = vpop.xlane.xlu0 %2570 }
0x21d2   :  { %v2574_v4 = vpop.xlane.xlu1 %2573  ;;  %v2584_v5 = vpop.permute.xlu0 %2583 }
0x21d3   :  { %8131 = vmatprep.subr.bf16.mxu1 %v2584_v5  ;;  %8839 = vrcp.f32 %v2574_v4 }
0x21d4   :  { %8132 = vmatpush3.bf16.msra.mxu1 %v2584_v5  ;;  %8841 = vrcp.f32 %v2571_v2 }
0x21d6   :  { %v2568_v6 = vpop.xlane.xlu1 %2567  ;;  %v2652_v32 = vpop.permute.xlu0 %2651 }
0x21d7   :  { %8843 = vrcp.f32 %v2568_v6  ;;  %v2663_v48 = vsel %vm195_vm4, %v2652_v32, 0 }
0x21da   :  { %v2586_v7 = vpop.permute.xlu1 %2585  ;;  %v2648_v33 = vpop.permute.xlu0 %2647 }
0x21db   :  { %v2595_v8 = vand.u32 %v2586_v7, %v9408_v3 }
0x21dd   :  { %8133 = vmatprep.subr.bf16.mxu1 %v2595_v8  ;;  %v8840_v9 = vpop.eup %8839 }
0x21de   :  { %v2650_v10 = vpop.permute.xlu1 %2649  ;;  %8134 = vmatpush3.bf16.msra.mxu1 %v2595_v8  ;;  %v8842_v11 = vpop.eup %8841  ;;  %v2580_v16 = vmul.f32 %v8840_v9, %v8836_v61 }
0x21df   :  { %8557 = vmatprep.subr.msk.bf16.mxu1 %vm195_vm4, %v2650_v10  ;;  %v2579_v28 = vmul.f32 %v8842_v11, %v8834_v59  ;;  %v2660_v31 = vsel %vm195_vm4, %v2650_v10, 0 }
0x21e0   :  { %v2582_v46 = vpack.c.bf16 %v2580_v16, %v2580_v16 }
0x21e1   :  { %v8844_v13 = vpop.eup %8843 }
0x21e2   :  { %v2578_v20 = vmul.f32 %v8844_v13, %v8838_v63  ;;  %v2646_v50 = vpop.permute.xlu1 %2645 }
0x21e4   :  { %v2581_v30 = vpack.c.bf16 %v2579_v28, %v2578_v20 }
0x21e6   :  { %8135 = vmatprep.mubr.msk.bf16.mxu1 %vm1257_vm15, %v2581_v30 }
0x21e7   :  { %8136 = vmatmul.mubr.msk.bf16.vlgmr.msra.gmra.mrb[60].mxu1 %vm1257_vm15, %v2582_v46 }
0x21e8   :  { %8140 = vmatpush3.bf16.xpose.msra.mxu1 %v2660_v31  ;;  %8143 = vmatprep.mubr.msk.bf16.mxu1 %vm195_vm4, %v2646_v50 }
0x21e9   :  { %8558 = vmatprep.subr.msk.bf16.mxu1 %vm195_vm4, %v2652_v32 }
0x21f0   :  { %8142 = vmatpush3.bf16.xpose.msra.mxu1 %v2663_v48 }
0x21f7   :  { %8144 = vmatmul.mubr.msk.bf16.vlgmr.msra.gmra.mrb[64].mxu1 %vm195_vm4, %v2648_v33 }
0x22ba   :  { %v9695_v36 = vpop.f32.mrb[60].mxu1 }
0x22bb   :  { %v9697_v38 = vpop.f32.mrb[61].mxu1 }
0x22bc   :  { %v8138_v21 = vpop.f32.mrb[62].mxu1 }
0x22bd   :  { %v9699_v39 = vpop.f32.mrb[63].mxu1 }
0x22ca   :  { %v8145_v40 = vpop.f32.mrb[64].mxu1 }
0x22cb   :  { %v2699_v26 = vpop.f32.mrb[65].mxu1  ;;  %v2715_v47 = vmul.f32 0.35355338, %v8145_v40 }
0x22cc   :  { %v2713_v22 = vmul.f32 0.35355338, %v2699_v26  ;;  %v8146_v42 = vpop.f32.mrb[66].mxu1 }
0x22cd   :  { %v2702_v43 = vpop.f32.mrb[67].mxu1  ;;  %v2722_v51 = vsel %vm1264_vm13, %v2715_v47, -inf }
0x22ce   :  { %v2714_v44 = vmul.f32 0.35355338, %v2702_v43  ;;  %v2716_v45 = vsel %vm1257_vm15, %v2713_v22, -inf }
0x22cf   :  { %2717 = vmax.xlane.f32.xlu1 %v2716_v45 }
0x22d0   :  { %v2719_v49 = vsel %vm1257_vm15, %v2714_v44, -inf }
0x22d1   :  { %2720 = vmax.xlane.f32.xlu0 %v2719_v49 }
0x22d5   :  { %2723 = vmax.xlane.f32.xlu0 %v2722_v51 }
0x235c   :  { %v2718_v12 = vpop.xlane.xlu1 %2717 }
0x235d   :  { %v2725_v53 = vsub.f32 %v2713_v22, %v2718_v12 }
0x235e   :  { %v2721_v34 = vpop.xlane.xlu0 %2720 }
0x235f   :  { %v2726_v52 = vsub.f32 %v2714_v44, %v2721_v34  ;;  %v2728_v25 = vmul.f32 1.442695, %v2725_v53 }
0x2361   :  { %v2730_v35 = vmul.f32 1.442695, %v2726_v52 }
0x2362   :  { %v2724_v54 = vpop.xlane.xlu0 %2723 }
0x2363   :  { %8845 = vpow2.f32 %v2730_v35  ;;  %v2727_v55 = vsub.f32 %v2715_v47, %v2724_v54 }
0x2365   :  { %v2732_v29 = vmul.f32 1.442695, %v2727_v55 }
0x2367   :  { %8847 = vpow2.f32 %v2732_v29 }
0x2368   :  { %8849 = vpow2.f32 %v2728_v25 }
0x236d   :  { %v8846_v14 = vpop.eup %8845 }
0x236e   :  { %v2737_v56 = vsel %vm1257_vm15, %v8846_v14, 0.0 }
0x236f   :  { %2738 = vadd.xlane.f32.xlu0 %v2737_v56 }
0x2371   :  { %v8848_v15 = vpop.eup %8847 }
0x2372   :  { %v2740_v17 = vsel %vm1264_vm13, %v8848_v15, 0.0  ;;  %v8850_v18 = vpop.eup %8849 }
0x2373   :  { %2741 = vadd.xlane.f32.xlu1 %v2740_v17  ;;  %v2734_v57 = vsel %vm1257_vm15, %v8850_v18, 0.0 }
0x2377   :  { %2735 = vadd.xlane.f32.xlu1 %v2734_v57 }
0x2385   :  { %2751 = vrot.lane.b32.xlu0 %v9656_v41, %s9069_s23 }
0x2388   :  { %2753 = vrot.lane.b32.xlu1 %v9652_v37, %s9069_s23 }
0x2389   :  { %2819 = vrot.lane.b32.xlu0 %v9652_v37, %s9064_s18 }
0x238c   :  { %2817 = vrot.lane.b32.xlu1 %v9656_v41, %s9064_s18 }
0x238d   :  { %2815 = vrot.lane.b32.xlu0 %v9652_v37, %s9065_s19 }
0x2390   :  { %2813 = vrot.lane.b32.xlu1 %v9656_v41, %s9065_s19 }
0x23fc   :  { %v2739_v58 = vpop.xlane.xlu0 %2738 }
0x2400   :  { %v2742_v59 = vpop.xlane.xlu1 %2741  ;;  %v2752_v60 = vpop.permute.xlu0 %2751 }
0x2401   :  { %8147 = vmatprep.subr.bf16.mxu0 %v2752_v60  ;;  %8851 = vrcp.f32 %v2742_v59 }
0x2402   :  { %8148 = vmatpush3.bf16.msra.mxu0 %v2752_v60  ;;  %8853 = vrcp.f32 %v2739_v58 }
0x2404   :  { %v2736_v61 = vpop.xlane.xlu1 %2735  ;;  %v2820_v16 = vpop.permute.xlu0 %2819 }
0x2405   :  { %8855 = vrcp.f32 %v2736_v61  ;;  %v2831_v20 = vsel %vm195_vm4, %v2820_v16, 0 }
0x2408   :  { %v2754_v62 = vpop.permute.xlu1 %2753  ;;  %v2816_v28 = vpop.permute.xlu0 %2815 }
0x2409   :  { %v2763_v63 = vand.u32 %v2754_v62, %v9408_v3 }
0x240b   :  { %8149 = vmatprep.subr.bf16.mxu0 %v2763_v63  ;;  %v8852_v1 = vpop.eup %8851 }
0x240c   :  { %v2818_v2 = vpop.permute.xlu1 %2817  ;;  %8150 = vmatpush3.bf16.msra.mxu0 %v2763_v63  ;;  %v8854_v4 = vpop.eup %8853  ;;  %v2748_v6 = vmul.f32 %v8852_v1, %v8848_v15 }
0x240d   :  { %8559 = vmatprep.subr.msk.bf16.mxu0 %vm195_vm4, %v2818_v2  ;;  %v2747_v8 = vmul.f32 %v8854_v4, %v8846_v14  ;;  %v2828_v13 = vsel %vm195_vm4, %v2818_v2, 0 }
0x240e   :  { %v2750_v10 = vpack.c.bf16 %v2748_v6, %v2748_v6 }
0x240f   :  { %v8856_v5 = vpop.eup %8855 }
0x2410   :  { %v2746_v7 = vmul.f32 %v8856_v5, %v8850_v18  ;;  %v2814_v11 = vpop.permute.xlu1 %2813 }
0x2412   :  { %v2749_v9 = vpack.c.bf16 %v2747_v8, %v2746_v7 }
0x2414   :  { %8151 = vmatprep.mubr.msk.bf16.mxu0 %vm1257_vm15, %v2749_v9 }
0x2415   :  { %8152 = vmatmul.mubr.msk.bf16.vlgmr.msra.gmra.mrb[60].mxu0 %vm1257_vm15, %v2750_v10 }
0x2416   :  { %8156 = vmatpush3.bf16.xpose.msra.mxu0 %v2828_v13  ;;  %8159 = vmatprep.mubr.msk.bf16.mxu0 %vm195_vm4, %v2814_v11 }
0x2417   :  { %8560 = vmatprep.subr.msk.bf16.mxu0 %vm195_vm4, %v2820_v16 }
0x241e   :  { %8158 = vmatpush3.bf16.xpose.msra.mxu0 %v2831_v20 }
0x2425   :  { %8160 = vmatmul.mubr.msk.bf16.vlgmr.msra.gmra.mrb[64].mxu0 %vm195_vm4, %v2816_v28 }
0x24e8   :  { %v9728_v30 = vpop.f32.mrb[60].mxu0 }
0x24e9   :  { %v9730_v46 = vpop.f32.mrb[61].mxu0 }
0x24ea   :  { %v8154_v50 = vpop.f32.mrb[62].mxu0 }
0x24eb   :  { %v9732_v31 = vpop.f32.mrb[63].mxu0 }
0x24ec   :  { %v8612_v32 = vpack.i.bf16 %v9732_v31, %v9730_v46 }
0x24f8   :  { %v8161_v48 = vpop.f32.mrb[64].mxu0 }
0x24f9   :  { %v2867_v33 = vpop.f32.mrb[65].mxu0  ;;  %v2883_v43 = vmul.f32 0.35355338, %v8161_v48 }
0x24fa   :  { %v2881_v21 = vmul.f32 0.35355338, %v2867_v33  ;;  %v8162_v40 = vpop.f32.mrb[66].mxu0 }
0x24fb   :  { %v2870_v26 = vpop.f32.mrb[67].mxu0  ;;  %v2890_v45 = vsel %vm1264_vm13, %v2883_v43, -inf }
0x24fc   :  { %v2882_v22 = vmul.f32 0.35355338, %v2870_v26  ;;  %v2884_v42 = vsel %vm1257_vm15, %v2881_v21, -inf }
0x24fd   :  { %2885 = vmax.xlane.f32.xlu1 %v2884_v42 }
0x24fe   :  { %v2887_v44 = vsel %vm1257_vm15, %v2882_v22, -inf }
0x24ff   :  { %2888 = vmax.xlane.f32.xlu0 %v2887_v44 }
0x2503   :  { %2891 = vmax.xlane.f32.xlu0 %v2890_v45 }
0x258a   :  { %v2886_v47 = vpop.xlane.xlu1 %2885 }
0x258b   :  { %v2893_v12 = vsub.f32 %v2881_v21, %v2886_v47 }
0x258c   :  { %v2889_v49 = vpop.xlane.xlu0 %2888 }
0x258d   :  { %v2894_v51 = vsub.f32 %v2882_v22, %v2889_v49  ;;  %v2896_v35 = vmul.f32 1.442695, %v2893_v12 }
0x258f   :  { %v2898_v34 = vmul.f32 1.442695, %v2894_v51 }
0x2590   :  { %v2892_v52 = vpop.xlane.xlu0 %2891 }
0x2591   :  { %8857 = vpow2.f32 %v2898_v34  ;;  %v2895_v53 = vsub.f32 %v2883_v43, %v2892_v52 }
0x2593   :  { %v2900_v54 = vmul.f32 1.442695, %v2895_v53 }
0x2595   :  { %8859 = vpow2.f32 %v2900_v54 }
0x2596   :  { %8861 = vpow2.f32 %v2896_v35 }
0x259b   :  { %v8858_v55 = vpop.eup %8857 }
0x259c   :  { %v2905_v25 = vsel %vm1257_vm15, %v8858_v55, 0.0 }
0x259d   :  { %2906 = vadd.xlane.f32.xlu0 %v2905_v25 }
0x259f   :  { %v8860_v29 = vpop.eup %8859 }
0x25a0   :  { %v2908_v14 = vsel %vm1264_vm13, %v8860_v29, 0.0  ;;  %v8862_v56 = vpop.eup %8861 }
0x25a1   :  { %2909 = vadd.xlane.f32.xlu1 %v2908_v14  ;;  %v2902_v15 = vsel %vm1257_vm15, %v8862_v56, 0.0 }
0x25a5   :  { %2903 = vadd.xlane.f32.xlu1 %v2902_v15 }
0x25b3   :  { %2919 = vrot.lane.b32.xlu0 %v9656_v41, %s9070_s24 }
0x25b6   :  { %2921 = vrot.lane.b32.xlu1 %v9652_v37, %s9070_s24 }
0x25b7   :  { %2987 = vrot.lane.b32.xlu0 %v9652_v37, %s9066_s20 }
0x25ba   :  { %2985 = vrot.lane.b32.xlu1 %v9656_v41, %s9066_s20 }
0x25bb   :  { %2983 = vrot.lane.b32.xlu0 %v9652_v37, %s9067_s21 }
0x25be   :  { %2981 = vrot.lane.b32.xlu1 %v9656_v41, %s9067_s21 }
0x262a   :  { %v2907_v17 = vpop.xlane.xlu0 %2906 }
0x262e   :  { %v2910_v18 = vpop.xlane.xlu1 %2909  ;;  %v2920_v57 = vpop.permute.xlu0 %2919 }
0x262f   :  { %8163 = vmatprep.subr.bf16.mxu1 %v2920_v57  ;;  %8863 = vrcp.f32 %v2910_v18 }
0x2630   :  { %8164 = vmatpush3.bf16.msra.mxu1 %v2920_v57  ;;  %8865 = vrcp.f32 %v2907_v17 }
0x2632   :  { %v2904_v58 = vpop.xlane.xlu1 %2903  ;;  %v2988_v10 = vpop.permute.xlu0 %2987 }
0x2633   :  { %8867 = vrcp.f32 %v2904_v58  ;;  %v2999_v11 = vsel %vm195_vm4, %v2988_v10, 0 }
0x2636   :  { %v2922_v59 = vpop.permute.xlu1 %2921  ;;  %v2984_v13 = vpop.permute.xlu0 %2983 }
0x2637   :  { %v2931_v60 = vand.u32 %v2922_v59, %v9408_v3 }
0x2639   :  { %8165 = vmatprep.subr.bf16.mxu1 %v2931_v60  ;;  %v8864_v61 = vpop.eup %8863 }
0x263a   :  { %v2986_v62 = vpop.permute.xlu1 %2985  ;;  %8166 = vmatpush3.bf16.msra.mxu1 %v2931_v60  ;;  %v8866_v63 = vpop.eup %8865  ;;  %v2916_v2 = vmul.f32 %v8864_v61, %v8860_v29 }
0x263b   :  { %8561 = vmatprep.subr.msk.bf16.mxu1 %vm195_vm4, %v2986_v62  ;;  %v2915_v5 = vmul.f32 %v8866_v63, %v8858_v55  ;;  %v2996_v9 = vsel %vm195_vm4, %v2986_v62, 0 }
0x263c   :  { %v2918_v7 = vpack.c.bf16 %v2916_v2, %v2916_v2  ;;  %v8689_v2 = vld [vmem:[%s10686_s3 + $0xd0] sm:$0xff]  }
0x263d   :  { %v8868_v1 = vpop.eup %8867 }
0x263e   :  { %v2914_v4 = vmul.f32 %v8868_v1, %v8862_v56  ;;  %v2982_v8 = vpop.permute.xlu1 %2981  ;;  %v8688_v1 = vld [vmem:[%s10686_s3 + $0xc8] sm:$0xff]  }
0x2640   :  { %v2917_v6 = vpack.c.bf16 %v2915_v5, %v2914_v4 }
0x2642   :  { %8167 = vmatprep.mubr.msk.bf16.mxu1 %vm1257_vm15, %v2917_v6 }
0x2643   :  { %8168 = vmatmul.mubr.msk.bf16.vlgmr.msra.gmra.mrb[68].mxu1 %vm1257_vm15, %v2918_v7 }
0x2644   :  { %8172 = vmatpush3.bf16.xpose.msra.mxu1 %v2996_v9  ;;  %8175 = vmatprep.mubr.msk.bf16.mxu1 %vm195_vm4, %v2982_v8 }
0x2645   :  { %8562 = vmatprep.subr.msk.bf16.mxu1 %vm195_vm4, %v2988_v10 }
0x264c   :  { %8174 = vmatpush3.bf16.xpose.msra.mxu1 %v2999_v11 }
0x2653   :  { %8176 = vmatmul.mubr.msk.bf16.vlgmr.msra.gmra.mrb[72].mxu1 %vm195_vm4, %v2984_v13 }
0x2716   :  { %v8169_v16 = vpop.f32.mrb[68].mxu1 }
0x2717   :  { %v2967_v20 = vpop.f32.mrb[69].mxu1 }
0x2718   :  { %v8170_v28 = vpop.f32.mrb[70].mxu1 }
0x2719   :  { %v2970_v50 = vpop.f32.mrb[71].mxu1 }
0x271a   :  { %v8617_v48 = vpack.i.bf16 %v2970_v50, %v2967_v20 }
0x2726   :  { %v8177_v33 = vpop.f32.mrb[72].mxu1 }
0x2727   :  { %v3035_v21 = vpop.f32.mrb[73].mxu1  ;;  %v3051_v44 = vmul.f32 0.35355338, %v8177_v33 }
0x2728   :  { %v3049_v40 = vmul.f32 0.35355338, %v3035_v21  ;;  %v8178_v26 = vpop.f32.mrb[74].mxu1 }
0x2729   :  { %v3038_v22 = vpop.f32.mrb[75].mxu1  ;;  %v3058_v47 = vsel %vm1264_vm13, %v3051_v44, -inf }
0x272a   :  { %v3050_v42 = vmul.f32 0.35355338, %v3038_v22  ;;  %v3052_v43 = vsel %vm1257_vm15, %v3049_v40, -inf }
0x272b   :  { %3053 = vmax.xlane.f32.xlu1 %v3052_v43 }
0x272c   :  { %v3055_v45 = vsel %vm1257_vm15, %v3050_v42, -inf }
0x272d   :  { %3056 = vmax.xlane.f32.xlu0 %v3055_v45 }
0x2731   :  { %3059 = vmax.xlane.f32.xlu0 %v3058_v47 }
0x27b8   :  { %v3054_v49 = vpop.xlane.xlu1 %3053 }
0x27b9   :  { %v3061_v34 = vsub.f32 %v3049_v40, %v3054_v49 }
0x27ba   :  { %v3057_v51 = vpop.xlane.xlu0 %3056 }
0x27bb   :  { %v3062_v12 = vsub.f32 %v3050_v42, %v3057_v51  ;;  %v3064_v54 = vmul.f32 1.442695, %v3061_v34 }
0x27bd   :  { %v3066_v52 = vmul.f32 1.442695, %v3062_v12 }
0x27be   :  { %v3060_v53 = vpop.xlane.xlu0 %3059 }
0x27bf   :  { %8869 = vpow2.f32 %v3066_v52  ;;  %v3063_v35 = vsub.f32 %v3051_v44, %v3060_v53 }
0x27c1   :  { %v3068_v55 = vmul.f32 1.442695, %v3063_v35 }
0x27c3   :  { %8871 = vpow2.f32 %v3068_v55 }
0x27c4   :  { %8873 = vpow2.f32 %v3064_v54 }
0x27c9   :  { %v8870_v25 = vpop.eup %8869 }
0x27ca   :  { %v3073_v29 = vsel %vm1257_vm15, %v8870_v25, 0.0 }
0x27cb   :  { %3074 = vadd.xlane.f32.xlu0 %v3073_v29 }
0x27cd   :  { %v8872_v14 = vpop.eup %8871 }
0x27ce   :  { %v3076_v56 = vsel %vm1264_vm13, %v8872_v14, 0.0  ;;  %v8874_v15 = vpop.eup %8873 }
0x27cf   :  { %3077 = vadd.xlane.f32.xlu1 %v3076_v56  ;;  %v3070_v17 = vsel %vm1257_vm15, %v8874_v15, 0.0 }
0x27d3   :  { %3071 = vadd.xlane.f32.xlu1 %v3070_v17 }
0x27e1   :  { %3087 = vrot.lane.b32.xlu0 %v9656_v41, %s9071_s25 }
0x27e4   :  { %3089 = vrot.lane.b32.xlu1 %v9652_v37, %s9071_s25 }
0x27e5   :  { %3156 = vrot.lane.b32.xlu0 %v9728_v30, %s9072_s26 }
0x27e8   :  { %8613 = vrot.lane.b32.xlu1 %v8612_v32, %s9072_s26 }
0x27e9   :  { %3168 = vrot.lane.b32.xlu0 %v8169_v16, %s9073_s6 }
0x27ec   :  { %8618 = vrot.lane.b32.xlu1 %v8617_v48, %s9073_s6 }
0x2858   :  { %v3075_v18 = vpop.xlane.xlu0 %3074 }
0x285c   :  { %v3078_v57 = vpop.xlane.xlu1 %3077  ;;  %v3088_v58 = vpop.permute.xlu0 %3087 }
0x285d   :  { %8179 = vmatprep.subr.bf16.mxu0 %v3088_v58  ;;  %8875 = vrcp.f32 %v3078_v57 }
0x285e   :  { %8180 = vmatpush3.bf16.msra.mxu0 %v3088_v58  ;;  %8877 = vrcp.f32 %v3075_v18 }
0x2860   :  { %v3072_v37 = vpop.xlane.xlu1 %3071  ;;  %v3157_v9 = vpop.permute.xlu0 %3156 }
0x2861   :  { %8879 = vrcp.f32 %v3072_v37  ;;  %v3187_v48 = vsel %vm195_vm4, %v9695_v36, %v3157_v9 }
0x2864   :  { %v3090_v41 = vpop.permute.xlu1 %3089  ;;  %v3169_v11 = vpop.permute.xlu0 %3168 }
0x2865   :  { %v3099_v30 = vand.u32 %v3090_v41, %v9408_v3  ;;  %v3190_v21 = vsel %vm652_vm8, %v3187_v48, %v3169_v11  ;;  %v7428_v48 = vld [vmem:[%s10688_s4 + $0xb0] ss:$0 sm:$0xff] }
0x2867   :  { %8181 = vmatprep.subr.bf16.mxu0 %v3099_v30  ;;  %v8876_v59 = vpop.eup %8875 }
0x2868   :  { %8182 = vmatpush3.bf16.msra.mxu0 %v3099_v30  ;;  %v8878_v46 = vpop.eup %8877  ;;  %v3084_v32 = vmul.f32 %v8876_v59, %v8872_v14  ;;  %v8614_v10 = vpop.permute.xlu1 %8613 }
0x2869   :  { %v3083_v61 = vmul.f32 %v8878_v46, %v8870_v25  ;;  %8187 = vmatprep.subr.bf16.mxu0 %v8688_v1  ;;  %v8616_v16 = vunpack.i.h.bf16 %v8614_v10  ;;  %v8615_v20 = vunpack.i.l.bf16 %v8614_v10 }
0x286a   :  { %v3086_v63 = vpack.c.bf16 %v3084_v32, %v3084_v32 }
0x286b   :  { %v8880_v31 = vpop.eup %8879  ;;  %v3186_v26 = vsel %vm195_vm4, %v9699_v39, %v8616_v16  ;;  %v3185_v22 = vsel %vm195_vm4, %v9697_v38, %v8615_v20  ;;  %v7426_v38 = vld [vmem:[%s10688_s4 + $0xa0] ss:$0 sm:$0xff] }
0x286c   :  { %v3082_v60 = vmul.f32 %v8880_v31, %v8874_v15  ;;  %v8619_v13 = vpop.permute.xlu1 %8618 }
0x286d   :  { %v8621_v28 = vunpack.i.h.bf16 %v8619_v13  ;;  %v8620_v50 = vunpack.i.l.bf16 %v8619_v13  ;;  %v7427_v13 = vld [vmem:[%s10688_s4 + $0xa8] ss:$0 sm:$0xff] }
0x286e   :  { %v3085_v62 = vpack.c.bf16 %v3083_v61, %v3082_v60 }
0x286f   :  { %v3188_v44 = vsel %vm652_vm8, %v3185_v22, %v8620_v50  ;;  %v3189_v45 = vsel %vm652_vm8, %v3186_v26, %v8621_v28 }
0x2870   :  { %8183 = vmatprep.mubr.msk.bf16.mxu0 %vm1257_vm15, %v3085_v62  ;;  %v8690_v62 = vld [vmem:[%s10686_s3 + $0xd8] sm:$0xff]  }
0x2871   :  { %8184 = vmatmul.mubr.msk.bf16.vlgmr.msra.gmra.mrb[68].mxu0 %vm1257_vm15, %v3086_v63  ;;  %8195 = vmatprep.subr.bf16.mxu1 %v8690_v62  ;;  %v8691_v63 = vld [vmem:[%s10686_s3 + $0xe0] sm:$0xff]  }
0x2872   :  { %8188 = vmatpush3.bf16.msra.mxu0 %v8688_v1  ;;  %8196 = vmatpush3.bf16.msra.mxu1 %v8690_v62 }
0x2873   :  { %8189 = vmatprep.subr.bf16.mxu0 %v8689_v2  ;;  %8197 = vmatprep.subr.bf16.mxu1 %v8691_v63 }
0x2876   :  { %8190 = vmatpush3.bf16.msra.mxu0 %v8689_v2  ;;  %8198 = vmatpush3.bf16.msra.mxu1 %v8691_v63 }
0x2944   :  { %v8185_v4 = vpop.f32.mrb[68].mxu0 }
0x2945   :  { %3180 = vrot.lane.b32.xlu0 %v8185_v4, %s9074_s7  ;;  %v3135_v5 = vpop.f32.mrb[69].mxu0 }
0x2946   :  { %v8186_v6 = vpop.f32.mrb[70].mxu0 }
0x2947   :  { %v3138_v7 = vpop.f32.mrb[71].mxu0 }
0x2948   :  { %v8622_v8 = vpack.i.bf16 %v3138_v7, %v3135_v5 }
0x294a   :  { %8623 = vrot.lane.b32.xlu1 %v8622_v8, %s9074_s7 }
0x29b7   :  { %v3181_v33 = vpop.permute.xlu0 %3180 }
0x29b8   :  { %v3193_v47 = vsel %vm654_vm9, %v3190_v21, %v3181_v33 }
0x29b9   :  { %v3195_v12 = vpack.c.bf16 %v3193_v47, %v3193_v47  ;;  %v8692_v47 = vld [vmem:[%s10686_s3 + $0xe8] sm:$0xff]  }
0x29ba   :  { %8203 = vmatprep.subr.bf16.mxu0 %v8692_v47 }
0x29bc   :  { %v8624_v40 = vpop.permute.xlu1 %8623 }
0x29bd   :  { %v8626_v42 = vunpack.i.h.bf16 %v8624_v40  ;;  %v8625_v43 = vunpack.i.l.bf16 %v8624_v40 }
0x29bf   :  { %v3192_v36 = vsel %vm654_vm9, %v3189_v45, %v8626_v42  ;;  %v3191_v49 = vsel %vm654_vm9, %v3188_v44, %v8625_v43 }
0x29c0   :  { %v3194_v51 = vpack.c.bf16 %v3192_v36, %v3191_v49  ;;  %v8693_v36 = vld [vmem:[%s10686_s3 + $0xf0] sm:$0xff]   ;;  %v8694_v49 = vld [vmem:[%s10686_s3 + $0xf8] sm:$0xff]  }
0x29c2   :  { %8191 = vmatprep.mubr.msk.bf16.mxu0 %vm147_vm3, %v3194_v51  ;;  %v8695_v51 = vld [vmem:[%s10686_s3 + $0x100] sm:$0xff]  }
0x29c3   :  { %8192 = vmatmul.mubr.msk.bf16.vlgmr.msra.gmra.mrb[72].mxu0 %vm147_vm3, %v3195_v12  ;;  %v7429_v12 = vld [vmem:[%s10688_s4 + $0xb8] ss:$0 sm:$0xff] }
0x29c4   :  { %8204 = vmatpush3.bf16.msra.mxu0 %v8692_v47 }
0x29c5   :  { %8205 = vmatprep.subr.bf16.mxu0 %v8693_v36 }
0x29c8   :  { %8206 = vmatpush3.bf16.msra.mxu0 %v8693_v36 }
0x29c9   :  { %8207 = vmatprep.subr.bf16.mxu0 %v8694_v49 }
0x29cc   :  { %8208 = vmatpush3.bf16.msra.mxu0 %v8694_v49 }
0x29cd   :  { %8209 = vmatprep.subr.bf16.mxu0 %v8695_v51 }
0x29d0   :  { %8210 = vmatpush3.bf16.msra.mxu0 %v8695_v51 }
0x29d1   :  { %8233 = vmatprep.subr.bf16.mxu0 %v9059_v0 }
0x2a96   :  { %v8193_v39 = vpop.f32.mrb[72].mxu0 }
0x2a97   :  { %v3252_v34 = vpop.f32.mrb[73].mxu0  ;;  %v3268_v54 = vadd.f32 %v8193_v39, %v9593_v24 }
0x2a98   :  { %v3266_v52 = vadd.f32 %v3252_v34, %v9590_v19  ;;  %v8194_v53 = vpop.f32.mrb[74].mxu0 }
0x2a99   :  { %v3255_v35 = vpop.f32.mrb[75].mxu0  ;;  %v9818_v56 = vadd.f32 %v7426_v38, %v3268_v54 }
0x2a9a   :  { %v9811_v55 = vadd.f32 %v7426_v38, %v3266_v52  ;;  %v3267_v25 = vadd.f32 %v3255_v35, %v9595_v27 }
0x2a9b   :  { %v3285_v19 = vsel %vm1061_vm14, %v9818_v56, 0.0 }
0x2a9c   :  { %v9814_v29 = vadd.f32 %v7426_v38, %v3267_v25  ;;  %v3279_v14 = vsel %vm147_vm3, %v9811_v55, 0.0 }
0x2a9d   :  { %3280 = vadd.xlane.f32.xlu1 %v3279_v14 }
0x2a9e   :  { %v3282_v15 = vsel %vm147_vm3, %v9814_v29, 0.0 }
0x2a9f   :  { %3283 = vadd.xlane.f32.xlu0 %v3282_v15 }
0x2aa3   :  { %3286 = vadd.xlane.f32.xlu0 %v3285_v19 }
0x2b2a   :  { %v3281_v24 = vpop.xlane.xlu1 %3280 }
0x2b2b   :  { %v3288_v17 = vmul.f32 0.03125, %v3281_v24 }
0x2b2c   :  { %v3284_v18 = vpop.xlane.xlu0 %3283 }
0x2b2d   :  { %v3291_v27 = vsub.f32 %v9811_v55, %v3288_v17  ;;  %v3289_v57 = vmul.f32 0.03125, %v3284_v18 }
0x2b2f   :  { %v3292_v58 = vsub.f32 %v9814_v29, %v3289_v57  ;;  %v3294_v37 = vmul.f32 %v3291_v27, %v3291_v27 }
0x2b30   :  { %v3287_v41 = vpop.xlane.xlu0 %3286 }
0x2b31   :  { %v3290_v30 = vmul.f32 0.03125, %v3287_v41  ;;  %v3297_v59 = vsel %vm147_vm3, %v3294_v37, 0.0  ;;  %v3295_v46 = vmul.f32 %v3292_v58, %v3292_v58 }
0x2b32   :  { %3298 = vadd.xlane.f32.xlu1 %v3297_v59 }
0x2b33   :  { %v3293_v31 = vsub.f32 %v9818_v56, %v3290_v30  ;;  %v3300_v32 = vsel %vm147_vm3, %v3295_v46, 0.0 }
0x2b34   :  { %3301 = vadd.xlane.f32.xlu0 %v3300_v32 }
0x2b35   :  { %v3296_v60 = vmul.f32 %v3293_v31, %v3293_v31 }
0x2b37   :  { %v3303_v61 = vsel %vm1061_vm14, %v3296_v60, 0.0 }
0x2b38   :  { %3304 = vadd.xlane.f32.xlu1 %v3303_v61 }
0x2bbf   :  { %v3299_v1 = vpop.xlane.xlu1 %3298 }
0x2bc0   :  { %v3306_v2 = vmul.f32 0.03125, %v3299_v1 }
0x2bc1   :  { %v3302_v4 = vpop.xlane.xlu0 %3301 }
0x2bc2   :  { %v3309_v5 = vadd.f32 1e-05, %v3306_v2  ;;  %v3307_v6 = vmul.f32 0.03125, %v3302_v4 }
0x2bc4   :  { %8881 = vrsqrt.f32 %v3309_v5  ;;  %v3310_v7 = vadd.f32 1e-05, %v3307_v6 }
0x2bc5   :  { %v3305_v8 = vpop.xlane.xlu1 %3304 }
0x2bc6   :  { %8883 = vrsqrt.f32 %v3310_v7  ;;  %v3308_v9 = vmul.f32 0.03125, %v3305_v8 }
0x2bc8   :  { %v3311_v10 = vadd.f32 1e-05, %v3308_v9 }
0x2bca   :  { %8885 = vrsqrt.f32 %v3311_v10 }
0x2bce   :  { %v8882_v11 = vpop.eup %8881 }
0x2bcf   :  { %v3315_v16 = vmul.f32 %v8882_v11, %v3291_v27  ;;  %v7440_v11 = vld [vmem:[%s10688_s4 + $0xc0] ss:$0 sm:$0xff] }
0x2bd0   :  { %v8884_v20 = vpop.eup %8883 }
0x2bd1   :  { %v3316_v28 = vmul.f32 %v8884_v20, %v3292_v58  ;;  %v3322_v50 = vmul.f32 %v7427_v13, %v3315_v16 }
0x2bd3   :  { %v3323_v33 = vmul.f32 %v7427_v13, %v3316_v28  ;;  %v3329_v26 = vadd.f32 %v7428_v48, %v3322_v50 }
0x2bd4   :  { %v8886_v21 = vpop.eup %8885 }
0x2bd5   :  { %v3317_v40 = vmul.f32 %v8886_v21, %v3293_v31  ;;  %v3330_v22 = vadd.f32 %v7428_v48, %v3323_v33 }
0x2bd7   :  { %v3332_v42 = vpack.c.bf16 %v3330_v22, %v3329_v26  ;;  %v3324_v43 = vmul.f32 %v7427_v13, %v3317_v40 }
0x2bd9   :  { %8199 = vmatprep.mubr.msk.bf16.mxu1 %vm147_vm3, %v3332_v42  ;;  %v3331_v44 = vadd.f32 %v7428_v48, %v3324_v43 }
0x2bdb   :  { %v3333_v45 = vpack.c.bf16 %v3331_v44, %v3331_v44 }
0x2bdd   :  { %8200 = vmatmul.mubr.msk.bf16.vlgmr.msra.gmra.mrb[76].mxu1 %vm147_vm3, %v3333_v45 }
0x2cb0   :  { %v8201_v39 = vpop.f32.mrb[76].mxu1 }
0x2cb1   :  { %v3404_v38 = vadd.f32 %v8201_v39, %v7429_v12  ;;  %v3395_v34 = vpop.f32.mrb[77].mxu1 }
0x2cb2   :  { %v3396_v52 = vadd.f32 %v7429_v12, %v3395_v34  ;;  %v8202_v53 = vpop.f32.mrb[78].mxu1 }
0x2cb3   :  { %v3411_v35 = vmul.f32 %v3404_v38, %v3404_v38  ;;  %v3398_v54 = vpop.f32.mrb[79].mxu1  ;;  %v8696_v53 = vld [vmem:[%s10686_s3 + $0x118] sm:$0xff]  }
0x2cb4   :  { %v3409_v25 = vmul.f32 %v3396_v52, %v3396_v52  ;;  %v3399_v14 = vadd.f32 %v7429_v12, %v3398_v54  ;;  %8215 = vmatprep.subr.bf16.mxu1 %v8696_v53 }
0x2cb5   :  { %v3414_v15 = vmul.f32 %v3411_v35, %v3404_v38  ;;  %8216 = vmatpush3.bf16.msra.mxu1 %v8696_v53  ;;  %v8697_v35 = vld [vmem:[%s10686_s3 + $0x120] sm:$0xff]  }
0x2cb6   :  { %v3412_v19 = vmul.f32 %v3409_v25, %v3396_v52  ;;  %v3410_v24 = vmul.f32 %v3399_v14, %v3399_v14  ;;  %8217 = vmatprep.subr.bf16.mxu1 %v8697_v35 }
0x2cb7   :  { %v3417_v17 = vmul.f32 0.044715, %v3414_v15 }
0x2cb8   :  { %v3415_v18 = vmul.f32 0.044715, %v3412_v19  ;;  %v3413_v27 = vmul.f32 %v3410_v24, %v3399_v14 }
0x2cb9   :  { %v3420_v57 = vadd.f32 %v3417_v17, %v3404_v38  ;;  %8218 = vmatpush3.bf16.msra.mxu1 %v8697_v35  ;;  %v7459_v35 = vld [vmem:[%s10688_s4 + $0x10] ss:$0 sm:$0xff] }
0x2cba   :  { %v3418_v58 = vadd.f32 %v3415_v18, %v3396_v52  ;;  %v3416_v37 = vmul.f32 0.044715, %v3413_v27  ;;  %8223 = vmatprep.subr.bf16.mxu1 %v9059_v0 }
0x2cbb   :  { %v3423_v41 = vmul.f32 0.7978846, %v3420_v57 }
0x2cbc   :  { %v3421_v30 = vmul.f32 0.7978846, %v3418_v58  ;;  %v3419_v59 = vadd.f32 %v3416_v37, %v3399_v14  ;;  %v7441_v58 = vld [vmem:[%s10688_s4 + $0xf0] ss:$0 sm:$0xff] }
0x2cbd   :  { %8887 = vtanh.f32 %v3423_v41 }
0x2cbe   :  { %8889 = vtanh.f32 %v3421_v30  ;;  %v3422_v46 = vmul.f32 0.7978846, %v3419_v59 }
0x2cc0   :  { %8891 = vtanh.f32 %v3422_v46 }
0x2cc7   :  { %v8888_v31 = vpop.eup %8887 }
0x2cc8   :  { %v8890_v32 = vpop.eup %8889  ;;  %v3429_v60 = vadd.f32 1.0, %v8888_v31  ;;  %v7442_v31 = vld [vmem:[%s10688_s4 + $0xf8] ss:$0 sm:$0xff] }
0x2cc9   :  { %v3427_v61 = vadd.f32 1.0, %v8890_v32 }
0x2cca   :  { %v8892_v62 = vpop.eup %8891  ;;  %v3432_v63 = vmul.f32 0.5, %v3429_v60 }
0x2ccb   :  { %v3430_v1 = vmul.f32 0.5, %v3427_v61  ;;  %v3428_v2 = vadd.f32 1.0, %v8892_v62 }
0x2ccc   :  { %v3435_v5 = vmul.f32 %v3432_v63, %v3404_v38 }
0x2ccd   :  { %v3431_v4 = vmul.f32 0.5, %v3428_v2  ;;  %v3433_v6 = vmul.f32 %v3430_v1, %v3396_v52 }
0x2cce   :  { %v3437_v9 = vpack.c.bf16 %v3435_v5, %v3435_v5 }
0x2ccf   :  { %v3434_v7 = vmul.f32 %v3431_v4, %v3399_v14  ;;  %v8698_v4 = vld [vmem:[%s10686_s3] sm:$0xff]  }
0x2cd1   :  { %v3436_v8 = vpack.c.bf16 %v3434_v7, %v3433_v6  ;;  %v8699_v6 = vld [vmem:[%s10686_s3 + $0x8] sm:$0xff]   ;;  %v7451_v7 = vld [vmem:[%s10687_s0 + $0x4] sm:$0xf] }
0x2cd3   :  { %8211 = vmatprep.mubr.msk.bf16.mxu0 %vm855_vm10, %v3436_v8  ;;  %v8700_v8 = vld [vmem:[%s10686_s3 + $0x10] sm:$0xff]  }
0x2cd4   :  { %8212 = vmatmul.mubr.msk.bf16.vlgmr.msra.gmra.mrb[76].mxu0 %vm855_vm10, %v3437_v9  ;;  %v3673_v9 = vpack.c.bf16 %v7451_v7, %v7451_v7 }
0x2cd5   :  { %8237 = vmatprep.mubr.msk.bf16.mxu0 %vm9060_vm0, %v9059_v0 }
0x2da7   :  { %v8213_v10 = vpop.f32.mrb[76].mxu0 }
0x2da8   :  { %v3510_v13 = vpop.f32.mrb[77].mxu0  ;;  %v3526_v16 = vadd.f32 %v8213_v10, %v9818_v56  ;;  %v7443_v10 = vld [vmem:[%s10688_s4 + $0x100] ss:$0 sm:$0xff] }
0x2da9   :  { %v3524_v20 = vadd.f32 %v3510_v13, %v9811_v55  ;;  %v8214_v28 = vpop.f32.mrb[78].mxu0 }
0x2daa   :  { %v3513_v50 = vpop.f32.mrb[79].mxu0  ;;  %v3534_v21 = vadd.f32 %v7440_v11, %v3526_v16 }
0x2dab   :  { %v3532_v48 = vadd.f32 %v7440_v11, %v3524_v20  ;;  %v3525_v33 = vadd.f32 %v3513_v50, %v9814_v29 }
0x2dac   :  { %v3543_v42 = vsel %vm1061_vm14, %v3534_v21, 0.0 }
0x2dad   :  { %v3533_v40 = vadd.f32 %v7440_v11, %v3525_v33  ;;  %v3537_v26 = vsel %vm147_vm3, %v3532_v48, 0.0  ;;  %v7452_v33 = vld [vmem:[%s10688_s4] ss:$0 sm:$0xff] }
0x2dae   :  { %3538 = vadd.xlane.f32.xlu0 %v3537_v26 }
0x2daf   :  { %v3540_v22 = vsel %vm147_vm3, %v3533_v40, 0.0 }
0x2db0   :  { %3541 = vadd.xlane.f32.xlu1 %v3540_v22 }
0x2db2   :  { %3544 = vadd.xlane.f32.xlu0 %v3543_v42 }
0x2e3b   :  { %v3539_v43 = vpop.xlane.xlu0 %3538 }
0x2e3c   :  { %v3546_v56 = vmul.f32 0.03125, %v3539_v43 }
0x2e3d   :  { %v3542_v44 = vpop.xlane.xlu1 %3541 }
0x2e3e   :  { %v3549_v55 = vsub.f32 %v3532_v48, %v3546_v56  ;;  %v3547_v45 = vmul.f32 0.03125, %v3542_v44 }
0x2e3f   :  { %v3545_v47 = vpop.xlane.xlu0 %3544 }
0x2e40   :  { %v3550_v36 = vsub.f32 %v3533_v40, %v3547_v45  ;;  %v3548_v49 = vmul.f32 0.03125, %v3545_v47  ;;  %v3552_v29 = vmul.f32 %v3549_v55, %v3549_v55  ;;  %v7457_v40 = vld [vmem:[%s10689_s1 + $0x4] sm:$0xf] }
0x2e42   :  { %v3551_v51 = vsub.f32 %v3534_v21, %v3548_v49  ;;  %v3555_v12 = vsel %vm147_vm3, %v3552_v29, 0.0  ;;  %v3553_v39 = vmul.f32 %v3550_v36, %v3550_v36  ;;  %v8701_v29 = vld [vmem:[%s10686_s3 + $0x18] sm:$0xff]  }
0x2e43   :  { %3556 = vadd.xlane.f32.xlu1 %v3555_v12  ;;  %8234 = vmatpush3.bf16.msra.mxu0 %v8701_v29 }
0x2e44   :  { %v3558_v38 = vsel %vm147_vm3, %v3553_v39, 0.0  ;;  %v3554_v34 = vmul.f32 %v3551_v51, %v3551_v51  ;;  %8235 = vmatprep.subr.bf16.mxu0 %v9059_v0 }
0x2e45   :  { %3559 = vadd.xlane.f32.xlu0 %v3558_v38 }
0x2e46   :  { %v3561_v52 = vsel %vm1061_vm14, %v3554_v34, 0.0 }
0x2e47   :  { %3562 = vadd.xlane.f32.xlu1 %v3561_v52  ;;  %v7458_v52 = vld [vmem:[%s10688_s4 + $0x8] ss:$0 sm:$0xff] }
0x2ed0   :  { %v3557_v54 = vpop.xlane.xlu1 %3556 }
0x2ed1   :  { %v3564_v25 = vmul.f32 0.03125, %v3557_v54 }
0x2ed2   :  { %v3560_v14 = vpop.xlane.xlu0 %3559 }
0x2ed3   :  { %v3567_v15 = vadd.f32 1e-05, %v3564_v25  ;;  %v3565_v19 = vmul.f32 0.03125, %v3560_v14 }
0x2ed4   :  { %v3563_v24 = vpop.xlane.xlu1 %3562 }
0x2ed5   :  { %8893 = vrsqrt.f32 %v3567_v15  ;;  %v3568_v17 = vadd.f32 1e-05, %v3565_v19  ;;  %v3566_v18 = vmul.f32 0.03125, %v3563_v24  ;;  %v7460_v15 = vld [vmem:[%s10688_s4 + $0x18] ss:$0 sm:$0xff] }
0x2ed7   :  { %8895 = vrsqrt.f32 %v3568_v17  ;;  %v3569_v27 = vadd.f32 1e-05, %v3566_v18 }
0x2ed9   :  { %8897 = vrsqrt.f32 %v3569_v27 }
0x2edf   :  { %v8894_v57 = vpop.eup %8893 }
0x2ee0   :  { %v3573_v37 = vmul.f32 %v8894_v57, %v3549_v55 }
0x2ee1   :  { %v8896_v41 = vpop.eup %8895 }
0x2ee2   :  { %v3574_v30 = vmul.f32 %v8896_v41, %v3550_v36  ;;  %v3580_v59 = vmul.f32 %v7441_v58, %v3573_v37 }
0x2ee3   :  { %v8898_v46 = vpop.eup %8897 }
0x2ee4   :  { %v3575_v32 = vmul.f32 %v8898_v46, %v3551_v51  ;;  %v3581_v60 = vmul.f32 %v7441_v58, %v3574_v30  ;;  %v3587_v61 = vadd.f32 %v7442_v31, %v3580_v59  ;;  %v8702_v51 = vld [vmem:[%s10686_s3 + $0x20] sm:$0xff]  }
0x2ee5   :  { %8236 = vmatpush3.bf16.msra.mxu0 %v8702_v51 }
0x2ee6   :  { %v3588_v62 = vadd.f32 %v7442_v31, %v3581_v60  ;;  %v3582_v63 = vmul.f32 %v7441_v58, %v3575_v32  ;;  %8241 = vmatprep.subr.bf16.mxu0 %v9059_v0 }
0x2ee8   :  { %v3590_v1 = vpack.c.bf16 %v3588_v62, %v3587_v61  ;;  %v3589_v2 = vadd.f32 %v7442_v31, %v3582_v63 }
0x2eea   :  { %8219 = vmatprep.mubr.msk.bf16.mxu1 %vm147_vm3, %v3590_v1  ;;  %v3591_v5 = vpack.c.bf16 %v3589_v2, %v3589_v2 }
0x2eec   :  { %8220 = vmatmul.mubr.msk.bf16.vlgmr.msra.gmra.mrb[80].mxu1 %vm147_vm3, %v3591_v5 }
0x2eed   :  { %8224 = vmatpush3.bf16.msra.mxu1 %v8698_v4  ;;  %8229 = vmatprep.mubr.msk.bf16.mxu1 %vm9060_vm0, %v9059_v0 }
0x2eee   :  { %8225 = vmatprep.subr.bf16.mxu1 %v9059_v0 }
0x2ef1   :  { %8226 = vmatpush3.bf16.msra.mxu1 %v8699_v6 }
0x2ef2   :  { %8227 = vmatprep.subr.bf16.mxu1 %v9059_v0 }
0x2ef5   :  { %8228 = vmatpush3.bf16.msra.mxu1 %v8700_v8 }
0x2ef6   :  { %8247 = vmatprep.subr.bf16.mxu1 %v9059_v0 }
0x2ef8   :  { %8230 = vmatmul.mubr.msk.bf16.vlgmr.msra.gmra.mrb[84].mxu1 %vm52_vm1, %v3673_v9 }
0x2ef9   :  { %8249 = vmatprep.mubr.msk.bf16.mxu1 %vm9060_vm0, %v9059_v0 }
0x2fbf   :  { %v8221_v11 = vpop.f32.mrb[80].mxu1 }
0x2fc0   :  { %v3662_v13 = vadd.f32 %v8221_v11, %v7443_v10  ;;  %v3653_v16 = vpop.f32.mrb[81].mxu1 }
0x2fc1   :  { %v3654_v20 = vadd.f32 %v7443_v10, %v3653_v16  ;;  %v8222_v28 = vpop.f32.mrb[82].mxu1 }
0x2fc2   :  { %7450 = vst [vmem:[%s10691_s5 + $0x1f] sm:$0x1] %v3662_v13  ;;  %v3656_v50 = vpop.f32.mrb[83].mxu1 }
0x2fc3   :  { %7448 = vst [vmem:[%s10691_s5 + $0xf] sm:$0xfe] %v3654_v20  ;;  %v3657_v48 = vadd.f32 %v7443_v10, %v3656_v50 }
0x2fc5   :  { %7449 = vst [vmem:[%s10691_s5 + $0x17] sm:$0xff] %v3657_v48 }
0x2fcb   :  { %v3740_v21 = vpop.f32.mrb[84].mxu1 }
0x2fcc   :  { %v3741_v26 = vadd.f32 %v7452_v33, %v3740_v21  ;;  %v8231_v22 = vpop.f32.mrb[85].mxu1 }
0x2fcd   :  { %v3743_v42 = vpop.f32.mrb[86].mxu1 }
0x2fce   :  { %v9929_v43 = vadd.f32 %v7457_v40, %v3741_v26  ;;  %v8232_v56 = vpop.f32.mrb[87].mxu1 }
0x2fd0   :  { %v3751_v44 = vsel %vm100_vm2, %v9929_v43, 0.0 }
0x2fd1   :  { %3752 = vadd.xlane.f32.xlu0 %v3751_v44 }
0x305e   :  { %v3753_v55 = vpop.xlane.xlu0 %3752 }
0x305f   :  { %v3754_v45 = vmul.f32 0.03125, %v3753_v55 }
0x3061   :  { %v3755_v47 = vsub.f32 %v9929_v43, %v3754_v45 }
0x3063   :  { %v3756_v36 = vmul.f32 %v3755_v47, %v3755_v47 }
0x3065   :  { %v3757_v49 = vsel %vm100_vm2, %v3756_v36, 0.0 }
0x3066   :  { %3758 = vadd.xlane.f32.xlu1 %v3757_v49 }
0x30f3   :  { %v3759_v12 = vpop.xlane.xlu1 %3758 }
0x30f4   :  { %v3760_v39 = vmul.f32 0.03125, %v3759_v12 }
0x30f6   :  { %v3761_v38 = vadd.f32 1e-05, %v3760_v39 }
0x30f8   :  { %8899 = vrsqrt.f32 %v3761_v38 }
0x3102   :  { %v8900_v34 = vpop.eup %8899 }
0x3103   :  { %v3763_v53 = vmul.f32 %v8900_v34, %v3755_v47 }
0x3105   :  { %v3768_v54 = vmul.f32 %v7458_v52, %v3763_v53 }
0x3107   :  { %v3773_v25 = vadd.f32 %v7459_v35, %v3768_v54 }
0x3109   :  { %v3774_v14 = vpack.c.bf16 %v3773_v25, %v3773_v25 }
0x310b   :  { %8238 = vmatmul.mubr.msk.bf16.vlgmr.msra.gmra.mrb[80].mxu0 %vm147_vm3, %v3774_v14 }
0x310c   :  { %8243 = vmatprep.mubr.msk.bf16.mxu0 %vm9060_vm0, %v9059_v0 }
0x31de   :  { %v3833_v19 = vpop.f32.mrb[80].mxu0 }
0x31df   :  { %v3834_v24 = vadd.f32 %v7460_v15, %v3833_v19  ;;  %v8239_v17 = vpop.f32.mrb[81].mxu0 }
0x31e0   :  { %v3836_v18 = vpop.f32.mrb[82].mxu0 }
0x31e1   :  { %v9955_v27 = vpack.c.bf16 %v3834_v24, %v3834_v24  ;;  %v8240_v57 = vpop.f32.mrb[83].mxu0 }
0x31e3   :  { %3952 = vrot.lane.b32.xlu1 %v9955_v27, %s9063_s17  ;;  %3841 = vrot.lane.b32.xlu0 %v9955_v27, %s9062_s16 }
0x31e7   :  { %3950 = vrot.lane.b32.xlu1 %v9955_v27, %s9061_s15  ;;  %4063 = vrot.lane.b32.xlu0 %v9955_v27, %s9064_s18 }
0x31eb   :  { %4061 = vrot.lane.b32.xlu1 %v9955_v27, %s9065_s19  ;;  %4174 = vrot.lane.b32.xlu0 %v9955_v27, %s9066_s20 }
0x31ef   :  { %4172 = vrot.lane.b32.xlu1 %v9955_v27, %s9067_s21 }
0x3255   :  { %v3842_v58 = vpop.permute.xlu0 %3841  ;;  %v3953_v41 = vpop.permute.xlu1 %3952 }
0x3256   :  { %v3847_v37 = vsel %vm195_vm4, %v3842_v58, 0  ;;  %v3958_v30 = vsel %vm195_vm4, %v3953_v41, 0 }
0x3257   :  { %8242 = vmatpush3.bf16.xpose.msra.mxu0 %v3847_v37 }
0x3258   :  { %8253 = vmatprep.subr.bf16.mxu0 %v9059_v0 }
0x3259   :  { %v4064_v59 = vpop.permute.xlu0 %4063  ;;  %v3951_v46 = vpop.permute.xlu1 %3950 }
0x325a   :  { %v4069_v31 = vsel %vm195_vm4, %v4064_v59, 0 }
0x325d   :  { %v4175_v32 = vpop.permute.xlu0 %4174  ;;  %v4062_v60 = vpop.permute.xlu1 %4061 }
0x325e   :  { %8244 = vmatmul.mubr.msk.bf16.vlgmr.msra.gmra.mrb[84].mxu0 %vm195_vm4, %v9955_v27  ;;  %v4180_v61 = vsel %vm195_vm4, %v4175_v32, 0 }
0x325f   :  { %8254 = vmatpush3.bf16.xpose.msra.mxu0 %v3958_v30  ;;  %8255 = vmatprep.mubr.msk.bf16.mxu0 %vm9060_vm0, %v9059_v0 }
0x3260   :  { %8265 = vmatprep.subr.bf16.mxu0 %v9059_v0 }
0x3261   :  { %v4173_v62 = vpop.permute.xlu1 %4172 }
0x3266   :  { %8256 = vmatmul.mubr.msk.bf16.vlgmr.msra.gmra.mrb[88].mxu0 %vm195_vm4, %v3951_v46 }
0x3267   :  { %8266 = vmatpush3.bf16.xpose.msra.mxu0 %v4069_v31  ;;  %8267 = vmatprep.mubr.msk.bf16.mxu0 %vm9060_vm0, %v9059_v0 }
0x3268   :  { %8277 = vmatprep.subr.bf16.mxu0 %v9059_v0 }
0x326e   :  { %8268 = vmatmul.mubr.msk.bf16.vlgmr.msra.gmra.mrb[92].mxu0 %vm195_vm4, %v4062_v60 }
0x326f   :  { %8278 = vmatpush3.bf16.xpose.msra.mxu0 %v4180_v61  ;;  %8279 = vmatprep.mubr.msk.bf16.mxu0 %vm9060_vm0, %v9059_v0 }
0x3270   :  { %8289 = vmatprep.subr.bf16.mxu0 %v9059_v0 }
0x3276   :  { %8280 = vmatmul.mubr.msk.bf16.vlgmr.msra.gmra.mrb[96].mxu0 %vm195_vm4, %v4173_v62 }
0x3277   :  { %8293 = vmatprep.mubr.msk.bf16.mxu0 %vm9060_vm0, %v9059_v0 }
0x3331   :  { %v3883_v63 = vpop.f32.mrb[84].mxu0 }
0x3332   :  { %v3889_v1 = vmul.f32 0.35355338, %v3883_v63  ;;  %v8245_v2 = vpop.f32.mrb[85].mxu0 }
0x3333   :  { %v3886_v4 = vpop.f32.mrb[86].mxu0 }
0x3334   :  { %v8246_v5 = vpop.f32.mrb[87].mxu0  ;;  %v3890_v6 = vsel %vm243_vm5, %v3889_v1, -inf }
0x3335   :  { %3891 = vmax.xlane.f32.xlu0 %v3890_v6 }
0x3339   :  { %v3994_v7 = vpop.f32.mrb[88].mxu0 }
0x333a   :  { %v4000_v8 = vmul.f32 0.35355338, %v3994_v7  ;;  %v8257_v9 = vpop.f32.mrb[89].mxu0 }
0x333b   :  { %v3997_v10 = vpop.f32.mrb[90].mxu0 }
0x333c   :  { %v8258_v11 = vpop.f32.mrb[91].mxu0  ;;  %v4001_v13 = vsel %vm243_vm5, %v4000_v8, -inf }
0x333d   :  { %4002 = vmax.xlane.f32.xlu1 %v4001_v13 }
0x3341   :  { %v4105_v16 = vpop.f32.mrb[92].mxu0 }
0x3342   :  { %v4111_v20 = vmul.f32 0.35355338, %v4105_v16  ;;  %v8269_v28 = vpop.f32.mrb[93].mxu0 }
0x3343   :  { %v4108_v50 = vpop.f32.mrb[94].mxu0 }
0x3344   :  { %v8270_v48 = vpop.f32.mrb[95].mxu0  ;;  %v4112_v33 = vsel %vm243_vm5, %v4111_v20, -inf }
0x3345   :  { %4113 = vmax.xlane.f32.xlu0 %v4112_v33  ;;  %v8703_v48 = vld [vmem:[%s10686_s3 + $0x28] sm:$0xff]   ;;  %v8704_v33 = vld [vmem:[%s10686_s3 + $0x30] sm:$0xff]  }
0x3346   :  { %8290 = vmatpush3.bf16.msra.mxu0 %v8703_v48 }
0x3347   :  { %8291 = vmatprep.subr.bf16.mxu0 %v9059_v0 }
0x3349   :  { %v4216_v21 = vpop.f32.mrb[96].mxu0 }
0x334a   :  { %v4222_v40 = vmul.f32 0.35355338, %v4216_v21  ;;  %v8281_v26 = vpop.f32.mrb[97].mxu0  ;;  %8292 = vmatpush3.bf16.msra.mxu0 %v8704_v33  ;;  %v8711_v33 = vld [vmem:[%s10686_s3 + $0x108] sm:$0xff]  }
0x334b   :  { %v4219_v22 = vpop.f32.mrb[98].mxu0  ;;  %8305 = vmatprep.subr.bf16.mxu0 %v9059_v0 }
0x334c   :  { %v8282_v42 = vpop.f32.mrb[99].mxu0  ;;  %v4223_v56 = vsel %vm243_vm5, %v4222_v40, -inf }
0x334d   :  { %4224 = vmax.xlane.f32.xlu0 %v4223_v56 }
0x33c2   :  { %v3892_v44 = vpop.xlane.xlu0 %3891 }
0x33c3   :  { %v3893_v55 = vsub.f32 %v3889_v1, %v3892_v44 }
0x33c5   :  { %v3894_v45 = vmul.f32 1.442695, %v3893_v55 }
0x33c7   :  { %8901 = vpow2.f32 %v3894_v45 }
0x33ca   :  { %v4003_v47 = vpop.xlane.xlu1 %4002 }
0x33cb   :  { %v4004_v36 = vsub.f32 %v4000_v8, %v4003_v47 }
0x33cd   :  { %v4005_v49 = vmul.f32 1.442695, %v4004_v36 }
0x33cf   :  { %8903 = vpow2.f32 %v4005_v49 }
0x33d1   :  { %v8902_v29 = vpop.eup %8901 }
0x33d2   :  { %v3896_v51 = vsel %vm243_vm5, %v8902_v29, 0.0  ;;  %v4114_v12 = vpop.xlane.xlu0 %4113 }
0x33d3   :  { %3897 = vadd.xlane.f32.xlu1 %v3896_v51  ;;  %v4115_v25 = vsub.f32 %v4111_v20, %v4114_v12 }
0x33d5   :  { %v4116_v14 = vmul.f32 1.442695, %v4115_v25 }
0x33d9   :  { %v8904_v39 = vpop.eup %8903 }
0x33da   :  { %v4225_v38 = vpop.xlane.xlu0 %4224  ;;  %v4007_v34 = vsel %vm243_vm5, %v8904_v39, 0.0 }
0x33db   :  { %v4226_v52 = vsub.f32 %v4222_v40, %v4225_v38  ;;  %4008 = vadd.xlane.f32.xlu0 %v4007_v34  ;;  %v7475_v38 = vld [vmem:[%s10688_s4 + $0x20] ss:$0 sm:$0xff] }
0x33dd   :  { %v4227_v53 = vmul.f32 1.442695, %v4226_v52 }
0x33df   :  { %8905 = vpow2.f32 %v4227_v53 }
0x33e0   :  { %8907 = vpow2.f32 %v4116_v14 }
0x33e4   :  { %3902 = vrot.lane.b32.xlu1 %v9955_v27, %s9068_s22 }
0x33e9   :  { %v8906_v35 = vpop.eup %8905 }
0x33ea   :  { %v4229_v54 = vsel %vm243_vm5, %v8906_v35, 0.0  ;;  %v8908_v15 = vpop.eup %8907 }
0x33eb   :  { %4230 = vadd.xlane.f32.xlu0 %v4229_v54  ;;  %v4118_v19 = vsel %vm243_vm5, %v8908_v15, 0.0 }
0x3401   :  { %4013 = vrot.lane.b32.xlu0 %v9955_v27, %s9069_s23 }
0x3408   :  { %4119 = vadd.xlane.f32.xlu1 %v4118_v19 }
0x3419   :  { %4124 = vrot.lane.b32.xlu1 %v9955_v27, %s9070_s24 }
0x341d   :  { %4235 = vrot.lane.b32.xlu1 %v9955_v27, %s9071_s25 }
0x3460   :  { %v3898_v24 = vpop.xlane.xlu1 %3897 }
0x3461   :  { %8909 = vrcp.f32 %v3898_v24 }
0x3464   :  { %v3903_v17 = vpop.permute.xlu1 %3902 }
0x3465   :  { %v3908_v18 = vsel %vm262_vm6, %v3903_v17, 0 }
0x3466   :  { %8248 = vmatpush3.bf16.msra.mxu1 %v3908_v18  ;;  %v8706_v18 = vld [vmem:[%s10686_s3 + $0x40] sm:$0xff]  }
0x3467   :  { %8259 = vmatprep.subr.bf16.mxu1 %v9059_v0 }
0x3468   :  { %v4009_v58 = vpop.xlane.xlu0 %4008 }
0x3469   :  { %8911 = vrcp.f32 %v4009_v58 }
0x346b   :  { %v8910_v57 = vpop.eup %8909 }
0x346c   :  { %v3900_v37 = vmul.f32 %v8910_v57, %v8902_v29 }
0x346e   :  { %v3901_v41 = vpack.c.bf16 %v3900_v37, %v3900_v37 }
0x3470   :  { %8250 = vmatmul.mubr.msk.bf16.vlgmr.msra.gmra.mrb[88].mxu1 %vm258_vm7, %v3901_v41 }
0x3471   :  { %8261 = vmatprep.mubr.msk.bf16.mxu1 %vm9060_vm0, %v9059_v0 }
0x3473   :  { %v8912_v30 = vpop.eup %8911 }
0x3474   :  { %v4011_v59 = vmul.f32 %v8912_v30, %v8904_v39  ;;  %v7476_v30 = vld [vmem:[%s10688_s4 + $0x28] ss:$0 sm:$0xff] }
0x3476   :  { %v4012_v32 = vpack.c.bf16 %v4011_v59, %v4011_v59  ;;  %v7477_v59 = vld [vmem:[%s10688_s4 + $0x30] ss:$0 sm:$0xff] }
0x3478   :  { %v4231_v27 = vpop.xlane.xlu0 %4230 }
0x347c   :  { %v4014_v46 = vpop.permute.xlu0 %4013 }
0x347d   :  { %v4019_v31 = vsel %vm262_vm6, %v4014_v46, 0 }
0x347e   :  { %8260 = vmatpush3.bf16.msra.mxu1 %v4019_v31 }
0x347f   :  { %8271 = vmatprep.subr.bf16.mxu1 %v9059_v0 }
0x3481   :  { %8262 = vmatmul.mubr.msk.bf16.vlgmr.msra.gmra.mrb[92].mxu1 %vm258_vm7, %v4012_v32 }
0x3482   :  { %8273 = vmatprep.mubr.msk.bf16.mxu1 %vm9060_vm0, %v9059_v0 }
0x3495   :  { %v4120_v60 = vpop.xlane.xlu1 %4119 }
0x3496   :  { %8913 = vrcp.f32 %v4120_v60  ;;  %v8707_v60 = vld [vmem:[%s10686_s3 + $0x48] sm:$0xff]  }
0x3497   :  { %8915 = vrcp.f32 %v4231_v27 }
0x3499   :  { %v4125_v61 = vpop.permute.xlu1 %4124 }
0x349a   :  { %v4130_v62 = vsel %vm262_vm6, %v4125_v61, 0  ;;  %v8708_v61 = vld [vmem:[%s10686_s3 + $0x50] sm:$0xff]  }
0x349b   :  { %8272 = vmatpush3.bf16.msra.mxu1 %v4130_v62  ;;  %v8709_v62 = vld [vmem:[%s10686_s3 + $0x58] sm:$0xff]  }
0x349c   :  { %8283 = vmatprep.subr.bf16.mxu1 %v9059_v0 }
0x349d   :  { %v4236_v2 = vpop.permute.xlu1 %4235 }
0x349e   :  { %v4241_v6 = vsel %vm262_vm6, %v4236_v2, 0 }
0x34a0   :  { %v8914_v63 = vpop.eup %8913 }
0x34a1   :  { %v4122_v1 = vmul.f32 %v8914_v63, %v8908_v15  ;;  %v8916_v5 = vpop.eup %8915  ;;  %v8710_v63 = vld [vmem:[%s10686_s3 + $0x60] sm:$0xff]  }
0x34a2   :  { %v4233_v7 = vmul.f32 %v8916_v5, %v8906_v35 }
0x34a3   :  { %v4123_v4 = vpack.c.bf16 %v4122_v1, %v4122_v1  ;;  %v7478_v1 = vld [vmem:[%s10688_s4 + $0x38] ss:$0 sm:$0xff] }
0x34a4   :  { %v4234_v8 = vpack.c.bf16 %v4233_v7, %v4233_v7 }
0x34a5   :  { %8274 = vmatmul.mubr.msk.bf16.vlgmr.msra.gmra.mrb[96].mxu1 %vm258_vm7, %v4123_v4 }
0x34a6   :  { %8284 = vmatpush3.bf16.msra.mxu1 %v4241_v6  ;;  %8285 = vmatprep.mubr.msk.bf16.mxu1 %vm9060_vm0, %v9059_v0 }
0x34a7   :  { %8297 = vmatprep.subr.bf16.mxu1 %v9059_v0 }
0x34ad   :  { %8286 = vmatmul.mubr.msk.bf16.vlgmr.msra.gmra.mrb[100].mxu1 %vm258_vm7, %v4234_v8 }
0x34ae   :  { %8301 = vmatprep.mubr.msk.bf16.mxu1 %vm9060_vm0, %v9059_v0 }
0x3543   :  { %v3944_v9 = vpop.f32.mrb[88].mxu1 }
0x3544   :  { %v8251_v10 = vpop.f32.mrb[89].mxu1 }
0x3545   :  { %v3947_v11 = vpop.f32.mrb[90].mxu1 }
0x3546   :  { %v8252_v13 = vpop.f32.mrb[91].mxu1 }
0x3554   :  { %v4055_v16 = vpop.f32.mrb[92].mxu1 }
0x3555   :  { %4284 = vrot.lane.b32.xlu0 %v4055_v16, %s9072_s26  ;;  %v8263_v20 = vpop.f32.mrb[93].mxu1 }
0x3556   :  { %v4058_v28 = vpop.f32.mrb[94].mxu1 }
0x3557   :  { %v8264_v50 = vpop.f32.mrb[95].mxu1 }
0x3578   :  { %v4166_v21 = vpop.f32.mrb[96].mxu1 }
0x3579   :  { %4288 = vrot.lane.b32.xlu1 %v4166_v21, %s9073_s6  ;;  %v8275_v40 = vpop.f32.mrb[97].mxu1  ;;  %v8712_v21 = vld [vmem:[%s10686_s3 + $0x110] sm:$0xff]  }
0x357a   :  { %v4169_v26 = vpop.f32.mrb[98].mxu1 }
0x357b   :  { %v8276_v22 = vpop.f32.mrb[99].mxu1  ;;  %v7487_v26 = vld [vmem:[%s10688_s4 + $0x40] ss:$0 sm:$0xff] }
0x3580   :  { %v4277_v42 = vpop.f32.mrb[100].mxu1 }
0x3581   :  { %4292 = vrot.lane.b32.xlu0 %v4277_v42, %s9074_s7  ;;  %v8287_v56 = vpop.f32.mrb[101].mxu1 }
0x3582   :  { %v4280_v44 = vpop.f32.mrb[102].mxu1 }
0x3583   :  { %v8288_v55 = vpop.f32.mrb[103].mxu1 }
0x35c7   :  { %v4285_v45 = vpop.permute.xlu0 %4284 }
0x35c8   :  { %v4295_v36 = vsel %vm195_vm4, %v3944_v9, %v4285_v45 }
0x35eb   :  { %v4289_v47 = vpop.permute.xlu1 %4288 }
0x35ec   :  { %v4296_v49 = vsel %vm652_vm8, %v4295_v36, %v4289_v47  ;;  %v4612_v47 = vld [vmem:[%s10688_s4 + $0xd0] sm:$0x1]  ;;  %v7488_v36 = vld [vmem:[%s10688_s4 + $0xc8] ss:$0 sm:$0xff] }
0x35f3   :  { %v4293_v29 = vpop.permute.xlu0 %4292 }
0x35f4   :  { %v4297_v51 = vsel %vm654_vm9, %v4296_v49, %v4293_v29  ;;  %v4614_v49 = vrot.slane %v4612_v47, 4 }
0x35f5   :  { %v4298_v12 = vpack.c.bf16 %v4297_v51, %v4297_v51 }
0x35f7   :  { %8294 = vmatmul.mubr.msk.bf16.vlgmr.msra.gmra.mrb[100].mxu0 %vm147_vm3, %v4298_v12 }
0x35f8   :  { %8313 = vmatprep.mubr.msk.bf16.mxu0 %vm9060_vm0, %v9059_v0  ;;  %8306 = vmatpush3.bf16.msra.mxu0 %v8707_v60 }
0x35f9   :  { %8307 = vmatprep.subr.bf16.mxu0 %v9059_v0 }
0x35fc   :  { %8308 = vmatpush3.bf16.msra.mxu0 %v8708_v61 }
0x35fd   :  { %8309 = vmatprep.subr.bf16.mxu0 %v9059_v0 }
0x3600   :  { %8310 = vmatpush3.bf16.msra.mxu0 %v8709_v62 }
0x3601   :  { %8311 = vmatprep.subr.bf16.mxu0 %v9059_v0 }
0x3604   :  { %8312 = vmatpush3.bf16.msra.mxu0 %v8710_v63 }
0x36ca   :  { %v4352_v39 = vpop.f32.mrb[100].mxu0 }
0x36cb   :  { %v4358_v34 = vadd.f32 %v4352_v39, %v9929_v43  ;;  %v8295_v52 = vpop.f32.mrb[101].mxu0  ;;  %v8705_v43 = vld [vmem:[%s10686_s3 + $0x38] sm:$0xff]  }
0x36cc   :  { %v4355_v53 = vpop.f32.mrb[102].mxu0  ;;  %8298 = vmatpush3.bf16.msra.mxu1 %v8705_v43 }
0x36cd   :  { %v10049_v35 = vadd.f32 %v7475_v38, %v4358_v34  ;;  %v8296_v54 = vpop.f32.mrb[103].mxu0  ;;  %8299 = vmatprep.subr.bf16.mxu1 %v9059_v0 }
0x36ce   :  { %v4622_v54 = vld [vmem:[%s10688_s4 + $0xd8] sm:$0xff] }
0x36cf   :  { %v4367_v25 = vsel %vm100_vm2, %v10049_v35, 0.0 }
0x36d0   :  { %4368 = vadd.xlane.f32.xlu1 %v4367_v25  ;;  %8300 = vmatpush3.bf16.msra.mxu1 %v8706_v18 }
0x36d1   :  { %8317 = vmatprep.subr.bf16.mxu1 %v9059_v0 }
0x375d   :  { %v4369_v14 = vpop.xlane.xlu1 %4368 }
0x375e   :  { %v4370_v15 = vmul.f32 0.03125, %v4369_v14  ;;  %v4624_v14 = vld [vmem:[%s10688_s4 + $0xe8] sm:$0x1] }
0x3760   :  { %v4371_v19 = vsub.f32 %v10049_v35, %v4370_v15 }
0x3762   :  { %v4372_v24 = vmul.f32 %v4371_v19, %v4371_v19 }
0x3764   :  { %v4373_v17 = vsel %vm100_vm2, %v4372_v24, 0.0 }
0x3765   :  { %4374 = vadd.xlane.f32.xlu0 %v4373_v17 }
0x37f2   :  { %v4375_v57 = vpop.xlane.xlu0 %4374 }
0x37f3   :  { %v4376_v58 = vmul.f32 0.03125, %v4375_v57 }
0x37f5   :  { %v4377_v37 = vadd.f32 1e-05, %v4376_v58 }
0x37f7   :  { %8917 = vrsqrt.f32 %v4377_v37 }
0x3801   :  { %v8918_v41 = vpop.eup %8917 }
0x3802   :  { %v4379_v27 = vmul.f32 %v8918_v41, %v4371_v19 }
0x3804   :  { %v4384_v46 = vmul.f32 %v7476_v30, %v4379_v27 }
0x3806   :  { %v4389_v31 = vadd.f32 %v7477_v59, %v4384_v46 }
0x3808   :  { %v4390_v32 = vpack.c.bf16 %v4389_v31, %v4389_v31 }
0x380a   :  { %8302 = vmatmul.mubr.msk.bf16.vlgmr.msra.gmra.mrb[104].mxu1 %vm147_vm3, %v4390_v32 }
0x380b   :  { %8321 = vmatprep.mubr.msk.bf16.mxu1 %vm9060_vm0, %v9059_v0  ;;  %8318 = vmatpush3.bf16.msra.mxu1 %v8711_v33  ;;  %vm10693_vm0 = vcmask 1043456   ;;  %v7499_v33 = vld [vmem:[%s10688_s4 + $0x48] ss:$0 sm:$0xff] }
0x380c   :  { %8319 = vmatprep.subr.bf16.mxu1 %v9059_v0  ;;  %v8713_v0 = vld [vmem:[%s10690_s2 + $0xc] sm:$0xff]  }
0x380f   :  { %8320 = vmatpush3.bf16.msra.mxu1 %v8712_v21 }
0x38dd   :  { %v4449_v2 = vpop.f32.mrb[104].mxu1 }
0x38de   :  { %v4450_v4 = vadd.f32 %v7478_v1, %v4449_v2  ;;  %v8303_v5 = vpop.f32.mrb[105].mxu1 }
0x38df   :  { %v4452_v6 = vpop.f32.mrb[106].mxu1 }
0x38e0   :  { %v4455_v7 = vmul.f32 %v4450_v4, %v4450_v4  ;;  %v8304_v8 = vpop.f32.mrb[107].mxu1  ;;  %v8715_v6 = vld [vmem:[%s10686_s3 + $0x68] sm:$0xff]  }
0x38e1   :  { %8331 = vmatprep.subr.bf16.mxu0 %v8715_v6 }
0x38e2   :  { %v4456_v9 = vmul.f32 %v4455_v7, %v4450_v4  ;;  %v8716_v7 = vld [vmem:[%s10686_s3 + $0x70] sm:$0xff]  }
0x38e4   :  { %v4457_v10 = vmul.f32 0.044715, %v4456_v9 }
0x38e6   :  { %v4458_v11 = vadd.f32 %v4457_v10, %v4450_v4 }
0x38e8   :  { %v4459_v13 = vmul.f32 0.7978846, %v4458_v11 }
0x38ea   :  { %8919 = vtanh.f32 %v4459_v13 }
0x38f4   :  { %v8920_v16 = vpop.eup %8919 }
0x38f5   :  { %v4461_v20 = vadd.f32 1.0, %v8920_v16 }
0x38f7   :  { %v4462_v28 = vmul.f32 0.5, %v4461_v20 }
0x38f9   :  { %v4463_v50 = vmul.f32 %v4462_v28, %v4450_v4 }
0x38fb   :  { %v4464_v48 = vpack.c.bf16 %v4463_v50, %v4463_v50 }
0x38fd   :  { %8314 = vmatmul.mubr.msk.bf16.vlgmr.msra.gmra.mrb[104].mxu0 %vm855_vm10, %v4464_v48 }
0x38fe   :  { %8332 = vmatpush3.bf16.msra.mxu0 %v8715_v6 }
0x38ff   :  { %8333 = vmatprep.subr.bf16.mxu0 %v8716_v7 }
0x3902   :  { %8334 = vmatpush3.bf16.msra.mxu0 %v8716_v7 }
0x39d0   :  { %v4534_v40 = vpop.f32.mrb[104].mxu0 }
0x39d1   :  { %v4540_v22 = vadd.f32 %v4534_v40, %v10049_v35  ;;  %v8315_v42 = vpop.f32.mrb[105].mxu0  ;;  %v8714_v35 = vld [vmem:[%s10690_s2 + $0x14] ss:$0 sps:$4 sm:$0x11]  }
0x39d2   :  { %v4537_v56 = vpop.f32.mrb[106].mxu0 }
0x39d3   :  { %v4546_v44 = vadd.f32 %v7487_v26, %v4540_v22  ;;  %v8316_v55 = vpop.f32.mrb[107].mxu0  ;;  %v7500_v56 = vld [vmem:[%s10688_s4 + $0x50] ss:$0 sm:$0xff] }
0x39d5   :  { %v4547_v45 = vpack.c.bf16 %v4546_v44, %v4546_v44 }
0x39d7   :  { %8322 = vmatmul.mubr.msk.bf16.vlgmr.msra.gmra.mrb[108].mxu1 %vm147_vm3, %v4547_v45 }
0x39d8   :  { %8327 = vmatprep.mubr.msk.bf16.mxu1 %vm992_vm11, %v8713_v0 }
0x3aaa   :  { %v4606_v29 = vpop.f32.mrb[108].mxu1 }
0x3aab   :  { %v4607_v51 = vadd.f32 %v7488_v36, %v4606_v29  ;;  %v8323_v12 = vpop.f32.mrb[109].mxu1 }
0x3aac   :  { %v4609_v39 = vpop.f32.mrb[110].mxu1 }
0x3aad   :  { %v4616_v38 = vsel %vm10693_vm0, %v4607_v51, %v4614_v49  ;;  %v8324_v34 = vpop.f32.mrb[111].mxu1  ;;  %v7501_v51 = vld [vmem:[%s10688_s4 + $0x58] ss:$0 sm:$0xff] }
0x3aae   :  { %v4621_v52 = vpack.c.bf16 %v4616_v38, %v4616_v38 }
0x3ab0   :  { %v4640_v53 = vand.u32 %v4621_v52, %v9323_v23  ;;  %v4623_v23 = vld [vmem:[%s10688_s4 + $0xe0] sm:$0xff] }
0x3ab2   :  { %8325 = vmatprep.subr.bf16.mxu1 %v4640_v53 }
0x3ab3   :  { %8326 = vmatpush3.bf16.msra.mxu1 %v4640_v53 }
0x3ab6   :  { %8328 = vmatmul.mubr.msk.bf16.vlgmr.msra.gmra.mrb[112].mxu1 %vm992_vm11, %v8714_v35 }
0x3b89   :  { %v8329_v25 = vpop.f32.mrb[112].mxu1 }
0x3b8a   :  { %v4676_v15 = vpop.f32.mrb[113].mxu1  ;;  %v10130_v43 = vadd.f32 %v8329_v25, %v4624_v14 }
0x3b8b   :  { %v10128_v19 = vadd.f32 %v4676_v15, %v4622_v54  ;;  %v8330_v24 = vpop.f32.mrb[114].mxu1 }
0x3b8c   :  { %v4679_v17 = vpop.f32.mrb[115].mxu1  ;;  %v4698_v37 = vsel %vm1061_vm14, %v10130_v43, 0.0 }
0x3b8d   :  { %v10132_v18 = vadd.f32 %v4679_v17, %v4623_v23  ;;  %v4692_v57 = vsel %vm147_vm3, %v10128_v19, 0.0 }
0x3b8e   :  { %4693 = vadd.xlane.f32.xlu0 %v4692_v57 }
0x3b8f   :  { %v4695_v58 = vsel %vm147_vm3, %v10132_v18, 0.0 }
0x3b90   :  { %4696 = vadd.xlane.f32.xlu1 %v4695_v58 }
0x3b92   :  { %4699 = vadd.xlane.f32.xlu0 %v4698_v37 }
0x3c1b   :  { %v4694_v41 = vpop.xlane.xlu0 %4693 }
0x3c1c   :  { %v4701_v30 = vmul.f32 0.03125, %v4694_v41 }
0x3c1d   :  { %v4697_v27 = vpop.xlane.xlu1 %4696 }
0x3c1e   :  { %v4704_v59 = vsub.f32 %v10128_v19, %v4701_v30  ;;  %v4702_v46 = vmul.f32 0.03125, %v4697_v27 }
0x3c1f   :  { %v4700_v31 = vpop.xlane.xlu0 %4699 }
0x3c20   :  { %v4705_v32 = vsub.f32 %v10132_v18, %v4702_v46  ;;  %v4703_v60 = vmul.f32 0.03125, %v4700_v31  ;;  %v4707_v61 = vmul.f32 %v4704_v59, %v4704_v59 }
0x3c22   :  { %v4706_v62 = vsub.f32 %v10130_v43, %v4703_v60  ;;  %v4710_v63 = vsel %vm147_vm3, %v4707_v61, 0.0  ;;  %v4708_v1 = vmul.f32 %v4705_v32, %v4705_v32 }
0x3c23   :  { %4711 = vadd.xlane.f32.xlu1 %v4710_v63 }
0x3c24   :  { %v4713_v2 = vsel %vm147_vm3, %v4708_v1, 0.0  ;;  %v4709_v4 = vmul.f32 %v4706_v62, %v4706_v62 }
0x3c25   :  { %4714 = vadd.xlane.f32.xlu0 %v4713_v2 }
0x3c26   :  { %v4716_v5 = vsel %vm1061_vm14, %v4709_v4, 0.0 }
0x3c27   :  { %4717 = vadd.xlane.f32.xlu1 %v4716_v5 }
0x3cb0   :  { %v4712_v8 = vpop.xlane.xlu1 %4711 }
0x3cb1   :  { %v4719_v9 = vmul.f32 0.03125, %v4712_v8 }
0x3cb2   :  { %v4715_v10 = vpop.xlane.xlu0 %4714 }
0x3cb3   :  { %v4722_v11 = vadd.f32 1e-05, %v4719_v9  ;;  %v4720_v13 = vmul.f32 0.03125, %v4715_v10 }
0x3cb4   :  { %v4718_v16 = vpop.xlane.xlu1 %4717 }
0x3cb5   :  { %8921 = vrsqrt.f32 %v4722_v11  ;;  %v4723_v20 = vadd.f32 1e-05, %v4720_v13  ;;  %v4721_v28 = vmul.f32 0.03125, %v4718_v16 }
0x3cb7   :  { %8923 = vrsqrt.f32 %v4723_v20  ;;  %v4724_v50 = vadd.f32 1e-05, %v4721_v28 }
0x3cb9   :  { %8925 = vrsqrt.f32 %v4724_v50 }
0x3cbf   :  { %v8922_v48 = vpop.eup %8921 }
0x3cc0   :  { %v4728_v21 = vmul.f32 %v8922_v48, %v4704_v59 }
0x3cc1   :  { %v8924_v40 = vpop.eup %8923 }
0x3cc2   :  { %v4729_v26 = vmul.f32 %v8924_v40, %v4705_v32  ;;  %v4735_v22 = vmul.f32 %v7499_v33, %v4728_v21 }
0x3cc3   :  { %v8926_v42 = vpop.eup %8925 }
0x3cc4   :  { %v4730_v44 = vmul.f32 %v8926_v42, %v4706_v62  ;;  %v4736_v55 = vmul.f32 %v7499_v33, %v4729_v26  ;;  %v4742_v45 = vadd.f32 %v7500_v56, %v4735_v22 }
0x3cc6   :  { %v4743_v0 = vadd.f32 %v7500_v56, %v4736_v55  ;;  %v4737_v47 = vmul.f32 %v7499_v33, %v4730_v44 }
0x3cc8   :  { %v4745_v36 = vpack.c.bf16 %v4743_v0, %v4742_v45  ;;  %v4744_v49 = vadd.f32 %v7500_v56, %v4737_v47 }
0x3cca   :  { %8335 = vmatprep.mubr.msk.bf16.mxu0 %vm147_vm3, %v4745_v36  ;;  %v4746_v29 = vpack.c.bf16 %v4744_v49, %v4744_v49 }
0x3ccc   :  { %8336 = vmatmul.mubr.msk.bf16.vlgmr.msra.gmra.mrb[108].mxu0 %vm147_vm3, %v4746_v29 }
0x3d9f   :  { %v8337_v12 = vpop.f32.mrb[108].mxu0 }
0x3da0   :  { %v4817_v39 = vadd.f32 %v8337_v12, %v7501_v51  ;;  %v4808_v38 = vpop.f32.mrb[109].mxu0 }
0x3da1   :  { %v8338_v34 = vpop.f32.mrb[110].mxu0  ;;  %v4809_v35 = vadd.f32 %v7501_v51, %v4808_v38 }
0x3da2   :  { %v10163_v52 = vpack.c.bf16 %v4817_v39, %v4817_v39  ;;  %v4811_v53 = vpop.f32.mrb[111].mxu0 }
0x3da3   :  { %v4812_v54 = vadd.f32 %v7501_v51, %v4811_v53 }
0x3da4   :  { %4828 = vrot.lane.b32.xlu1 %v10163_v52, %s9062_s16 }
0x3da5   :  { %v10167_v25 = vpack.c.bf16 %v4812_v54, %v4809_v35 }
0x3da7   :  { %4826 = vrot.lane.b32.xlu0 %v10167_v25, %s9062_s16  ;;  %8343 = vmatprep.mubr.msk.bf16.mxu1 %vm195_vm4, %v10167_v25 }
0x3e16   :  { %v4829_v23 = vpop.permute.xlu1 %4828 }
0x3e17   :  { %v4840_v24 = vsel %vm195_vm4, %v4829_v23, 0 }
0x3e19   :  { %v4827_v14 = vpop.permute.xlu0 %4826 }
0x3e1a   :  { %8563 = vmatprep.subr.msk.bf16.mxu1 %vm195_vm4, %v4827_v14  ;;  %v4837_v15 = vsel %vm195_vm4, %v4827_v14, 0 }
0x3e1b   :  { %8340 = vmatpush3.bf16.xpose.msra.mxu1 %v4837_v15 }
0x3e1c   :  { %8564 = vmatprep.subr.msk.bf16.mxu1 %vm195_vm4, %v4829_v23 }
0x3e23   :  { %8342 = vmatpush3.bf16.xpose.msra.mxu1 %v4840_v24 }
0x3e2a   :  { %8344 = vmatmul.mubr.msk.bf16.vlgmr.msra.gmra.mrb[116].mxu1 %vm195_vm4, %v10163_v52 }
0x3efd   :  { %v8345_v17 = vpop.f32.mrb[116].mxu1 }
0x3efe   :  { %v4876_v57 = vpop.f32.mrb[117].mxu1  ;;  %v4892_v59 = vmul.f32 0.35355338, %v8345_v17 }
0x3eff   :  { %v4890_v58 = vmul.f32 0.35355338, %v4876_v57  ;;  %v8346_v37 = vpop.f32.mrb[118].mxu1 }
0x3f00   :  { %v4879_v41 = vpop.f32.mrb[119].mxu1  ;;  %v4899_v31 = vsel %vm1264_vm13, %v4892_v59, -inf }
0x3f01   :  { %v4891_v30 = vmul.f32 0.35355338, %v4879_v41  ;;  %v4893_v27 = vsel %vm1257_vm15, %v4890_v58, -inf }
0x3f02   :  { %4894 = vmax.xlane.f32.xlu1 %v4893_v27 }
0x3f03   :  { %v4896_v46 = vsel %vm1257_vm15, %v4891_v30, -inf }
0x3f04   :  { %4897 = vmax.xlane.f32.xlu0 %v4896_v46 }
0x3f08   :  { %4900 = vmax.xlane.f32.xlu0 %v4899_v31 }
0x3f8f   :  { %v4895_v32 = vpop.xlane.xlu1 %4894 }
0x3f90   :  { %v4902_v62 = vsub.f32 %v4890_v58, %v4895_v32 }
0x3f91   :  { %v4898_v60 = vpop.xlane.xlu0 %4897 }
0x3f92   :  { %v4903_v61 = vsub.f32 %v4891_v30, %v4898_v60  ;;  %v4905_v4 = vmul.f32 1.442695, %v4902_v62 }
0x3f94   :  { %v4907_v63 = vmul.f32 1.442695, %v4903_v61 }
0x3f95   :  { %v4901_v1 = vpop.xlane.xlu0 %4900 }
0x3f96   :  { %8927 = vpow2.f32 %v4907_v63  ;;  %v4904_v2 = vsub.f32 %v4892_v59, %v4901_v1 }
0x3f98   :  { %v4909_v5 = vmul.f32 1.442695, %v4904_v2 }
0x3f9a   :  { %8929 = vpow2.f32 %v4909_v5 }
0x3f9b   :  { %8931 = vpow2.f32 %v4905_v4 }
0x3fa0   :  { %v8928_v6 = vpop.eup %8927 }
0x3fa1   :  { %v4914_v7 = vsel %vm1257_vm15, %v8928_v6, 0.0 }
0x3fa2   :  { %4915 = vadd.xlane.f32.xlu0 %v4914_v7 }
0x3fa4   :  { %v8930_v8 = vpop.eup %8929 }
0x3fa5   :  { %v4917_v9 = vsel %vm1264_vm13, %v8930_v8, 0.0  ;;  %v8932_v10 = vpop.eup %8931 }
0x3fa6   :  { %4918 = vadd.xlane.f32.xlu1 %v4917_v9  ;;  %v4911_v11 = vsel %vm1257_vm15, %v8932_v10, 0.0 }
0x3faa   :  { %4912 = vadd.xlane.f32.xlu1 %v4911_v11 }
0x3fb8   :  { %4928 = vrot.lane.b32.xlu0 %v10167_v25, %s9068_s22 }
0x3fbb   :  { %4930 = vrot.lane.b32.xlu1 %v10163_v52, %s9068_s22 }
0x3fbc   :  { %4996 = vrot.lane.b32.xlu0 %v10163_v52, %s9063_s17 }
0x3fbf   :  { %4994 = vrot.lane.b32.xlu1 %v10167_v25, %s9063_s17 }
0x3fc0   :  { %4992 = vrot.lane.b32.xlu0 %v10163_v52, %s9061_s15 }
0x3fc3   :  { %4990 = vrot.lane.b32.xlu1 %v10167_v25, %s9061_s15 }
0x402f   :  { %v4916_v13 = vpop.xlane.xlu0 %4915 }
0x4033   :  { %v4919_v16 = vpop.xlane.xlu1 %4918  ;;  %v4929_v20 = vpop.permute.xlu0 %4928 }
0x4034   :  { %8347 = vmatprep.subr.bf16.mxu0 %v4929_v20  ;;  %8933 = vrcp.f32 %v4919_v16 }
0x4035   :  { %8348 = vmatpush3.bf16.msra.mxu0 %v4929_v20  ;;  %8935 = vrcp.f32 %v4916_v13 }
0x4037   :  { %v4913_v28 = vpop.xlane.xlu1 %4912  ;;  %v4997_v47 = vpop.permute.xlu0 %4996 }
0x4038   :  { %8937 = vrcp.f32 %v4913_v28  ;;  %v5008_v36 = vsel %vm195_vm4, %v4997_v47, 0 }
0x403b   :  { %v4931_v50 = vpop.permute.xlu1 %4930  ;;  %v4993_v49 = vpop.permute.xlu0 %4992 }
0x403c   :  { %v4940_v48 = vand.u32 %v4931_v50, %v9408_v3 }
0x403e   :  { %8349 = vmatprep.subr.bf16.mxu0 %v4940_v48  ;;  %v8934_v33 = vpop.eup %8933 }
0x403f   :  { %v4995_v21 = vpop.permute.xlu1 %4994  ;;  %8350 = vmatpush3.bf16.msra.mxu0 %v4940_v48  ;;  %v8936_v40 = vpop.eup %8935  ;;  %v4925_v22 = vmul.f32 %v8934_v33, %v8930_v8 }
0x4040   :  { %8565 = vmatprep.subr.msk.bf16.mxu0 %vm195_vm4, %v4995_v21  ;;  %v4924_v56 = vmul.f32 %v8936_v40, %v8928_v6  ;;  %v5005_v0 = vsel %vm195_vm4, %v4995_v21, 0 }
0x4041   :  { %v4927_v55 = vpack.c.bf16 %v4925_v22, %v4925_v22 }
0x4042   :  { %v8938_v26 = vpop.eup %8937 }
0x4043   :  { %v4923_v42 = vmul.f32 %v8938_v26, %v8932_v10  ;;  %v4991_v45 = vpop.permute.xlu1 %4990 }
0x4045   :  { %v4926_v44 = vpack.c.bf16 %v4924_v56, %v4923_v42 }
0x4047   :  { %8351 = vmatprep.mubr.msk.bf16.mxu0 %vm1257_vm15, %v4926_v44 }
0x4048   :  { %8352 = vmatmul.mubr.msk.bf16.vlgmr.msra.gmra.mrb[112].mxu0 %vm1257_vm15, %v4927_v55 }
0x4049   :  { %8356 = vmatpush3.bf16.xpose.msra.mxu0 %v5005_v0  ;;  %8359 = vmatprep.mubr.msk.bf16.mxu0 %vm195_vm4, %v4991_v45 }
0x404a   :  { %8566 = vmatprep.subr.msk.bf16.mxu0 %vm195_vm4, %v4997_v47 }
0x4051   :  { %8358 = vmatpush3.bf16.xpose.msra.mxu0 %v5008_v36 }
0x4058   :  { %8360 = vmatmul.mubr.msk.bf16.vlgmr.msra.gmra.mrb[116].mxu0 %vm195_vm4, %v4993_v49 }
0x411b   :  { %v10206_v29 = vpop.f32.mrb[112].mxu0 }
0x411c   :  { %v10208_v51 = vpop.f32.mrb[113].mxu0 }
0x411d   :  { %v8354_v12 = vpop.f32.mrb[114].mxu0 }
0x411e   :  { %v10210_v39 = vpop.f32.mrb[115].mxu0 }
0x412b   :  { %v8361_v38 = vpop.f32.mrb[116].mxu0 }
0x412c   :  { %v5044_v34 = vpop.f32.mrb[117].mxu0  ;;  %v5060_v23 = vmul.f32 0.35355338, %v8361_v38 }
0x412d   :  { %v5058_v53 = vmul.f32 0.35355338, %v5044_v34  ;;  %v8362_v35 = vpop.f32.mrb[118].mxu0 }
0x412e   :  { %v5047_v54 = vpop.f32.mrb[119].mxu0  ;;  %v5067_v17 = vsel %vm1264_vm13, %v5060_v23, -inf }
0x412f   :  { %v5059_v14 = vmul.f32 0.35355338, %v5047_v54  ;;  %v5061_v15 = vsel %vm1257_vm15, %v5058_v53, -inf }
0x4130   :  { %5062 = vmax.xlane.f32.xlu1 %v5061_v15 }
0x4131   :  { %v5064_v24 = vsel %vm1257_vm15, %v5059_v14, -inf }
0x4132   :  { %5065 = vmax.xlane.f32.xlu0 %v5064_v24 }
0x4136   :  { %5068 = vmax.xlane.f32.xlu0 %v5067_v17 }
0x41bd   :  { %v5063_v57 = vpop.xlane.xlu1 %5062 }
0x41be   :  { %v5070_v41 = vsub.f32 %v5058_v53, %v5063_v57 }
0x41bf   :  { %v5066_v58 = vpop.xlane.xlu0 %5065 }
0x41c0   :  { %v5071_v37 = vsub.f32 %v5059_v14, %v5066_v58  ;;  %v5073_v46 = vmul.f32 1.442695, %v5070_v41 }
0x41c2   :  { %v5075_v30 = vmul.f32 1.442695, %v5071_v37 }
0x41c3   :  { %v5069_v27 = vpop.xlane.xlu0 %5068 }
0x41c4   :  { %8939 = vpow2.f32 %v5075_v30  ;;  %v5072_v59 = vsub.f32 %v5060_v23, %v5069_v27 }
0x41c6   :  { %v5077_v31 = vmul.f32 1.442695, %v5072_v59 }
0x41c8   :  { %8941 = vpow2.f32 %v5077_v31 }
0x41c9   :  { %8943 = vpow2.f32 %v5073_v46 }
0x41ce   :  { %v8940_v32 = vpop.eup %8939 }
0x41cf   :  { %v5082_v60 = vsel %vm1257_vm15, %v8940_v32, 0.0 }
0x41d0   :  { %5083 = vadd.xlane.f32.xlu0 %v5082_v60 }
0x41d2   :  { %v8942_v61 = vpop.eup %8941 }
0x41d3   :  { %v5085_v62 = vsel %vm1264_vm13, %v8942_v61, 0.0  ;;  %v8944_v63 = vpop.eup %8943 }
0x41d4   :  { %5086 = vadd.xlane.f32.xlu1 %v5085_v62  ;;  %v5079_v1 = vsel %vm1257_vm15, %v8944_v63, 0.0 }
0x41d8   :  { %5080 = vadd.xlane.f32.xlu1 %v5079_v1 }
0x41e6   :  { %5096 = vrot.lane.b32.xlu0 %v10167_v25, %s9069_s23 }
0x41e9   :  { %5098 = vrot.lane.b32.xlu1 %v10163_v52, %s9069_s23 }
0x41ea   :  { %5164 = vrot.lane.b32.xlu0 %v10163_v52, %s9064_s18 }
0x41ed   :  { %5162 = vrot.lane.b32.xlu1 %v10167_v25, %s9064_s18 }
0x41ee   :  { %5160 = vrot.lane.b32.xlu0 %v10163_v52, %s9065_s19 }
0x41f1   :  { %5158 = vrot.lane.b32.xlu1 %v10167_v25, %s9065_s19 }
0x425d   :  { %v5084_v2 = vpop.xlane.xlu0 %5083 }
0x4261   :  { %v5087_v4 = vpop.xlane.xlu1 %5086  ;;  %v5097_v5 = vpop.permute.xlu0 %5096 }
0x4262   :  { %8363 = vmatprep.subr.bf16.mxu1 %v5097_v5  ;;  %8945 = vrcp.f32 %v5087_v4 }
0x4263   :  { %8364 = vmatpush3.bf16.msra.mxu1 %v5097_v5  ;;  %8947 = vrcp.f32 %v5084_v2 }
0x4265   :  { %v5081_v6 = vpop.xlane.xlu1 %5080  ;;  %v5165_v40 = vpop.permute.xlu0 %5164 }
0x4266   :  { %8949 = vrcp.f32 %v5081_v6  ;;  %v5176_v26 = vsel %vm195_vm4, %v5165_v40, 0 }
0x4269   :  { %v5099_v7 = vpop.permute.xlu1 %5098  ;;  %v5161_v22 = vpop.permute.xlu0 %5160 }
0x426a   :  { %v5108_v8 = vand.u32 %v5099_v7, %v9408_v3 }
0x426c   :  { %8365 = vmatprep.subr.bf16.mxu1 %v5108_v8  ;;  %v8946_v9 = vpop.eup %8945 }
0x426d   :  { %v5163_v10 = vpop.permute.xlu1 %5162  ;;  %8366 = vmatpush3.bf16.msra.mxu1 %v5108_v8  ;;  %v8948_v11 = vpop.eup %8947  ;;  %v5093_v16 = vmul.f32 %v8946_v9, %v8942_v61 }
0x426e   :  { %8567 = vmatprep.subr.msk.bf16.mxu1 %vm195_vm4, %v5163_v10  ;;  %v5092_v28 = vmul.f32 %v8948_v11, %v8940_v32  ;;  %v5173_v21 = vsel %vm195_vm4, %v5163_v10, 0 }
0x426f   :  { %v5095_v48 = vpack.c.bf16 %v5093_v16, %v5093_v16 }
0x4270   :  { %v8950_v13 = vpop.eup %8949 }
0x4271   :  { %v5091_v20 = vmul.f32 %v8950_v13, %v8944_v63  ;;  %v5159_v33 = vpop.permute.xlu1 %5158 }
0x4273   :  { %v5094_v50 = vpack.c.bf16 %v5092_v28, %v5091_v20 }
0x4275   :  { %8367 = vmatprep.mubr.msk.bf16.mxu1 %vm1257_vm15, %v5094_v50 }
0x4276   :  { %8368 = vmatmul.mubr.msk.bf16.vlgmr.msra.gmra.mrb[120].mxu1 %vm1257_vm15, %v5095_v48 }
0x4277   :  { %8372 = vmatpush3.bf16.xpose.msra.mxu1 %v5173_v21  ;;  %8375 = vmatprep.mubr.msk.bf16.mxu1 %vm195_vm4, %v5159_v33 }
0x4278   :  { %8568 = vmatprep.subr.msk.bf16.mxu1 %vm195_vm4, %v5165_v40 }
0x427f   :  { %8374 = vmatpush3.bf16.xpose.msra.mxu1 %v5176_v26 }
0x4286   :  { %8376 = vmatmul.mubr.msk.bf16.vlgmr.msra.gmra.mrb[124].mxu1 %vm195_vm4, %v5161_v22 }
0x4349   :  { %v10239_v42 = vpop.f32.mrb[120].mxu1 }
0x434a   :  { %v10241_v56 = vpop.f32.mrb[121].mxu1 }
0x434b   :  { %v8370_v44 = vpop.f32.mrb[122].mxu1 }
0x434c   :  { %v10243_v55 = vpop.f32.mrb[123].mxu1 }
0x434d   :  { %v8627_v45 = vpack.i.bf16 %v10243_v55, %v10241_v56 }
0x4359   :  { %v8377_v0 = vpop.f32.mrb[124].mxu1 }
0x435a   :  { %v5212_v47 = vpop.f32.mrb[125].mxu1  ;;  %v5228_v53 = vmul.f32 0.35355338, %v8377_v0 }
0x435b   :  { %v5226_v36 = vmul.f32 0.35355338, %v5212_v47  ;;  %v8378_v49 = vpop.f32.mrb[126].mxu1 }
0x435c   :  { %v5215_v12 = vpop.f32.mrb[127].mxu1  ;;  %v5235_v54 = vsel %vm1264_vm13, %v5228_v53, -inf }
0x435d   :  { %v5227_v38 = vmul.f32 0.35355338, %v5215_v12  ;;  %v5229_v34 = vsel %vm1257_vm15, %v5226_v36, -inf }
0x435e   :  { %5230 = vmax.xlane.f32.xlu1 %v5229_v34 }
0x435f   :  { %v5232_v35 = vsel %vm1257_vm15, %v5227_v38, -inf }
0x4360   :  { %5233 = vmax.xlane.f32.xlu0 %v5232_v35 }
0x4364   :  { %5236 = vmax.xlane.f32.xlu0 %v5235_v54 }
0x43eb   :  { %v5231_v14 = vpop.xlane.xlu1 %5230 }
0x43ec   :  { %v5238_v24 = vsub.f32 %v5226_v36, %v5231_v14 }
0x43ed   :  { %v5234_v15 = vpop.xlane.xlu0 %5233 }
0x43ee   :  { %v5239_v23 = vsub.f32 %v5227_v38, %v5234_v15  ;;  %v5241_v37 = vmul.f32 1.442695, %v5238_v24 }
0x43f0   :  { %v5243_v17 = vmul.f32 1.442695, %v5239_v23 }
0x43f1   :  { %v5237_v57 = vpop.xlane.xlu0 %5236 }
0x43f2   :  { %8951 = vpow2.f32 %v5243_v17  ;;  %v5240_v58 = vsub.f32 %v5228_v53, %v5237_v57 }
0x43f4   :  { %v5245_v41 = vmul.f32 1.442695, %v5240_v58 }
0x43f6   :  { %8953 = vpow2.f32 %v5245_v41 }
0x43f7   :  { %8955 = vpow2.f32 %v5241_v37 }
0x43fc   :  { %v8952_v30 = vpop.eup %8951 }
0x43fd   :  { %v5250_v27 = vsel %vm1257_vm15, %v8952_v30, 0.0 }
0x43fe   :  { %5251 = vadd.xlane.f32.xlu0 %v5250_v27 }
0x4400   :  { %v8954_v59 = vpop.eup %8953 }
0x4401   :  { %v5253_v46 = vsel %vm1264_vm13, %v8954_v59, 0.0  ;;  %v8956_v31 = vpop.eup %8955 }
0x4402   :  { %5254 = vadd.xlane.f32.xlu1 %v5253_v46  ;;  %v5247_v32 = vsel %vm1257_vm15, %v8956_v31, 0.0 }
0x4406   :  { %5248 = vadd.xlane.f32.xlu1 %v5247_v32 }
0x4414   :  { %5264 = vrot.lane.b32.xlu0 %v10167_v25, %s9070_s24 }
0x4417   :  { %5266 = vrot.lane.b32.xlu1 %v10163_v52, %s9070_s24 }
0x4418   :  { %5332 = vrot.lane.b32.xlu0 %v10163_v52, %s9066_s20 }
0x441b   :  { %5330 = vrot.lane.b32.xlu1 %v10167_v25, %s9066_s20 }
0x441c   :  { %5328 = vrot.lane.b32.xlu0 %v10163_v52, %s9067_s21 }
0x441f   :  { %5326 = vrot.lane.b32.xlu1 %v10167_v25, %s9067_s21 }
0x448b   :  { %v5252_v60 = vpop.xlane.xlu0 %5251 }
0x448f   :  { %v5255_v61 = vpop.xlane.xlu1 %5254  ;;  %v5265_v62 = vpop.permute.xlu0 %5264 }
0x4490   :  { %8379 = vmatprep.subr.bf16.mxu0 %v5265_v62  ;;  %8957 = vrcp.f32 %v5255_v61 }
0x4491   :  { %8380 = vmatpush3.bf16.msra.mxu0 %v5265_v62  ;;  %8959 = vrcp.f32 %v5252_v60 }
0x4493   :  { %v5249_v63 = vpop.xlane.xlu1 %5248  ;;  %v5333_v28 = vpop.permute.xlu0 %5332 }
0x4494   :  { %8961 = vrcp.f32 %v5249_v63  ;;  %v5344_v50 = vsel %vm195_vm4, %v5333_v28, 0 }
0x4497   :  { %v5267_v1 = vpop.permute.xlu1 %5266  ;;  %v5329_v48 = vpop.permute.xlu0 %5328 }
0x4498   :  { %v5276_v2 = vand.u32 %v5267_v1, %v9408_v3 }
0x449a   :  { %8381 = vmatprep.subr.bf16.mxu0 %v5276_v2  ;;  %v8958_v4 = vpop.eup %8957 }
0x449b   :  { %v5331_v5 = vpop.permute.xlu1 %5330  ;;  %8382 = vmatpush3.bf16.msra.mxu0 %v5276_v2  ;;  %v8960_v6 = vpop.eup %8959  ;;  %v5261_v8 = vmul.f32 %v8958_v4, %v8954_v59 }
0x449c   :  { %8569 = vmatprep.subr.msk.bf16.mxu0 %vm195_vm4, %v5331_v5  ;;  %v5260_v10 = vmul.f32 %v8960_v6, %v8952_v30  ;;  %v5341_v16 = vsel %vm195_vm4, %v5331_v5, 0  ;;  %v8717_v5 = vld [vmem:[%s10686_s3 + $0x78] sm:$0xff]   ;;  %v8718_v6 = vld [vmem:[%s10686_s3 + $0x80] sm:$0xff]  }
0x449d   :  { %v5263_v13 = vpack.c.bf16 %v5261_v8, %v5261_v8 }
0x449e   :  { %v8962_v7 = vpop.eup %8961 }
0x449f   :  { %v5259_v9 = vmul.f32 %v8962_v7, %v8956_v31  ;;  %v5327_v20 = vpop.permute.xlu1 %5326 }
0x44a1   :  { %v5262_v11 = vpack.c.bf16 %v5260_v10, %v5259_v9 }
0x44a3   :  { %8383 = vmatprep.mubr.msk.bf16.mxu0 %vm1257_vm15, %v5262_v11 }
0x44a4   :  { %8384 = vmatmul.mubr.msk.bf16.vlgmr.msra.gmra.mrb[120].mxu0 %vm1257_vm15, %v5263_v13 }
0x44a5   :  { %8388 = vmatpush3.bf16.xpose.msra.mxu0 %v5341_v16  ;;  %8391 = vmatprep.mubr.msk.bf16.mxu0 %vm195_vm4, %v5327_v20 }
0x44a6   :  { %8570 = vmatprep.subr.msk.bf16.mxu0 %vm195_vm4, %v5333_v28 }
0x44ad   :  { %8390 = vmatpush3.bf16.xpose.msra.mxu0 %v5344_v50 }
0x44b4   :  { %8392 = vmatmul.mubr.msk.bf16.vlgmr.msra.gmra.mrb[124].mxu0 %vm195_vm4, %v5329_v48 }
0x4577   :  { %v8385_v33 = vpop.f32.mrb[120].mxu0 }
0x4578   :  { %v5312_v21 = vpop.f32.mrb[121].mxu0 }
0x4579   :  { %v8386_v40 = vpop.f32.mrb[122].mxu0 }
0x457a   :  { %v5315_v26 = vpop.f32.mrb[123].mxu0 }
0x457b   :  { %v8632_v22 = vpack.i.bf16 %v5315_v26, %v5312_v21 }
0x4587   :  { %v8393_v44 = vpop.f32.mrb[124].mxu0 }
0x4588   :  { %v5380_v0 = vpop.f32.mrb[125].mxu0  ;;  %v5396_v34 = vmul.f32 0.35355338, %v8393_v44 }
0x4589   :  { %v5394_v47 = vmul.f32 0.35355338, %v5380_v0  ;;  %v8394_v36 = vpop.f32.mrb[126].mxu0 }
0x458a   :  { %v5383_v49 = vpop.f32.mrb[127].mxu0  ;;  %v5403_v35 = vsel %vm1264_vm13, %v5396_v34, -inf }
0x458b   :  { %v5395_v12 = vmul.f32 0.35355338, %v5383_v49  ;;  %v5397_v38 = vsel %vm1257_vm15, %v5394_v47, -inf }
0x458c   :  { %5398 = vmax.xlane.f32.xlu1 %v5397_v38 }
0x458d   :  { %v5400_v53 = vsel %vm1257_vm15, %v5395_v12, -inf }
0x458e   :  { %5401 = vmax.xlane.f32.xlu0 %v5400_v53 }
0x4592   :  { %5404 = vmax.xlane.f32.xlu0 %v5403_v35 }
0x4619   :  { %v5399_v54 = vpop.xlane.xlu1 %5398 }
0x461a   :  { %v5406_v23 = vsub.f32 %v5394_v47, %v5399_v54 }
0x461b   :  { %v5402_v14 = vpop.xlane.xlu0 %5401 }
0x461c   :  { %v5407_v15 = vsub.f32 %v5395_v12, %v5402_v14  ;;  %v5409_v58 = vmul.f32 1.442695, %v5406_v23 }
0x461e   :  { %v5411_v24 = vmul.f32 1.442695, %v5407_v15 }
0x461f   :  { %v5405_v17 = vpop.xlane.xlu0 %5404 }
0x4620   :  { %8963 = vpow2.f32 %v5411_v24  ;;  %v5408_v57 = vsub.f32 %v5396_v34, %v5405_v17 }
0x4622   :  { %v5413_v37 = vmul.f32 1.442695, %v5408_v57 }
0x4624   :  { %8965 = vpow2.f32 %v5413_v37 }
0x4625   :  { %8967 = vpow2.f32 %v5409_v58 }
0x462a   :  { %v8964_v41 = vpop.eup %8963 }
0x462b   :  { %v5418_v30 = vsel %vm1257_vm15, %v8964_v41, 0.0 }
0x462c   :  { %5419 = vadd.xlane.f32.xlu0 %v5418_v30 }
0x462e   :  { %v8966_v27 = vpop.eup %8965 }
0x462f   :  { %v5421_v59 = vsel %vm1264_vm13, %v8966_v27, 0.0  ;;  %v8968_v46 = vpop.eup %8967 }
0x4630   :  { %5422 = vadd.xlane.f32.xlu1 %v5421_v59  ;;  %v5415_v31 = vsel %vm1257_vm15, %v8968_v46, 0.0 }
0x4634   :  { %5416 = vadd.xlane.f32.xlu1 %v5415_v31 }
0x4642   :  { %5432 = vrot.lane.b32.xlu0 %v10167_v25, %s9071_s25 }
0x4645   :  { %5434 = vrot.lane.b32.xlu1 %v10163_v52, %s9071_s25 }
0x4646   :  { %5501 = vrot.lane.b32.xlu0 %v10239_v42, %s9072_s26 }
0x4649   :  { %8628 = vrot.lane.b32.xlu1 %v8627_v45, %s9072_s26 }
0x464a   :  { %5513 = vrot.lane.b32.xlu0 %v8385_v33, %s9073_s6 }
0x464d   :  { %8633 = vrot.lane.b32.xlu1 %v8632_v22, %s9073_s6 }
0x46b9   :  { %v5420_v32 = vpop.xlane.xlu0 %5419 }
0x46bd   :  { %v5423_v60 = vpop.xlane.xlu1 %5422  ;;  %v5433_v61 = vpop.permute.xlu0 %5432 }
0x46be   :  { %8395 = vmatprep.subr.bf16.mxu1 %v5433_v61  ;;  %8969 = vrcp.f32 %v5423_v60 }
0x46bf   :  { %8396 = vmatpush3.bf16.msra.mxu1 %v5433_v61  ;;  %8971 = vrcp.f32 %v5420_v32 }
0x46c1   :  { %v5417_v52 = vpop.xlane.xlu1 %5416  ;;  %v5502_v13 = vpop.permute.xlu0 %5501 }
0x46c2   :  { %8973 = vrcp.f32 %v5417_v52  ;;  %v5532_v40 = vsel %vm195_vm4, %v10206_v29, %v5502_v13 }
0x46c5   :  { %v5435_v25 = vpop.permute.xlu1 %5434  ;;  %v5514_v20 = vpop.permute.xlu0 %5513 }
0x46c6   :  { %v5444_v42 = vand.u32 %v5435_v25, %v9408_v3  ;;  %v5535_v22 = vsel %vm652_vm8, %v5532_v40, %v5514_v20 }
0x46c8   :  { %8397 = vmatprep.subr.bf16.mxu1 %v5444_v42  ;;  %v8970_v62 = vpop.eup %8969 }
0x46c9   :  { %8398 = vmatpush3.bf16.msra.mxu1 %v5444_v42  ;;  %v8972_v56 = vpop.eup %8971  ;;  %v5429_v45 = vmul.f32 %v8970_v62, %v8966_v27  ;;  %v8629_v16 = vpop.permute.xlu1 %8628 }
0x46ca   :  { %v5428_v1 = vmul.f32 %v8972_v56, %v8964_v41  ;;  %8403 = vmatprep.subr.bf16.mxu1 %v8717_v5  ;;  %v8631_v50 = vunpack.i.h.bf16 %v8629_v16  ;;  %v8630_v48 = vunpack.i.l.bf16 %v8629_v16  ;;  %v7527_v16 = vld [vmem:[%s10688_s4 + $0x68] ss:$0 sm:$0xff] }
0x46cb   :  { %v5431_v4 = vpack.c.bf16 %v5429_v45, %v5429_v45 }
0x46cc   :  { %v8974_v55 = vpop.eup %8973  ;;  %v5531_v0 = vsel %vm195_vm4, %v10210_v39, %v8631_v50  ;;  %v5530_v47 = vsel %vm195_vm4, %v10208_v51, %v8630_v48  ;;  %v7526_v51 = vld [vmem:[%s10688_s4 + $0x60] ss:$0 sm:$0xff] }
0x46cd   :  { %v5427_v63 = vmul.f32 %v8974_v55, %v8968_v46  ;;  %v8634_v28 = vpop.permute.xlu1 %8633 }
0x46ce   :  { %v8636_v33 = vunpack.i.h.bf16 %v8634_v28  ;;  %v8635_v21 = vunpack.i.l.bf16 %v8634_v28 }
0x46cf   :  { %v5430_v2 = vpack.c.bf16 %v5428_v1, %v5427_v63  ;;  %v8719_v63 = vld [vmem:[%s10686_s3 + $0x88] sm:$0xff]   ;;  %v8720_v1 = vld [vmem:[%s10686_s3 + $0x90] sm:$0xff]  }
0x46d0   :  { %v5533_v12 = vsel %vm652_vm8, %v5530_v47, %v8635_v21  ;;  %v5534_v38 = vsel %vm652_vm8, %v5531_v0, %v8636_v33  ;;  %8411 = vmatprep.subr.bf16.mxu0 %v8719_v63  ;;  %v7528_v33 = vld [vmem:[%s10688_s4 + $0x70] ss:$0 sm:$0xff] }
0x46d1   :  { %8399 = vmatprep.mubr.msk.bf16.mxu1 %vm1257_vm15, %v5430_v2  ;;  %8412 = vmatpush3.bf16.msra.mxu0 %v8719_v63 }
0x46d2   :  { %8400 = vmatmul.mubr.msk.bf16.vlgmr.msra.gmra.mrb[128].mxu1 %vm1257_vm15, %v5431_v4  ;;  %8413 = vmatprep.subr.bf16.mxu0 %v8720_v1 }
0x46d3   :  { %8404 = vmatpush3.bf16.msra.mxu1 %v8717_v5 }
0x46d4   :  { %8405 = vmatprep.subr.bf16.mxu1 %v8718_v6 }
0x46d5   :  { %8414 = vmatpush3.bf16.msra.mxu0 %v8720_v1 }
0x46d7   :  { %8406 = vmatpush3.bf16.msra.mxu1 %v8718_v6 }
0x47a5   :  { %v8401_v7 = vpop.f32.mrb[128].mxu1 }
0x47a6   :  { %5525 = vrot.lane.b32.xlu0 %v8401_v7, %s9074_s7  ;;  %v5480_v8 = vpop.f32.mrb[129].mxu1 }
0x47a7   :  { %v8402_v9 = vpop.f32.mrb[130].mxu1 }
0x47a8   :  { %v5483_v10 = vpop.f32.mrb[131].mxu1 }
0x47a9   :  { %v8637_v11 = vpack.i.bf16 %v5483_v10, %v5480_v8 }
0x47ab   :  { %8638 = vrot.lane.b32.xlu1 %v8637_v11, %s9074_s7 }
0x4818   :  { %v5526_v26 = vpop.permute.xlu0 %5525 }
0x4819   :  { %v5538_v34 = vsel %vm654_vm9, %v5535_v22, %v5526_v26 }
0x481a   :  { %v5540_v54 = vpack.c.bf16 %v5538_v34, %v5538_v34  ;;  %v8723_v34 = vld [vmem:[%s10686_s3 + $0xa8] sm:$0xff]  }
0x481d   :  { %v8639_v44 = vpop.permute.xlu1 %8638 }
0x481e   :  { %v8641_v36 = vunpack.i.h.bf16 %v8639_v44  ;;  %v8640_v49 = vunpack.i.l.bf16 %v8639_v44 }
0x4820   :  { %v5537_v29 = vsel %vm654_vm9, %v5534_v38, %v8641_v36  ;;  %v5536_v53 = vsel %vm654_vm9, %v5533_v12, %v8640_v49  ;;  %v8721_v12 = vld [vmem:[%s10686_s3 + $0x98] sm:$0xff]   ;;  %v8722_v38 = vld [vmem:[%s10686_s3 + $0xa0] sm:$0xff]  }
0x4821   :  { %v5539_v35 = vpack.c.bf16 %v5537_v29, %v5536_v53  ;;  %8419 = vmatprep.subr.bf16.mxu1 %v8721_v12  ;;  %v8724_v29 = vld [vmem:[%s10686_s3 + $0xb0] sm:$0xff]   ;;  %v7529_v53 = vld [vmem:[%s10688_s4 + $0x78] ss:$0 sm:$0xff] }
0x4823   :  { %8407 = vmatprep.mubr.msk.bf16.mxu1 %vm147_vm3, %v5539_v35 }
0x4824   :  { %8408 = vmatmul.mubr.msk.bf16.vlgmr.msra.gmra.mrb[132].mxu1 %vm147_vm3, %v5540_v54 }
0x4825   :  { %8420 = vmatpush3.bf16.msra.mxu1 %v8721_v12 }
0x4826   :  { %8421 = vmatprep.subr.bf16.mxu1 %v8722_v38 }
0x4829   :  { %8422 = vmatpush3.bf16.msra.mxu1 %v8722_v38 }
0x482a   :  { %8423 = vmatprep.subr.bf16.mxu1 %v8723_v34 }
0x482d   :  { %8424 = vmatpush3.bf16.msra.mxu1 %v8723_v34 }
0x482e   :  { %8425 = vmatprep.subr.bf16.mxu1 %v8724_v29 }
0x4831   :  { %8426 = vmatpush3.bf16.msra.mxu1 %v8724_v29 }
0x48f7   :  { %v8409_v39 = vpop.f32.mrb[132].mxu1 }
0x48f8   :  { %v5597_v14 = vpop.f32.mrb[133].mxu1  ;;  %v5613_v17 = vadd.f32 %v8409_v39, %v10130_v43 }
0x48f9   :  { %v5611_v15 = vadd.f32 %v5597_v14, %v10128_v19  ;;  %v8410_v23 = vpop.f32.mrb[134].mxu1 }
0x48fa   :  { %v5600_v24 = vpop.f32.mrb[135].mxu1  ;;  %v10329_v30 = vadd.f32 %v7526_v51, %v5613_v17 }
0x48fb   :  { %v10322_v57 = vadd.f32 %v7526_v51, %v5611_v15  ;;  %v5612_v58 = vadd.f32 %v5600_v24, %v10132_v18 }
0x48fc   :  { %v5630_v19 = vsel %vm1061_vm14, %v10329_v30, 0.0 }
0x48fd   :  { %v10325_v37 = vadd.f32 %v7526_v51, %v5612_v58  ;;  %v5624_v41 = vsel %vm147_vm3, %v10322_v57, 0.0 }
0x48fe   :  { %5625 = vadd.xlane.f32.xlu1 %v5624_v41 }
0x48ff   :  { %v5627_v27 = vsel %vm147_vm3, %v10325_v37, 0.0 }
0x4900   :  { %5628 = vadd.xlane.f32.xlu0 %v5627_v27 }
0x4904   :  { %5631 = vadd.xlane.f32.xlu0 %v5630_v19 }
0x498b   :  { %v5626_v43 = vpop.xlane.xlu1 %5625 }
0x498c   :  { %v5633_v59 = vmul.f32 0.03125, %v5626_v43 }
0x498d   :  { %v5629_v46 = vpop.xlane.xlu0 %5628 }
0x498e   :  { %v5636_v18 = vsub.f32 %v10322_v57, %v5633_v59  ;;  %v5634_v31 = vmul.f32 0.03125, %v5629_v46 }
0x4990   :  { %v5637_v32 = vsub.f32 %v10325_v37, %v5634_v31  ;;  %v5639_v60 = vmul.f32 %v5636_v18, %v5636_v18 }
0x4991   :  { %v5632_v61 = vpop.xlane.xlu0 %5631 }
0x4992   :  { %v5635_v52 = vmul.f32 0.03125, %v5632_v61  ;;  %v5642_v25 = vsel %vm147_vm3, %v5639_v60, 0.0  ;;  %v5640_v42 = vmul.f32 %v5637_v32, %v5637_v32 }
0x4993   :  { %5643 = vadd.xlane.f32.xlu1 %v5642_v25 }
0x4994   :  { %v5638_v62 = vsub.f32 %v10329_v30, %v5635_v52  ;;  %v5645_v56 = vsel %vm147_vm3, %v5640_v42, 0.0 }
0x4995   :  { %5646 = vadd.xlane.f32.xlu0 %v5645_v56 }
0x4996   :  { %v5641_v55 = vmul.f32 %v5638_v62, %v5638_v62 }
0x4998   :  { %v5648_v45 = vsel %vm1061_vm14, %v5641_v55, 0.0 }
0x4999   :  { %5649 = vadd.xlane.f32.xlu1 %v5648_v45 }
0x4a20   :  { %v5644_v2 = vpop.xlane.xlu1 %5643 }
0x4a21   :  { %v5651_v4 = vmul.f32 0.03125, %v5644_v2 }
0x4a22   :  { %v5647_v5 = vpop.xlane.xlu0 %5646 }
0x4a23   :  { %v5654_v6 = vadd.f32 1e-05, %v5651_v4  ;;  %v5652_v7 = vmul.f32 0.03125, %v5647_v5 }
0x4a25   :  { %8975 = vrsqrt.f32 %v5654_v6  ;;  %v5655_v8 = vadd.f32 1e-05, %v5652_v7 }
0x4a26   :  { %v5650_v9 = vpop.xlane.xlu1 %5649 }
0x4a27   :  { %8977 = vrsqrt.f32 %v5655_v8  ;;  %v5653_v10 = vmul.f32 0.03125, %v5650_v9 }
0x4a29   :  { %v5656_v11 = vadd.f32 1e-05, %v5653_v10  ;;  %v7540_v10 = vld [vmem:[%s10688_s4 + $0x80] ss:$0 sm:$0xff] }
0x4a2b   :  { %8979 = vrsqrt.f32 %v5656_v11 }
0x4a2f   :  { %v8976_v13 = vpop.eup %8975 }
0x4a30   :  { %v5660_v20 = vmul.f32 %v8976_v13, %v5636_v18 }
0x4a31   :  { %v8978_v28 = vpop.eup %8977 }
0x4a32   :  { %v5661_v50 = vmul.f32 %v8978_v28, %v5637_v32  ;;  %v5667_v48 = vmul.f32 %v7527_v16, %v5660_v20 }
0x4a34   :  { %v5668_v21 = vmul.f32 %v7527_v16, %v5661_v50  ;;  %v5674_v22 = vadd.f32 %v7528_v33, %v5667_v48 }
0x4a35   :  { %v8980_v40 = vpop.eup %8979 }
0x4a36   :  { %v5662_v26 = vmul.f32 %v8980_v40, %v5638_v62  ;;  %v5675_v44 = vadd.f32 %v7528_v33, %v5668_v21 }
0x4a38   :  { %v5677_v0 = vpack.c.bf16 %v5675_v44, %v5674_v22  ;;  %v5669_v47 = vmul.f32 %v7527_v16, %v5662_v26 }
0x4a3a   :  { %8415 = vmatprep.mubr.msk.bf16.mxu0 %vm147_vm3, %v5677_v0  ;;  %v5676_v36 = vadd.f32 %v7528_v33, %v5669_v47 }
0x4a3c   :  { %v5678_v49 = vpack.c.bf16 %v5676_v36, %v5676_v36 }
0x4a3e   :  { %8416 = vmatmul.mubr.msk.bf16.vlgmr.msra.gmra.mrb[128].mxu0 %vm147_vm3, %v5678_v49 }
0x4b11   :  { %v8417_v35 = vpop.f32.mrb[128].mxu0 }
0x4b12   :  { %v5749_v54 = vadd.f32 %v8417_v35, %v7529_v53  ;;  %v5740_v39 = vpop.f32.mrb[129].mxu0 }
0x4b13   :  { %v5741_v51 = vadd.f32 %v7529_v53, %v5740_v39  ;;  %v8418_v14 = vpop.f32.mrb[130].mxu0  ;;  %v8725_v39 = vld [vmem:[%s10686_s3 + $0x118] sm:$0xff]  }
0x4b14   :  { %v5756_v15 = vmul.f32 %v5749_v54, %v5749_v54  ;;  %v5743_v23 = vpop.f32.mrb[131].mxu0  ;;  %8431 = vmatprep.subr.bf16.mxu0 %v8725_v39  ;;  %v8727_v14 = vld [vmem:[%s10686_s3 + $0xb8] sm:$0xff]  }
0x4b15   :  { %v5754_v24 = vmul.f32 %v5741_v51, %v5741_v51  ;;  %v5744_v17 = vadd.f32 %v7529_v53, %v5743_v23  ;;  %8432 = vmatpush3.bf16.msra.mxu0 %v8725_v39 }
0x4b16   :  { %v5759_v58 = vmul.f32 %v5756_v15, %v5749_v54 }
0x4b17   :  { %v5757_v41 = vmul.f32 %v5754_v24, %v5741_v51  ;;  %v5755_v27 = vmul.f32 %v5744_v17, %v5744_v17 }
0x4b18   :  { %v5762_v19 = vmul.f32 0.044715, %v5759_v58 }
0x4b19   :  { %v5760_v43 = vmul.f32 0.044715, %v5757_v41  ;;  %v5758_v59 = vmul.f32 %v5755_v27, %v5744_v17 }
0x4b1a   :  { %v5765_v46 = vadd.f32 %v5762_v19, %v5749_v54 }
0x4b1b   :  { %v5763_v18 = vadd.f32 %v5760_v43, %v5741_v51  ;;  %v5761_v31 = vmul.f32 0.044715, %v5758_v59 }
0x4b1c   :  { %v5768_v32 = vmul.f32 0.7978846, %v5765_v46  ;;  %v7541_v46 = vld [vmem:[%s10688_s4 + $0xf0] ss:$0 sm:$0xff] }
0x4b1d   :  { %v5766_v60 = vmul.f32 0.7978846, %v5763_v18  ;;  %v5764_v61 = vadd.f32 %v5761_v31, %v5744_v17 }
0x4b1e   :  { %8981 = vtanh.f32 %v5768_v32 }
0x4b1f   :  { %8983 = vtanh.f32 %v5766_v60  ;;  %v5767_v52 = vmul.f32 0.7978846, %v5764_v61  ;;  %v7551_v61 = vld [vmem:[%s10688_s4 + $0x88] ss:$0 sm:$0xff] }
0x4b21   :  { %8985 = vtanh.f32 %v5767_v52 }
0x4b28   :  { %v8982_v25 = vpop.eup %8981 }
0x4b29   :  { %v8984_v42 = vpop.eup %8983  ;;  %v5774_v62 = vadd.f32 1.0, %v8982_v25  ;;  %v7542_v25 = vld [vmem:[%s10688_s4 + $0xf8] ss:$0 sm:$0xff] }
0x4b2a   :  { %v5772_v56 = vadd.f32 1.0, %v8984_v42 }
0x4b2b   :  { %v8986_v55 = vpop.eup %8985  ;;  %v5777_v45 = vmul.f32 0.5, %v5774_v62 }
0x4b2c   :  { %v5775_v63 = vmul.f32 0.5, %v5772_v56  ;;  %v5773_v1 = vadd.f32 1.0, %v8986_v55 }
0x4b2d   :  { %v5780_v4 = vmul.f32 %v5777_v45, %v5749_v54 }
0x4b2e   :  { %v5776_v2 = vmul.f32 0.5, %v5773_v1  ;;  %v5778_v5 = vmul.f32 %v5775_v63, %v5741_v51  ;;  %v8726_v51 = vld [vmem:[%s10686_s3 + $0x120] sm:$0xff]  }
0x4b2f   :  { %v5782_v8 = vpack.c.bf16 %v5780_v4, %v5780_v4  ;;  %8433 = vmatprep.subr.bf16.mxu0 %v8726_v51 }
0x4b30   :  { %v5779_v6 = vmul.f32 %v5776_v2, %v5744_v17  ;;  %8434 = vmatpush3.bf16.msra.mxu0 %v8726_v51  ;;  %v7552_v2 = vld [vmem:[%s10688_s4 + $0x90] ss:$0 sm:$0xff] }
0x4b31   :  { %8439 = vmatprep.subr.bf16.mxu0 %v8727_v14 }
0x4b32   :  { %v5781_v7 = vpack.c.bf16 %v5779_v6, %v5778_v5 }
0x4b34   :  { %8427 = vmatprep.mubr.msk.bf16.mxu1 %vm855_vm10, %v5781_v7 }
0x4b35   :  { %8428 = vmatmul.mubr.msk.bf16.vlgmr.msra.gmra.mrb[136].mxu1 %vm855_vm10, %v5782_v8 }
0x4c08   :  { %v8429_v9 = vpop.f32.mrb[136].mxu1 }
0x4c09   :  { %v5855_v11 = vpop.f32.mrb[137].mxu1  ;;  %v5871_v13 = vadd.f32 %v8429_v9, %v10329_v30  ;;  %v8728_v9 = vld [vmem:[%s10686_s3 + $0xc0] sm:$0xff]  }
0x4c0a   :  { %v5869_v16 = vadd.f32 %v5855_v11, %v10322_v57  ;;  %v8430_v20 = vpop.f32.mrb[138].mxu1 }
0x4c0b   :  { %v5858_v28 = vpop.f32.mrb[139].mxu1  ;;  %v10380_v33 = vadd.f32 %v7540_v10, %v5871_v13  ;;  %v7543_v20 = vld [vmem:[%s10688_s4 + $0x100] ss:$0 sm:$0xff] }
0x4c0c   :  { %v10377_v50 = vadd.f32 %v7540_v10, %v5869_v16  ;;  %v5870_v48 = vadd.f32 %v5858_v28, %v10325_v37 }
0x4c0d   :  { %v5888_v57 = vsel %vm1061_vm14, %v10380_v33, 0.0 }
0x4c0e   :  { %v10382_v21 = vadd.f32 %v7540_v10, %v5870_v48  ;;  %v5882_v40 = vsel %vm147_vm3, %v10377_v50, 0.0 }
0x4c0f   :  { %5883 = vadd.xlane.f32.xlu0 %v5882_v40 }
0x4c10   :  { %v5885_v26 = vsel %vm147_vm3, %v10382_v21, 0.0 }
0x4c11   :  { %5886 = vadd.xlane.f32.xlu1 %v5885_v26 }
0x4c13   :  { %5889 = vadd.xlane.f32.xlu0 %v5888_v57 }
0x4c9c   :  { %v5884_v30 = vpop.xlane.xlu0 %5883 }
0x4c9d   :  { %v5891_v22 = vmul.f32 0.03125, %v5884_v30 }
0x4c9e   :  { %v5887_v44 = vpop.xlane.xlu1 %5886 }
0x4c9f   :  { %v5894_v37 = vsub.f32 %v10377_v50, %v5891_v22  ;;  %v5892_v0 = vmul.f32 0.03125, %v5887_v44  ;;  %v7553_v44 = vld [vmem:[%s10688_s4 + $0x98] ss:$0 sm:$0xff] }
0x4ca0   :  { %v5890_v47 = vpop.xlane.xlu0 %5889 }
0x4ca1   :  { %v5895_v36 = vsub.f32 %v10382_v21, %v5892_v0  ;;  %v5893_v49 = vmul.f32 0.03125, %v5890_v47  ;;  %v5897_v12 = vmul.f32 %v5894_v37, %v5894_v37 }
0x4ca3   :  { %v5896_v38 = vsub.f32 %v10380_v33, %v5893_v49  ;;  %v5900_v34 = vsel %vm147_vm3, %v5897_v12, 0.0  ;;  %v5898_v29 = vmul.f32 %v5895_v36, %v5895_v36 }
0x4ca4   :  { %5901 = vadd.xlane.f32.xlu1 %v5900_v34 }
0x4ca5   :  { %v5903_v53 = vsel %vm147_vm3, %v5898_v29, 0.0  ;;  %v5899_v35 = vmul.f32 %v5896_v38, %v5896_v38 }
0x4ca6   :  { %5904 = vadd.xlane.f32.xlu0 %v5903_v53 }
0x4ca7   :  { %v5906_v54 = vsel %vm1061_vm14, %v5899_v35, 0.0 }
0x4ca8   :  { %5907 = vadd.xlane.f32.xlu1 %v5906_v54 }
0x4d31   :  { %v5902_v15 = vpop.xlane.xlu1 %5901 }
0x4d32   :  { %v5909_v23 = vmul.f32 0.03125, %v5902_v15 }
0x4d33   :  { %v5905_v24 = vpop.xlane.xlu0 %5904 }
0x4d34   :  { %v5912_v17 = vadd.f32 1e-05, %v5909_v23  ;;  %v5910_v58 = vmul.f32 0.03125, %v5905_v24 }
0x4d35   :  { %v5908_v41 = vpop.xlane.xlu1 %5907 }
0x4d36   :  { %8987 = vrsqrt.f32 %v5912_v17  ;;  %v5913_v27 = vadd.f32 1e-05, %v5910_v58  ;;  %v5911_v19 = vmul.f32 0.03125, %v5908_v41 }
0x4d38   :  { %8989 = vrsqrt.f32 %v5913_v27  ;;  %v5914_v43 = vadd.f32 1e-05, %v5911_v19 }
0x4d3a   :  { %8991 = vrsqrt.f32 %v5914_v43 }
0x4d40   :  { %v8988_v59 = vpop.eup %8987 }
0x4d41   :  { %v5918_v18 = vmul.f32 %v8988_v59, %v5894_v37 }
0x4d42   :  { %v8990_v31 = vpop.eup %8989 }
0x4d43   :  { %v5919_v32 = vmul.f32 %v8990_v31, %v5895_v36  ;;  %v5925_v60 = vmul.f32 %v7541_v46, %v5918_v18  ;;  %v6022_v55 = vmul.f32 %v7551_v61, %v5918_v18 }
0x4d44   :  { %v8992_v52 = vpop.eup %8991 }
0x4d45   :  { %v5920_v42 = vmul.f32 %v8992_v52, %v5896_v38  ;;  %v5926_v62 = vmul.f32 %v7541_v46, %v5919_v32  ;;  %v6023_v56 = vmul.f32 %v7551_v61, %v5919_v32  ;;  %v5932_v45 = vadd.f32 %v7542_v25, %v5925_v60 }
0x4d46   :  { %v6029_v7 = vadd.f32 %v7552_v2, %v6022_v55 }
0x4d47   :  { %v5933_v63 = vadd.f32 %v7542_v25, %v5926_v62  ;;  %v5927_v1 = vmul.f32 %v7541_v46, %v5920_v42  ;;  %v6030_v4 = vadd.f32 %v7552_v2, %v6023_v56  ;;  %v6024_v10 = vmul.f32 %v7551_v61, %v5920_v42 }
0x4d49   :  { %v5935_v5 = vpack.c.bf16 %v5933_v63, %v5932_v45  ;;  %v5934_v6 = vadd.f32 %v7542_v25, %v5927_v1  ;;  %v6032_v11 = vpack.c.bf16 %v6030_v4, %v6029_v7  ;;  %v6031_v13 = vadd.f32 %v7552_v2, %v6024_v10 }
0x4d4b   :  { %8435 = vmatprep.mubr.msk.bf16.mxu0 %vm147_vm3, %v5935_v5  ;;  %v5936_v8 = vpack.c.bf16 %v5934_v6, %v5934_v6  ;;  %v6033_v16 = vpack.c.bf16 %v6031_v13, %v6031_v13 }
0x4d4d   :  { %8436 = vmatmul.mubr.msk.bf16.vlgmr.msra.gmra.mrb[132].mxu0 %vm147_vm3, %v5936_v8 }
0x4d4e   :  { %8440 = vmatpush3.bf16.msra.mxu0 %v8727_v14  ;;  %8443 = vmatprep.mubr.msk.bf16.mxu0 %vm147_vm3, %v6032_v11 }
0x4d4f   :  { %8441 = vmatprep.subr.bf16.mxu0 %v8728_v9 }
0x4d52   :  { %8442 = vmatpush3.bf16.msra.mxu0 %v8728_v9 }
0x4d55   :  { %8444 = vmatmul.mubr.msk.bf16.vlgmr.msra.gmra.mrb[136].mxu0 %vm147_vm3, %v6033_v16 }
0x4e20   :  { %v8437_v28 = vpop.f32.mrb[132].mxu0 }
0x4e21   :  { %v6007_v48 = vadd.f32 %v8437_v28, %v7543_v20  ;;  %v5998_v40 = vpop.f32.mrb[133].mxu0 }
0x4e22   :  { %v5999_v26 = vadd.f32 %v7543_v20, %v5998_v40  ;;  %v8438_v57 = vpop.f32.mrb[134].mxu0 }
0x4e23   :  { %7550 = vst [vmem:[%s10691_s5 + $0x2f] sm:$0x1] %v6007_v48  ;;  %v6001_v30 = vpop.f32.mrb[135].mxu0 }
0x4e24   :  { %7548 = vst [vmem:[%s10691_s5 + $0x1f] sm:$0xfe] %v5999_v26  ;;  %v6002_v22 = vadd.f32 %v7543_v20, %v6001_v30 }
0x4e26   :  { %7549 = vst [vmem:[%s10691_s5 + $0x27] sm:$0xff] %v6002_v22 }
0x4e28   :  { %v8445_v37 = vpop.f32.mrb[136].mxu0 }
0x4e29   :  { %v6104_v0 = vadd.f32 %v8445_v37, %v7553_v44  ;;  %v6095_v47 = vpop.f32.mrb[137].mxu0 }
0x4e2a   :  { %v8446_v36 = vpop.f32.mrb[138].mxu0  ;;  %v6096_v38 = vadd.f32 %v7553_v44, %v6095_v47 }
0x4e2b   :  { %v10439_v49 = vpack.c.bf16 %v6104_v0, %v6104_v0  ;;  %v6098_v12 = vpop.f32.mrb[139].mxu0 }
0x4e2c   :  { %v6099_v34 = vadd.f32 %v7553_v44, %v6098_v12 }
0x4e2d   :  { %6115 = vrot.lane.b32.xlu1 %v10439_v49, %s9062_s16 }
0x4e2e   :  { %v10443_v29 = vpack.c.bf16 %v6099_v34, %v6096_v38 }
0x4e30   :  { %6113 = vrot.lane.b32.xlu0 %v10443_v29, %s9062_s16  ;;  %8451 = vmatprep.mubr.msk.bf16.mxu1 %vm195_vm4, %v10443_v29 }
0x4e9f   :  { %v6116_v54 = vpop.permute.xlu1 %6115 }
0x4ea0   :  { %v6127_v39 = vsel %vm195_vm4, %v6116_v54, 0 }
0x4ea2   :  { %v6114_v53 = vpop.permute.xlu0 %6113 }
0x4ea3   :  { %v6124_v35 = vsel %vm195_vm4, %v6114_v53, 0  ;;  %8571 = vmatprep.subr.msk.bf16.mxu1 %vm195_vm4, %v6114_v53 }
0x4ea4   :  { %8448 = vmatpush3.bf16.xpose.msra.mxu1 %v6124_v35 }
0x4ea5   :  { %8572 = vmatprep.subr.msk.bf16.mxu1 %vm195_vm4, %v6116_v54 }
0x4eac   :  { %8450 = vmatpush3.bf16.xpose.msra.mxu1 %v6127_v39 }
0x4eb3   :  { %8452 = vmatmul.mubr.msk.bf16.vlgmr.msra.gmra.mrb[140].mxu1 %vm195_vm4, %v10439_v49 }
0x4f86   :  { %v8453_v51 = vpop.f32.mrb[140].mxu1 }
0x4f87   :  { %v6163_v14 = vpop.f32.mrb[141].mxu1  ;;  %v6179_v41 = vmul.f32 0.35355338, %v8453_v51 }
0x4f88   :  { %v6177_v15 = vmul.f32 0.35355338, %v6163_v14  ;;  %v8454_v23 = vpop.f32.mrb[142].mxu1 }
0x4f89   :  { %v6166_v24 = vpop.f32.mrb[143].mxu1  ;;  %v6186_v19 = vsel %vm1264_vm13, %v6179_v41, -inf }
0x4f8a   :  { %v6178_v17 = vmul.f32 0.35355338, %v6166_v24  ;;  %v6180_v58 = vsel %vm1257_vm15, %v6177_v15, -inf }
0x4f8b   :  { %6181 = vmax.xlane.f32.xlu1 %v6180_v58 }
0x4f8c   :  { %v6183_v27 = vsel %vm1257_vm15, %v6178_v17, -inf }
0x4f8d   :  { %6184 = vmax.xlane.f32.xlu0 %v6183_v27 }
0x4f91   :  { %6187 = vmax.xlane.f32.xlu0 %v6186_v19 }
0x5018   :  { %v6182_v43 = vpop.xlane.xlu1 %6181 }
0x5019   :  { %v6189_v18 = vsub.f32 %v6177_v15, %v6182_v43 }
0x501a   :  { %v6185_v59 = vpop.xlane.xlu0 %6184 }
0x501b   :  { %v6190_v46 = vsub.f32 %v6178_v17, %v6185_v59  ;;  %v6192_v61 = vmul.f32 1.442695, %v6189_v18 }
0x501d   :  { %v6194_v31 = vmul.f32 1.442695, %v6190_v46 }
0x501e   :  { %v6188_v32 = vpop.xlane.xlu0 %6187 }
0x501f   :  { %8993 = vpow2.f32 %v6194_v31  ;;  %v6191_v60 = vsub.f32 %v6179_v41, %v6188_v32 }
0x5021   :  { %v6196_v52 = vmul.f32 1.442695, %v6191_v60 }
0x5023   :  { %8995 = vpow2.f32 %v6196_v52 }
0x5024   :  { %8997 = vpow2.f32 %v6192_v61 }
0x5029   :  { %v8994_v25 = vpop.eup %8993 }
0x502a   :  { %v6201_v42 = vsel %vm1257_vm15, %v8994_v25, 0.0 }
0x502b   :  { %6202 = vadd.xlane.f32.xlu0 %v6201_v42 }
0x502d   :  { %v8996_v62 = vpop.eup %8995 }
0x502e   :  { %v6204_v56 = vsel %vm1264_vm13, %v8996_v62, 0.0  ;;  %v8998_v55 = vpop.eup %8997 }
0x502f   :  { %6205 = vadd.xlane.f32.xlu1 %v6204_v56  ;;  %v6198_v45 = vsel %vm1257_vm15, %v8998_v55, 0.0 }
0x5033   :  { %6199 = vadd.xlane.f32.xlu1 %v6198_v45 }
0x5041   :  { %6215 = vrot.lane.b32.xlu0 %v10443_v29, %s9068_s22 }
0x5044   :  { %6217 = vrot.lane.b32.xlu1 %v10439_v49, %s9068_s22 }
0x5045   :  { %6283 = vrot.lane.b32.xlu0 %v10439_v49, %s9063_s17 }
0x5048   :  { %6281 = vrot.lane.b32.xlu1 %v10443_v29, %s9063_s17 }
0x5049   :  { %6279 = vrot.lane.b32.xlu0 %v10439_v49, %s9061_s15 }
0x504c   :  { %6277 = vrot.lane.b32.xlu1 %v10443_v29, %s9061_s15 }
0x50b8   :  { %v6203_v63 = vpop.xlane.xlu0 %6202 }
0x50bc   :  { %v6206_v1 = vpop.xlane.xlu1 %6205  ;;  %v6216_v2 = vpop.permute.xlu0 %6215 }
0x50bd   :  { %8455 = vmatprep.subr.bf16.mxu0 %v6216_v2  ;;  %8999 = vrcp.f32 %v6206_v1 }
0x50be   :  { %8456 = vmatpush3.bf16.msra.mxu0 %v6216_v2  ;;  %9001 = vrcp.f32 %v6203_v63 }
0x50c0   :  { %v6200_v4 = vpop.xlane.xlu1 %6199  ;;  %v6284_v26 = vpop.permute.xlu0 %6283 }
0x50c1   :  { %9003 = vrcp.f32 %v6200_v4  ;;  %v6295_v57 = vsel %vm195_vm4, %v6284_v26, 0 }
0x50c4   :  { %v6218_v5 = vpop.permute.xlu1 %6217  ;;  %v6280_v30 = vpop.permute.xlu0 %6279 }
0x50c5   :  { %v6227_v6 = vand.u32 %v6218_v5, %v9408_v3 }
0x50c7   :  { %8457 = vmatprep.subr.bf16.mxu0 %v6227_v6  ;;  %v9000_v7 = vpop.eup %8999 }
0x50c8   :  { %v6282_v8 = vpop.permute.xlu1 %6281  ;;  %8458 = vmatpush3.bf16.msra.mxu0 %v6227_v6  ;;  %v9002_v9 = vpop.eup %9001  ;;  %v6212_v11 = vmul.f32 %v9000_v7, %v8996_v62 }
0x50c9   :  { %8573 = vmatprep.subr.msk.bf16.mxu0 %vm195_vm4, %v6282_v8  ;;  %v6211_v16 = vmul.f32 %v9002_v9, %v8994_v25  ;;  %v6292_v48 = vsel %vm195_vm4, %v6282_v8, 0 }
0x50ca   :  { %v6214_v28 = vpack.c.bf16 %v6212_v11, %v6212_v11 }
0x50cb   :  { %v9004_v10 = vpop.eup %9003 }
0x50cc   :  { %v6210_v13 = vmul.f32 %v9004_v10, %v8998_v55  ;;  %v6278_v40 = vpop.permute.xlu1 %6277 }
0x50ce   :  { %v6213_v20 = vpack.c.bf16 %v6211_v16, %v6210_v13 }
0x50d0   :  { %8459 = vmatprep.mubr.msk.bf16.mxu0 %vm1257_vm15, %v6213_v20 }
0x50d1   :  { %8460 = vmatmul.mubr.msk.bf16.vlgmr.msra.gmra.mrb[140].mxu0 %vm1257_vm15, %v6214_v28 }
0x50d2   :  { %8464 = vmatpush3.bf16.xpose.msra.mxu0 %v6292_v48  ;;  %8467 = vmatprep.mubr.msk.bf16.mxu0 %vm195_vm4, %v6278_v40 }
0x50d3   :  { %8574 = vmatprep.subr.msk.bf16.mxu0 %vm195_vm4, %v6284_v26 }
0x50da   :  { %8466 = vmatpush3.bf16.xpose.msra.mxu0 %v6295_v57 }
0x50e1   :  { %8468 = vmatmul.mubr.msk.bf16.vlgmr.msra.gmra.mrb[144].mxu0 %vm195_vm4, %v6280_v30 }
0x51a4   :  { %v10482_v22 = vpop.f32.mrb[140].mxu0 }
0x51a5   :  { %v10484_v44 = vpop.f32.mrb[141].mxu0 }
0x51a6   :  { %v8462_v37 = vpop.f32.mrb[142].mxu0 }
0x51a7   :  { %v10486_v0 = vpop.f32.mrb[143].mxu0 }
0x51b4   :  { %v8469_v47 = vpop.f32.mrb[144].mxu0 }
0x51b5   :  { %v6331_v36 = vpop.f32.mrb[145].mxu0  ;;  %v6347_v54 = vmul.f32 0.35355338, %v8469_v47 }
0x51b6   :  { %v6345_v12 = vmul.f32 0.35355338, %v6331_v36  ;;  %v8470_v38 = vpop.f32.mrb[146].mxu0 }
0x51b7   :  { %v6334_v34 = vpop.f32.mrb[147].mxu0  ;;  %v6354_v51 = vsel %vm1264_vm13, %v6347_v54, -inf }
0x51b8   :  { %v6346_v53 = vmul.f32 0.35355338, %v6334_v34  ;;  %v6348_v35 = vsel %vm1257_vm15, %v6345_v12, -inf }
0x51b9   :  { %6349 = vmax.xlane.f32.xlu1 %v6348_v35 }
0x51ba   :  { %v6351_v39 = vsel %vm1257_vm15, %v6346_v53, -inf }
0x51bb   :  { %6352 = vmax.xlane.f32.xlu0 %v6351_v39 }
0x51bf   :  { %6355 = vmax.xlane.f32.xlu0 %v6354_v51 }
0x5246   :  { %v6350_v14 = vpop.xlane.xlu1 %6349 }
0x5247   :  { %v6357_v24 = vsub.f32 %v6345_v12, %v6350_v14 }
0x5248   :  { %v6353_v15 = vpop.xlane.xlu0 %6352 }
0x5249   :  { %v6358_v23 = vsub.f32 %v6346_v53, %v6353_v15  ;;  %v6360_v27 = vmul.f32 1.442695, %v6357_v24 }
0x524b   :  { %v6362_v17 = vmul.f32 1.442695, %v6358_v23 }
0x524c   :  { %v6356_v58 = vpop.xlane.xlu0 %6355 }
0x524d   :  { %9005 = vpow2.f32 %v6362_v17  ;;  %v6359_v41 = vsub.f32 %v6347_v54, %v6356_v58 }
0x524f   :  { %v6364_v19 = vmul.f32 1.442695, %v6359_v41 }
0x5251   :  { %9007 = vpow2.f32 %v6364_v19 }
0x5252   :  { %9009 = vpow2.f32 %v6360_v27 }
0x5257   :  { %v9006_v43 = vpop.eup %9005 }
0x5258   :  { %v6369_v59 = vsel %vm1257_vm15, %v9006_v43, 0.0 }
0x5259   :  { %6370 = vadd.xlane.f32.xlu0 %v6369_v59 }
0x525b   :  { %v9008_v46 = vpop.eup %9007 }
0x525c   :  { %v6372_v18 = vsel %vm1264_vm13, %v9008_v46, 0.0  ;;  %v9010_v31 = vpop.eup %9009 }
0x525d   :  { %6373 = vadd.xlane.f32.xlu1 %v6372_v18  ;;  %v6366_v32 = vsel %vm1257_vm15, %v9010_v31, 0.0 }
0x5261   :  { %6367 = vadd.xlane.f32.xlu1 %v6366_v32 }
0x526f   :  { %6383 = vrot.lane.b32.xlu0 %v10443_v29, %s9069_s23 }
0x5272   :  { %6385 = vrot.lane.b32.xlu1 %v10439_v49, %s9069_s23 }
0x5273   :  { %6451 = vrot.lane.b32.xlu0 %v10439_v49, %s9064_s18 }
0x5276   :  { %6449 = vrot.lane.b32.xlu1 %v10443_v29, %s9064_s18 }
0x5277   :  { %6447 = vrot.lane.b32.xlu0 %v10439_v49, %s9065_s19 }
0x527a   :  { %6445 = vrot.lane.b32.xlu1 %v10443_v29, %s9065_s19 }
0x52e6   :  { %v6371_v60 = vpop.xlane.xlu0 %6370 }
0x52ea   :  { %v6374_v61 = vpop.xlane.xlu1 %6373  ;;  %v6384_v52 = vpop.permute.xlu0 %6383 }
0x52eb   :  { %8471 = vmatprep.subr.bf16.mxu1 %v6384_v52  ;;  %9011 = vrcp.f32 %v6374_v61 }
0x52ec   :  { %8472 = vmatpush3.bf16.msra.mxu1 %v6384_v52  ;;  %9013 = vrcp.f32 %v6371_v60 }
0x52ee   :  { %v6368_v25 = vpop.xlane.xlu1 %6367  ;;  %v6452_v9 = vpop.permute.xlu0 %6451 }
0x52ef   :  { %9015 = vrcp.f32 %v6368_v25  ;;  %v6463_v10 = vsel %vm195_vm4, %v6452_v9, 0 }
0x52f2   :  { %v6386_v42 = vpop.permute.xlu1 %6385  ;;  %v6448_v11 = vpop.permute.xlu0 %6447 }
0x52f3   :  { %v6395_v62 = vand.u32 %v6386_v42, %v9408_v3 }
0x52f5   :  { %8473 = vmatprep.subr.bf16.mxu1 %v6395_v62  ;;  %v9012_v56 = vpop.eup %9011 }
0x52f6   :  { %v6450_v55 = vpop.permute.xlu1 %6449  ;;  %8474 = vmatpush3.bf16.msra.mxu1 %v6395_v62  ;;  %v9014_v45 = vpop.eup %9013  ;;  %v6380_v1 = vmul.f32 %v9012_v56, %v9008_v46 }
0x52f7   :  { %8575 = vmatprep.subr.msk.bf16.mxu1 %vm195_vm4, %v6450_v55  ;;  %v6379_v4 = vmul.f32 %v9014_v45, %v9006_v43  ;;  %v6460_v7 = vsel %vm195_vm4, %v6450_v55, 0 }
0x52f8   :  { %v6382_v6 = vpack.c.bf16 %v6380_v1, %v6380_v1 }
0x52f9   :  { %v9016_v63 = vpop.eup %9015 }
0x52fa   :  { %v6378_v2 = vmul.f32 %v9016_v63, %v9010_v31  ;;  %v6446_v8 = vpop.permute.xlu1 %6445 }
0x52fc   :  { %v6381_v5 = vpack.c.bf16 %v6379_v4, %v6378_v2 }
0x52fe   :  { %8475 = vmatprep.mubr.msk.bf16.mxu1 %vm1257_vm15, %v6381_v5 }
0x52ff   :  { %8476 = vmatmul.mubr.msk.bf16.vlgmr.msra.gmra.mrb[144].mxu1 %vm1257_vm15, %v6382_v6 }
0x5300   :  { %8480 = vmatpush3.bf16.xpose.msra.mxu1 %v6460_v7  ;;  %8483 = vmatprep.mubr.msk.bf16.mxu1 %vm195_vm4, %v6446_v8 }
0x5301   :  { %8576 = vmatprep.subr.msk.bf16.mxu1 %vm195_vm4, %v6452_v9 }
0x5308   :  { %8482 = vmatpush3.bf16.xpose.msra.mxu1 %v6463_v10 }
0x530f   :  { %8484 = vmatmul.mubr.msk.bf16.vlgmr.msra.gmra.mrb[148].mxu1 %vm195_vm4, %v6448_v11 }
0x53d2   :  { %v10515_v13 = vpop.f32.mrb[144].mxu1 }
0x53d3   :  { %v10517_v16 = vpop.f32.mrb[145].mxu1 }
0x53d4   :  { %v8478_v20 = vpop.f32.mrb[146].mxu1 }
0x53d5   :  { %v10519_v28 = vpop.f32.mrb[147].mxu1 }
0x53d6   :  { %v8642_v48 = vpack.i.bf16 %v10519_v28, %v10517_v16 }
0x53e2   :  { %v8485_v40 = vpop.f32.mrb[148].mxu1 }
0x53e3   :  { %v6499_v26 = vpop.f32.mrb[149].mxu1  ;;  %v6515_v12 = vmul.f32 0.35355338, %v8485_v40 }
0x53e4   :  { %v6513_v57 = vmul.f32 0.35355338, %v6499_v26  ;;  %v8486_v30 = vpop.f32.mrb[150].mxu1 }
0x53e5   :  { %v6502_v37 = vpop.f32.mrb[151].mxu1  ;;  %v6522_v34 = vsel %vm1264_vm13, %v6515_v12, -inf }
0x53e6   :  { %v6514_v47 = vmul.f32 0.35355338, %v6502_v37  ;;  %v6516_v36 = vsel %vm1257_vm15, %v6513_v57, -inf }
0x53e7   :  { %6517 = vmax.xlane.f32.xlu1 %v6516_v36 }
0x53e8   :  { %v6519_v38 = vsel %vm1257_vm15, %v6514_v47, -inf }
0x53e9   :  { %6520 = vmax.xlane.f32.xlu0 %v6519_v38 }
0x53ed   :  { %6523 = vmax.xlane.f32.xlu0 %v6522_v34 }
0x5474   :  { %v6518_v53 = vpop.xlane.xlu1 %6517 }
0x5475   :  { %v6525_v39 = vsub.f32 %v6513_v57, %v6518_v53 }
0x5476   :  { %v6521_v35 = vpop.xlane.xlu0 %6520 }
0x5477   :  { %v6526_v54 = vsub.f32 %v6514_v47, %v6521_v35  ;;  %v6528_v23 = vmul.f32 1.442695, %v6525_v39 }
0x5479   :  { %v6530_v51 = vmul.f32 1.442695, %v6526_v54 }
0x547a   :  { %v6524_v14 = vpop.xlane.xlu0 %6523 }
0x547b   :  { %9017 = vpow2.f32 %v6530_v51  ;;  %v6527_v15 = vsub.f32 %v6515_v12, %v6524_v14 }
0x547d   :  { %v6532_v24 = vmul.f32 1.442695, %v6527_v15 }
0x547f   :  { %9019 = vpow2.f32 %v6532_v24 }
0x5480   :  { %9021 = vpow2.f32 %v6528_v23 }
0x5485   :  { %v9018_v17 = vpop.eup %9017 }
0x5486   :  { %v6537_v58 = vsel %vm1257_vm15, %v9018_v17, 0.0 }
0x5487   :  { %6538 = vadd.xlane.f32.xlu0 %v6537_v58 }
0x5489   :  { %v9020_v41 = vpop.eup %9019 }
0x548a   :  { %v6540_v27 = vsel %vm1264_vm13, %v9020_v41, 0.0  ;;  %v9022_v19 = vpop.eup %9021 }
0x548b   :  { %6541 = vadd.xlane.f32.xlu1 %v6540_v27  ;;  %v6534_v43 = vsel %vm1257_vm15, %v9022_v19, 0.0 }
0x548f   :  { %6535 = vadd.xlane.f32.xlu1 %v6534_v43 }
0x549d   :  { %6551 = vrot.lane.b32.xlu0 %v10443_v29, %s9070_s24 }
0x54a0   :  { %6553 = vrot.lane.b32.xlu1 %v10439_v49, %s9070_s24 }
0x54a1   :  { %6619 = vrot.lane.b32.xlu0 %v10439_v49, %s9066_s20 }
0x54a4   :  { %6617 = vrot.lane.b32.xlu1 %v10443_v29, %s9066_s20 }
0x54a5   :  { %6615 = vrot.lane.b32.xlu0 %v10439_v49, %s9067_s21 }
0x54a8   :  { %6613 = vrot.lane.b32.xlu1 %v10443_v29, %s9067_s21 }
0x5514   :  { %v6539_v59 = vpop.xlane.xlu0 %6538 }
0x5518   :  { %v6542_v46 = vpop.xlane.xlu1 %6541  ;;  %v6552_v18 = vpop.permute.xlu0 %6551 }
0x5519   :  { %8487 = vmatprep.subr.bf16.mxu0 %v6552_v18  ;;  %9023 = vrcp.f32 %v6542_v46 }
0x551a   :  { %8488 = vmatpush3.bf16.msra.mxu0 %v6552_v18  ;;  %9025 = vrcp.f32 %v6539_v59 }
0x551c   :  { %v6536_v31 = vpop.xlane.xlu1 %6535  ;;  %v6620_v4 = vpop.permute.xlu0 %6619 }
0x551d   :  { %9027 = vrcp.f32 %v6536_v31  ;;  %v6631_v5 = vsel %vm195_vm4, %v6620_v4, 0 }
0x5520   :  { %v6554_v32 = vpop.permute.xlu1 %6553  ;;  %v6616_v6 = vpop.permute.xlu0 %6615 }
0x5521   :  { %v6563_v60 = vand.u32 %v6554_v32, %v9408_v3 }
0x5523   :  { %8489 = vmatprep.subr.bf16.mxu0 %v6563_v60  ;;  %v9024_v61 = vpop.eup %9023 }
0x5524   :  { %v6618_v52 = vpop.permute.xlu1 %6617  ;;  %8490 = vmatpush3.bf16.msra.mxu0 %v6563_v60  ;;  %v9026_v25 = vpop.eup %9025  ;;  %v6548_v62 = vmul.f32 %v9024_v61, %v9020_v41 }
0x5525   :  { %8577 = vmatprep.subr.msk.bf16.mxu0 %vm195_vm4, %v6618_v52  ;;  %v6547_v55 = vmul.f32 %v9026_v25, %v9018_v17  ;;  %v6628_v1 = vsel %vm195_vm4, %v6618_v52, 0  ;;  %v8729_v52 = vld [vmem:[%s10686_s3 + $0xc8] sm:$0xff]  }
0x5526   :  { %v6550_v63 = vpack.c.bf16 %v6548_v62, %v6548_v62 }
0x5527   :  { %v9028_v42 = vpop.eup %9027 }
0x5528   :  { %v6546_v56 = vmul.f32 %v9028_v42, %v9022_v19  ;;  %v6614_v2 = vpop.permute.xlu1 %6613 }
0x552a   :  { %v6549_v45 = vpack.c.bf16 %v6547_v55, %v6546_v56 }
0x552c   :  { %8491 = vmatprep.mubr.msk.bf16.mxu0 %vm1257_vm15, %v6549_v45 }
0x552d   :  { %8492 = vmatmul.mubr.msk.bf16.vlgmr.msra.gmra.mrb[148].mxu0 %vm1257_vm15, %v6550_v63 }
0x552e   :  { %8496 = vmatpush3.bf16.xpose.msra.mxu0 %v6628_v1  ;;  %8499 = vmatprep.mubr.msk.bf16.mxu0 %vm195_vm4, %v6614_v2 }
0x552f   :  { %8578 = vmatprep.subr.msk.bf16.mxu0 %vm195_vm4, %v6620_v4 }
0x5536   :  { %8498 = vmatpush3.bf16.xpose.msra.mxu0 %v6631_v5 }
0x553d   :  { %8500 = vmatmul.mubr.msk.bf16.vlgmr.msra.gmra.mrb[152].mxu0 %vm195_vm4, %v6616_v6 }
0x5600   :  { %v8493_v7 = vpop.f32.mrb[148].mxu0 }
0x5601   :  { %v6599_v8 = vpop.f32.mrb[149].mxu0 }
0x5602   :  { %v8494_v9 = vpop.f32.mrb[150].mxu0 }
0x5603   :  { %v6602_v10 = vpop.f32.mrb[151].mxu0 }
0x5604   :  { %v8647_v11 = vpack.i.bf16 %v6602_v10, %v6599_v8 }
0x5610   :  { %v8501_v20 = vpop.f32.mrb[152].mxu0 }
0x5611   :  { %v6667_v40 = vpop.f32.mrb[153].mxu0  ;;  %v6683_v36 = vmul.f32 0.35355338, %v8501_v20 }
0x5612   :  { %v6681_v26 = vmul.f32 0.35355338, %v6667_v40  ;;  %v8502_v57 = vpop.f32.mrb[154].mxu0 }
0x5613   :  { %v6670_v30 = vpop.f32.mrb[155].mxu0  ;;  %v6690_v38 = vsel %vm1264_vm13, %v6683_v36, -inf }
0x5614   :  { %v6682_v37 = vmul.f32 0.35355338, %v6670_v30  ;;  %v6684_v47 = vsel %vm1257_vm15, %v6681_v26, -inf }
0x5615   :  { %6685 = vmax.xlane.f32.xlu1 %v6684_v47 }
0x5616   :  { %v6687_v12 = vsel %vm1257_vm15, %v6682_v37, -inf }
0x5617   :  { %6688 = vmax.xlane.f32.xlu0 %v6687_v12 }
0x561b   :  { %6691 = vmax.xlane.f32.xlu0 %v6690_v38 }
0x56a2   :  { %v6686_v34 = vpop.xlane.xlu1 %6685 }
0x56a3   :  { %v6693_v54 = vsub.f32 %v6681_v26, %v6686_v34 }
0x56a4   :  { %v6689_v53 = vpop.xlane.xlu0 %6688 }
0x56a5   :  { %v6694_v35 = vsub.f32 %v6682_v37, %v6689_v53  ;;  %v6696_v15 = vmul.f32 1.442695, %v6693_v54 }
0x56a7   :  { %v6698_v39 = vmul.f32 1.442695, %v6694_v35 }
0x56a8   :  { %v6692_v51 = vpop.xlane.xlu0 %6691 }
0x56a9   :  { %9029 = vpow2.f32 %v6698_v39  ;;  %v6695_v14 = vsub.f32 %v6683_v36, %v6692_v51 }
0x56ab   :  { %v6700_v23 = vmul.f32 1.442695, %v6695_v14 }
0x56ad   :  { %9031 = vpow2.f32 %v6700_v23 }
0x56ae   :  { %9033 = vpow2.f32 %v6696_v15 }
0x56b3   :  { %v9030_v24 = vpop.eup %9029 }
0x56b4   :  { %v6705_v17 = vsel %vm1257_vm15, %v9030_v24, 0.0 }
0x56b5   :  { %6706 = vadd.xlane.f32.xlu0 %v6705_v17 }
0x56b7   :  { %v9032_v58 = vpop.eup %9031 }
0x56b8   :  { %v6708_v41 = vsel %vm1264_vm13, %v9032_v58, 0.0  ;;  %v9034_v27 = vpop.eup %9033 }
0x56b9   :  { %6709 = vadd.xlane.f32.xlu1 %v6708_v41  ;;  %v6702_v19 = vsel %vm1257_vm15, %v9034_v27, 0.0 }
0x56bd   :  { %6703 = vadd.xlane.f32.xlu1 %v6702_v19 }
0x56cb   :  { %6719 = vrot.lane.b32.xlu0 %v10443_v29, %s9071_s25 }
0x56ce   :  { %6721 = vrot.lane.b32.xlu1 %v10439_v49, %s9071_s25 }
0x56cf   :  { %6788 = vrot.lane.b32.xlu0 %v10515_v13, %s9072_s26 }
0x56d2   :  { %8643 = vrot.lane.b32.xlu1 %v8642_v48, %s9072_s26 }
0x56d3   :  { %6800 = vrot.lane.b32.xlu0 %v8493_v7, %s9073_s6 }
0x56d6   :  { %8648 = vrot.lane.b32.xlu1 %v8647_v11, %s9073_s6 }
0x5742   :  { %v6707_v43 = vpop.xlane.xlu0 %6706 }
0x5746   :  { %v6710_v59 = vpop.xlane.xlu1 %6709  ;;  %v6720_v46 = vpop.permute.xlu0 %6719 }
0x5747   :  { %8503 = vmatprep.subr.bf16.mxu1 %v6720_v46  ;;  %9035 = vrcp.f32 %v6710_v59 }
0x5748   :  { %8504 = vmatpush3.bf16.msra.mxu1 %v6720_v46  ;;  %9037 = vrcp.f32 %v6707_v43 }
0x574a   :  { %v6704_v49 = vpop.xlane.xlu1 %6703  ;;  %v6789_v45 = vpop.permute.xlu0 %6788 }
0x574b   :  { %9039 = vrcp.f32 %v6704_v49  ;;  %v6819_v8 = vsel %vm195_vm4, %v10482_v22, %v6789_v45  ;;  %v7579_v45 = vld [vmem:[%s10688_s4 + $0xa8] ss:$0 sm:$0xff] }
0x574e   :  { %v6722_v29 = vpop.permute.xlu1 %6721  ;;  %v6801_v1 = vpop.permute.xlu0 %6800 }
0x574f   :  { %v6731_v13 = vand.u32 %v6722_v29, %v9408_v3  ;;  %v8730_v3 = vld [vmem:[%s10686_s3 + $0xd0] sm:$0xff]   ;;  %v6822_v10 = vsel %vm652_vm8, %v6819_v8, %v6801_v1 }
0x5751   :  { %8505 = vmatprep.subr.bf16.mxu1 %v6731_v13  ;;  %v9036_v18 = vpop.eup %9035 }
0x5752   :  { %8506 = vmatpush3.bf16.msra.mxu1 %v6731_v13  ;;  %v9038_v16 = vpop.eup %9037  ;;  %v6716_v48 = vmul.f32 %v9036_v18, %v9032_v58  ;;  %v8644_v63 = vpop.permute.xlu1 %8643 }
0x5753   :  { %v6715_v32 = vmul.f32 %v9038_v16, %v9030_v24  ;;  %8511 = vmatprep.subr.bf16.mxu1 %v8729_v52  ;;  %v8646_v4 = vunpack.i.h.bf16 %v8644_v63  ;;  %v8645_v5 = vunpack.i.l.bf16 %v8644_v63 }
0x5754   :  { %v6718_v61 = vpack.c.bf16 %v6716_v48, %v6716_v48  ;;  %v8731_v48 = vld [vmem:[%s10686_s3 + $0xd8] sm:$0xff]  }
0x5755   :  { %v9040_v28 = vpop.eup %9039  ;;  %v6818_v20 = vsel %vm195_vm4, %v10486_v0, %v8646_v4  ;;  %v6817_v40 = vsel %vm195_vm4, %v10484_v44, %v8645_v5  ;;  %v7578_v44 = vld [vmem:[%s10688_s4 + $0xa0] ss:$0 sm:$0xff]  ;;  %8519 = vmatprep.subr.bf16.mxu0 %v8731_v48  ;;  %v7580_v5 = vld [vmem:[%s10688_s4 + $0xb0] ss:$0 sm:$0xff] }
0x5756   :  { %v6714_v31 = vmul.f32 %v9040_v28, %v9034_v27  ;;  %v8649_v2 = vpop.permute.xlu1 %8648  ;;  %8520 = vmatpush3.bf16.msra.mxu0 %v8731_v48 }
0x5757   :  { %v8651_v6 = vunpack.i.h.bf16 %v8649_v2  ;;  %v8650_v7 = vunpack.i.l.bf16 %v8649_v2 }
0x5758   :  { %v6717_v60 = vpack.c.bf16 %v6715_v32, %v6714_v31  ;;  %v8732_v31 = vld [vmem:[%s10686_s3 + $0xe0] sm:$0xff]  }
0x5759   :  { %v6820_v30 = vsel %vm652_vm8, %v6817_v40, %v8650_v7  ;;  %v6821_v37 = vsel %vm652_vm8, %v6818_v20, %v8651_v6  ;;  %8521 = vmatprep.subr.bf16.mxu0 %v8732_v31 }
0x575a   :  { %8507 = vmatprep.mubr.msk.bf16.mxu1 %vm1257_vm15, %v6717_v60  ;;  %8522 = vmatpush3.bf16.msra.mxu0 %v8732_v31 }
0x575b   :  { %8508 = vmatmul.mubr.msk.bf16.vlgmr.msra.gmra.mrb[152].mxu1 %vm1257_vm15, %v6718_v61 }
0x575c   :  { %8512 = vmatpush3.bf16.msra.mxu1 %v8729_v52 }
0x575d   :  { %8513 = vmatprep.subr.bf16.mxu1 %v8730_v3 }
0x5760   :  { %8514 = vmatpush3.bf16.msra.mxu1 %v8730_v3 }
0x582e   :  { %v8509_v25 = vpop.f32.mrb[152].mxu1 }
0x582f   :  { %6812 = vrot.lane.b32.xlu0 %v8509_v25, %s9074_s7  ;;  %v6767_v42 = vpop.f32.mrb[153].mxu1 }
0x5830   :  { %v8510_v62 = vpop.f32.mrb[154].mxu1 }
0x5831   :  { %v6770_v56 = vpop.f32.mrb[155].mxu1 }
0x5832   :  { %v8652_v55 = vpack.i.bf16 %v6770_v56, %v6767_v42 }
0x5834   :  { %8653 = vrot.lane.b32.xlu1 %v8652_v55, %s9074_s7 }
0x58a1   :  { %v6813_v9 = vpop.permute.xlu0 %6812 }
0x58a2   :  { %v6825_v47 = vsel %vm654_vm9, %v6822_v10, %v6813_v9 }
0x58a3   :  { %v6827_v38 = vpack.c.bf16 %v6825_v47, %v6825_v47  ;;  %v8736_v47 = vld [vmem:[%s10686_s3 + $0x100] sm:$0xff]  }
0x58a6   :  { %v8654_v11 = vpop.permute.xlu1 %8653 }
0x58a7   :  { %v8656_v26 = vunpack.i.h.bf16 %v8654_v11  ;;  %v8655_v57 = vunpack.i.l.bf16 %v8654_v11 }
0x58a9   :  { %v6824_v22 = vsel %vm654_vm9, %v6821_v37, %v8656_v26  ;;  %v6823_v36 = vsel %vm654_vm9, %v6820_v30, %v8655_v57  ;;  %v8733_v57 = vld [vmem:[%s10686_s3 + $0xe8] sm:$0xff]   ;;  %v8734_v30 = vld [vmem:[%s10686_s3 + $0xf0] sm:$0xff]   ;;  %v8735_v37 = vld [vmem:[%s10686_s3 + $0xf8] sm:$0xff]  }
0x58aa   :  { %v6826_v12 = vpack.c.bf16 %v6824_v22, %v6823_v36  ;;  %8527 = vmatprep.subr.bf16.mxu1 %v8733_v57  ;;  %v7581_v22 = vld [vmem:[%s10688_s4 + $0xb8] ss:$0 sm:$0xff] }
0x58ac   :  { %8515 = vmatprep.mubr.msk.bf16.mxu1 %vm147_vm3, %v6826_v12 }
0x58ad   :  { %8516 = vmatmul.mubr.msk.bf16.vlgmr.msra.gmra.mrb[156].mxu1 %vm147_vm3, %v6827_v38 }
0x58ae   :  { %8528 = vmatpush3.bf16.msra.mxu1 %v8733_v57 }
0x58af   :  { %8529 = vmatprep.subr.bf16.mxu1 %v8734_v30 }
0x58b2   :  { %8530 = vmatpush3.bf16.msra.mxu1 %v8734_v30 }
0x58b3   :  { %8531 = vmatprep.subr.bf16.mxu1 %v8735_v37 }
0x58b6   :  { %8532 = vmatpush3.bf16.msra.mxu1 %v8735_v37 }
0x58b7   :  { %8533 = vmatprep.subr.bf16.mxu1 %v8736_v47 }
0x58ba   :  { %8534 = vmatpush3.bf16.msra.mxu1 %v8736_v47 }
0x5980   :  { %v8517_v0 = vpop.f32.mrb[156].mxu1 }
0x5981   :  { %v6884_v34 = vpop.f32.mrb[157].mxu1  ;;  %v6900_v39 = vadd.f32 %v8517_v0, %v10380_v33 }
0x5982   :  { %v6898_v53 = vadd.f32 %v6884_v34, %v10377_v50  ;;  %v8518_v35 = vpop.f32.mrb[158].mxu1 }
0x5983   :  { %v6887_v54 = vpop.f32.mrb[159].mxu1  ;;  %v10605_v24 = vadd.f32 %v7578_v44, %v6900_v39 }
0x5984   :  { %v10598_v51 = vadd.f32 %v7578_v44, %v6898_v53  ;;  %v6899_v14 = vadd.f32 %v6887_v54, %v10382_v21 }
0x5985   :  { %v6917_v50 = vsel %vm1061_vm14, %v10605_v24, 0.0 }
0x5986   :  { %v10601_v15 = vadd.f32 %v7578_v44, %v6899_v14  ;;  %v6911_v23 = vsel %vm147_vm3, %v10598_v51, 0.0 }
0x5987   :  { %6912 = vadd.xlane.f32.xlu1 %v6911_v23 }
0x5988   :  { %v6914_v17 = vsel %vm147_vm3, %v10601_v15, 0.0 }
0x5989   :  { %6915 = vadd.xlane.f32.xlu0 %v6914_v17 }
0x598d   :  { %6918 = vadd.xlane.f32.xlu0 %v6917_v50 }
0x5a14   :  { %v6913_v33 = vpop.xlane.xlu1 %6912 }
0x5a15   :  { %v6920_v58 = vmul.f32 0.03125, %v6913_v33 }
0x5a16   :  { %v6916_v41 = vpop.xlane.xlu0 %6915 }
0x5a17   :  { %v6923_v21 = vsub.f32 %v10598_v51, %v6920_v58  ;;  %v6921_v27 = vmul.f32 0.03125, %v6916_v41 }
0x5a19   :  { %v6924_v19 = vsub.f32 %v10601_v15, %v6921_v27  ;;  %v6926_v43 = vmul.f32 %v6923_v21, %v6923_v21 }
0x5a1a   :  { %v6919_v59 = vpop.xlane.xlu0 %6918 }
0x5a1b   :  { %v6922_v46 = vmul.f32 0.03125, %v6919_v59  ;;  %v6929_v49 = vsel %vm147_vm3, %v6926_v43, 0.0  ;;  %v6927_v29 = vmul.f32 %v6924_v19, %v6924_v19 }
0x5a1c   :  { %6930 = vadd.xlane.f32.xlu1 %v6929_v49 }
0x5a1d   :  { %v6925_v13 = vsub.f32 %v10605_v24, %v6922_v46  ;;  %v6932_v18 = vsel %vm147_vm3, %v6927_v29, 0.0 }
0x5a1e   :  { %6933 = vadd.xlane.f32.xlu0 %v6932_v18 }
0x5a1f   :  { %v6928_v16 = vmul.f32 %v6925_v13, %v6925_v13 }
0x5a21   :  { %v6935_v28 = vsel %vm1061_vm14, %v6928_v16, 0.0 }
0x5a22   :  { %6936 = vadd.xlane.f32.xlu1 %v6935_v28 }
0x5aa9   :  { %v6931_v32 = vpop.xlane.xlu1 %6930 }
0x5aaa   :  { %v6938_v60 = vmul.f32 0.03125, %v6931_v32 }
0x5aab   :  { %v6934_v61 = vpop.xlane.xlu0 %6933 }
0x5aac   :  { %v6941_v52 = vadd.f32 1e-05, %v6938_v60  ;;  %v6939_v3 = vmul.f32 0.03125, %v6934_v61 }
0x5aae   :  { %9041 = vrsqrt.f32 %v6941_v52  ;;  %v6942_v25 = vadd.f32 1e-05, %v6939_v3 }
0x5aaf   :  { %v6937_v42 = vpop.xlane.xlu1 %6936 }
0x5ab0   :  { %9043 = vrsqrt.f32 %v6942_v25  ;;  %v6940_v62 = vmul.f32 0.03125, %v6937_v42  ;;  %v7592_v42 = vld [vmem:[%s10688_s4 + $0xc0] ss:$0 sm:$0xff] }
0x5ab2   :  { %v6943_v56 = vadd.f32 1e-05, %v6940_v62 }
0x5ab4   :  { %9045 = vrsqrt.f32 %v6943_v56 }
0x5ab8   :  { %v9042_v55 = vpop.eup %9041 }
0x5ab9   :  { %v6947_v63 = vmul.f32 %v9042_v55, %v6923_v21 }
0x5aba   :  { %v9044_v1 = vpop.eup %9043 }
0x5abb   :  { %v6948_v2 = vmul.f32 %v9044_v1, %v6924_v19  ;;  %v6954_v4 = vmul.f32 %v7579_v45, %v6947_v63 }
0x5abd   :  { %v6955_v6 = vmul.f32 %v7579_v45, %v6948_v2  ;;  %v6961_v9 = vadd.f32 %v7580_v5, %v6954_v4 }
0x5abe   :  { %v9046_v7 = vpop.eup %9045 }
0x5abf   :  { %v6949_v8 = vmul.f32 %v9046_v7, %v6925_v13  ;;  %v6962_v10 = vadd.f32 %v7580_v5, %v6955_v6 }
0x5ac1   :  { %v6964_v11 = vpack.c.bf16 %v6962_v10, %v6961_v9  ;;  %v6956_v20 = vmul.f32 %v7579_v45, %v6949_v8 }
0x5ac3   :  { %8523 = vmatprep.mubr.msk.bf16.mxu0 %vm147_vm3, %v6964_v11  ;;  %v6963_v40 = vadd.f32 %v7580_v5, %v6956_v20 }
0x5ac5   :  { %v6965_v26 = vpack.c.bf16 %v6963_v40, %v6963_v40 }
0x5ac7   :  { %8524 = vmatmul.mubr.msk.bf16.vlgmr.msra.gmra.mrb[156].mxu0 %vm147_vm3, %v6965_v26 }
0x5b9a   :  { %v8525_v36 = vpop.f32.mrb[156].mxu0 }
0x5b9b   :  { %v7036_v12 = vadd.f32 %v8525_v36, %v7581_v22  ;;  %v7027_v38 = vpop.f32.mrb[157].mxu0 }
0x5b9c   :  { %v7028_v0 = vadd.f32 %v7581_v22, %v7027_v38  ;;  %v8526_v44 = vpop.f32.mrb[158].mxu0  ;;  %v8738_v38 = vld [vmem:[%s10686_s3 + $0x120] sm:$0xff]  }
0x5b9d   :  { %v7043_v34 = vmul.f32 %v7036_v12, %v7036_v12  ;;  %v7030_v53 = vpop.f32.mrb[159].mxu0 }
0x5b9e   :  { %v7041_v35 = vmul.f32 %v7028_v0, %v7028_v0  ;;  %v7031_v54 = vadd.f32 %v7581_v22, %v7030_v53 }
0x5b9f   :  { %v7046_v39 = vmul.f32 %v7043_v34, %v7036_v12 }
0x5ba0   :  { %v7044_v14 = vmul.f32 %v7041_v35, %v7028_v0  ;;  %v7042_v23 = vmul.f32 %v7031_v54, %v7031_v54 }
0x5ba1   :  { %v7049_v17 = vmul.f32 0.044715, %v7046_v39 }
0x5ba2   :  { %v7047_v50 = vmul.f32 0.044715, %v7044_v14  ;;  %v7045_v33 = vmul.f32 %v7042_v23, %v7031_v54 }
0x5ba3   :  { %v7052_v58 = vadd.f32 %v7049_v17, %v7036_v12 }
0x5ba4   :  { %v7050_v41 = vadd.f32 %v7047_v50, %v7028_v0  ;;  %v7048_v21 = vmul.f32 0.044715, %v7045_v33  ;;  %v7593_v50 = vld [vmem:[%s10688_s4 + $0xf0] ss:$0 sm:$0xff] }
0x5ba5   :  { %v7055_v27 = vmul.f32 0.7978846, %v7052_v58 }
0x5ba6   :  { %v7053_v19 = vmul.f32 0.7978846, %v7050_v41  ;;  %v7051_v43 = vadd.f32 %v7048_v21, %v7031_v54 }
0x5ba7   :  { %9047 = vtanh.f32 %v7055_v27 }
0x5ba8   :  { %9049 = vtanh.f32 %v7053_v19  ;;  %v7054_v59 = vmul.f32 0.7978846, %v7051_v43  ;;  %v7594_v19 = vld [vmem:[%s10688_s4 + $0xf8] ss:$0 sm:$0xff] }
0x5baa   :  { %9051 = vtanh.f32 %v7054_v59 }
0x5bb1   :  { %v9048_v46 = vpop.eup %9047 }
0x5bb2   :  { %v9050_v49 = vpop.eup %9049  ;;  %v7061_v29 = vadd.f32 1.0, %v9048_v46 }
0x5bb3   :  { %v7059_v13 = vadd.f32 1.0, %v9050_v49 }
0x5bb4   :  { %v9052_v18 = vpop.eup %9051  ;;  %v7064_v16 = vmul.f32 0.5, %v7061_v29 }
0x5bb5   :  { %v7062_v28 = vmul.f32 0.5, %v7059_v13  ;;  %v7060_v48 = vadd.f32 1.0, %v9052_v18 }
0x5bb6   :  { %v7067_v32 = vmul.f32 %v7064_v16, %v7036_v12  ;;  %v8737_v12 = vld [vmem:[%s10686_s3 + $0x118] sm:$0xff]  }
0x5bb7   :  { %v7063_v31 = vmul.f32 0.5, %v7060_v48  ;;  %v7065_v60 = vmul.f32 %v7062_v28, %v7028_v0  ;;  %8539 = vmatprep.subr.bf16.mxu0 %v8737_v12  ;;  %v7595_v28 = vld [vmem:[%s10688_s4 + $0x100] ss:$0 sm:$0xff] }
0x5bb8   :  { %v7069_v3 = vpack.c.bf16 %v7067_v32, %v7067_v32  ;;  %8540 = vmatpush3.bf16.msra.mxu0 %v8737_v12 }
0x5bb9   :  { %v7066_v61 = vmul.f32 %v7063_v31, %v7031_v54  ;;  %8541 = vmatprep.subr.bf16.mxu0 %v8738_v38 }
0x5bbb   :  { %v7068_v52 = vpack.c.bf16 %v7066_v61, %v7065_v60 }
0x5bbc   :  { %8542 = vmatpush3.bf16.msra.mxu0 %v8738_v38 }
0x5bbd   :  { %8535 = vmatprep.mubr.msk.bf16.mxu1 %vm855_vm10, %v7068_v52 }
0x5bbe   :  { %8536 = vmatmul.mubr.msk.bf16.vlgmr.msra.gmra.mrb[160].mxu1 %vm855_vm10, %v7069_v3 }
0x5c91   :  { %v8537_v25 = vpop.f32.mrb[160].mxu1 }
0x5c92   :  { %v7142_v62 = vpop.f32.mrb[161].mxu1  ;;  %v7158_v56 = vadd.f32 %v8537_v25, %v10605_v24 }
0x5c93   :  { %v7156_v55 = vadd.f32 %v7142_v62, %v10598_v51  ;;  %v8538_v45 = vpop.f32.mrb[162].mxu1 }
0x5c94   :  { %v7145_v63 = vpop.f32.mrb[163].mxu1  ;;  %v7166_v4 = vadd.f32 %v7592_v42, %v7158_v56 }
0x5c95   :  { %v7164_v1 = vadd.f32 %v7592_v42, %v7156_v55  ;;  %v7157_v2 = vadd.f32 %v7145_v63, %v10601_v15 }
0x5c96   :  { %v7175_v8 = vsel %vm1061_vm14, %v7166_v4, 0.0 }
0x5c97   :  { %v7165_v5 = vadd.f32 %v7592_v42, %v7157_v2  ;;  %v7169_v6 = vsel %vm147_vm3, %v7164_v1, 0.0 }
0x5c98   :  { %7170 = vadd.xlane.f32.xlu0 %v7169_v6 }
0x5c99   :  { %v7172_v7 = vsel %vm147_vm3, %v7165_v5, 0.0 }
0x5c9a   :  { %7173 = vadd.xlane.f32.xlu1 %v7172_v7 }
0x5c9c   :  { %7176 = vadd.xlane.f32.xlu0 %v7175_v8 }
0x5d25   :  { %v7171_v9 = vpop.xlane.xlu0 %7170 }
0x5d26   :  { %v7178_v24 = vmul.f32 0.03125, %v7171_v9 }
0x5d27   :  { %v7174_v10 = vpop.xlane.xlu1 %7173 }
0x5d28   :  { %v7181_v51 = vsub.f32 %v7164_v1, %v7178_v24  ;;  %v7179_v11 = vmul.f32 0.03125, %v7174_v10 }
0x5d29   :  { %v7177_v20 = vpop.xlane.xlu0 %7176 }
0x5d2a   :  { %v7182_v40 = vsub.f32 %v7165_v5, %v7179_v11  ;;  %v7180_v26 = vmul.f32 0.03125, %v7177_v20  ;;  %v7184_v15 = vmul.f32 %v7181_v51, %v7181_v51 }
0x5d2c   :  { %v7183_v57 = vsub.f32 %v7166_v4, %v7180_v26  ;;  %v7187_v30 = vsel %vm147_vm3, %v7184_v15, 0.0  ;;  %v7185_v37 = vmul.f32 %v7182_v40, %v7182_v40 }
0x5d2d   :  { %7188 = vadd.xlane.f32.xlu1 %v7187_v30 }
0x5d2e   :  { %v7190_v47 = vsel %vm147_vm3, %v7185_v37, 0.0  ;;  %v7186_v22 = vmul.f32 %v7183_v57, %v7183_v57 }
0x5d2f   :  { %7191 = vadd.xlane.f32.xlu0 %v7190_v47 }
0x5d30   :  { %v7193_v36 = vsel %vm1061_vm14, %v7186_v22, 0.0 }
0x5d31   :  { %7194 = vadd.xlane.f32.xlu1 %v7193_v36 }
0x5dba   :  { %v7189_v0 = vpop.xlane.xlu1 %7188 }
0x5dbb   :  { %v7196_v44 = vmul.f32 0.03125, %v7189_v0 }
0x5dbc   :  { %v7192_v34 = vpop.xlane.xlu0 %7191 }
0x5dbd   :  { %v7199_v53 = vadd.f32 1e-05, %v7196_v44  ;;  %v7197_v35 = vmul.f32 0.03125, %v7192_v34 }
0x5dbe   :  { %v7195_v54 = vpop.xlane.xlu1 %7194 }
0x5dbf   :  { %9053 = vrsqrt.f32 %v7199_v53  ;;  %v7200_v39 = vadd.f32 1e-05, %v7197_v35  ;;  %v7198_v14 = vmul.f32 0.03125, %v7195_v54 }
0x5dc1   :  { %9055 = vrsqrt.f32 %v7200_v39  ;;  %v7201_v23 = vadd.f32 1e-05, %v7198_v14 }
0x5dc3   :  { %9057 = vrsqrt.f32 %v7201_v23 }
0x5dc9   :  { %v9054_v17 = vpop.eup %9053 }
0x5dca   :  { %v7205_v33 = vmul.f32 %v9054_v17, %v7181_v51 }
0x5dcb   :  { %v9056_v58 = vpop.eup %9055 }
0x5dcc   :  { %v7206_v41 = vmul.f32 %v9056_v58, %v7182_v40  ;;  %v7212_v21 = vmul.f32 %v7593_v50, %v7205_v33 }
0x5dcd   :  { %v9058_v27 = vpop.eup %9057 }
0x5dce   :  { %v7207_v43 = vmul.f32 %v9058_v27, %v7183_v57  ;;  %v7213_v59 = vmul.f32 %v7593_v50, %v7206_v41  ;;  %v7219_v49 = vadd.f32 %v7594_v19, %v7212_v21 }
0x5dd0   :  { %v7214_v46 = vmul.f32 %v7593_v50, %v7207_v43  ;;  %v7220_v29 = vadd.f32 %v7594_v19, %v7213_v59 }
0x5dd2   :  { %v7222_v13 = vpack.c.bf16 %v7220_v29, %v7219_v49  ;;  %v7221_v18 = vadd.f32 %v7594_v19, %v7214_v46 }
0x5dd4   :  { %8543 = vmatprep.mubr.msk.bf16.mxu0 %vm147_vm3, %v7222_v13  ;;  %v7223_v16 = vpack.c.bf16 %v7221_v18, %v7221_v18 }
0x5dd6   :  { %8544 = vmatmul.mubr.msk.bf16.vlgmr.msra.gmra.mrb[160].mxu0 %vm147_vm3, %v7223_v16 }
0x5ea9   :  { %v8545_v48 = vpop.f32.mrb[160].mxu0 }
0x5eaa   :  { %v7294_v31 = vadd.f32 %v8545_v48, %v7595_v28  ;;  %v7285_v32 = vpop.f32.mrb[161].mxu0 }
0x5eab   :  { %v7286_v60 = vadd.f32 %v7595_v28, %v7285_v32  ;;  %v8546_v61 = vpop.f32.mrb[162].mxu0 }
0x5eac   :  { %7602 = vst [vmem:[%s10691_s5 + $0x3f] sm:$0x1] %v7294_v31  ;;  %v7288_v52 = vpop.f32.mrb[163].mxu0 }
0x5ead   :  { %7600 = vst [vmem:[%s10691_s5 + $0x2f] sm:$0xfe] %v7286_v60  ;;  %v7289_v3 = vadd.f32 %v7595_v28, %v7288_v52 }
0x5eaf   :  { %7601 = vst [vmem:[%s10691_s5 + $0x37] sm:$0xff] %v7289_v3 }

</bundles_post_ra>
